<compile_context>
chip_gen: v5e
topology: v5e:2x2
jax: 0.10.0
libtpu: 0.0.40
codegen_flags: <defaults>
</compile_context>

<pallas_src>
import functools

import jax
import jax.numpy as jnp
from jax.experimental import pallas as pl
from jax.experimental.pallas import tpu as pltpu

_NUM_CLASSES = 10      # hard-coded in the reference: nn.Linear(64 * 8 * 8, 10)
_LANE_PAD = 128        # lane-dense FC output width

_COMPILER_PARAMS = pltpu.CompilerParams(
    dimension_semantics=("parallel",),
    vmem_limit_bytes=32 * 1024 * 1024,
)


# ----------------------------- Pallas kernels ------------------------------

def _conv3x3_relu_kernel(x_ref, w_ref, b_ref, o_ref, *, h, wd, cin, cout, pool):
    """Fused 3x3 conv (stride 1, pad 1) + bias + ReLU (+ optional 2x2 maxpool).

    x_ref: (h+2, wd+2, cin)  bf16, spatially pre-padded, one batch element
    w_ref: (3, 3, cin, cout) bf16
    b_ref: (1, cout)         f32
    o_ref: (h, wd, cout) or (h//2, wd//2, cout)  f32
    """
    acc = jnp.zeros((h * wd, cout), jnp.float32)
    # In-kernel im2col: 9 shifted taps, each a (h*wd, cin) x (cin, cout) MXU dot
    # accumulated in f32.  All reshapes keep the lane (channel) dim unchanged.
    for kh in range(3):
        for kw in range(3):
            tap = x_ref[kh:kh + h, kw:kw + wd, :].reshape(h * wd, cin)
            acc = acc + jnp.dot(tap, w_ref[kh, kw],
                                preferred_element_type=jnp.float32)
    acc = jnp.maximum(acc + b_ref[...], 0.0)
    if pool:
        # 2x2/2 maxpool in the epilogue: pool H (major axis) first, then W,
        # via reshape + max (no stride-2 sublane slicing).
        y = acc.reshape(h // 2, 2, wd, cout)
        y = jnp.max(y, axis=1)                       # (h//2, wd, cout)
        y = y.reshape(h // 2, wd // 2, 2, cout)
        y = jnp.max(y, axis=2)                       # (h//2, wd//2, cout)
    else:
        y = acc.reshape(h, wd, cout)
    o_ref[...] = y.astype(o_ref.dtype)


def _fc_kernel(x_ref, w_ref, b_ref, o_ref):
    acc = jnp.dot(x_ref[...], w_ref[...], preferred_element_type=jnp.float32)
    o_ref[...] = (acc + b_ref[...]).astype(o_ref.dtype)


# ------------------------------ layer wrappers ------------------------------

def conv3x3_relu(x_nhwc, w_bf16, b_row, *, pool):
    """3x3 / stride 1 / pad 1 conv + bias + ReLU (+ fused 2x2 maxpool)."""
    n, h, wd, cin = x_nhwc.shape
    cout = w_bf16.shape[-1]
    if pool:
        assert h % 2 == 0 and wd % 2 == 0, "2x2 maxpool needs even spatial dims"
    ho, wo = (h // 2, wd // 2) if pool else (h, wd)
    # "same" spatial padding + bf16 cast in one cheap XLA pass (halves input DMA).
    xp = jnp.pad(x_nhwc, ((0, 0), (1, 1), (1, 1), (0, 0))).astype(jnp.bfloat16)
    kernel = functools.partial(_conv3x3_relu_kernel, h=h, wd=wd,
                               cin=cin, cout=cout, pool=pool)
    return pl.pallas_call(
        kernel,
        out_shape=jax.ShapeDtypeStruct((n, ho, wo, cout), jnp.float32),
        grid=(n,),
        in_specs=[
            pl.BlockSpec((None, h + 2, wd + 2, cin), lambda i: (i, 0, 0, 0)),
            pl.BlockSpec((3, 3, cin, cout), lambda i: (0, 0, 0, 0)),
            pl.BlockSpec((1, cout), lambda i: (0, 0)),
        ],
        out_specs=pl.BlockSpec((None, ho, wo, cout), lambda i: (i, 0, 0, 0)),
        compiler_params=_COMPILER_PARAMS,
    )(xp, w_bf16, b_row)


def linear_lane_dense(x_flat_bf16, w_pad_bf16, b_pad_row):
    """x @ w + b with a lane-dense (pre-padded to 128) output, tiled over M."""
    m, k = x_flat_bf16.shape
    npad = w_pad_bf16.shape[1]
    tm = m if m <= 512 else 512
    return pl.pallas_call(
        _fc_kernel,
        out_shape=jax.ShapeDtypeStruct((m, npad), jnp.float32),
        grid=(pl.cdiv(m, tm),),
        in_specs=[
            pl.BlockSpec((tm, k), lambda i: (i, 0)),
            pl.BlockSpec((k, npad), lambda i: (0, 0)),
            pl.BlockSpec((1, npad), lambda i: (0, 0)),
        ],
        out_specs=pl.BlockSpec((tm, npad), lambda i: (i, 0)),
        compiler_params=_COMPILER_PARAMS,
    )(x_flat_bf16, w_pad_bf16, b_pad_row)


# ------------------------------ parameters ------------------------------

def init_params(key, depth):
    """Torch-convention parameters (f32; fc weight rows in CHW-flatten order)."""
    params = {"conv": []}
    for i in range(depth):
        cin = 3 if i == 0 else 64
        key, kw_, kb_ = jax.random.split(key, 3)
        bound = 1.0 / (cin * 9) ** 0.5
        w = jax.random.uniform(kw_, (3, 3, cin, 64), jnp.float32, -bound, bound)
        b = jax.random.uniform(kb_, (64,), jnp.float32, -bound, bound)
        params["conv"].append((w, b))
    fan_in = 64 * 8 * 8
    key, kw_, kb_ = jax.random.split(key, 3)
    bound = 1.0 / fan_in ** 0.5
    params["fc_w"] = jax.random.uniform(kw_, (fan_in, _NUM_CLASSES),
                                        jnp.float32, -bound, bound)
    params["fc_b"] = jax.random.uniform(kb_, (_NUM_CLASSES,),
                                        jnp.float32, -bound, bound)
    return params


def prep_params(params, feat_hw=8, feat_c=64):
    """One-time host-side prep: bf16 weights, bias rows, fc row-permute + lane pad."""
    prepped = {"conv": [(w.astype(jnp.bfloat16), b.reshape(1, -1))
                        for (w, b) in params["conv"]]}
    # fc weight rows are in torch CHW-flatten order; permute to HWC-flatten order
    # so the FC consumes the natural NHWC flatten (no transpose on the hot path),
    # then pad the output dim 10 -> 128 for lane-dense MXU/stores.
    w = params["fc_w"].reshape(feat_c, feat_hw, feat_hw, _NUM_CLASSES)
    w = jnp.transpose(w, (1, 2, 0, 3)).reshape(feat_hw * feat_hw * feat_c,
                                               _NUM_CLASSES)
    prepped["fc_w"] = jnp.pad(
        w, ((0, 0), (0, _LANE_PAD - _NUM_CLASSES))).astype(jnp.bfloat16)
    prepped["fc_b"] = jnp.pad(
        params["fc_b"], (0, _LANE_PAD - _NUM_CLASSES)).reshape(1, _LANE_PAD)
    return prepped


# ------------------------------ model ------------------------------

@functools.partial(jax.jit, static_argnums=(2, 3, 4))
def custom_cnn_forward(prepped, x_nchw, depth, layer_of_extraction,
                       skip_connection=False):
    # TODO(synk): the skip_connection=True path is broken in the reference module
    # (__init__ writes to undefined self.skip_connections_layer and forward reads
    # an empty ModuleList), so only skip_connection=False is implemented.
    assert not skip_connection

    x = jnp.transpose(x_nchw, (0, 2, 3, 1))          # NCHW -> NHWC (boundary only)
    layer_outputs = []
    for i in range(depth):
        w, b = prepped["conv"][i]
        x = conv3x3_relu(x, w, b, pool=(i < depth - 1))   # fused conv+ReLU(+pool)
        if i == layer_of_extraction:
            layer_outputs.append(jnp.transpose(x, (0, 3, 1, 2)))  # PyTorch NCHW

    # FC consumes the natural (H, W, C)-order flatten; fc_w rows were permuted
    # once at prep time, so no NHWC->NCHW transpose on the hot path.
    flat = x.reshape(x.shape[0], -1).astype(jnp.bfloat16)
    logits_pad = linear_lane_dense(flat, prepped["fc_w"], prepped["fc_b"])
    logits = logits_pad[:, :_NUM_CLASSES]

    if layer_of_extraction == depth - 1 and len(layer_outputs) == 0:
        layer_outputs.append(logits)
    elif layer_of_extraction < depth - 1:
        layer_outputs.append(logits)
    return logits, layer_outputs[-1]


# ------------------------------ demo ------------------------------

if __name__ == "__main__":
    depth = 2
    layer_of_extraction = 1   # == depth - 1: extracted feature = last conv activation
    skip_connection = False

    key = jax.random.PRNGKey(0)
    pkey, xkey = jax.random.split(key)
    params = init_params(pkey, depth)
    prepped = prep_params(params)

    # (depth - 1) maxpools; fc expects 64 * 8 * 8 -> input spatial = 8 * 2**(depth-1)
    spatial = 8 * 2 ** (depth - 1)
    x = jax.random.normal(xkey, (2, 3, spatial, spatial), jnp.float32)  # NCHW

    logits, feat = custom_cnn_forward(prepped, x, depth, layer_of_extraction,
                                      skip_connection)
    jax.block_until_ready((logits, feat))

    assert logits.shape == (2, 10) and logits.dtype == jnp.float32
    assert feat.shape == (2, 64, 8, 8) and feat.dtype == jnp.float32
    print("KERNEL_OK")
</pallas_src>

<mosaic_0001>
module attributes {stable_mosaic.version = 11 : i64} {
  func.func @_conv3x3_relu_kernel(%arg0: i32, %arg1: memref<1x18x18x3xbf16, #tpu.memory_space<vmem>>, %arg2: memref<3x3x3x64xbf16, #tpu.memory_space<vmem>>, %arg3: memref<1x64xf32, #tpu.memory_space<vmem>>, %arg4: memref<1x8x8x64xf32, #tpu.memory_space<vmem>>) attributes {dimension_semantics = [#tpu.dimension_semantics<parallel>], iteration_bounds = array<i64: 2>, scalar_prefetch = 0 : i64, scratch_operands = 0 : i64, tpu.core_type = #tpu.core_type<tc>, window_params = [{transform_indices = @transform_0, window_bounds = array<i64: 1, 18, 18, 3>}, {pipeline_mode = #tpu.pipeline_mode<synchronous>, transform_indices = @transform_1, window_bounds = array<i64: 3, 3, 3, 64>}, {pipeline_mode = #tpu.pipeline_mode<synchronous>, transform_indices = @transform_2, window_bounds = array<i64: 1, 64>}, {transform_indices = @transform_3, window_bounds = array<i64: 1, 8, 8, 64>}]} {
    %cst = arith.constant 0.000000e+00 : f32
    %0 = vector.broadcast %cst : f32 to vector<256x64xf32>
    %c0 = arith.constant 0 : index
    %c0_0 = arith.constant 0 : index
    %c0_1 = arith.constant 0 : index
    %c0_2 = arith.constant 0 : index
    %1 = vector.load %arg1[%c0, %c0_0, %c0_1, %c0_2] : memref<1x18x18x3xbf16, #tpu.memory_space<vmem>>, vector<1x16x16x3xbf16>
    %2 = vector.shape_cast %1 : vector<1x16x16x3xbf16> to vector<16x16x3xbf16>
    %3 = vector.shape_cast %2 : vector<16x16x3xbf16> to vector<256x3xbf16>
    %c0_3 = arith.constant 0 : index
    %c0_4 = arith.constant 0 : index
    %c0_5 = arith.constant 0 : index
    %c0_6 = arith.constant 0 : index
    %4 = vector.load %arg2[%c0_3, %c0_4, %c0_5, %c0_6] : memref<3x3x3x64xbf16, #tpu.memory_space<vmem>>, vector<1x1x3x64xbf16>
    %5 = vector.shape_cast %4 : vector<1x1x3x64xbf16> to vector<3x64xbf16>
    %cst_7 = arith.constant dense<0.000000e+00> : vector<256x64xf32>
    %6 = tpu.matmul %3, %5, %cst_7 {dimension_numbers = #tpu.dot_dimension_numbers<[1], [0], [0], [1], [0, 0, 1, 1], [], []>} : vector<256x3xbf16>, vector<3x64xbf16>, vector<256x64xf32> -> vector<256x64xf32>
    %7 = arith.addf %0, %6 : vector<256x64xf32>
    %c0_8 = arith.constant 0 : index
    %c0_9 = arith.constant 0 : index
    %c1 = arith.constant 1 : index
    %c0_10 = arith.constant 0 : index
    %8 = vector.load %arg1[%c0_8, %c0_9, %c1, %c0_10] : memref<1x18x18x3xbf16, #tpu.memory_space<vmem>>, vector<1x16x16x3xbf16>
    %9 = vector.shape_cast %8 : vector<1x16x16x3xbf16> to vector<16x16x3xbf16>
    %10 = vector.shape_cast %9 : vector<16x16x3xbf16> to vector<256x3xbf16>
    %c0_11 = arith.constant 0 : index
    %c1_12 = arith.constant 1 : index
    %c0_13 = arith.constant 0 : index
    %c0_14 = arith.constant 0 : index
    %11 = vector.load %arg2[%c0_11, %c1_12, %c0_13, %c0_14] : memref<3x3x3x64xbf16, #tpu.memory_space<vmem>>, vector<1x1x3x64xbf16>
    %12 = vector.shape_cast %11 : vector<1x1x3x64xbf16> to vector<3x64xbf16>
    %cst_15 = arith.constant dense<0.000000e+00> : vector<256x64xf32>
    %13 = tpu.matmul %10, %12, %cst_15 {dimension_numbers = #tpu.dot_dimension_numbers<[1], [0], [0], [1], [0, 0, 1, 1], [], []>} : vector<256x3xbf16>, vector<3x64xbf16>, vector<256x64xf32> -> vector<256x64xf32>
    %14 = arith.addf %7, %13 : vector<256x64xf32>
    %c0_16 = arith.constant 0 : index
    %c0_17 = arith.constant 0 : index
    %c2 = arith.constant 2 : index
    %c0_18 = arith.constant 0 : index
    %15 = vector.load %arg1[%c0_16, %c0_17, %c2, %c0_18] : memref<1x18x18x3xbf16, #tpu.memory_space<vmem>>, vector<1x16x16x3xbf16>
    %16 = vector.shape_cast %15 : vector<1x16x16x3xbf16> to vector<16x16x3xbf16>
    %17 = vector.shape_cast %16 : vector<16x16x3xbf16> to vector<256x3xbf16>
    %c0_19 = arith.constant 0 : index
    %c2_20 = arith.constant 2 : index
    %c0_21 = arith.constant 0 : index
    %c0_22 = arith.constant 0 : index
    %18 = vector.load %arg2[%c0_19, %c2_20, %c0_21, %c0_22] : memref<3x3x3x64xbf16, #tpu.memory_space<vmem>>, vector<1x1x3x64xbf16>
    %19 = vector.shape_cast %18 : vector<1x1x3x64xbf16> to vector<3x64xbf16>
    %cst_23 = arith.constant dense<0.000000e+00> : vector<256x64xf32>
    %20 = tpu.matmul %17, %19, %cst_23 {dimension_numbers = #tpu.dot_dimension_numbers<[1], [0], [0], [1], [0, 0, 1, 1], [], []>} : vector<256x3xbf16>, vector<3x64xbf16>, vector<256x64xf32> -> vector<256x64xf32>
    %21 = arith.addf %14, %20 : vector<256x64xf32>
    %c0_24 = arith.constant 0 : index
    %c1_25 = arith.constant 1 : index
    %c0_26 = arith.constant 0 : index
    %c0_27 = arith.constant 0 : index
    %22 = vector.load %arg1[%c0_24, %c1_25, %c0_26, %c0_27] : memref<1x18x18x3xbf16, #tpu.memory_space<vmem>>, vector<1x16x16x3xbf16>
    %23 = vector.shape_cast %22 : vector<1x16x16x3xbf16> to vector<16x16x3xbf16>
    %24 = vector.shape_cast %23 : vector<16x16x3xbf16> to vector<256x3xbf16>
    %c1_28 = arith.constant 1 : index
    %c0_29 = arith.constant 0 : index
    %c0_30 = arith.constant 0 : index
    %c0_31 = arith.constant 0 : index
    %25 = vector.load %arg2[%c1_28, %c0_29, %c0_30, %c0_31] : memref<3x3x3x64xbf16, #tpu.memory_space<vmem>>, vector<1x1x3x64xbf16>
    %26 = vector.shape_cast %25 : vector<1x1x3x64xbf16> to vector<3x64xbf16>
    %cst_32 = arith.constant dense<0.000000e+00> : vector<256x64xf32>
    %27 = tpu.matmul %24, %26, %cst_32 {dimension_numbers = #tpu.dot_dimension_numbers<[1], [0], [0], [1], [0, 0, 1, 1], [], []>} : vector<256x3xbf16>, vector<3x64xbf16>, vector<256x64xf32> -> vector<256x64xf32>
    %28 = arith.addf %21, %27 : vector<256x64xf32>
    %c0_33 = arith.constant 0 : index
    %c1_34 = arith.constant 1 : index
    %c1_35 = arith.constant 1 : index
    %c0_36 = arith.constant 0 : index
    %29 = vector.load %arg1[%c0_33, %c1_34, %c1_35, %c0_36] : memref<1x18x18x3xbf16, #tpu.memory_space<vmem>>, vector<1x16x16x3xbf16>
    %30 = vector.shape_cast %29 : vector<1x16x16x3xbf16> to vector<16x16x3xbf16>
    %31 = vector.shape_cast %30 : vector<16x16x3xbf16> to vector<256x3xbf16>
    %c1_37 = arith.constant 1 : index
    %c1_38 = arith.constant 1 : index
    %c0_39 = arith.constant 0 : index
    %c0_40 = arith.constant 0 : index
    %32 = vector.load %arg2[%c1_37, %c1_38, %c0_39, %c0_40] : memref<3x3x3x64xbf16, #tpu.memory_space<vmem>>, vector<1x1x3x64xbf16>
    %33 = vector.shape_cast %32 : vector<1x1x3x64xbf16> to vector<3x64xbf16>
    %cst_41 = arith.constant dense<0.000000e+00> : vector<256x64xf32>
    %34 = tpu.matmul %31, %33, %cst_41 {dimension_numbers = #tpu.dot_dimension_numbers<[1], [0], [0], [1], [0, 0, 1, 1], [], []>} : vector<256x3xbf16>, vector<3x64xbf16>, vector<256x64xf32> -> vector<256x64xf32>
    %35 = arith.addf %28, %34 : vector<256x64xf32>
    %c0_42 = arith.constant 0 : index
    %c1_43 = arith.constant 1 : index
    %c2_44 = arith.constant 2 : index
    %c0_45 = arith.constant 0 : index
    %36 = vector.load %arg1[%c0_42, %c1_43, %c2_44, %c0_45] : memref<1x18x18x3xbf16, #tpu.memory_space<vmem>>, vector<1x16x16x3xbf16>
    %37 = vector.shape_cast %36 : vector<1x16x16x3xbf16> to vector<16x16x3xbf16>
    %38 = vector.shape_cast %37 : vector<16x16x3xbf16> to vector<256x3xbf16>
    %c1_46 = arith.constant 1 : index
    %c2_47 = arith.constant 2 : index
    %c0_48 = arith.constant 0 : index
    %c0_49 = arith.constant 0 : index
    %39 = vector.load %arg2[%c1_46, %c2_47, %c0_48, %c0_49] : memref<3x3x3x64xbf16, #tpu.memory_space<vmem>>, vector<1x1x3x64xbf16>
    %40 = vector.shape_cast %39 : vector<1x1x3x64xbf16> to vector<3x64xbf16>
    %cst_50 = arith.constant dense<0.000000e+00> : vector<256x64xf32>
    %41 = tpu.matmul %38, %40, %cst_50 {dimension_numbers = #tpu.dot_dimension_numbers<[1], [0], [0], [1], [0, 0, 1, 1], [], []>} : vector<256x3xbf16>, vector<3x64xbf16>, vector<256x64xf32> -> vector<256x64xf32>
    %42 = arith.addf %35, %41 : vector<256x64xf32>
    %c0_51 = arith.constant 0 : index
    %c2_52 = arith.constant 2 : index
    %c0_53 = arith.constant 0 : index
    %c0_54 = arith.constant 0 : index
    %43 = vector.load %arg1[%c0_51, %c2_52, %c0_53, %c0_54] : memref<1x18x18x3xbf16, #tpu.memory_space<vmem>>, vector<1x16x16x3xbf16>
    %44 = vector.shape_cast %43 : vector<1x16x16x3xbf16> to vector<16x16x3xbf16>
    %45 = vector.shape_cast %44 : vector<16x16x3xbf16> to vector<256x3xbf16>
    %c2_55 = arith.constant 2 : index
    %c0_56 = arith.constant 0 : index
    %c0_57 = arith.constant 0 : index
    %c0_58 = arith.constant 0 : index
    %46 = vector.load %arg2[%c2_55, %c0_56, %c0_57, %c0_58] : memref<3x3x3x64xbf16, #tpu.memory_space<vmem>>, vector<1x1x3x64xbf16>
    %47 = vector.shape_cast %46 : vector<1x1x3x64xbf16> to vector<3x64xbf16>
    %cst_59 = arith.constant dense<0.000000e+00> : vector<256x64xf32>
    %48 = tpu.matmul %45, %47, %cst_59 {dimension_numbers = #tpu.dot_dimension_numbers<[1], [0], [0], [1], [0, 0, 1, 1], [], []>} : vector<256x3xbf16>, vector<3x64xbf16>, vector<256x64xf32> -> vector<256x64xf32>
    %49 = arith.addf %42, %48 : vector<256x64xf32>
    %c0_60 = arith.constant 0 : index
    %c2_61 = arith.constant 2 : index
    %c1_62 = arith.constant 1 : index
    %c0_63 = arith.constant 0 : index
    %50 = vector.load %arg1[%c0_60, %c2_61, %c1_62, %c0_63] : memref<1x18x18x3xbf16, #tpu.memory_space<vmem>>, vector<1x16x16x3xbf16>
    %51 = vector.shape_cast %50 : vector<1x16x16x3xbf16> to vector<16x16x3xbf16>
    %52 = vector.shape_cast %51 : vector<16x16x3xbf16> to vector<256x3xbf16>
    %c2_64 = arith.constant 2 : index
    %c1_65 = arith.constant 1 : index
    %c0_66 = arith.constant 0 : index
    %c0_67 = arith.constant 0 : index
    %53 = vector.load %arg2[%c2_64, %c1_65, %c0_66, %c0_67] : memref<3x3x3x64xbf16, #tpu.memory_space<vmem>>, vector<1x1x3x64xbf16>
    %54 = vector.shape_cast %53 : vector<1x1x3x64xbf16> to vector<3x64xbf16>
    %cst_68 = arith.constant dense<0.000000e+00> : vector<256x64xf32>
    %55 = tpu.matmul %52, %54, %cst_68 {dimension_numbers = #tpu.dot_dimension_numbers<[1], [0], [0], [1], [0, 0, 1, 1], [], []>} : vector<256x3xbf16>, vector<3x64xbf16>, vector<256x64xf32> -> vector<256x64xf32>
    %56 = arith.addf %49, %55 : vector<256x64xf32>
    %c0_69 = arith.constant 0 : index
    %c2_70 = arith.constant 2 : index
    %c2_71 = arith.constant 2 : index
    %c0_72 = arith.constant 0 : index
    %57 = vector.load %arg1[%c0_69, %c2_70, %c2_71, %c0_72] : memref<1x18x18x3xbf16, #tpu.memory_space<vmem>>, vector<1x16x16x3xbf16>
    %58 = vector.shape_cast %57 : vector<1x16x16x3xbf16> to vector<16x16x3xbf16>
    %59 = vector.shape_cast %58 : vector<16x16x3xbf16> to vector<256x3xbf16>
    %c2_73 = arith.constant 2 : index
    %c2_74 = arith.constant 2 : index
    %c0_75 = arith.constant 0 : index
    %c0_76 = arith.constant 0 : index
    %60 = vector.load %arg2[%c2_73, %c2_74, %c0_75, %c0_76] : memref<3x3x3x64xbf16, #tpu.memory_space<vmem>>, vector<1x1x3x64xbf16>
    %61 = vector.shape_cast %60 : vector<1x1x3x64xbf16> to vector<3x64xbf16>
    %cst_77 = arith.constant dense<0.000000e+00> : vector<256x64xf32>
    %62 = tpu.matmul %59, %61, %cst_77 {dimension_numbers = #tpu.dot_dimension_numbers<[1], [0], [0], [1], [0, 0, 1, 1], [], []>} : vector<256x3xbf16>, vector<3x64xbf16>, vector<256x64xf32> -> vector<256x64xf32>
    %63 = arith.addf %56, %62 : vector<256x64xf32>
    %c0_78 = arith.constant 0 : index
    %c0_79 = arith.constant 0 : index
    %64 = vector.load %arg3[%c0_78, %c0_79] : memref<1x64xf32, #tpu.memory_space<vmem>>, vector<1x64xf32>
    %65 = vector.broadcast %64 : vector<1x64xf32> to vector<256x64xf32>
    %66 = arith.addf %63, %65 : vector<256x64xf32>
    %cst_80 = arith.constant 0.000000e+00 : f32
    %67 = vector.broadcast %cst_80 : f32 to vector<256x64xf32>
    %68 = arith.maximumf %66, %67 : vector<256x64xf32>
    %69 = vector.shape_cast %68 : vector<256x64xf32> to vector<8x2x16x64xf32>
    %cst_81 = arith.constant dense<0xFF800000> : vector<8x16x64xf32>
    %70 = vector.multi_reduction <maximumf>, %69, %cst_81 [1] : vector<8x2x16x64xf32> to vector<8x16x64xf32>
    %71 = vector.shape_cast %70 : vector<8x16x64xf32> to vector<8x8x2x64xf32>
    %cst_82 = arith.constant dense<0xFF800000> : vector<8x8x64xf32>
    %72 = vector.multi_reduction <maximumf>, %71, %cst_82 [2] : vector<8x8x2x64xf32> to vector<8x8x64xf32>
    %c0_83 = arith.constant 0 : index
    %c0_84 = arith.constant 0 : index
    %c0_85 = arith.constant 0 : index
    %c0_86 = arith.constant 0 : index
    %73 = vector.load %arg4[%c0_83, %c0_84, %c0_85, %c0_86] : memref<1x8x8x64xf32, #tpu.memory_space<vmem>>, vector<1x8x8x64xf32>
    %74 = vector.shape_cast %73 : vector<1x8x8x64xf32> to vector<8x8x64xf32>
    %75 = vector.shape_cast %72 : vector<8x8x64xf32> to vector<1x8x8x64xf32>
    tpu.vector_store %arg4[%c0_83, %c0_84, %c0_85, %c0_86], %75 {strides = array<i32>} : memref<1x8x8x64xf32, #tpu.memory_space<vmem>>, vector<1x8x8x64xf32>,
    return
  }
  func.func @transform_0(%arg0: i32) -> (i32, i32, i32, i32) {
    %c0_i32 = arith.constant 0 : i32
    %c0_i32_0 = arith.constant 0 : i32
    %c0_i32_1 = arith.constant 0 : i32
    %c0_i32_2 = arith.constant 0 : i32
    return %arg0, %c0_i32, %c0_i32_0, %c0_i32_1 : i32, i32, i32, i32
  }
  func.func @transform_1(%arg0: i32) -> (i32, i32, i32, i32) {
    %c0_i32 = arith.constant 0 : i32
    %c0_i32_0 = arith.constant 0 : i32
    %c0_i32_1 = arith.constant 0 : i32
    %c0_i32_2 = arith.constant 0 : i32
    %c0_i32_3 = arith.constant 0 : i32
    return %c0_i32, %c0_i32_0, %c0_i32_1, %c0_i32_2 : i32, i32, i32, i32
  }
  func.func @transform_2(%arg0: i32) -> (i32, i32) {
    %c0_i32 = arith.constant 0 : i32
    %c0_i32_0 = arith.constant 0 : i32
    %c0_i32_1 = arith.constant 0 : i32
    return %c0_i32, %c0_i32_0 : i32, i32
  }
  func.func @transform_3(%arg0: i32) -> (i32, i32, i32, i32) {
    %c0_i32 = arith.constant 0 : i32
    %c0_i32_0 = arith.constant 0 : i32
    %c0_i32_1 = arith.constant 0 : i32
    %c0_i32_2 = arith.constant 0 : i32
    return %arg0, %c0_i32, %c0_i32_0, %c0_i32_1 : i32, i32, i32, i32
  }
}

module attributes {stable_mosaic.version = 11 : i64} {
  func.func @_conv3x3_relu_kernel(%arg0: i32, %arg1: memref<1x10x10x64xbf16, #tpu.memory_space<vmem>>, %arg2: memref<3x3x64x64xbf16, #tpu.memory_space<vmem>>, %arg3: memref<1x64xf32, #tpu.memory_space<vmem>>, %arg4: memref<1x8x8x64xf32, #tpu.memory_space<vmem>>) attributes {dimension_semantics = [#tpu.dimension_semantics<parallel>], iteration_bounds = array<i64: 2>, scalar_prefetch = 0 : i64, scratch_operands = 0 : i64, tpu.core_type = #tpu.core_type<tc>, window_params = [{transform_indices = @transform_0, window_bounds = array<i64: 1, 10, 10, 64>}, {pipeline_mode = #tpu.pipeline_mode<synchronous>, transform_indices = @transform_1, window_bounds = array<i64: 3, 3, 64, 64>}, {pipeline_mode = #tpu.pipeline_mode<synchronous>, transform_indices = @transform_2, window_bounds = array<i64: 1, 64>}, {transform_indices = @transform_3, window_bounds = array<i64: 1, 8, 8, 64>}]} {
    %cst = arith.constant 0.000000e+00 : f32
    %0 = vector.broadcast %cst : f32 to vector<64x64xf32>
    %c0 = arith.constant 0 : index
    %c0_0 = arith.constant 0 : index
    %c0_1 = arith.constant 0 : index
    %c0_2 = arith.constant 0 : index
    %1 = vector.load %arg1[%c0, %c0_0, %c0_1, %c0_2] : memref<1x10x10x64xbf16, #tpu.memory_space<vmem>>, vector<1x8x8x64xbf16>
    %2 = vector.shape_cast %1 : vector<1x8x8x64xbf16> to vector<8x8x64xbf16>
    %3 = vector.shape_cast %2 : vector<8x8x64xbf16> to vector<64x64xbf16>
    %c0_3 = arith.constant 0 : index
    %c0_4 = arith.constant 0 : index
    %c0_5 = arith.constant 0 : index
    %c0_6 = arith.constant 0 : index
    %4 = vector.load %arg2[%c0_3, %c0_4, %c0_5, %c0_6] : memref<3x3x64x64xbf16, #tpu.memory_space<vmem>>, vector<1x1x64x64xbf16>
    %5 = vector.shape_cast %4 : vector<1x1x64x64xbf16> to vector<64x64xbf16>
    %cst_7 = arith.constant dense<0.000000e+00> : vector<64x64xf32>
    %6 = tpu.matmul %3, %5, %cst_7 {dimension_numbers = #tpu.dot_dimension_numbers<[1], [0], [0], [1], [0, 0, 1, 1], [], []>} : vector<64x64xbf16>, vector<64x64xbf16>, vector<64x64xf32> -> vector<64x64xf32>
    %7 = arith.addf %0, %6 : vector<64x64xf32>
    %c0_8 = arith.constant 0 : index
    %c0_9 = arith.constant 0 : index
    %c1 = arith.constant 1 : index
    %c0_10 = arith.constant 0 : index
    %8 = vector.load %arg1[%c0_8, %c0_9, %c1, %c0_10] : memref<1x10x10x64xbf16, #tpu.memory_space<vmem>>, vector<1x8x8x64xbf16>
    %9 = vector.shape_cast %8 : vector<1x8x8x64xbf16> to vector<8x8x64xbf16>
    %10 = vector.shape_cast %9 : vector<8x8x64xbf16> to vector<64x64xbf16>
    %c0_11 = arith.constant 0 : index
    %c1_12 = arith.constant 1 : index
    %c0_13 = arith.constant 0 : index
    %c0_14 = arith.constant 0 : index
    %11 = vector.load %arg2[%c0_11, %c1_12, %c0_13, %c0_14] : memref<3x3x64x64xbf16, #tpu.memory_space<vmem>>, vector<1x1x64x64xbf16>
    %12 = vector.shape_cast %11 : vector<1x1x64x64xbf16> to vector<64x64xbf16>
    %cst_15 = arith.constant dense<0.000000e+00> : vector<64x64xf32>
    %13 = tpu.matmul %10, %12, %cst_15 {dimension_numbers = #tpu.dot_dimension_numbers<[1], [0], [0], [1], [0, 0, 1, 1], [], []>} : vector<64x64xbf16>, vector<64x64xbf16>, vector<64x64xf32> -> vector<64x64xf32>
    %14 = arith.addf %7, %13 : vector<64x64xf32>
    %c0_16 = arith.constant 0 : index
    %c0_17 = arith.constant 0 : index
    %c2 = arith.constant 2 : index
    %c0_18 = arith.constant 0 : index
    %15 = vector.load %arg1[%c0_16, %c0_17, %c2, %c0_18] : memref<1x10x10x64xbf16, #tpu.memory_space<vmem>>, vector<1x8x8x64xbf16>
    %16 = vector.shape_cast %15 : vector<1x8x8x64xbf16> to vector<8x8x64xbf16>
    %17 = vector.shape_cast %16 : vector<8x8x64xbf16> to vector<64x64xbf16>
    %c0_19 = arith.constant 0 : index
    %c2_20 = arith.constant 2 : index
    %c0_21 = arith.constant 0 : index
    %c0_22 = arith.constant 0 : index
    %18 = vector.load %arg2[%c0_19, %c2_20, %c0_21, %c0_22] : memref<3x3x64x64xbf16, #tpu.memory_space<vmem>>, vector<1x1x64x64xbf16>
    %19 = vector.shape_cast %18 : vector<1x1x64x64xbf16> to vector<64x64xbf16>
    %cst_23 = arith.constant dense<0.000000e+00> : vector<64x64xf32>
    %20 = tpu.matmul %17, %19, %cst_23 {dimension_numbers = #tpu.dot_dimension_numbers<[1], [0], [0], [1], [0, 0, 1, 1], [], []>} : vector<64x64xbf16>, vector<64x64xbf16>, vector<64x64xf32> -> vector<64x64xf32>
    %21 = arith.addf %14, %20 : vector<64x64xf32>
    %c0_24 = arith.constant 0 : index
    %c1_25 = arith.constant 1 : index
    %c0_26 = arith.constant 0 : index
    %c0_27 = arith.constant 0 : index
    %22 = vector.load %arg1[%c0_24, %c1_25, %c0_26, %c0_27] : memref<1x10x10x64xbf16, #tpu.memory_space<vmem>>, vector<1x8x8x64xbf16>
    %23 = vector.shape_cast %22 : vector<1x8x8x64xbf16> to vector<8x8x64xbf16>
    %24 = vector.shape_cast %23 : vector<8x8x64xbf16> to vector<64x64xbf16>
    %c1_28 = arith.constant 1 : index
    %c0_29 = arith.constant 0 : index
    %c0_30 = arith.constant 0 : index
    %c0_31 = arith.constant 0 : index
    %25 = vector.load %arg2[%c1_28, %c0_29, %c0_30, %c0_31] : memref<3x3x64x64xbf16, #tpu.memory_space<vmem>>, vector<1x1x64x64xbf16>
    %26 = vector.shape_cast %25 : vector<1x1x64x64xbf16> to vector<64x64xbf16>
    %cst_32 = arith.constant dense<0.000000e+00> : vector<64x64xf32>
    %27 = tpu.matmul %24, %26, %cst_32 {dimension_numbers = #tpu.dot_dimension_numbers<[1], [0], [0], [1], [0, 0, 1, 1], [], []>} : vector<64x64xbf16>, vector<64x64xbf16>, vector<64x64xf32> -> vector<64x64xf32>
    %28 = arith.addf %21, %27 : vector<64x64xf32>
    %c0_33 = arith.constant 0 : index
    %c1_34 = arith.constant 1 : index
    %c1_35 = arith.constant 1 : index
    %c0_36 = arith.constant 0 : index
    %29 = vector.load %arg1[%c0_33, %c1_34, %c1_35, %c0_36] : memref<1x10x10x64xbf16, #tpu.memory_space<vmem>>, vector<1x8x8x64xbf16>
    %30 = vector.shape_cast %29 : vector<1x8x8x64xbf16> to vector<8x8x64xbf16>
    %31 = vector.shape_cast %30 : vector<8x8x64xbf16> to vector<64x64xbf16>
    %c1_37 = arith.constant 1 : index
    %c1_38 = arith.constant 1 : index
    %c0_39 = arith.constant 0 : index
    %c0_40 = arith.constant 0 : index
    %32 = vector.load %arg2[%c1_37, %c1_38, %c0_39, %c0_40] : memref<3x3x64x64xbf16, #tpu.memory_space<vmem>>, vector<1x1x64x64xbf16>
    %33 = vector.shape_cast %32 : vector<1x1x64x64xbf16> to vector<64x64xbf16>
    %cst_41 = arith.constant dense<0.000000e+00> : vector<64x64xf32>
    %34 = tpu.matmul %31, %33, %cst_41 {dimension_numbers = #tpu.dot_dimension_numbers<[1], [0], [0], [1], [0, 0, 1, 1], [], []>} : vector<64x64xbf16>, vector<64x64xbf16>, vector<64x64xf32> -> vector<64x64xf32>
    %35 = arith.addf %28, %34 : vector<64x64xf32>
    %c0_42 = arith.constant 0 : index
    %c1_43 = arith.constant 1 : index
    %c2_44 = arith.constant 2 : index
    %c0_45 = arith.constant 0 : index
    %36 = vector.load %arg1[%c0_42, %c1_43, %c2_44, %c0_45] : memref<1x10x10x64xbf16, #tpu.memory_space<vmem>>, vector<1x8x8x64xbf16>
    %37 = vector.shape_cast %36 : vector<1x8x8x64xbf16> to vector<8x8x64xbf16>
    %38 = vector.shape_cast %37 : vector<8x8x64xbf16> to vector<64x64xbf16>
    %c1_46 = arith.constant 1 : index
    %c2_47 = arith.constant 2 : index
    %c0_48 = arith.constant 0 : index
    %c0_49 = arith.constant 0 : index
    %39 = vector.load %arg2[%c1_46, %c2_47, %c0_48, %c0_49] : memref<3x3x64x64xbf16, #tpu.memory_space<vmem>>, vector<1x1x64x64xbf16>
    %40 = vector.shape_cast %39 : vector<1x1x64x64xbf16> to vector<64x64xbf16>
    %cst_50 = arith.constant dense<0.000000e+00> : vector<64x64xf32>
    %41 = tpu.matmul %38, %40, %cst_50 {dimension_numbers = #tpu.dot_dimension_numbers<[1], [0], [0], [1], [0, 0, 1, 1], [], []>} : vector<64x64xbf16>, vector<64x64xbf16>, vector<64x64xf32> -> vector<64x64xf32>
    %42 = arith.addf %35, %41 : vector<64x64xf32>
    %c0_51 = arith.constant 0 : index
    %c2_52 = arith.constant 2 : index
    %c0_53 = arith.constant 0 : index
    %c0_54 = arith.constant 0 : index
    %43 = vector.load %arg1[%c0_51, %c2_52, %c0_53, %c0_54] : memref<1x10x10x64xbf16, #tpu.memory_space<vmem>>, vector<1x8x8x64xbf16>
    %44 = vector.shape_cast %43 : vector<1x8x8x64xbf16> to vector<8x8x64xbf16>
    %45 = vector.shape_cast %44 : vector<8x8x64xbf16> to vector<64x64xbf16>
    %c2_55 = arith.constant 2 : index
    %c0_56 = arith.constant 0 : index
    %c0_57 = arith.constant 0 : index
    %c0_58 = arith.constant 0 : index
    %46 = vector.load %arg2[%c2_55, %c0_56, %c0_57, %c0_58] : memref<3x3x64x64xbf16, #tpu.memory_space<vmem>>, vector<1x1x64x64xbf16>
    %47 = vector.shape_cast %46 : vector<1x1x64x64xbf16> to vector<64x64xbf16>
    %cst_59 = arith.constant dense<0.000000e+00> : vector<64x64xf32>
    %48 = tpu.matmul %45, %47, %cst_59 {dimension_numbers = #tpu.dot_dimension_numbers<[1], [0], [0], [1], [0, 0, 1, 1], [], []>} : vector<64x64xbf16>, vector<64x64xbf16>, vector<64x64xf32> -> vector<64x64xf32>
    %49 = arith.addf %42, %48 : vector<64x64xf32>
    %c0_60 = arith.constant 0 : index
    %c2_61 = arith.constant 2 : index
    %c1_62 = arith.constant 1 : index
    %c0_63 = arith.constant 0 : index
    %50 = vector.load %arg1[%c0_60, %c2_61, %c1_62, %c0_63] : memref<1x10x10x64xbf16, #tpu.memory_space<vmem>>, vector<1x8x8x64xbf16>
    %51 = vector.shape_cast %50 : vector<1x8x8x64xbf16> to vector<8x8x64xbf16>
    %52 = vector.shape_cast %51 : vector<8x8x64xbf16> to vector<64x64xbf16>
    %c2_64 = arith.constant 2 : index
    %c1_65 = arith.constant 1 : index
    %c0_66 = arith.constant 0 : index
    %c0_67 = arith.constant 0 : index
    %53 = vector.load %arg2[%c2_64, %c1_65, %c0_66, %c0_67] : memref<3x3x64x64xbf16, #tpu.memory_space<vmem>>, vector<1x1x64x64xbf16>
    %54 = vector.shape_cast %53 : vector<1x1x64x64xbf16> to vector<64x64xbf16>
    %cst_68 = arith.constant dense<0.000000e+00> : vector<64x64xf32>
    %55 = tpu.matmul %52, %54, %cst_68 {dimension_numbers = #tpu.dot_dimension_numbers<[1], [0], [0], [1], [0, 0, 1, 1], [], []>} : vector<64x64xbf16>, vector<64x64xbf16>, vector<64x64xf32> -> vector<64x64xf32>
    %56 = arith.addf %49, %55 : vector<64x64xf32>
    %c0_69 = arith.constant 0 : index
    %c2_70 = arith.constant 2 : index
    %c2_71 = arith.constant 2 : index
    %c0_72 = arith.constant 0 : index
    %57 = vector.load %arg1[%c0_69, %c2_70, %c2_71, %c0_72] : memref<1x10x10x64xbf16, #tpu.memory_space<vmem>>, vector<1x8x8x64xbf16>
    %58 = vector.shape_cast %57 : vector<1x8x8x64xbf16> to vector<8x8x64xbf16>
    %59 = vector.shape_cast %58 : vector<8x8x64xbf16> to vector<64x64xbf16>
    %c2_73 = arith.constant 2 : index
    %c2_74 = arith.constant 2 : index
    %c0_75 = arith.constant 0 : index
    %c0_76 = arith.constant 0 : index
    %60 = vector.load %arg2[%c2_73, %c2_74, %c0_75, %c0_76] : memref<3x3x64x64xbf16, #tpu.memory_space<vmem>>, vector<1x1x64x64xbf16>
    %61 = vector.shape_cast %60 : vector<1x1x64x64xbf16> to vector<64x64xbf16>
    %cst_77 = arith.constant dense<0.000000e+00> : vector<64x64xf32>
    %62 = tpu.matmul %59, %61, %cst_77 {dimension_numbers = #tpu.dot_dimension_numbers<[1], [0], [0], [1], [0, 0, 1, 1], [], []>} : vector<64x64xbf16>, vector<64x64xbf16>, vector<64x64xf32> -> vector<64x64xf32>
    %63 = arith.addf %56, %62 : vector<64x64xf32>
    %c0_78 = arith.constant 0 : index
    %c0_79 = arith.constant 0 : index
    %64 = vector.load %arg3[%c0_78, %c0_79] : memref<1x64xf32, #tpu.memory_space<vmem>>, vector<1x64xf32>
    %65 = vector.broadcast %64 : vector<1x64xf32> to vector<64x64xf32>
    %66 = arith.addf %63, %65 : vector<64x64xf32>
    %cst_80 = arith.constant 0.000000e+00 : f32
    %67 = vector.broadcast %cst_80 : f32 to vector<64x64xf32>
    %68 = arith.maximumf %66, %67 : vector<64x64xf32>
    %69 = vector.shape_cast %68 : vector<64x64xf32> to vector<8x8x64xf32>
    %c0_81 = arith.constant 0 : index
    %c0_82 = arith.constant 0 : index
    %c0_83 = arith.constant 0 : index
    %c0_84 = arith.constant 0 : index
    %70 = vector.load %arg4[%c0_81, %c0_82, %c0_83, %c0_84] : memref<1x8x8x64xf32, #tpu.memory_space<vmem>>, vector<1x8x8x64xf32>
    %71 = vector.shape_cast %70 : vector<1x8x8x64xf32> to vector<8x8x64xf32>
    %72 = vector.shape_cast %69 : vector<8x8x64xf32> to vector<1x8x8x64xf32>
    tpu.vector_store %arg4[%c0_81, %c0_82, %c0_83, %c0_84], %72 {strides = array<i32>} : memref<1x8x8x64xf32, #tpu.memory_space<vmem>>, vector<1x8x8x64xf32>,
    return
  }
  func.func @transform_0(%arg0: i32) -> (i32, i32, i32, i32) {
    %c0_i32 = arith.constant 0 : i32
    %c0_i32_0 = arith.constant 0 : i32
    %c0_i32_1 = arith.constant 0 : i32
    %c0_i32_2 = arith.constant 0 : i32
    return %arg0, %c0_i32, %c0_i32_0, %c0_i32_1 : i32, i32, i32, i32
  }
  func.func @transform_1(%arg0: i32) -> (i32, i32, i32, i32) {
    %c0_i32 = arith.constant 0 : i32
    %c0_i32_0 = arith.constant 0 : i32
    %c0_i32_1 = arith.constant 0 : i32
    %c0_i32_2 = arith.constant 0 : i32
    %c0_i32_3 = arith.constant 0 : i32
    return %c0_i32, %c0_i32_0, %c0_i32_1, %c0_i32_2 : i32, i32, i32, i32
  }
  func.func @transform_2(%arg0: i32) -> (i32, i32) {
    %c0_i32 = arith.constant 0 : i32
    %c0_i32_0 = arith.constant 0 : i32
    %c0_i32_1 = arith.constant 0 : i32
    return %c0_i32, %c0_i32_0 : i32, i32
  }
  func.func @transform_3(%arg0: i32) -> (i32, i32, i32, i32) {
    %c0_i32 = arith.constant 0 : i32
    %c0_i32_0 = arith.constant 0 : i32
    %c0_i32_1 = arith.constant 0 : i32
    %c0_i32_2 = arith.constant 0 : i32
    return %arg0, %c0_i32, %c0_i32_0, %c0_i32_1 : i32, i32, i32, i32
  }
}

module attributes {stable_mosaic.version = 11 : i64} {
  func.func @_fc_kernel(%arg0: i32, %arg1: memref<2x4096xbf16, #tpu.memory_space<vmem>>, %arg2: memref<4096x128xbf16, #tpu.memory_space<vmem>>, %arg3: memref<1x128xf32, #tpu.memory_space<vmem>>, %arg4: memref<2x128xf32, #tpu.memory_space<vmem>>) attributes {dimension_semantics = [#tpu.dimension_semantics<parallel>], iteration_bounds = array<i64: 1>, scalar_prefetch = 0 : i64, scratch_operands = 0 : i64, tpu.core_type = #tpu.core_type<tc>, window_params = [{transform_indices = @transform_0, window_bounds = array<i64: 2, 4096>}, {pipeline_mode = #tpu.pipeline_mode<synchronous>, transform_indices = @transform_1, window_bounds = array<i64: 4096, 128>}, {pipeline_mode = #tpu.pipeline_mode<synchronous>, transform_indices = @transform_2, window_bounds = array<i64: 1, 128>}, {transform_indices = @transform_3, window_bounds = array<i64: 2, 128>}]} {
    %c0 = arith.constant 0 : index
    %c0_0 = arith.constant 0 : index
    %0 = vector.load %arg1[%c0, %c0_0] : memref<2x4096xbf16, #tpu.memory_space<vmem>>, vector<2x4096xbf16>
    %c0_1 = arith.constant 0 : index
    %c0_2 = arith.constant 0 : index
    %1 = vector.load %arg2[%c0_1, %c0_2] : memref<4096x128xbf16, #tpu.memory_space<vmem>>, vector<4096x128xbf16>
    %cst = arith.constant dense<0.000000e+00> : vector<2x128xf32>
    %2 = tpu.matmul %0, %1, %cst {dimension_numbers = #tpu.dot_dimension_numbers<[1], [0], [0], [1], [0, 0, 1, 1], [], []>} : vector<2x4096xbf16>, vector<4096x128xbf16>, vector<2x128xf32> -> vector<2x128xf32>
    %c0_3 = arith.constant 0 : index
    %c0_4 = arith.constant 0 : index
    %3 = vector.load %arg3[%c0_3, %c0_4] : memref<1x128xf32, #tpu.memory_space<vmem>>, vector<1x128xf32>
    %4 = vector.broadcast %3 : vector<1x128xf32> to vector<2x128xf32>
    %5 = arith.addf %2, %4 : vector<2x128xf32>
    %c0_5 = arith.constant 0 : index
    %c0_6 = arith.constant 0 : index
    %6 = vector.load %arg4[%c0_5, %c0_6] : memref<2x128xf32, #tpu.memory_space<vmem>>, vector<2x128xf32>
    tpu.vector_store %arg4[%c0_5, %c0_6], %5 {strides = array<i32>} : memref<2x128xf32, #tpu.memory_space<vmem>>, vector<2x128xf32>,
    return
  }
  func.func @transform_0(%arg0: i32) -> (i32, i32) {
    %c0_i32 = arith.constant 0 : i32
    %c0_i32_0 = arith.constant 0 : i32
    return %arg0, %c0_i32 : i32, i32
  }
  func.func @transform_1(%arg0: i32) -> (i32, i32) {
    %c0_i32 = arith.constant 0 : i32
    %c0_i32_0 = arith.constant 0 : i32
    %c0_i32_1 = arith.constant 0 : i32
    return %c0_i32, %c0_i32_0 : i32, i32
  }
  func.func @transform_2(%arg0: i32) -> (i32, i32) {
    %c0_i32 = arith.constant 0 : i32
    %c0_i32_0 = arith.constant 0 : i32
    %c0_i32_1 = arith.constant 0 : i32
    return %c0_i32, %c0_i32_0 : i32, i32
  }
  func.func @transform_3(%arg0: i32) -> (i32, i32) {
    %c0_i32 = arith.constant 0 : i32
    %c0_i32_0 = arith.constant 0 : i32
    return %arg0, %c0_i32 : i32, i32
  }
}

</mosaic_0001>

<bundles_post_ra>
// kernel: custom_cnn_forward.4
= control target key start
LH: loop header
LB: loop body
LE: loop exit
PB: predicated region body
PF: predicated region fallthrough
CT: control target
= control target key end

     0   :  { %s2174_s12 = smov 0   ;;  %s2702_s0 = inlined_call_operand.vmem [shape: bf16[2,10,10,64], index: 0, kind: input, shape index: {}]   ;;  %s2703_s1 = inlined_call_operand.vmem [shape: bf16[3,3,64,64], index: 1, kind: input, shape index: {}]   ;;  %s2704_s2 = inlined_call_operand.vmem [shape: f32[1,64], index: 2, kind: input, shape index: {}]   ;;  %s2705_s3 = inlined_call_operand.vmem [shape: f32[2,8,8,64], index: 3, kind: output, shape index: {}]  }
   0x1 LB: > { %s1685_s13 = sadd.s32 4294967295, %s2152_s12   ;;  %p1689_p0 = scmp.ge.s32.totalorder %s2152_s12, 1  ;;  %s2152_s12 = sphi %s2174_s12, %s13_s12  }
   0x2   : > { %p137_p1 = scmp.lt.s32.totalorder %s2152_s12, 3 }
   0x4   : > { %p138_p2 = pnand %p1689_p0, %p137_p1 }
   0x5   : > { %p161_p3 = scmp.lt.s32.totalorder (!%p138_p2), %s1685_s13, 1 }
   0x6   : > { %141 = sbr.rel (%p138_p2) target bundleno = 319 (0x13f), region = 32 }
   0xb   : > { %v2087_v0 = vld [vmem:[%s2703_s1 + $0x38] sm:$0xff]  ;;  %v2086_v1 = vld [vmem:[%s2703_s1 + $0x30] sm:$0xff]  ;;  %s2711_s13 = smov (!%p161_p3, %s1685_s13), 1  ;;  %v2085_v2 = vld [vmem:[%s2703_s1 + $0x28] sm:$0xff]  ;;  %vm196_vm0 = vsmask.f32 3328 }
   0xc   : > { %2124 = vmatpush.bf16.msra.mxu1 %v2087_v0  ;;  %2125 = vmatpush.bf16.msra.mxu2 %v2087_v0  ;;  %s2136_s18 = smul.u32 80, %s2711_s13  ;;  %vm197_vm1 = vsmask.f32 7440  ;;  %v2084_v6 = vld [vmem:[%s2703_s1 + $0x20] sm:$0xff]  ;;  %v2091_v21 = vld [vmem:[%s2703_s1 + $0x58] sm:$0xff]  ;;  %vm356_vm2 = vcmask 523264  }
   0xd   : > { %2126 = vmatpush.bf16.msra.mxu3 %v2087_v0  ;;  %373 = vmatpush.bf16.msra.mxu0 %v2087_v0  ;;  %v2083_v32 = vld [vmem:[%s2703_s1 + $0x18] sm:$0xff]  ;;  %vm2230_vm3 = vmor %vm196_vm0, %vm197_vm1  ;;  %v2090_v49 = vld [vmem:[%s2703_s1 + $0x50] sm:$0xff]  ;;  %vm507_vm4 = vcmask 1042432   ;;  %vm508_vm5 = vcmask 1046532  }
   0xe   : > { %s2197_s23 = scalar_lea.vmem %s2702_s0, %s2136_s18  ;;  %v2099_v38 = vld [vmem:[%s2703_s1 + $0x78] sm:$0xff]  ;;  %v2082_v50 = vld [vmem:[%s2703_s1 + $0x10] sm:$0xff]  ;;  %vm2313_vm6 = vmor %vm507_vm4, %vm508_vm5  ;;  %s2075_s18 = sshll.u32 %s2711_s13, 6 }
   0xf   : > { %v174_v3 = vld [vmem:[%s2197_s23 + $0x10] sm:$0xf]  ;;  %v175_v4 = vld [vmem:[%s2197_s23 + $0x18] sm:$0xf]  ;;  %v2202_v5 = vld [vmem:[%s2197_s23 + $0x14] sm:$0x1]  ;;  %s2653_s21 = scalar_lea.vmem %s2705_s3, %s2075_s18 }
  0x10   : > { %2127 = vmatpush.bf16.msra.mxu1 %v2086_v1  ;;  %2128 = vmatpush.bf16.msra.mxu2 %v2086_v1  ;;  %v2208_v7 = vld [vmem:[%s2197_s23 + $0x1c] sm:$0x1]  ;;  %v228_v8 = vshrl.u32 %v174_v3, 16  ;;  %v231_v9 = vshll.u32 %v174_v3, 16  ;;  %v237_v10 = vshll.u32 %v2202_v5, 16  ;;  %v242_v11 = vshrl.u32 %v175_v4, 16 }
  0x11   : > { %2129 = vmatpush.bf16.msra.mxu3 %v2086_v1  ;;  %374 = vmatpush.bf16.msra.mxu0 %v2086_v1  ;;  %v245_v12 = vshll.u32 %v175_v4, 16  ;;  %v251_v13 = vshll.u32 %v2208_v7, 16  ;;  %v176_v14 = vld [vmem:[%s2197_s23 + $0x20] sm:$0xf]  ;;  %v177_v15 = vld [vmem:[%s2197_s23 + $0x28] sm:$0xf] }
  0x12   : > { %v230_v16 = vrot.slane %v228_v8, 4  ;;  %v233_v17 = vrot.slane %v231_v9, 5  ;;  %v239_v18 = vrot.slane %v237_v10, 5  ;;  %v244_v19 = vrot.slane %v242_v11, 4  ;;  %v2215_v20 = vld [vmem:[%s2197_s23 + $0x24] sm:$0x1] }
  0x13   : > { %v247_v22 = vrot.slane %v245_v12, 5  ;;  %v253_v23 = vrot.slane %v251_v13, 5  ;;  %v2221_v24 = vld [vmem:[%s2197_s23 + $0x2c] sm:$0x1]  ;;  %v256_v25 = vshrl.u32 %v176_v14, 16  ;;  %v259_v26 = vshll.u32 %v176_v14, 16 }
  0x14   : > { %2130 = vmatpush.bf16.msra.mxu1 %v2085_v2  ;;  %2131 = vmatpush.bf16.msra.mxu2 %v2085_v2  ;;  %v234_v27 = vor.u32 %v233_v17, %v230_v16  ;;  %v265_v28 = vshll.u32 %v2215_v20, 16  ;;  %v270_v29 = vshrl.u32 %v177_v15, 16  ;;  %v273_v30 = vshll.u32 %v177_v15, 16  ;;  %v178_v31 = vld [vmem:[%s2197_s23 + $0x30] sm:$0xf]  ;;  %v2103_v39 = vld [vmem:[%s2703_s1 + $0x98] sm:$0xff] }
  0x15   : > { %2132 = vmatpush.bf16.msra.mxu3 %v2085_v2  ;;  %375 = vmatpush.bf16.msra.mxu0 %v2085_v2  ;;  %v248_v34 = vor.u32 %v247_v22, %v244_v19  ;;  %v258_v35 = vrot.slane %v256_v25, 4  ;;  %v261_v36 = vrot.slane %v259_v26, 5  ;;  %v279_v37 = vshll.u32 %v2221_v24, 16  ;;  %v2242_v44 = vld [vmem:[%s2197_s23 + $0x34] sm:$0x1]  ;;  %v2089_v16 = vld [vmem:[%s2703_s1 + $0x48] sm:$0xff] }
  0x16   : > { %v235_v40 = vrot.slane %v234_v27, 4  ;;  %v267_v41 = vrot.slane %v265_v28, 5  ;;  %v272_v42 = vrot.slane %v270_v29, 4  ;;  %v275_v43 = vrot.slane %v273_v30, 5  ;;  %v179_v53 = vld [vmem:[%s2197_s23 + $0x38] sm:$0xf] }
  0x17   : > { %v249_v45 = vrot.slane %v248_v34, 4  ;;  %v262_v46 = vor.u32 %v261_v36, %v258_v35  ;;  %v281_v47 = vrot.slane %v279_v37, 5  ;;  %v284_v48 = vshrl.u32 %v178_v31, 16  ;;  %v2254_v54 = vld [vmem:[%s2197_s23 + $0x3c] sm:$0x1]  ;;  %v2098_v61 = vld [vmem:[%s2703_s1 + $0x70] sm:$0xff] }
  0x18   : > { %2133 = vmatpush.bf16.msra.mxu1 %v2084_v6  ;;  %2134 = vmatpush.bf16.msra.mxu2 %v2084_v6  ;;  %v240_v51 = vsel %vm2230_vm3, %v235_v40, %v239_v18  ;;  %v276_v52 = vor.u32 %v275_v43, %v272_v42  ;;  %v287_v55 = vshll.u32 %v178_v31, 16  ;;  %v293_v56 = vshll.u32 %v2242_v44, 16  ;;  %v2102_v62 = vld [vmem:[%s2703_s1 + $0x90] sm:$0xff]  ;;  %v172_v3 = vld [vmem:[%s2197_s23] sm:$0xf]  ;;  %v2081_v17 = vld [vmem:[%s2703_s1 + $0x8] sm:$0xff] }
  0x19   : > { %2135 = vmatpush.bf16.msra.mxu3 %v2084_v6  ;;  %376 = vmatpush.bf16.msra.mxu0 %v2084_v6  ;;  %v254_v57 = vsel %vm2230_vm3, %v249_v45, %v253_v23  ;;  %v322_v58 = vunpack.c.l.b16 %v240_v51  ;;  %v263_v59 = vrot.slane %v262_v46, 4  ;;  %v286_v60 = vrot.slane %v284_v48, 4  ;;  %v2270_v10 = vld [vmem:[%s2197_s23 + $0x4] sm:$0x1]  ;;  %v173_v15 = vld [vmem:[%s2197_s23 + $0x8] sm:$0xf] }
  0x1a   : > { %v323_v63 = vunpack.c.l.b16 %v254_v57  ;;  %v277_v0 = vrot.slane %v276_v52, 4  ;;  %v289_v1 = vrot.slane %v287_v55, 5  ;;  %v295_v2 = vrot.slane %v293_v56, 5  ;;  %v2097_v23 = vld [vmem:[%s2703_s1 + $0x68] sm:$0xff]  ;;  %v2088_v30 = vld [vmem:[%s2703_s1 + $0x40] sm:$0xff]  ;;  %v2115_v51 = vld [vmem:[%s2703_s1 + $0xd8] sm:$0xff] }
  0x1b   : > { %v268_v4 = vsel %vm2230_vm3, %v263_v59, %v267_v41  ;;  %v298_v6 = vshrl.u32 %v179_v53, 16  ;;  %v301_v8 = vshll.u32 %v179_v53, 16  ;;  %v307_v9 = vshll.u32 %v2254_v54, 16  ;;  %v2101_v29 = vld [vmem:[%s2703_s1 + $0x88] sm:$0xff]  ;;  %v2080_v37 = vld [vmem:[%s2703_s1] sm:$0xff]  ;;  %v2107_v59 = vld [vmem:[%s2703_s1 + $0xb8] sm:$0xff] }
  0x1c   : > { %603 = vmatpush.bf16.msrb.mxu2 %v2091_v21  ;;  %458 = vmatpush.bf16.msrb.mxu1 %v2083_v32  ;;  %v329_v11 = vpack.c.b16 %v323_v63, %v322_v58  ;;  %v282_v12 = vsel %vm2230_vm3, %v277_v0, %v281_v47  ;;  %v324_v13 = vunpack.c.l.b16 %v268_v4  ;;  %v290_v14 = vor.u32 %v289_v1, %v286_v60  ;;  %v189_v34 = vld [vmem:[%s2197_s23 + $0xc] sm:$0x1]  ;;  %v2100_v43 = vld [vmem:[%s2703_s1 + $0x80] sm:$0xff]  ;;  %v1845_v58 = vld [vmem:[%s2197_s23 + $0x8] sm:$0xf] }
  0x1d   : > { %714 = vmatpush.bf16.msrb.mxu3 %v2099_v38  ;;  %936 = vmatpush.bf16.msrb.mxu0 %v2103_v39  ;;  %v325_v18 = vunpack.c.l.b16 %v282_v12  ;;  %v300_v19 = vrot.slane %v298_v6, 4  ;;  %v303_v21 = vrot.slane %v301_v8, 5  ;;  %v309_v22 = vrot.slane %v307_v9, 5  ;;  %v2096_v38 = vld [vmem:[%s2703_s1 + $0x60] sm:$0xff]  ;;  %v1847_v6 = vld [vmem:[%s2197_s23 + $0x10] sm:$0xf] }
  0x1e   : > { %1718 = vmatmul.msk.bf16.vlgmr.msra.gmra.mxu1 %vm356_vm2, %v329_v11  ;;  %v291_v25 = vrot.slane %v290_v14, 4  ;;  %v200_v26 = vshrl.u32 %v172_v3, 16  ;;  %v203_v27 = vshll.u32 %v172_v3, 16  ;;  %v209_v28 = vshll.u32 %v2270_v10, 16  ;;  %v483_v45 = vld [vmem:[%s2197_s23] sm:$0xe] }
  0x1f   : > { %v330_v31 = vpack.c.b16 %v325_v18, %v324_v13  ;;  %v304_v32 = vor.u32 %v303_v21, %v300_v19  ;;  %v214_v35 = vshrl.u32 %v173_v15, 16  ;;  %v217_v36 = vshll.u32 %v173_v15, 16  ;;  %v2119_v9 = vld [vmem:[%s2703_s1 + $0xf8] sm:$0xff]  ;;  %v2334_v13 = vld [vmem:[%s2197_s23 + $0xc] sm:$0x1] }
  0x20   : > { %604 = vmatpush.bf16.msrb.mxu2 %v2090_v49  ;;  %459 = vmatpush.bf16.msrb.mxu1 %v2082_v50  ;;  %v296_v39 = vsel %vm2230_vm3, %v291_v25, %v295_v2  ;;  %v202_v40 = vrot.slane %v200_v26, 4  ;;  %v205_v41 = vrot.slane %v203_v27, 5  ;;  %v211_v42 = vrot.slane %v209_v28, 5  ;;  %v484_v50 = vld [vmem:[%s2197_s23 + $0x8] sm:$0xe]  ;;  %v2114_v26 = vld [vmem:[%s2703_s1 + $0xd0] sm:$0xff] }
  0x21   : > { %715 = vmatpush.bf16.msrb.mxu3 %v2098_v61  ;;  %937 = vmatpush.bf16.msrb.mxu0 %v2102_v62  ;;  %v305_v46 = vrot.slane %v304_v32, 4  ;;  %v326_v47 = vunpack.c.l.b16 %v296_v39  ;;  %v216_v48 = vrot.slane %v214_v35, 4  ;;  %v219_v49 = vrot.slane %v217_v36, 5  ;;  %v2337_v14 = vld [vmem:[%s2197_s23 + $0x14] sm:$0x1] }
  0x22   : > { %1719 = vmatmul.msk.bf16.vlgmr.msra.gmra.mxu2 %vm356_vm2, %v330_v31  ;;  %v206_v52 = vor.u32 %v205_v41, %v202_v40  ;;  %v223_v53 = vshll.u32 %v189_v34, 16  ;;  %v512_v55 = vrot.slane %v2270_v10, 5  ;;  %v516_v56 = vrot.slane %v189_v34, 5  ;;  %v2076_v18 = vld [vmem:[%s2197_s23 + $0x4] sm:$0xf0]  ;;  %v2123_v31 = vld [vmem:[%s2703_s1 + $0x118] sm:$0xff] }
  0x23   : > { %v310_v60 = vsel %vm2230_vm3, %v305_v46, %v309_v22  ;;  %v220_v61 = vor.u32 %v219_v49, %v216_v48  ;;  %v1757_v62 = vrot.slane %v483_v45, 9  ;;  %v1758_v2 = vrot.slane %v484_v50, 9  ;;  %v485_v39 = vld [vmem:[%s2197_s23 + $0x10] sm:$0xe]  ;;  %v1851_v50 = vld [vmem:[%s2197_s23 + $0x20] sm:$0xf] }
  0x24   : > { %605 = vmatpush.bf16.msrb.mxu2 %v2089_v16  ;;  %460 = vmatpush.bf16.msrb.mxu1 %v2081_v17  ;;  %v327_v63 = vunpack.c.l.b16 %v310_v60  ;;  %v207_v0 = vrot.slane %v206_v52, 4  ;;  %v225_v1 = vrot.slane %v223_v53, 5  ;;  %v764_v8 = vshrl.u32 %v1845_v58, 16  ;;  %v1723_v17 = vld [vmem:[%s2197_s23] sm:$0xf]  ;;  %v2118_v40 = vld [vmem:[%s2703_s1 + $0xf0] sm:$0xff] }
  0x25   : > { %716 = vmatpush.bf16.msrb.mxu3 %v2097_v23  ;;  %938 = vmatpush.bf16.msrb.mxu0 %v2101_v29  ;;  %v221_v3 = vrot.slane %v220_v61, 4  ;;  %v513_v4 = vsel %vm2313_vm6, %v1757_v62, %v512_v55  ;;  %v517_v12 = vsel %vm2313_vm6, %v1758_v2, %v516_v56  ;;  %v767_v23 = vshll.u32 %v1845_v58, 16  ;;  %v2106_v41 = vld [vmem:[%s2703_s1 + $0xb0] sm:$0xff]  ;;  %v486_v52 = vld [vmem:[%s2197_s23 + $0x18] sm:$0xe] }
  0x26   : > { %v331_v10 = vpack.c.b16 %v327_v63, %v326_v47  ;;  %v212_v11 = vsel %vm2230_vm3, %v207_v0, %v211_v42  ;;  %v551_v19 = vunpack.c.l.b16 %v513_v4  ;;  %v766_v22 = vrot.slane %v764_v8, 4  ;;  %v1849_v47 = vld [vmem:[%s2197_s23 + $0x18] sm:$0xf]  ;;  %v2122_v48 = vld [vmem:[%s2703_s1 + $0x110] sm:$0xff]  ;;  %v2379_v8 = vld [vmem:[%s2197_s23 + $0x1c] sm:$0x1] }
  0x27   : > { %v226_v15 = vsel %vm2230_vm3, %v221_v3, %v225_v1  ;;  %v320_v16 = vunpack.c.l.b16 %v212_v11  ;;  %v778_v25 = vshrl.u32 %v1847_v6, 16  ;;  %v552_v27 = vunpack.c.l.b16 %v517_v12  ;;  %v2092_v60 = vld [vmem:[%s2197_s23 + $0xc] sm:$0xf0] }
  0x28   : > { %606 = vmatpush.bf16.msrb.mxu2 %v2088_v30  ;;  %461 = vmatpush.bf16.msrb.mxu1 %v2080_v37  ;;  %v321_v21 = vunpack.c.l.b16 %v226_v15  ;;  %v773_v28 = vshll.u32 %v2334_v13, 16  ;;  %v781_v29 = vshll.u32 %v1847_v6, 16  ;;  %v787_v30 = vshll.u32 %v2337_v14, 16 }
  0x29   : > { %717 = vmatpush.bf16.msrb.mxu3 %v2096_v38  ;;  %939 = vmatpush.bf16.msrb.mxu0 %v2100_v43  ;;  %v1724_v34 = vor.u32 %v2076_v18, %v1723_v17  ;;  %v769_v35 = vrot.slane %v767_v23, 5  ;;  %v780_v36 = vrot.slane %v778_v25, 4  ;;  %v559_v42 = vpack.c.b16 %v552_v27, %v551_v19  ;;  %v1727_v17 = vld [vmem:[%s2197_s23 + $0x10] sm:$0xf] }
  0x2a   : > { %1720 = vmatmul.msk.bf16.vlgmr.msra.gmra.mxu3 %vm356_vm2, %v331_v10  ;;  %v328_v32 = vpack.c.b16 %v321_v21, %v320_v16  ;;  %v783_v37 = vrot.slane %v781_v29, 5  ;;  %v775_v43 = vrot.slane %v773_v28, 5  ;;  %v789_v46 = vrot.slane %v787_v30, 5  ;;  %v2384_v16 = vld [vmem:[%s2197_s23 + $0x24] sm:$0x1] }
  0x2b   : > { %v770_v38 = vor.u32 %v769_v35, %v766_v22  ;;  %v1759_v53 = vrot.slane %v485_v39, 9  ;;  %v520_v55 = vrot.slane %v2202_v5, 5  ;;  %v792_v56 = vshrl.u32 %v1849_v47, 16  ;;  %v2113_v22 = vld [vmem:[%s2703_s1 + $0xc8] sm:$0xff]  ;;  %v1855_v39 = vld [vmem:[%s2197_s23 + $0x30] sm:$0xf] }
  0x2c   : > { %1197 = vmatpush.bf16.msra.mxu2 %v2115_v51  ;;  %1086 = vmatpush.bf16.msra.mxu1 %v2107_v59  ;;  %v784_v45 = vor.u32 %v783_v37, %v780_v36  ;;  %v795_v58 = vshll.u32 %v1849_v47, 16  ;;  %v1811_v59 = vld [vmem:[%s2197_s23 + $0x8] sm:$0xf]  ;;  %v806_v63 = vshrl.u32 %v1851_v50, 16  ;;  %v809_v0 = vshll.u32 %v1851_v50, 16 }
  0x2d   : > { %1419 = vmatpush.bf16.msra.mxu3 %v2119_v9  ;;  %1717 = vmatmul.msk.bf16.vlgmr.msra.gmra.mxu0 %vm356_vm2, %v328_v32  ;;  %v771_v49 = vrot.slane %v770_v38, 4  ;;  %v1760_v5 = vrot.slane %v486_v52, 9  ;;  %v524_v1 = vrot.slane %v2208_v7, 5  ;;  %v1812_v2 = vor.u32 %v2092_v60, %v1811_v59  ;;  %v2077_v7 = vld [vmem:[%s2197_s23 + $0x14] sm:$0xf0]  ;;  %v2105_v32 = vld [vmem:[%s2703_s1 + $0xa8] sm:$0xff] }
  0x2e   : > { %1569 = vmatpush.bf16.msra.mxu0 %v2123_v31  ;;  %1753 = vmatmul.msk.bf16.vlgmr.msrb.gmra.mxu1 %vm356_vm2, %v1724_v34  ;;  %v785_v51 = vrot.slane %v784_v45, 4  ;;  %v521_v6 = vsel %vm2313_vm6, %v1759_v53, %v520_v55  ;;  %v794_v9 = vrot.slane %v792_v56, 4  ;;  %v797_v10 = vrot.slane %v795_v58, 5  ;;  %v1853_v29 = vld [vmem:[%s2197_s23 + $0x28] sm:$0xf] }
  0x2f   : > { %v776_v61 = vsel %vm2230_vm3, %v771_v49, %v775_v43  ;;  %v808_v11 = vrot.slane %v806_v63, 4  ;;  %v811_v12 = vrot.slane %v809_v0, 5  ;;  %v525_v15 = vsel %vm2313_vm6, %v1760_v5, %v524_v1  ;;  %v2117_v31 = vld [vmem:[%s2703_s1 + $0xe8] sm:$0xff]  ;;  %v1815_v45 = vld [vmem:[%s2197_s23 + $0x18] sm:$0xf] }
  0x30   : > { %1198 = vmatpush.bf16.msra.mxu2 %v2114_v26  ;;  %1087 = vmatpush.bf16.msra.mxu1 %v2106_v41  ;;  %v790_v62 = vsel %vm2230_vm3, %v785_v51, %v789_v46  ;;  %v884_v3 = vunpack.c.l.b16 %v776_v61  ;;  %v553_v19 = vunpack.c.l.b16 %v521_v6  ;;  %v801_v21 = vshll.u32 %v2379_v8, 16  ;;  %v2121_v34 = vld [vmem:[%s2703_s1 + $0x108] sm:$0xff]  ;;  %v2093_v46 = vld [vmem:[%s2197_s23 + $0x1c] sm:$0xf0]  ;;  %v2422_v5 = vld [vmem:[%s2197_s23 + $0x34] sm:$0x1] }
  0x31   : > { %1420 = vmatpush.bf16.msra.mxu3 %v2118_v40  ;;  %v885_v4 = vunpack.c.l.b16 %v790_v62  ;;  %v554_v23 = vunpack.c.l.b16 %v525_v15  ;;  %v798_v25 = vor.u32 %v797_v10, %v794_v9  ;;  %v812_v26 = vor.u32 %v811_v12, %v808_v11  ;;  %v487_v40 = vld [vmem:[%s2197_s23 + $0x20] sm:$0xe]  ;;  %v488_v41 = vld [vmem:[%s2197_s23 + $0x28] sm:$0xe]  ;;  %v2419_v62 = vld [vmem:[%s2197_s23 + $0x2c] sm:$0x1] }
  0x32   : > { %1789 = vmatmul.msk.bf16.vlgmr.msrb.gmra.mxu2 %vm356_vm2, %v559_v42  ;;  %1570 = vmatpush.bf16.msra.mxu0 %v2122_v48  ;;  %v815_v27 = vshll.u32 %v2384_v16, 16  ;;  %v1728_v28 = vor.u32 %v2077_v7, %v1727_v17  ;;  %v803_v30 = vrot.slane %v801_v21, 5  ;;  %v820_v42 = vshrl.u32 %v1853_v29, 16  ;;  %v2112_v11 = vld [vmem:[%s2703_s1 + $0xc0] sm:$0xff]  ;;  %v1857_v21 = vld [vmem:[%s2197_s23 + $0x38] sm:$0xf] }
  0x33   : > { %v892_v18 = vpack.c.b16 %v885_v4, %v884_v3  ;;  %v560_v35 = vpack.c.b16 %v554_v23, %v553_v19  ;;  %v799_v36 = vrot.slane %v798_v25, 4  ;;  %v813_v37 = vrot.slane %v812_v26, 4  ;;  %v489_v19 = vld [vmem:[%s2197_s23 + $0x30] sm:$0xe]  ;;  %v2116_v25 = vld [vmem:[%s2703_s1 + $0xe0] sm:$0xff] }
  0x34   : > { %1199 = vmatpush.bf16.msra.mxu2 %v2113_v22  ;;  %v817_v38 = vrot.slane %v815_v27, 5  ;;  %v823_v43 = vshll.u32 %v1853_v29, 16  ;;  %1088 = vmatpush.bf16.msra.mxu1 %v2105_v32  ;;  %v834_v47 = vshrl.u32 %v1855_v39, 16  ;;  %v837_v48 = vshll.u32 %v1855_v39, 16  ;;  %v2104_v26 = vld [vmem:[%s2703_s1 + $0xa0] sm:$0xff] }
  0x35   : > { %1421 = vmatpush.bf16.msra.mxu3 %v2117_v31  ;;  %v804_v49 = vsel %vm2230_vm3, %v799_v36, %v803_v30  ;;  %v1761_v51 = vrot.slane %v487_v40, 9  ;;  %v528_v52 = vrot.slane %v2215_v20, 5  ;;  %v1762_v53 = vrot.slane %v488_v41, 9  ;;  %v2120_v27 = vld [vmem:[%s2703_s1 + $0x100] sm:$0xff]  ;;  %v490_v30 = vld [vmem:[%s2197_s23 + $0x38] sm:$0xe] }
  0x36   : > { %1571 = vmatpush.bf16.msra.mxu0 %v2121_v34  ;;  %v818_v50 = vsel %vm2230_vm3, %v813_v37, %v817_v38  ;;  %v532_v55 = vrot.slane %v2221_v24, 5  ;;  %v1816_v56 = vor.u32 %v2093_v46, %v1815_v45  ;;  %v822_v58 = vrot.slane %v820_v42, 4  ;;  %v2078_v24 = vld [vmem:[%s2197_s23 + $0x24] sm:$0xf0]  ;;  %v1859_v29 = vld [vmem:[%s2197_s23 + $0x40] sm:$0xf] }
  0x37   : > { %v825_v59 = vrot.slane %v823_v43, 5  ;;  %v886_v60 = vunpack.c.l.b16 %v804_v49  ;;  %v887_v61 = vunpack.c.l.b16 %v818_v50  ;;  %v836_v63 = vrot.slane %v834_v47, 4  ;;  %v1819_v31 = vld [vmem:[%s2197_s23 + $0x28] sm:$0xf]  ;;  %v2094_v37 = vld [vmem:[%s2197_s23 + $0x2c] sm:$0xf0] }
  0x38   : > { %v839_v0 = vrot.slane %v837_v48, 5  ;;  %v529_v1 = vsel %vm2313_vm6, %v1761_v51, %v528_v52  ;;  %v533_v20 = vsel %vm2313_vm6, %v1762_v53, %v532_v55  ;;  %v829_v4 = vshll.u32 %v2419_v62, 16  ;;  %1200 = vmatpush.bf16.msra.mxu2 %v2112_v11  ;;  %1089 = vmatpush.bf16.msra.mxu1 %v2104_v26  ;;  %v2463_v48 = vld [vmem:[%s2197_s23 + $0x3c] sm:$0x1]  ;;  %v2466_v49 = vld [vmem:[%s2197_s23 + $0x44] sm:$0x1] }
  0x39   : > { %v826_v3 = vor.u32 %v825_v59, %v822_v58  ;;  %v893_v6 = vpack.c.b16 %v887_v61, %v886_v60  ;;  %v843_v10 = vshll.u32 %v2422_v5, 16  ;;  %v555_v12 = vunpack.c.l.b16 %v529_v1  ;;  %1422 = vmatpush.bf16.msra.mxu3 %v2116_v25  ;;  %v1889_v11 = vld [vmem:[%s2197_s23 + $0x8] sm:$0xe]  ;;  %v1823_v25 = vld [vmem:[%s2197_s23 + $0x38] sm:$0xf] }
  0x3a   : > { %1841 = vmatmul.msk.bf16.vlgmr.msrb.gmra.mxu3 %vm356_vm2, %v1812_v2  ;;  %v1731_v2 = vld [vmem:[%s2197_s23 + $0x20] sm:$0xf]  ;;  %v840_v9 = vor.u32 %v839_v0, %v836_v63  ;;  %v556_v15 = vunpack.c.l.b16 %v533_v20  ;;  %v1763_v34 = vrot.slane %v489_v19, 9  ;;  %v848_v36 = vshrl.u32 %v1857_v21, 16  ;;  %1572 = vmatpush.bf16.msra.mxu0 %v2120_v27 }
  0x3b   : > { %v1732_v17 = vor.u32 %v2078_v24, %v1731_v2  ;;  %v827_v7 = vrot.slane %v826_v3, 4  ;;  %v845_v23 = vrot.slane %v843_v10, 5  ;;  %v851_v39 = vshll.u32 %v1857_v21, 16  ;;  %v1985_v2 = vld [vmem:[%s2197_s23 + $0x10] sm:$0xf] }
  0x3c   : > { %v841_v22 = vrot.slane %v840_v9, 4  ;;  %v862_v40 = vshrl.u32 %v1859_v29, 16  ;;  %v865_v41 = vshll.u32 %v1859_v29, 16  ;;  %v1764_v42 = vrot.slane %v490_v30, 9  ;;  %v1987_v24 = vld [vmem:[%s2197_s23 + $0x18] sm:$0xf] }
  0x3d   : > { %1885 = vmatmul.msk.bf16.vlgmr.msrb.gmra.mxu0 %vm356_vm2, %v892_v18  ;;  %v831_v18 = vrot.slane %v829_v4, 5  ;;  %v540_v43 = vrot.slane %v2254_v54, 5  ;;  %v850_v50 = vrot.slane %v848_v36, 4  ;;  %v853_v51 = vrot.slane %v851_v39, 5  ;;  %v1735_v54 = vld [vmem:[%s2197_s23 + $0x30] sm:$0xf] }
  0x3e   : > { %1754 = vmatmul.msk.bf16.gmra.mxu1 %vm356_vm2, %v1728_v28  ;;  %v561_v28 = vpack.c.b16 %v556_v15, %v555_v12  ;;  %v846_v38 = vsel %vm2230_vm3, %v841_v22, %v845_v23  ;;  %v864_v52 = vrot.slane %v862_v40, 4  ;;  %v867_v53 = vrot.slane %v865_v41, 5  ;;  %v1890_v12 = vld [vmem:[%s2197_s23 + $0x10] sm:$0xe] }
  0x3f   : > { %v832_v32 = vsel %vm2230_vm3, %v827_v7, %v831_v18  ;;  %v889_v46 = vunpack.c.l.b16 %v846_v38  ;;  %v541_v55 = vsel %vm2313_vm6, %v1764_v42, %v540_v43  ;;  %v857_v59 = vshll.u32 %v2463_v48, 16 }
  0x40   : > { %v888_v45 = vunpack.c.l.b16 %v832_v32  ;;  %v871_v60 = vshll.u32 %v2466_v49, 16  ;;  %v558_v63 = vunpack.c.l.b16 %v541_v55  ;;  %v854_v0 = vor.u32 %v853_v51, %v850_v50  ;;  %v2108_v50 = vld [vmem:[%s2197_s23 + $0x14] sm:$0xf0] }
  0x41   : > { %v868_v1 = vor.u32 %v867_v53, %v864_v52  ;;  %v859_v3 = vrot.slane %v857_v59, 5  ;;  %v1247_v15 = vshrl.u32 %v1985_v2, 16  ;;  %v1261_v7 = vshrl.u32 %v1987_v24, 16  ;;  %v2030_v51 = vld [vmem:[%s2197_s23 + $0x18] sm:$0xe] }
  0x42   : > { %1790 = vmatmul.msk.bf16.gmra.mxu2 %vm356_vm2, %v560_v35  ;;  %v536_v35 = vrot.slane %v2242_v44, 5  ;;  %v1820_v44 = vor.u32 %v2094_v37, %v1819_v31  ;;  %v894_v61 = vpack.c.b16 %v889_v46, %v888_v45  ;;  %v873_v4 = vrot.slane %v871_v60, 5  ;;  %v2029_v45 = vld [vmem:[%s2197_s23 + $0x10] sm:$0xe] }
  0x43   : > { %v855_v9 = vrot.slane %v854_v0, 4  ;;  %v869_v10 = vrot.slane %v868_v1, 4  ;;  %v1264_v18 = vshll.u32 %v1987_v24, 16  ;;  %v995_v19 = vrot.slane %v2334_v13, 5  ;;  %v1986_v13 = vld [vmem:[%s2197_s23 + $0x14] sm:$0x1] }
  0x44   : > { %v537_v47 = vsel %vm2313_vm6, %v1763_v34, %v536_v35  ;;  %v999_v21 = vrot.slane %v2337_v14, 5  ;;  %v1897_v22 = vrot.slane %v1889_v11, 9  ;;  %v1898_v23 = vrot.slane %v1890_v12, 9  ;;  %v1988_v14 = vld [vmem:[%s2197_s23 + $0x1c] sm:$0x1] }
  0x45   : > { %v557_v58 = vunpack.c.l.b16 %v537_v47  ;;  %v860_v26 = vsel %vm2230_vm3, %v855_v9, %v859_v3  ;;  %v874_v27 = vsel %vm2230_vm3, %v869_v10, %v873_v4  ;;  %v1249_v29 = vrot.slane %v1247_v15, 4  ;;  %v1951_v47 = vld [vmem:[%s2197_s23 + $0x10] sm:$0xf] }
  0x46   : > { %v1263_v31 = vrot.slane %v1261_v7, 4  ;;  %v1266_v32 = vrot.slane %v1264_v18, 5  ;;  %v996_v34 = vsel %vm2313_vm6, %v1897_v22, %v995_v19  ;;  %v1000_v35 = vsel %vm2313_vm6, %v1898_v23, %v999_v21 }
  0x47   : > { %v890_v37 = vunpack.c.l.b16 %v860_v26  ;;  %v891_v38 = vunpack.c.l.b16 %v874_v27  ;;  %v1256_v40 = vshll.u32 %v1986_v13, 16  ;;  %v1270_v42 = vshll.u32 %v1988_v14, 16 }
  0x48   : > { %v1267_v41 = vor.u32 %v1266_v32, %v1263_v31  ;;  %v1034_v43 = vunpack.c.l.b16 %v996_v34  ;;  %v2037_v59 = vrot.slane %v2029_v45, 9  ;;  %v1478_v60 = vrot.slane %v1986_v13, 5 }
  0x49   : > { %v895_v46 = vpack.c.b16 %v891_v38, %v890_v37  ;;  %v1258_v53 = vrot.slane %v1256_v40, 5  ;;  %v1482_v0 = vrot.slane %v1988_v14, 5  ;;  %v1952_v1 = vor.u32 %v2108_v50, %v1951_v47  ;;  %v1955_v37 = vld [vmem:[%s2197_s23 + $0x20] sm:$0xf]  ;;  %v1995_v50 = vld [vmem:[%s2197_s23 + $0x38] sm:$0xf] }
  0x4a   : > { %1842 = vmatmul.msk.bf16.gmra.mxu3 %vm356_vm2, %v1816_v56  ;;  %v2079_v56 = vld [vmem:[%s2197_s23 + $0x34] sm:$0xf0]  ;;  %v1268_v55 = vrot.slane %v1267_v41, 4  ;;  %v1479_v11 = vsel %vm2313_vm6, %v2037_v59, %v1478_v60  ;;  %v1003_v15 = vrot.slane %v2379_v8, 5  ;;  %v1007_v7 = vrot.slane %v2384_v16, 5 }
  0x4b   : > { %v1736_v20 = vor.u32 %v2079_v56, %v1735_v54  ;;  %v1272_v54 = vrot.slane %v1270_v42, 5  ;;  %v1989_v56 = vld [vmem:[%s2197_s23 + $0x20] sm:$0xf]  ;;  %v1993_v42 = vld [vmem:[%s2197_s23 + $0x30] sm:$0xf] }
  0x4c   : > { %v1275_v24 = vshrl.u32 %v1989_v56, 16  ;;  %v1278_v3 = vshll.u32 %v1989_v56, 16  ;;  %v2031_v41 = vld [vmem:[%s2197_s23 + $0x20] sm:$0xe]  ;;  %v1893_v59 = vld [vmem:[%s2197_s23 + $0x28] sm:$0xe] }
  0x4d   : > { %1886 = vmatmul.msk.bf16.gmra.mxu0 %vm356_vm2, %v893_v6  ;;  %v562_v6 = vpack.c.b16 %v558_v63, %v557_v58  ;;  %v2038_v63 = vrot.slane %v2030_v51, 9  ;;  %v2039_v51 = vrot.slane %v2031_v41, 9  ;;  %v1894_v60 = vld [vmem:[%s2197_s23 + $0x30] sm:$0xe] }
  0x4e   : > { %1755 = vmatmul.msk.bf16.gmra.mxu1 %vm356_vm2, %v1732_v17  ;;  %v1250_v17 = vshll.u32 %v1985_v2, 16  ;;  %v1892_v2 = vld [vmem:[%s2197_s23 + $0x20] sm:$0xe]  ;;  %v1277_v21 = vrot.slane %v1275_v24, 4  ;;  %v1280_v22 = vrot.slane %v1278_v3, 5  ;;  %v1901_v24 = vrot.slane %v1893_v59, 9 }
  0x4f   : > { %v1483_v23 = vsel %vm2313_vm6, %v2038_v63, %v1482_v0  ;;  %v1317_v0 = vshrl.u32 %v1995_v50, 16  ;;  %v1902_v3 = vrot.slane %v1894_v60, 9  ;;  %v1023_v59 = vrot.slane %v2466_v49, 5 }
  0x50   : > { %v1252_v30 = vrot.slane %v1250_v17, 5  ;;  %v1900_v17 = vrot.slane %v1892_v2, 9  ;;  %v1518_v31 = vunpack.c.l.b16 %v1483_v23  ;;  %v1281_v32 = vor.u32 %v1280_v22, %v1277_v21 }
  0x51   : > { %v1015_v2 = vrot.slane %v2422_v5, 5 }
  0x52   : > { %1791 = vmatmul.msk.bf16.gmra.mxu2 %vm356_vm2, %v561_v28  ;;  %v2095_v28 = vld [vmem:[%s2197_s23 + $0x3c] sm:$0xf0]  ;;  %v1253_v39 = vor.u32 %v1252_v30, %v1249_v29  ;;  %v1517_v29 = vunpack.c.l.b16 %v1479_v11  ;;  %v1008_v16 = vsel %vm2313_vm6, %v1900_v17, %v1007_v7  ;;  %v1994_v11 = vld [vmem:[%s2197_s23 + $0x34] sm:$0x1]  ;;  %v1319_v17 = vrot.slane %v1317_v0, 4 }
  0x53   : > { %v1824_v36 = vor.u32 %v2095_v28, %v1823_v25  ;;  %v1990_v25 = vld [vmem:[%s2197_s23 + $0x24] sm:$0x1]  ;;  %v1992_v28 = vld [vmem:[%s2197_s23 + $0x2c] sm:$0x1]  ;;  %v1312_v21 = vshll.u32 %v1994_v11, 16  ;;  %v1494_v41 = vrot.slane %v1994_v11, 5 }
  0x54   : > { %v1254_v52 = vrot.slane %v1253_v39, 4  ;;  %v1284_v13 = vshll.u32 %v1990_v25, 16  ;;  %v1298_v34 = vshll.u32 %v1992_v28, 16  ;;  %v1525_v38 = vpack.c.b16 %v1518_v31, %v1517_v29  ;;  %v1959_v31 = vld [vmem:[%s2197_s23 + $0x30] sm:$0xf] }
  0x55   : > { %v1282_v39 = vrot.slane %v1281_v32, 4  ;;  %v1486_v56 = vrot.slane %v1990_v25, 5  ;;  %v1490_v63 = vrot.slane %v1992_v28, 5  ;;  %v2033_v32 = vld [vmem:[%s2197_s23 + $0x30] sm:$0xe] }
  0x56   : > { %v1259_v4 = vsel %vm2230_vm3, %v1254_v52, %v1258_v53  ;;  %v1286_v40 = vrot.slane %v1284_v13, 5  ;;  %v1300_v45 = vrot.slane %v1298_v34, 5  ;;  %v1303_v52 = vshrl.u32 %v1993_v42, 16  ;;  %v2034_v13 = vld [vmem:[%s2197_s23 + $0x38] sm:$0xe] }
  0x57   : > { %v1367_v18 = vunpack.c.l.b16 %v1259_v4  ;;  %v1306_v53 = vshll.u32 %v1993_v42, 16  ;;  %v2042_v42 = vrot.slane %v2034_v13, 9 }
  0x58   : > { %v1305_v4 = vrot.slane %v1303_v52, 4 }
  0x5a   : > { %1843 = vmatmul.msk.bf16.gmra.mxu3 %vm356_vm2, %v1820_v44  ;;  %v1035_v44 = vunpack.c.l.b16 %v1000_v35 }
  0x5c   : > { %v1042_v58 = vpack.c.b16 %v1035_v44, %v1034_v43  ;;  %v2109_v43 = vld [vmem:[%s2197_s23 + $0x24] sm:$0xf0] }
  0x5d   : > { %1887 = vmatmul.msk.bf16.gmra.mxu0 %vm356_vm2, %v894_v61  ;;  %v1991_v61 = vld [vmem:[%s2197_s23 + $0x28] sm:$0xf] }
  0x5e   : > { %1756 = vmatmul.msk.bf16.gmra.mxu1 %vm356_vm2, %v1736_v20  ;;  %v1891_v20 = vld [vmem:[%s2197_s23 + $0x18] sm:$0xe]  ;;  %v1289_v9 = vshrl.u32 %v1991_v61, 16  ;;  %v1292_v10 = vshll.u32 %v1991_v61, 16 }
  0x5f   : > { %v1899_v12 = vrot.slane %v1891_v20, 9  ;;  %v1011_v20 = vrot.slane %v2419_v62, 5  ;;  %v1996_v62 = vld [vmem:[%s2197_s23 + $0x3c] sm:$0x1] }
  0x60   : > { %v1291_v26 = vrot.slane %v1289_v9, 4  ;;  %v1294_v27 = vrot.slane %v1292_v10, 5 }
  0x61   : > { %v1004_v8 = vsel %vm2313_vm6, %v1899_v12, %v1003_v15  ;;  %v1487_v12 = vsel %vm2313_vm6, %v2039_v51, %v1486_v56  ;;  %v1012_v5 = vsel %vm2313_vm6, %v1901_v24, %v1011_v20  ;;  %v1498_v51 = vrot.slane %v1996_v62, 5  ;;  %v1998_v20 = vld [vmem:[%s2197_s23 + $0x44] sm:$0x1] }
  0x62   : > { %1792 = vmatmul.msk.bf16.gmra.mxu2 %vm356_vm2, %v562_v6  ;;  %v1273_v6 = vsel %vm2230_vm3, %v1268_v55, %v1272_v54  ;;  %v1295_v14 = vor.u32 %v1294_v27, %v1291_v26  ;;  %v1036_v35 = vunpack.c.l.b16 %v1004_v8  ;;  %v1956_v55 = vor.u32 %v2109_v43, %v1955_v37 }
  0x63   : > { %v1368_v19 = vunpack.c.l.b16 %v1273_v6  ;;  %v1287_v54 = vsel %vm2230_vm3, %v1282_v39, %v1286_v40  ;;  %v1308_v6 = vrot.slane %v1306_v53, 5  ;;  %v1519_v23 = vunpack.c.l.b16 %v1487_v12 }
  0x64   : > { %v1296_v44 = vrot.slane %v1295_v14, 4  ;;  %v1369_v9 = vunpack.c.l.b16 %v1287_v54  ;;  %v1326_v27 = vshll.u32 %v1996_v62, 16  ;;  %v1038_v28 = vunpack.c.l.b16 %v1012_v5  ;;  %v2110_v14 = vld [vmem:[%s2197_s23 + $0x34] sm:$0xf0] }
  0x65   : > { %v1375_v30 = vpack.c.b16 %v1368_v19, %v1367_v18  ;;  %v1016_v18 = vsel %vm2313_vm6, %v1902_v3, %v1015_v2  ;;  %v1309_v19 = vor.u32 %v1308_v6, %v1305_v4  ;;  %v2041_v40 = vrot.slane %v2033_v32, 9  ;;  %v2000_v3 = vld [vmem:[%s2197_s23 + $0x4c] sm:$0x1] }
  0x66   : > { %v1301_v61 = vsel %vm2230_vm3, %v1296_v44, %v1300_v45  ;;  %v1039_v29 = vunpack.c.l.b16 %v1016_v18  ;;  %v1960_v43 = vor.u32 %v2110_v14, %v1959_v31  ;;  %v1895_v44 = vld [vmem:[%s2197_s23 + $0x38] sm:$0xe]  ;;  %v1896_v45 = vld [vmem:[%s2197_s23 + $0x40] sm:$0xe]  ;;  %v1019_v56 = vrot.slane %v2463_v48, 5 }
  0x67   : > { %v1370_v10 = vunpack.c.l.b16 %v1301_v61  ;;  %v1310_v8 = vrot.slane %v1309_v19, 4  ;;  %v1903_v54 = vrot.slane %v1895_v44, 9  ;;  %v1495_v61 = vsel %vm2313_vm6, %v2041_v40, %v1494_v41 }
  0x68   : > { %v1044_v37 = vpack.c.b16 %v1039_v29, %v1038_v28  ;;  %v1521_v4 = vunpack.c.l.b16 %v1495_v61  ;;  %v1340_v11 = vshll.u32 %v1998_v20, 16  ;;  %v1506_v13 = vrot.slane %v2000_v3, 5 }
  0x69   : > { %v1376_v22 = vpack.c.b16 %v1370_v10, %v1369_v9  ;;  %v1020_v48 = vsel %vm2313_vm6, %v1903_v54, %v1019_v56 }
  0x6a   : > { %1844 = vmatmul.msk.bf16.gmra.mxu3 %vm356_vm2, %v1824_v36  ;;  %v1037_v36 = vunpack.c.l.b16 %v1008_v16  ;;  %v1314_v16 = vrot.slane %v1312_v21, 5  ;;  %v1342_v18 = vrot.slane %v1340_v11, 5 }
  0x6c   : > { %v1043_v47 = vpack.c.b16 %v1037_v36, %v1036_v35  ;;  %v1328_v35 = vrot.slane %v1326_v27, 5  ;;  %v1997_v36 = vld [vmem:[%s2197_s23 + $0x40] sm:$0xf]  ;;  %v1315_v39 = vsel %vm2230_vm3, %v1310_v8, %v1314_v16  ;;  %v2036_v27 = vld [vmem:[%s2197_s23 + $0x48] sm:$0xe]  ;;  %v1502_v16 = vrot.slane %v1998_v20, 5 }
  0x6d   : > { %1888 = vmatmul.msk.bf16.gmra.mxu0 %vm356_vm2, %v895_v46  ;;  %v2032_v46 = vld [vmem:[%s2197_s23 + $0x28] sm:$0xe]  ;;  %v2044_v32 = vrot.slane %v2036_v27, 9 }
  0x6e   : > { %1929 = vmatmul.msk.bf16.vlgmr.msra.gmra.mxu1 %vm356_vm2, %v1042_v58  ;;  %v2040_v58 = vrot.slane %v2032_v46, 9  ;;  %v1331_v46 = vshrl.u32 %v1997_v36, 16 }
  0x70   : > { %v1491_v15 = vsel %vm2313_vm6, %v2040_v58, %v1490_v63  ;;  %v1904_v58 = vrot.slane %v1896_v45, 9  ;;  %v1333_v63 = vrot.slane %v1331_v46, 4 }
  0x71   : > { %v1520_v25 = vunpack.c.l.b16 %v1491_v15  ;;  %v1354_v15 = vshll.u32 %v2000_v3, 16 }
  0x72   : > { %1981 = vmatmul.msk.bf16.vlgmr.msra.gmra.mxu2 %vm356_vm2, %v1952_v1  ;;  %v1320_v1 = vshll.u32 %v1995_v50, 16  ;;  %v1024_v49 = vsel %vm2313_vm6, %v1904_v58, %v1023_v59 }
  0x73   : > { %v1356_v21 = vrot.slane %v1354_v15, 5 }
  0x74   : > { %v1322_v7 = vrot.slane %v1320_v1, 5  ;;  %v1499_v1 = vsel %vm2313_vm6, %v2042_v42, %v1498_v51 }
  0x75   : > { %v1522_v9 = vunpack.c.l.b16 %v1499_v1 }
  0x76   : > { %v1323_v26 = vor.u32 %v1322_v7, %v1319_v17  ;;  %v1040_v17 = vunpack.c.l.b16 %v1020_v48  ;;  %v1041_v7 = vunpack.c.l.b16 %v1024_v49 }
  0x77   : > { %v1527_v62 = vpack.c.b16 %v1522_v9, %v1521_v4 }
  0x78   : > { %v1324_v34 = vrot.slane %v1323_v26, 4  ;;  %v2111_v26 = vld [vmem:[%s2197_s23 + $0x44] sm:$0xf0] }
  0x7a   : > { %2025 = vmatmul.msk.bf16.vlgmr.msra.gmra.mxu3 %vm356_vm2, %v1375_v30  ;;  %v1526_v30 = vpack.c.b16 %v1520_v25, %v1519_v23  ;;  %v1329_v50 = vsel %vm2230_vm3, %v1324_v34, %v1328_v35  ;;  %v1045_v23 = vpack.c.b16 %v1041_v7, %v1040_v17  ;;  %v1963_v25 = vld [vmem:[%s2197_s23 + $0x40] sm:$0xf] }
  0x7b   : > { %v1372_v60 = vunpack.c.l.b16 %v1329_v50 }
  0x7d   : > { %2069 = vmatmul.msk.bf16.vlgmr.msra.gmra.mxu0 %vm356_vm2, %v1525_v38  ;;  %v1999_v38 = vld [vmem:[%s2197_s23 + $0x48] sm:$0xf] }
  0x7e   : > { %1930 = vmatmul.msk.bf16.gmra.mxu1 %vm356_vm2, %v1043_v47  ;;  %v1334_v47 = vshll.u32 %v1997_v36, 16  ;;  %v1345_v52 = vshrl.u32 %v1999_v38, 16  ;;  %v1348_v53 = vshll.u32 %v1999_v38, 16  ;;  %v1507_v36 = vsel %vm2313_vm6, %v2044_v32, %v1506_v13 }
  0x7f   : > { %v1524_v33 = vunpack.c.l.b16 %v1507_v36 }
  0x80   : > { %v1336_v0 = vrot.slane %v1334_v47, 5  ;;  %v1347_v2 = vrot.slane %v1345_v52, 4  ;;  %v1350_v24 = vrot.slane %v1348_v53, 5 }
  0x82   : > { %1982 = vmatmul.msk.bf16.gmra.mxu2 %vm356_vm2, %v1956_v55  ;;  %v1371_v55 = vunpack.c.l.b16 %v1315_v39  ;;  %v1337_v10 = vor.u32 %v1336_v0, %v1333_v63  ;;  %v1351_v12 = vor.u32 %v1350_v24, %v1347_v2 }
  0x84   : > { %v1377_v6 = vpack.c.b16 %v1372_v60, %v1371_v55  ;;  %v1338_v5 = vrot.slane %v1337_v10, 4  ;;  %v1352_v19 = vrot.slane %v1351_v12, 4 }
  0x86   : > { %v1343_v29 = vsel %vm2230_vm3, %v1338_v5, %v1342_v18  ;;  %v1357_v31 = vsel %vm2230_vm3, %v1352_v19, %v1356_v21 }
  0x87   : > { %v1373_v14 = vunpack.c.l.b16 %v1343_v29  ;;  %v1374_v34 = vunpack.c.l.b16 %v1357_v31 }
  0x89   : > { %v1378_v38 = vpack.c.b16 %v1374_v34, %v1373_v14 }
  0x8a   : > { %2026 = vmatmul.msk.bf16.gmra.mxu3 %vm356_vm2, %v1376_v22  ;;  %v2035_v22 = vld [vmem:[%s2197_s23 + $0x40] sm:$0xe] }
  0x8b   : > { %v2043_v8 = vrot.slane %v2035_v22, 9 }
  0x8d   : > { %2070 = vmatmul.msk.bf16.gmra.mxu0 %vm356_vm2, %v1526_v30  ;;  %v1964_v30 = vor.u32 %v2111_v26, %v1963_v25  ;;  %v1503_v35 = vsel %vm2313_vm6, %v2043_v8, %v1502_v16 }
  0x8e   : > { %1931 = vmatmul.msk.bf16.gmra.mxu1 %vm356_vm2, %v1044_v37  ;;  %v1523_v39 = vunpack.c.l.b16 %v1503_v35  ;;  %v2646_v35 = vld [vmem:[%s2704_s2] ss:$0 sm:$0xff] }
  0x90   : > { %v1528_v41 = vpack.c.b16 %v1524_v33, %v1523_v39 }
  0x92   : > { %1983 = vmatmul.msk.bf16.gmra.mxu2 %vm356_vm2, %v1960_v43 }
  0x9a   : > { %2027 = vmatmul.msk.bf16.gmra.mxu3 %vm356_vm2, %v1377_v6 }
  0x9b   : > { %v2585_v28 = vpop.f32.mrf.mxu1 }
  0x9d   : > { %2071 = vmatmul.msk.bf16.gmra.mxu0 %vm356_vm2, %v1527_v62 }
  0x9e   : > { %1932 = vmatmul.msk.bf16.gmra.mxu1 %vm356_vm2, %v1045_v23 }
  0xa2   : > { %1984 = vmatmul.msk.bf16.gmra.mxu2 %vm356_vm2, %v1964_v30 }
  0xa3   : > { %v2598_v37 = vpop.f32.mrf.mxu1 }
  0xa5   : > { %v2600_v40 = vpop.f32.mrf.mxu2 }
  0xaa   : > { %2028 = vmatmul.msk.bf16.gmra.mxu3 %vm356_vm2, %v1378_v38  ;;  %v378_v42 = vpop.f32.mrf.mxu0 }
  0xab   : > { %v463_v44 = vpop.f32.mrf.mxu1 }
  0xac   : > { %v464_v15 = vadd.f32 %v463_v44, %v378_v42 }
  0xad   : > { %v2603_v43 = vpop.f32.mrf.mxu3  ;;  %2072 = vmatmul.msk.bf16.gmra.mxu0 %vm356_vm2, %v1528_v41  ;;  %v2606_v45 = vpop.f32.mrf.mxu2 }
  0xb2   : > { %v380_v57 = vpop.f32.mrf.mxu0 }
  0xb3   : > { %v465_v47 = vpop.f32.mrf.mxu1 }
  0xb4   : > { %v466_v21 = vadd.f32 %v465_v47, %v380_v57 }
  0xb5   : > { %v2608_v46 = vpop.f32.mrf.mxu3  ;;  %v608_v50 = vpop.f32.mrf.mxu2 }
  0xb6   : > { %v628_v62 = vadd.f32 %v608_v50, %v464_v15 }
  0xba   : > { %v941_v51 = vpop.f32.mrf.mxu0 }
  0xbb   : > { %v468_v53 = vpop.f32.mrf.mxu1 }
  0xbc   : > { %v469_v31 = vadd.f32 %v468_v53, %v2585_v28 }
  0xbd   : > { %v719_v52 = vpop.f32.mrf.mxu3  ;;  %v610_v55 = vpop.f32.mrf.mxu2 }
  0xbe   : > { %v739_v18 = vadd.f32 %v719_v52, %v628_v62  ;;  %v629_v25 = vadd.f32 %v610_v55, %v466_v21 }
  0xc0   : > { %v961_v26 = vadd.f32 %v941_v51, %v739_v18 }
  0xc2   : > { %v943_v54 = vpop.f32.mrf.mxu0 }
  0xc3   : > { %v470_v58 = vpop.f32.mrf.mxu1 }
  0xc4   : > { %v471_v57 = vadd.f32 %v470_v58, %v2598_v37 }
  0xc5   : > { %v721_v56 = vpop.f32.mrf.mxu3  ;;  %v613_v59 = vpop.f32.mrf.mxu2 }
  0xc6   : > { %v740_v8 = vadd.f32 %v721_v56, %v629_v25  ;;  %v630_v14 = vadd.f32 %v613_v59, %v469_v31 }
  0xc8   : > { %v962_v36 = vadd.f32 %v943_v54, %v740_v8 }
  0xca   : > { %v946_v60 = vpop.f32.mrf.mxu0 }
  0xcb   : > { %v2610_v63 = vpop.f32.mrf.mxu1 }
  0xcc   : > { %v474_v37 = vadd.f32 %v2610_v63, %v2600_v40 }
  0xcd   : > { %v724_v61 = vpop.f32.mrf.mxu3  ;;  %v615_v0 = vpop.f32.mrf.mxu2 }
  0xce   : > { %v741_v41 = vadd.f32 %v724_v61, %v630_v14  ;;  %v631_v52 = vadd.f32 %v615_v0, %v471_v57 }
  0xd0   : > { %v963_v55 = vadd.f32 %v946_v60, %v741_v41 }
  0xd2   : > { %v2612_v1 = vpop.f32.mrf.mxu0 }
  0xd3   : > { %v2614_v2 = vpop.f32.mrf.mxu1 }
  0xd4   : > { %v476_v40 = vadd.f32 %v2614_v2, %v2606_v45 }
  0xd5   : > { %v726_v20 = vpop.f32.mrf.mxu3  ;;  %v618_v24 = vpop.f32.mrf.mxu2 }
  0xd6   : > { %v742_v61 = vadd.f32 %v726_v20, %v631_v52  ;;  %v632_v21 = vadd.f32 %v618_v24, %v474_v37 }
  0xd8   : > { %v964_v60 = vadd.f32 %v2612_v1, %v742_v61 }
  0xda   : > { %v2616_v3 = vpop.f32.mrf.mxu0 }
  0xdb   : > { %v2620_v48 = vpop.f32.mrf.mxu1 }
  0xdc   : > { %v479_v2 = vadd.f32 %v2620_v48, %v2603_v43 }
  0xdd   : > { %v2618_v4 = vpop.f32.mrf.mxu3  ;;  %v2622_v49 = vpop.f32.mrf.mxu2 }
  0xe2   : > { %v2624_v6 = vpop.f32.mrf.mxu0 }
  0xe3   : > { %v2628_v10 = vpop.f32.mrf.mxu1 }
  0xe4   : > { %v481_v48 = vadd.f32 %v2628_v10, %v2608_v46 }
  0xe5   : > { %v2626_v9 = vpop.f32.mrf.mxu3  ;;  %v2630_v11 = vpop.f32.mrf.mxu2 }
  0xea   : > { %v2632_v12 = vpop.f32.mrf.mxu0 }
  0xeb   : > { %v1091_v7 = vpop.f32.mrf.mxu1 }
  0xec   : > { %v1111_v29 = vadd.f32 %v1091_v7, %v961_v26 }
  0xed   : > { %v2634_v17 = vpop.f32.mrf.mxu3  ;;  %v2636_v5 = vpop.f32.mrf.mxu2 }
  0xee   : > { %v635_v52 = vadd.f32 %v2636_v5, %v481_v48 }
  0xf2   : > { %v2638_v19 = vpop.f32.mrf.mxu0 }
  0xf3   : > { %v1093_v23 = vpop.f32.mrf.mxu1 }
  0xf4   : > { %v1112_v33 = vadd.f32 %v1093_v23, %v962_v36 }
  0xf5   : > { %v2640_v22 = vpop.f32.mrf.mxu3  ;;  %v1202_v27 = vpop.f32.mrf.mxu2 }
  0xf6   : > { %v1222_v16 = vadd.f32 %v1202_v27, %v1111_v29  ;;  %v743_v27 = vadd.f32 %v2618_v4, %v632_v21 }
  0xf8   : > { %v965_v31 = vadd.f32 %v2616_v3, %v743_v27 }
  0xfa   : > { %v1574_v30 = vpop.f32.mrf.mxu0 }
  0xfb   : > { %v1096_v13 = vpop.f32.mrf.mxu1 }
  0xfc   : > { %v1113_v59 = vadd.f32 %v1096_v13, %v963_v55 }
  0xfd   : > { %v1424_v32 = vpop.f32.mrf.mxu3  ;;  %v1204_v38 = vpop.f32.mrf.mxu2 }
  0xfe   : > { %v1444_v34 = vadd.f32 %v1424_v32, %v1222_v16  ;;  %v1223_v44 = vadd.f32 %v1204_v38, %v1112_v33  ;;  %v634_v33 = vadd.f32 %v2630_v11, %v479_v2 }
 0x100   : > { %v1594_v39 = vadd.f32 %v1574_v30, %v1444_v34  ;;  %v633_v30 = vadd.f32 %v2622_v49, %v476_v40 }
 0x102   : > { %v1606_v42 = vadd.f32 %v2646_v35, %v1594_v39  ;;  %v1576_v28 = vpop.f32.mrf.mxu0  ;;  %v744_v34 = vadd.f32 %v2626_v9, %v633_v30 }
 0x103   : > { %v1098_v51 = vpop.f32.mrf.mxu1 }
 0x104   : > { %v1614_v47 = vmax.f32 %v1606_v42, 0.0  ;;  %v1114_v20 = vadd.f32 %v1098_v51, %v964_v60  ;;  %v966_v41 = vadd.f32 %v2624_v6, %v744_v34 }
 0x105   : > { %v1426_v50 = vpop.f32.mrf.mxu3  ;;  %v1207_v54 = vpop.f32.mrf.mxu2 }
 0x106   : > { %1622 = vst.msk [vmem:[%s2653_s21] sm:$0xff] %vm356_vm2, %v1614_v47  ;;  %v1445_v53 = vadd.f32 %v1426_v50, %v1223_v44  ;;  %v1224_v7 = vadd.f32 %v1207_v54, %v1113_v59 }
 0x108   : > { %v1595_v56 = vadd.f32 %v1576_v28, %v1445_v53  ;;  %v745_v28 = vadd.f32 %v2634_v17, %v634_v33 }
 0x10a   : > { %v1607_v15 = vadd.f32 %v2646_v35, %v1595_v56  ;;  %v1579_v62 = vpop.f32.mrf.mxu0  ;;  %v967_v53 = vadd.f32 %v2632_v12, %v745_v28  ;;  %v746_v56 = vadd.f32 %v2640_v22, %v635_v52 }
 0x10b   : > { %v1101_v25 = vpop.f32.mrf.mxu1 }
 0x10c   : > { %v1615_v58 = vmax.f32 %v1607_v15, 0.0  ;;  %v1115_v4 = vadd.f32 %v1101_v25, %v965_v31 }
 0x10d   : > { %v1429_v18 = vpop.f32.mrf.mxu3  ;;  %v1209_v23 = vpop.f32.mrf.mxu2 }
 0x10e   : > { %1623 = vst.msk [vmem:[%s2653_s21 + $0x8] sm:$0xff] %vm356_vm2, %v1615_v58  ;;  %v1446_v0 = vadd.f32 %v1429_v18, %v1224_v7  ;;  %v1225_v8 = vadd.f32 %v1209_v23, %v1114_v20 }
 0x110   : > { %v1596_v26 = vadd.f32 %v1579_v62, %v1446_v0  ;;  %v968_v62 = vadd.f32 %v2638_v19, %v746_v56 }
 0x112   : > { %v1608_v29 = vadd.f32 %v2646_v35, %v1596_v26  ;;  %v1581_v16 = vpop.f32.mrf.mxu0 }
 0x113   : > { %v1103_v14 = vpop.f32.mrf.mxu1 }
 0x114   : > { %v1616_v63 = vmax.f32 %v1608_v29, 0.0  ;;  %v1116_v9 = vadd.f32 %v1103_v14, %v966_v41 }
 0x115   : > { %v1431_v24 = vpop.f32.mrf.mxu3  ;;  %v1212_v32 = vpop.f32.mrf.mxu2 }
 0x116   : > { %1624 = vst.msk [vmem:[%s2653_s21 + $0x10] sm:$0xff] %vm356_vm2, %v1616_v63  ;;  %v1447_v1 = vadd.f32 %v1431_v24, %v1225_v8  ;;  %v1226_v38 = vadd.f32 %v1212_v32, %v1115_v4 }
 0x118   : > { %v1597_v13 = vadd.f32 %v1581_v16, %v1447_v1 }
 0x11a   : > { %v1609_v36 = vadd.f32 %v2646_v35, %v1597_v13  ;;  %v1584_v45 = vpop.f32.mrf.mxu0 }
 0x11b   : > { %v1106_v50 = vpop.f32.mrf.mxu1 }
 0x11c   : > { %v1617_v49 = vmax.f32 %v1609_v36, 0.0  ;;  %v1117_v54 = vadd.f32 %v1106_v50, %v967_v53 }
 0x11d   : > { %v1434_v39 = vpop.f32.mrf.mxu3  ;;  %v1214_v42 = vpop.f32.mrf.mxu2 }
 0x11e   : > { %1625 = vst.msk [vmem:[%s2653_s21 + $0x18] sm:$0xff] %vm356_vm2, %v1617_v49  ;;  %v1448_v3 = vadd.f32 %v1434_v39, %v1226_v38  ;;  %v1227_v47 = vadd.f32 %v1214_v42, %v1116_v9 }
 0x120   : > { %v1598_v44 = vadd.f32 %v1584_v45, %v1448_v3 }
 0x122   : > { %v1610_v57 = vadd.f32 %v2646_v35, %v1598_v44  ;;  %v1586_v43 = vpop.f32.mrf.mxu0 }
 0x123   : > { %v1108_v10 = vpop.f32.mrf.mxu1 }
 0x124   : > { %v1618_v11 = vmax.f32 %v1610_v57, 0.0  ;;  %v1118_v58 = vadd.f32 %v1108_v10, %v968_v62 }
 0x125   : > { %v1436_v51 = vpop.f32.mrf.mxu3  ;;  %v1217_v55 = vpop.f32.mrf.mxu2 }
 0x126   : > { %1626 = vst.msk [vmem:[%s2653_s21 + $0x20] sm:$0xff] %vm356_vm2, %v1618_v11  ;;  %v1449_v6 = vadd.f32 %v1436_v51, %v1227_v47  ;;  %v1228_v61 = vadd.f32 %v1217_v55, %v1117_v54 }
 0x128   : > { %v1599_v17 = vadd.f32 %v1586_v43, %v1449_v6 }
 0x12a   : > { %v1611_v59 = vadd.f32 %v2646_v35, %v1599_v17  ;;  %v1589_v15 = vpop.f32.mrf.mxu0 }
 0x12c   : > { %v1619_v46 = vmax.f32 %v1611_v59, 0.0 }
 0x12d   : > { %v1439_v7 = vpop.f32.mrf.mxu3  ;;  %v1219_v12 = vpop.f32.mrf.mxu2 }
 0x12e   : > { %1627 = vst.msk [vmem:[%s2653_s21 + $0x28] sm:$0xff] %vm356_vm2, %v1619_v46  ;;  %v1450_v5 = vadd.f32 %v1439_v7, %v1228_v61  ;;  %v1229_v22 = vadd.f32 %v1219_v12, %v1118_v58 }
 0x130   : > { %v1600_v37 = vadd.f32 %v1589_v15, %v1450_v5 }
 0x132   : > { %v1612_v18 = vadd.f32 %v2646_v35, %v1600_v37  ;;  %v1591_v23 = vpop.f32.mrf.mxu0 }
 0x134   : > { %v1620_v21 = vmax.f32 %v1612_v18, 0.0 }
 0x135   : > { %v1441_v0 = vpop.f32.mrf.mxu3 }
 0x136   : > { %1628 = vst.msk [vmem:[%s2653_s21 + $0x30] sm:$0xff] %vm356_vm2, %v1620_v21  ;;  %v1451_v60 = vadd.f32 %v1441_v0, %v1229_v22 }
 0x138   : > { %v1601_v25 = vadd.f32 %v1591_v23, %v1451_v60 }
 0x13a   : > { %v1613_v26 = vadd.f32 %v2646_v35, %v1601_v25 }
 0x13c   : > { %v1621_v20 = vmax.f32 %v1613_v26, 0.0 }
 0x13e   : > { %1629 = vst.msk [vmem:[%s2653_s21 + $0x38] sm:$0xff] %vm356_vm2, %v1621_v20 }
 0x13f PF: > { %s13_s12 = sadd.s32 1, %s2152_s12  }
 0x140   : > { %p10_p4 = scmp.ge.s32.totalorder %s13_s12, 4  }
 0x142   :  { %12 = sbr.rel (!%p10_p4) target bundleno = 1 (0x1), region = 72 }

// kernel: custom_cnn_forward.5
= control target key start
LH: loop header
LB: loop body
LE: loop exit
PB: predicated region body
PF: predicated region fallthrough
CT: control target
= control target key end

     0   :  { %8 = vsyncpa [#allocation3], 0  ;;  %s3978_s0 = inlined_call_operand.vmem [shape: bf16[2,4096], index: 0, kind: input, shape index: {}]   ;;  %s3979_s1 = inlined_call_operand.hbm [shape: bf16[4096,128], index: 1, kind: input, shape index: {}]   ;;  %s3980_s2 = inlined_call_operand.vmem [shape: f32[1,128], index: 2, kind: input, shape index: {}]   ;;  %s3981_s3 = inlined_call_operand.hbm [shape: f32[2,128], index: 3, kind: output, shape index: {}]  }
   0x1   :  { %9 = vsyncpa [#allocation4], 0  ;;  %s16_s14 = sshll.u32 %s3979_s1, 4  ;;  %s3930_s15 = smov [#allocation2]   ;;  %s17_s14 = int_to_ptr.hbm [resolvable:$true] %s16_s14 }
   0x2   :  { %s18_s16 = sshll.u32 %s3930_s15, 4  ;;  %s3931_s17 = smov 64   ;;  %s19_s16 = int_to_ptr.vmem [resolvable:$true] %s18_s16 }
   0x3   :  { %s3932_s18 = smov 4  }
   0x4   :  { %24 = dma.hbm_to_vmem [thread:$0]  %s17_s14, 32768, %s19_s16, [#allocation3], %s3931_s17, %s3931_s17, %s3932_s18  }
   0x5   :  { %3926 = dma.done.wait [#allocation3], 32768  }
   0x6   :  { %3927 = vsyncadd [#allocation3], 4294934528  ;;  %v3624_v0 = vld [vmem:[#allocation2 + $0x38] sm:$0xff]  ;;  %v3623_v4 = vld [vmem:[#allocation2 + $0x30] sm:$0xff]  ;;  %s2583_s30 = sshll.u32 %s3981_s3, 4  ;;  %s2584_s30 = int_to_ptr.hbm [resolvable:$true] %s2583_s30 }
   0x7   :  { %v3632_v1 = vld [vmem:[#allocation2 + $0x78] sm:$0xff]  ;;  %2159 = vmatpush.bf16.msra.mxu0 %v3624_v0  ;;  %v3631_v5 = vld [vmem:[#allocation2 + $0x70] sm:$0xff]  ;;  %v3622_v8 = vld [vmem:[#allocation2 + $0x28] sm:$0xff] }
   0x8   :  { %v3640_v2 = vld [vmem:[#allocation2 + $0xb8] sm:$0xff]  ;;  %2172 = vmatpush.bf16.msra.mxu1 %v3632_v1  ;;  %v3639_v6 = vld [vmem:[#allocation2 + $0xb0] sm:$0xff]  ;;  %v3630_v9 = vld [vmem:[#allocation2 + $0x68] sm:$0xff] }
   0x9   :  { %v3648_v3 = vld [vmem:[#allocation2 + $0xf8] sm:$0xff]  ;;  %2185 = vmatpush.bf16.msra.mxu2 %v3640_v2  ;;  %v3647_v7 = vld [vmem:[#allocation2 + $0xf0] sm:$0xff]  ;;  %v3638_v10 = vld [vmem:[#allocation2 + $0xa8] sm:$0xff] }
   0xa   :  { %2198 = vmatpush.bf16.msra.mxu3 %v3648_v3  ;;  %v3646_v11 = vld [vmem:[#allocation2 + $0xe8] sm:$0xff]  ;;  %v3621_v12 = vld [vmem:[#allocation2 + $0x20] sm:$0xff]  ;;  %v3620_v16 = vld [vmem:[#allocation2 + $0x18] sm:$0xff] }
   0xb   :  { %2160 = vmatpush.bf16.msra.mxu0 %v3623_v4  ;;  %v3629_v13 = vld [vmem:[#allocation2 + $0x60] sm:$0xff]  ;;  %v3628_v17 = vld [vmem:[#allocation2 + $0x58] sm:$0xff]  ;;  %v3619_v21 = vld [vmem:[#allocation2 + $0x10] sm:$0xff] }
   0xc   :  { %2173 = vmatpush.bf16.msra.mxu1 %v3631_v5  ;;  %v3637_v14 = vld [vmem:[#allocation2 + $0xa0] sm:$0xff]  ;;  %v3636_v18 = vld [vmem:[#allocation2 + $0x98] sm:$0xff]  ;;  %v3627_v22 = vld [vmem:[#allocation2 + $0x50] sm:$0xff] }
   0xd   :  { %2186 = vmatpush.bf16.msra.mxu2 %v3639_v6  ;;  %v3645_v15 = vld [vmem:[#allocation2 + $0xe0] sm:$0xff]  ;;  %v3644_v19 = vld [vmem:[#allocation2 + $0xd8] sm:$0xff]  ;;  %v3635_v23 = vld [vmem:[#allocation2 + $0x90] sm:$0xff] }
   0xe   :  { %2199 = vmatpush.bf16.msra.mxu3 %v3647_v7  ;;  %v31_v20 = vld [vmem:[%s3978_s0] sm:$0xff]  ;;  %v3643_v24 = vld [vmem:[#allocation2 + $0xd0] sm:$0xff]  ;;  %v3618_v25 = vld [vmem:[#allocation2 + $0x8] sm:$0xff] }
   0xf   :  { %2161 = vmatpush.bf16.msra.mxu0 %v3622_v8  ;;  %552 = vst [vmem:[#allocation1] ss:$9 sm:$0xff] %v31_v20  ;;  %v3626_v26 = vld [vmem:[#allocation2 + $0x48] sm:$0xff]  ;;  %v3617_v29 = vld [vmem:[#allocation2] sm:$0xff]  ;;  %v3656_v33 = vld [vmem:[#allocation2 + $0x138] sm:$0xff] }
  0x10   :  { %2174 = vmatpush.bf16.msra.mxu1 %v3630_v9  ;;  %v3634_v27 = vld [vmem:[#allocation2 + $0x88] sm:$0xff]  ;;  %v3625_v30 = vld [vmem:[#allocation2 + $0x40] sm:$0xff]  ;;  %v3664_v34 = vld [vmem:[#allocation2 + $0x178] sm:$0xff] }
  0x11   :  { %2187 = vmatpush.bf16.msra.mxu2 %v3638_v10  ;;  %v3642_v28 = vld [vmem:[#allocation2 + $0xc8] sm:$0xff]  ;;  %v3633_v31 = vld [vmem:[#allocation2 + $0x80] sm:$0xff]  ;;  %v3672_v35 = vld [vmem:[#allocation2 + $0x1b8] sm:$0xff] }
  0x12   :  { %2200 = vmatpush.bf16.msra.mxu3 %v3646_v11  ;;  %v3641_v32 = vld [vmem:[#allocation2 + $0xc0] sm:$0xff]  ;;  %v3680_v36 = vld [vmem:[#allocation2 + $0x1f8] sm:$0xff]  ;;  %v3655_v37 = vld [vmem:[#allocation2 + $0x130] sm:$0xff] }
  0x13   :  { %2162 = vmatpush.bf16.msra.mxu0 %v3621_v12  ;;  %v3663_v40 = vld [vmem:[#allocation2 + $0x170] sm:$0xff]  ;;  %v3654_v45 = vld [vmem:[#allocation2 + $0x128] sm:$0xff]  ;;  %v32_v52 = vld [vmem:[%s3978_s0 + $0x8] sm:$0xff] }
  0x14   :  { %2175 = vmatpush.bf16.msra.mxu1 %v3629_v13  ;;  %v3671_v43 = vld [vmem:[#allocation2 + $0x1b0] sm:$0xff]  ;;  %v3662_v46 = vld [vmem:[#allocation2 + $0x168] sm:$0xff]  ;;  %v3653_v54 = vld [vmem:[#allocation2 + $0x120] sm:$0xff] }
  0x15   :  { %2188 = vmatpush.bf16.msra.mxu2 %v3637_v14  ;;  %v3679_v44 = vld [vmem:[#allocation2 + $0x1f0] sm:$0xff]  ;;  %v3670_v47 = vld [vmem:[#allocation2 + $0x1a8] sm:$0xff]  ;;  %v3661_v55 = vld [vmem:[#allocation2 + $0x160] sm:$0xff] }
  0x16   :  { %2201 = vmatpush.bf16.msra.mxu3 %v3645_v15  ;;  %v555_v38 = vld [vmem:[#allocation1 + $0x12] sm:$0xff]  ;;  %v553_v39 = vld [vmem:[#allocation1] sm:$0xff]  ;;  %v554_v42 = vld [vmem:[#allocation1 + $0x9] sm:$0xff] }
  0x17   :  { %2163 = vmatpush.bf16.msra.mxu0 %v3620_v16  ;;  %v556_v41 = vld [vmem:[#allocation1 + $0x1b] sm:$0xff]  ;;  %v3678_v48 = vld [vmem:[#allocation2 + $0x1e8] sm:$0xff]  ;;  %v557_v50 = vld [vmem:[#allocation1 + $0x24] sm:$0xff] }
  0x18   :  { %2176 = vmatpush.bf16.msra.mxu1 %v3628_v17  ;;  %v559_v49 = vld [vmem:[#allocation1 + $0x36] sm:$0xff]  ;;  %v560_v51 = vld [vmem:[#allocation1 + $0x3f] sm:$0xff]  ;;  %v558_v53 = vld [vmem:[#allocation1 + $0x2d] sm:$0xff] }
  0x19   :  { %2189 = vmatpush.bf16.msra.mxu2 %v3636_v18  ;;  %562 = vst [vmem:[#allocation1] ss:$9 sm:$0xff] %v32_v52  ;;  %v3669_v56 = vld [vmem:[#allocation2 + $0x1a0] sm:$0xff]  ;;  %v3652_v58 = vld [vmem:[#allocation2 + $0x118] sm:$0xff]  ;;  %v3651_v62 = vld [vmem:[#allocation2 + $0x110] sm:$0xff] }
  0x1a   :  { %2202 = vmatpush.bf16.msra.mxu3 %v3644_v19  ;;  %v3677_v57 = vld [vmem:[#allocation2 + $0x1e0] sm:$0xff]  ;;  %v3660_v59 = vld [vmem:[#allocation2 + $0x158] sm:$0xff]  ;;  %v3659_v63 = vld [vmem:[#allocation2 + $0x150] sm:$0xff] }
  0x1b   :  { %2164 = vmatpush.bf16.msra.mxu0 %v3619_v21  ;;  %v3668_v60 = vld [vmem:[#allocation2 + $0x198] sm:$0xff]  ;;  %v3667_v0 = vld [vmem:[#allocation2 + $0x190] sm:$0xff]  ;;  %v3650_v2 = vld [vmem:[#allocation2 + $0x108] sm:$0xff] }
  0x1c   :  { %2177 = vmatpush.bf16.msra.mxu1 %v3627_v22  ;;  %v3676_v61 = vld [vmem:[#allocation2 + $0x1d8] sm:$0xff]  ;;  %v3675_v1 = vld [vmem:[#allocation2 + $0x1d0] sm:$0xff]  ;;  %v3658_v3 = vld [vmem:[#allocation2 + $0x148] sm:$0xff] }
  0x1d   :  { %2190 = vmatpush.bf16.msra.mxu2 %v3635_v23  ;;  %v3666_v4 = vld [vmem:[#allocation2 + $0x188] sm:$0xff]  ;;  %v3649_v6 = vld [vmem:[#allocation2 + $0x100] sm:$0xff]  ;;  %v3688_v10 = vld [vmem:[#allocation2 + $0x238] sm:$0xff] }
  0x1e   :  { %2203 = vmatpush.bf16.msra.mxu3 %v3643_v24  ;;  %v3674_v5 = vld [vmem:[#allocation2 + $0x1c8] sm:$0xff]  ;;  %v3657_v7 = vld [vmem:[#allocation2 + $0x140] sm:$0xff]  ;;  %v3696_v11 = vld [vmem:[#allocation2 + $0x278] sm:$0xff] }
  0x1f   :  { %2165 = vmatpush.bf16.msra.mxu0 %v3618_v25  ;;  %v3665_v8 = vld [vmem:[#allocation2 + $0x180] sm:$0xff]  ;;  %v3704_v12 = vld [vmem:[#allocation2 + $0x2b8] sm:$0xff]  ;;  %v3687_v14 = vld [vmem:[#allocation2 + $0x230] sm:$0xff] }
  0x20   :  { %2178 = vmatpush.bf16.msra.mxu1 %v3626_v26  ;;  %v3673_v9 = vld [vmem:[#allocation2 + $0x1c0] sm:$0xff]  ;;  %v3712_v13 = vld [vmem:[#allocation2 + $0x2f8] sm:$0xff]  ;;  %v3695_v15 = vld [vmem:[#allocation2 + $0x270] sm:$0xff] }
  0x21   :  { %2191 = vmatpush.bf16.msra.mxu2 %v3634_v27  ;;  %v3703_v16 = vld [vmem:[#allocation2 + $0x2b0] sm:$0xff]  ;;  %v3686_v18 = vld [vmem:[#allocation2 + $0x228] sm:$0xff]  ;;  %v3685_v22 = vld [vmem:[#allocation2 + $0x220] sm:$0xff] }
  0x22   :  { %2204 = vmatpush.bf16.msra.mxu3 %v3642_v28  ;;  %v3711_v17 = vld [vmem:[#allocation2 + $0x2f0] sm:$0xff]  ;;  %v3694_v19 = vld [vmem:[#allocation2 + $0x268] sm:$0xff]  ;;  %v3693_v23 = vld [vmem:[#allocation2 + $0x260] sm:$0xff] }
  0x23   :  { %2166 = vmatpush.bf16.msra.mxu0 %v3617_v29  ;;  %v3702_v20 = vld [vmem:[#allocation2 + $0x2a8] sm:$0xff]  ;;  %v3701_v24 = vld [vmem:[#allocation2 + $0x2a0] sm:$0xff]  ;;  %v3684_v26 = vld [vmem:[#allocation2 + $0x218] sm:$0xff] }
  0x24   :  { %2179 = vmatpush.bf16.msra.mxu1 %v3625_v30  ;;  %v3710_v21 = vld [vmem:[#allocation2 + $0x2e8] sm:$0xff]  ;;  %v3709_v25 = vld [vmem:[#allocation2 + $0x2e0] sm:$0xff]  ;;  %v3692_v27 = vld [vmem:[#allocation2 + $0x258] sm:$0xff] }
  0x25   :  { %2192 = vmatpush.bf16.msra.mxu2 %v3633_v31  ;;  %v3700_v28 = vld [vmem:[#allocation2 + $0x298] sm:$0xff]  ;;  %v3683_v30 = vld [vmem:[#allocation2 + $0x210] sm:$0xff] }
  0x26   :  { %2205 = vmatpush.bf16.msra.mxu3 %v3641_v32  ;;  %2167 = vmatmul.bf16.vlgmr.msra.gmra.mxu0 %v553_v39  ;;  %v3708_v29 = vld [vmem:[#allocation2 + $0x2d8] sm:$0xff]  ;;  %v3691_v31 = vld [vmem:[#allocation2 + $0x250] sm:$0xff]  ;;  %v3689_v39 = vld [vmem:[#allocation2 + $0x240] sm:$0xff] }
  0x27   :  { %2211 = vmatpush.bf16.msrb.mxu0 %v3656_v33  ;;  %2180 = vmatmul.bf16.vlgmr.msra.gmra.mxu1 %v554_v42  ;;  %v3699_v32 = vld [vmem:[#allocation2 + $0x290] sm:$0xff]  ;;  %v3720_v42 = vld [vmem:[#allocation2 + $0x338] sm:$0xff] }
  0x28   :  { %2224 = vmatpush.bf16.msrb.mxu1 %v3664_v34  ;;  %2193 = vmatmul.bf16.vlgmr.msra.gmra.mxu2 %v555_v38  ;;  %v3707_v33 = vld [vmem:[#allocation2 + $0x2d0] sm:$0xff]  ;;  %v3682_v34 = vld [vmem:[#allocation2 + $0x208] sm:$0xff]  ;;  %v3681_v38 = vld [vmem:[#allocation2 + $0x200] sm:$0xff] }
  0x29   :  { %2237 = vmatpush.bf16.msrb.mxu2 %v3672_v35  ;;  %2206 = vmatmul.bf16.vlgmr.msra.gmra.mxu3 %v556_v41  ;;  %v3690_v35 = vld [vmem:[#allocation2 + $0x248] sm:$0xff]  ;;  %v3705_v41 = vld [vmem:[#allocation2 + $0x2c0] sm:$0xff]  ;;  %v3735_v52 = vld [vmem:[#allocation2 + $0x3b0] sm:$0xff] }
  0x2a   :  { %2250 = vmatpush.bf16.msrb.mxu3 %v3680_v36  ;;  %v3698_v36 = vld [vmem:[#allocation2 + $0x288] sm:$0xff] }
  0x2b   :  { %2212 = vmatpush.bf16.msrb.mxu0 %v3655_v37  ;;  %v3706_v37 = vld [vmem:[#allocation2 + $0x2c8] sm:$0xff] }
  0x2c   :  { %2225 = vmatpush.bf16.msrb.mxu1 %v3663_v40  ;;  %v3697_v40 = vld [vmem:[#allocation2 + $0x280] sm:$0xff] }
  0x2d   :  { %2238 = vmatpush.bf16.msrb.mxu2 %v3671_v43  ;;  %v3728_v43 = vld [vmem:[#allocation2 + $0x378] sm:$0xff] }
  0x2e   :  { %2251 = vmatpush.bf16.msrb.mxu3 %v3679_v44  ;;  %v3736_v44 = vld [vmem:[#allocation2 + $0x3b8] sm:$0xff] }
  0x2f   :  { %2213 = vmatpush.bf16.msrb.mxu0 %v3654_v45  ;;  %v3744_v45 = vld [vmem:[#allocation2 + $0x3f8] sm:$0xff] }
  0x30   :  { %2226 = vmatpush.bf16.msrb.mxu1 %v3662_v46  ;;  %v563_v46 = vld [vmem:[#allocation1] sm:$0xff] }
  0x31   :  { %2239 = vmatpush.bf16.msrb.mxu2 %v3670_v47  ;;  %v565_v47 = vld [vmem:[#allocation1 + $0x12] sm:$0xff] }
  0x32   :  { %2252 = vmatpush.bf16.msrb.mxu3 %v3678_v48  ;;  %v564_v48 = vld [vmem:[#allocation1 + $0x9] sm:$0xff] }
  0x33   :  { %2214 = vmatpush.bf16.msrb.mxu0 %v3653_v54  ;;  %v3718_v54 = vld [vmem:[#allocation2 + $0x328] sm:$0xff] }
  0x34   :  { %2227 = vmatpush.bf16.msrb.mxu1 %v3661_v55  ;;  %v3726_v55 = vld [vmem:[#allocation2 + $0x368] sm:$0xff] }
  0x35   :  { %2240 = vmatpush.bf16.msrb.mxu2 %v3669_v56  ;;  %v3734_v56 = vld [vmem:[#allocation2 + $0x3a8] sm:$0xff] }
  0x36   :  { %2253 = vmatpush.bf16.msrb.mxu3 %v3677_v57  ;;  %v3742_v57 = vld [vmem:[#allocation2 + $0x3e8] sm:$0xff] }
  0x37   :  { %2215 = vmatpush.bf16.msrb.mxu0 %v3652_v58  ;;  %v3717_v58 = vld [vmem:[#allocation2 + $0x320] sm:$0xff] }
  0x38   :  { %2228 = vmatpush.bf16.msrb.mxu1 %v3660_v59  ;;  %v3725_v59 = vld [vmem:[#allocation2 + $0x360] sm:$0xff] }
  0x39   :  { %2241 = vmatpush.bf16.msrb.mxu2 %v3668_v60  ;;  %v3733_v60 = vld [vmem:[#allocation2 + $0x3a0] sm:$0xff] }
  0x3a   :  { %2254 = vmatpush.bf16.msrb.mxu3 %v3676_v61  ;;  %v3741_v61 = vld [vmem:[#allocation2 + $0x3e0] sm:$0xff] }
  0x3b   :  { %2216 = vmatpush.bf16.msrb.mxu0 %v3651_v62  ;;  %v3716_v62 = vld [vmem:[#allocation2 + $0x318] sm:$0xff] }
  0x3c   :  { %2229 = vmatpush.bf16.msrb.mxu1 %v3659_v63  ;;  %v3724_v63 = vld [vmem:[#allocation2 + $0x358] sm:$0xff] }
  0x3d   :  { %2242 = vmatpush.bf16.msrb.mxu2 %v3667_v0  ;;  %v3732_v0 = vld [vmem:[#allocation2 + $0x398] sm:$0xff] }
  0x3e   :  { %2255 = vmatpush.bf16.msrb.mxu3 %v3675_v1  ;;  %v3740_v1 = vld [vmem:[#allocation2 + $0x3d8] sm:$0xff] }
  0x3f   :  { %2217 = vmatpush.bf16.msrb.mxu0 %v3650_v2  ;;  %v3715_v2 = vld [vmem:[#allocation2 + $0x310] sm:$0xff] }
  0x40   :  { %2230 = vmatpush.bf16.msrb.mxu1 %v3658_v3  ;;  %v3723_v3 = vld [vmem:[#allocation2 + $0x350] sm:$0xff] }
  0x41   :  { %2243 = vmatpush.bf16.msrb.mxu2 %v3666_v4  ;;  %v3731_v4 = vld [vmem:[#allocation2 + $0x390] sm:$0xff] }
  0x42   :  { %2256 = vmatpush.bf16.msrb.mxu3 %v3674_v5  ;;  %v3739_v5 = vld [vmem:[#allocation2 + $0x3d0] sm:$0xff] }
  0x43   :  { %2218 = vmatpush.bf16.msrb.mxu0 %v3649_v6  ;;  %v3714_v6 = vld [vmem:[#allocation2 + $0x308] sm:$0xff] }
  0x44   :  { %2231 = vmatpush.bf16.msrb.mxu1 %v3657_v7  ;;  %v3722_v7 = vld [vmem:[#allocation2 + $0x348] sm:$0xff] }
  0x45   :  { %2244 = vmatpush.bf16.msrb.mxu2 %v3665_v8  ;;  %v3730_v8 = vld [vmem:[#allocation2 + $0x388] sm:$0xff] }
  0x46   :  { %2257 = vmatpush.bf16.msrb.mxu3 %v3673_v9  ;;  %2219 = vmatmul.bf16.vlgmr.msrb.gmra.mxu0 %v557_v50  ;;  %v3719_v50 = vld [vmem:[#allocation2 + $0x330] sm:$0xff]  ;;  %v3738_v9 = vld [vmem:[#allocation2 + $0x3c8] sm:$0xff] }
  0x47   :  { %2263 = vmatpush.bf16.msra.mxu0 %v3688_v10  ;;  %2232 = vmatmul.bf16.vlgmr.msrb.gmra.mxu1 %v558_v53  ;;  %v3743_v53 = vld [vmem:[#allocation2 + $0x3f0] sm:$0xff]  ;;  %v567_v10 = vld [vmem:[#allocation1 + $0x24] sm:$0xff] }
  0x48   :  { %2276 = vmatpush.bf16.msra.mxu1 %v3696_v11  ;;  %2245 = vmatmul.bf16.vlgmr.msrb.gmra.mxu2 %v559_v49  ;;  %v566_v49 = vld [vmem:[#allocation1 + $0x1b] sm:$0xff] }
  0x49   :  { %2289 = vmatpush.bf16.msra.mxu2 %v3704_v12  ;;  %2258 = vmatmul.bf16.vlgmr.msrb.gmra.mxu3 %v560_v51  ;;  %v3727_v51 = vld [vmem:[#allocation2 + $0x370] sm:$0xff]  ;;  %v568_v12 = vld [vmem:[#allocation1 + $0x2d] sm:$0xff] }
  0x4a   :  { %2302 = vmatpush.bf16.msra.mxu3 %v3712_v13  ;;  %v569_v11 = vld [vmem:[#allocation1 + $0x36] sm:$0xff]  ;;  %v570_v13 = vld [vmem:[#allocation1 + $0x3f] sm:$0xff] }
  0x4b   :  { %2264 = vmatpush.bf16.msra.mxu0 %v3687_v14  ;;  %v33_v14 = vld [vmem:[%s3978_s0 + $0x10] sm:$0xff] }
  0x4c   :  { %2277 = vmatpush.bf16.msra.mxu1 %v3695_v15  ;;  %572 = vst [vmem:[#allocation1] ss:$9 sm:$0xff] %v33_v14  ;;  %v3713_v15 = vld [vmem:[#allocation2 + $0x300] sm:$0xff]  ;;  %v3796_v14 = vld [vmem:[#allocation2 + $0x598] sm:$0xff] }
  0x4d   :  { %2290 = vmatpush.bf16.msra.mxu2 %v3703_v16  ;;  %v3721_v16 = vld [vmem:[#allocation2 + $0x340] sm:$0xff] }
  0x4e   :  { %2303 = vmatpush.bf16.msra.mxu3 %v3711_v17  ;;  %v3729_v17 = vld [vmem:[#allocation2 + $0x380] sm:$0xff] }
  0x4f   :  { %2265 = vmatpush.bf16.msra.mxu0 %v3686_v18  ;;  %v3737_v18 = vld [vmem:[#allocation2 + $0x3c0] sm:$0xff] }
  0x50   :  { %2278 = vmatpush.bf16.msra.mxu1 %v3694_v19  ;;  %v3752_v19 = vld [vmem:[#allocation2 + $0x438] sm:$0xff] }
  0x51   :  { %2291 = vmatpush.bf16.msra.mxu2 %v3702_v20  ;;  %v3760_v20 = vld [vmem:[#allocation2 + $0x478] sm:$0xff] }
  0x52   :  { %2304 = vmatpush.bf16.msra.mxu3 %v3710_v21  ;;  %v3768_v21 = vld [vmem:[#allocation2 + $0x4b8] sm:$0xff] }
  0x53   :  { %2266 = vmatpush.bf16.msra.mxu0 %v3685_v22  ;;  %v3776_v22 = vld [vmem:[#allocation2 + $0x4f8] sm:$0xff] }
  0x54   :  { %2279 = vmatpush.bf16.msra.mxu1 %v3693_v23  ;;  %v3751_v23 = vld [vmem:[#allocation2 + $0x430] sm:$0xff] }
  0x55   :  { %2292 = vmatpush.bf16.msra.mxu2 %v3701_v24  ;;  %v3759_v24 = vld [vmem:[#allocation2 + $0x470] sm:$0xff] }
  0x56   :  { %2305 = vmatpush.bf16.msra.mxu3 %v3709_v25  ;;  %v3767_v25 = vld [vmem:[#allocation2 + $0x4b0] sm:$0xff] }
  0x57   :  { %2267 = vmatpush.bf16.msra.mxu0 %v3684_v26  ;;  %v3775_v26 = vld [vmem:[#allocation2 + $0x4f0] sm:$0xff] }
  0x58   :  { %2280 = vmatpush.bf16.msra.mxu1 %v3692_v27  ;;  %v3750_v27 = vld [vmem:[#allocation2 + $0x428] sm:$0xff] }
  0x59   :  { %2293 = vmatpush.bf16.msra.mxu2 %v3700_v28  ;;  %v3758_v28 = vld [vmem:[#allocation2 + $0x468] sm:$0xff] }
  0x5a   :  { %2306 = vmatpush.bf16.msra.mxu3 %v3708_v29  ;;  %v3766_v29 = vld [vmem:[#allocation2 + $0x4a8] sm:$0xff] }
  0x5b   :  { %2268 = vmatpush.bf16.msra.mxu0 %v3683_v30  ;;  %v3774_v30 = vld [vmem:[#allocation2 + $0x4e8] sm:$0xff] }
  0x5c   :  { %2281 = vmatpush.bf16.msra.mxu1 %v3691_v31  ;;  %v3749_v31 = vld [vmem:[#allocation2 + $0x420] sm:$0xff] }
  0x5d   :  { %2294 = vmatpush.bf16.msra.mxu2 %v3699_v32  ;;  %v3757_v32 = vld [vmem:[#allocation2 + $0x460] sm:$0xff] }
  0x5e   :  { %2307 = vmatpush.bf16.msra.mxu3 %v3707_v33  ;;  %v3765_v33 = vld [vmem:[#allocation2 + $0x4a0] sm:$0xff] }
  0x5f   :  { %2269 = vmatpush.bf16.msra.mxu0 %v3682_v34  ;;  %v3773_v34 = vld [vmem:[#allocation2 + $0x4e0] sm:$0xff] }
  0x60   :  { %2282 = vmatpush.bf16.msra.mxu1 %v3690_v35  ;;  %v3748_v35 = vld [vmem:[#allocation2 + $0x418] sm:$0xff] }
  0x61   :  { %2295 = vmatpush.bf16.msra.mxu2 %v3698_v36  ;;  %v3756_v36 = vld [vmem:[#allocation2 + $0x458] sm:$0xff] }
  0x62   :  { %2308 = vmatpush.bf16.msra.mxu3 %v3706_v37  ;;  %v3764_v37 = vld [vmem:[#allocation2 + $0x498] sm:$0xff] }
  0x63   :  { %2270 = vmatpush.bf16.msra.mxu0 %v3681_v38  ;;  %v3772_v38 = vld [vmem:[#allocation2 + $0x4d8] sm:$0xff] }
  0x64   :  { %2283 = vmatpush.bf16.msra.mxu1 %v3689_v39  ;;  %v3747_v39 = vld [vmem:[#allocation2 + $0x410] sm:$0xff] }
  0x65   :  { %2296 = vmatpush.bf16.msra.mxu2 %v3697_v40  ;;  %v3755_v40 = vld [vmem:[#allocation2 + $0x450] sm:$0xff] }
  0x66   :  { %2309 = vmatpush.bf16.msra.mxu3 %v3705_v41  ;;  %2271 = vmatmul.bf16.vlgmr.msra.gmra.mxu0 %v563_v46  ;;  %v3763_v41 = vld [vmem:[#allocation2 + $0x490] sm:$0xff]  ;;  %v3770_v46 = vld [vmem:[#allocation2 + $0x4c8] sm:$0xff] }
  0x67   :  { %2315 = vmatpush.bf16.msrb.mxu0 %v3720_v42  ;;  %2284 = vmatmul.bf16.vlgmr.msra.gmra.mxu1 %v564_v48  ;;  %v3771_v42 = vld [vmem:[#allocation2 + $0x4d0] sm:$0xff]  ;;  %v3753_v48 = vld [vmem:[#allocation2 + $0x440] sm:$0xff] }
  0x68   :  { %2328 = vmatpush.bf16.msrb.mxu1 %v3728_v43  ;;  %2297 = vmatmul.bf16.vlgmr.msra.gmra.mxu2 %v565_v47  ;;  %v3746_v43 = vld [vmem:[#allocation2 + $0x408] sm:$0xff]  ;;  %v3745_v47 = vld [vmem:[#allocation2 + $0x400] sm:$0xff] }
  0x69   :  { %2341 = vmatpush.bf16.msrb.mxu2 %v3736_v44  ;;  %2310 = vmatmul.bf16.vlgmr.msra.gmra.mxu3 %v566_v49  ;;  %v3754_v44 = vld [vmem:[#allocation2 + $0x448] sm:$0xff]  ;;  %v3761_v49 = vld [vmem:[#allocation2 + $0x480] sm:$0xff] }
  0x6a   :  { %2354 = vmatpush.bf16.msrb.mxu3 %v3744_v45  ;;  %v3762_v45 = vld [vmem:[#allocation2 + $0x488] sm:$0xff] }
  0x6b   :  { %2316 = vmatpush.bf16.msrb.mxu0 %v3719_v50  ;;  %v3769_v50 = vld [vmem:[#allocation2 + $0x4c0] sm:$0xff] }
  0x6c   :  { %2329 = vmatpush.bf16.msrb.mxu1 %v3727_v51  ;;  %v3784_v51 = vld [vmem:[#allocation2 + $0x538] sm:$0xff] }
  0x6d   :  { %2342 = vmatpush.bf16.msrb.mxu2 %v3735_v52  ;;  %v3792_v52 = vld [vmem:[#allocation2 + $0x578] sm:$0xff] }
  0x6e   :  { %2355 = vmatpush.bf16.msrb.mxu3 %v3743_v53  ;;  %v3800_v53 = vld [vmem:[#allocation2 + $0x5b8] sm:$0xff] }
  0x6f   :  { %2317 = vmatpush.bf16.msrb.mxu0 %v3718_v54  ;;  %v3808_v54 = vld [vmem:[#allocation2 + $0x5f8] sm:$0xff] }
  0x70   :  { %2330 = vmatpush.bf16.msrb.mxu1 %v3726_v55  ;;  %v573_v55 = vld [vmem:[#allocation1] sm:$0xff] }
  0x71   :  { %2343 = vmatpush.bf16.msrb.mxu2 %v3734_v56  ;;  %v575_v56 = vld [vmem:[#allocation1 + $0x12] sm:$0xff] }
  0x72   :  { %2356 = vmatpush.bf16.msrb.mxu3 %v3742_v57  ;;  %v574_v57 = vld [vmem:[#allocation1 + $0x9] sm:$0xff] }
  0x73   :  { %2318 = vmatpush.bf16.msrb.mxu0 %v3717_v58  ;;  %v576_v58 = vld [vmem:[#allocation1 + $0x1b] sm:$0xff] }
  0x74   :  { %2331 = vmatpush.bf16.msrb.mxu1 %v3725_v59  ;;  %v3783_v59 = vld [vmem:[#allocation2 + $0x530] sm:$0xff] }
  0x75   :  { %2344 = vmatpush.bf16.msrb.mxu2 %v3733_v60  ;;  %v3791_v60 = vld [vmem:[#allocation2 + $0x570] sm:$0xff] }
  0x76   :  { %2357 = vmatpush.bf16.msrb.mxu3 %v3741_v61  ;;  %v3799_v61 = vld [vmem:[#allocation2 + $0x5b0] sm:$0xff] }
  0x77   :  { %2319 = vmatpush.bf16.msrb.mxu0 %v3716_v62  ;;  %v3807_v62 = vld [vmem:[#allocation2 + $0x5f0] sm:$0xff] }
  0x78   :  { %2332 = vmatpush.bf16.msrb.mxu1 %v3724_v63  ;;  %v3782_v63 = vld [vmem:[#allocation2 + $0x528] sm:$0xff] }
  0x79   :  { %2345 = vmatpush.bf16.msrb.mxu2 %v3732_v0  ;;  %v3790_v0 = vld [vmem:[#allocation2 + $0x568] sm:$0xff] }
  0x7a   :  { %2358 = vmatpush.bf16.msrb.mxu3 %v3740_v1  ;;  %v3877_v1 = vld [vmem:[%s3980_s2] ss:$0 sm:$0xff] }
  0x7b   :  { %2320 = vmatpush.bf16.msrb.mxu0 %v3715_v2  ;;  %v3798_v2 = vld [vmem:[#allocation2 + $0x5a8] sm:$0xff] }
  0x7c   :  { %2333 = vmatpush.bf16.msrb.mxu1 %v3723_v3  ;;  %v3806_v3 = vld [vmem:[#allocation2 + $0x5e8] sm:$0xff] }
  0x7d   :  { %2346 = vmatpush.bf16.msrb.mxu2 %v3731_v4 }
  0x7e   :  { %2359 = vmatpush.bf16.msrb.mxu3 %v3739_v5  ;;  %v3781_v5 = vld [vmem:[#allocation2 + $0x520] sm:$0xff] }
  0x7f   :  { %2321 = vmatpush.bf16.msrb.mxu0 %v3714_v6  ;;  %v3789_v6 = vld [vmem:[#allocation2 + $0x560] sm:$0xff] }
  0x80   :  { %2334 = vmatpush.bf16.msrb.mxu1 %v3722_v7 }
  0x81   :  { %2347 = vmatpush.bf16.msrb.mxu2 %v3730_v8 }
  0x82   :  { %2360 = vmatpush.bf16.msrb.mxu3 %v3738_v9  ;;  %v3797_v9 = vld [vmem:[#allocation2 + $0x5a0] sm:$0xff] }
  0x83   :  { %2322 = vmatpush.bf16.msrb.mxu0 %v3713_v15  ;;  %v3804_v15 = vld [vmem:[#allocation2 + $0x5d8] sm:$0xff] }
  0x84   :  { %2335 = vmatpush.bf16.msrb.mxu1 %v3721_v16 }
  0x85   :  { %2348 = vmatpush.bf16.msrb.mxu2 %v3729_v17 }
  0x86   :  { %2361 = vmatpush.bf16.msrb.mxu3 %v3737_v18  ;;  %2323 = vmatmul.bf16.vlgmr.msrb.gmra.mxu0 %v567_v10  ;;  %v3805_v10 = vld [vmem:[#allocation2 + $0x5e0] sm:$0xff] }
  0x87   :  { %2367 = vmatpush.bf16.msra.mxu0 %v3752_v19  ;;  %2336 = vmatmul.bf16.vlgmr.msrb.gmra.mxu1 %v568_v12  ;;  %v3780_v12 = vld [vmem:[#allocation2 + $0x518] sm:$0xff] }
  0x88   :  { %2380 = vmatpush.bf16.msra.mxu1 %v3760_v20  ;;  %2349 = vmatmul.bf16.vlgmr.msrb.gmra.mxu2 %v569_v11  ;;  %v3779_v20 = vld [vmem:[#allocation2 + $0x510] sm:$0xff] }
  0x89   :  { %2393 = vmatpush.bf16.msra.mxu2 %v3768_v21  ;;  %2362 = vmatmul.bf16.vlgmr.msrb.gmra.mxu3 %v570_v13  ;;  %v3788_v13 = vld [vmem:[#allocation2 + $0x558] sm:$0xff]  ;;  %v3787_v21 = vld [vmem:[#allocation2 + $0x550] sm:$0xff] }
  0x8a   :  { %2406 = vmatpush.bf16.msra.mxu3 %v3776_v22 }
  0x8b   :  { %2368 = vmatpush.bf16.msra.mxu0 %v3751_v23 }
  0x8c   :  { %2381 = vmatpush.bf16.msra.mxu1 %v3759_v24  ;;  %v3795_v24 = vld [vmem:[#allocation2 + $0x590] sm:$0xff] }
  0x8d   :  { %2394 = vmatpush.bf16.msra.mxu2 %v3767_v25  ;;  %v3803_v25 = vld [vmem:[#allocation2 + $0x5d0] sm:$0xff] }
  0x8e   :  { %2407 = vmatpush.bf16.msra.mxu3 %v3775_v26  ;;  %v3778_v26 = vld [vmem:[#allocation2 + $0x508] sm:$0xff] }
  0x8f   :  { %2369 = vmatpush.bf16.msra.mxu0 %v3750_v27  ;;  %v3786_v27 = vld [vmem:[#allocation2 + $0x548] sm:$0xff] }
  0x90   :  { %2382 = vmatpush.bf16.msra.mxu1 %v3758_v28  ;;  %v3794_v28 = vld [vmem:[#allocation2 + $0x588] sm:$0xff] }
  0x91   :  { %2395 = vmatpush.bf16.msra.mxu2 %v3766_v29  ;;  %v3802_v29 = vld [vmem:[#allocation2 + $0x5c8] sm:$0xff] }
  0x92   :  { %2408 = vmatpush.bf16.msra.mxu3 %v3774_v30  ;;  %v577_v30 = vld [vmem:[#allocation1 + $0x24] sm:$0xff] }
  0x93   :  { %2370 = vmatpush.bf16.msra.mxu0 %v3749_v31  ;;  %v579_v31 = vld [vmem:[#allocation1 + $0x36] sm:$0xff] }
  0x94   :  { %2383 = vmatpush.bf16.msra.mxu1 %v3757_v32 }
  0x95   :  { %2396 = vmatpush.bf16.msra.mxu2 %v3765_v33  ;;  %v578_v33 = vld [vmem:[#allocation1 + $0x2d] sm:$0xff] }
  0x96   :  { %2409 = vmatpush.bf16.msra.mxu3 %v3773_v34  ;;  %v580_v34 = vld [vmem:[#allocation1 + $0x3f] sm:$0xff] }
  0x97   :  { %2371 = vmatpush.bf16.msra.mxu0 %v3748_v35 }
  0x98   :  { %2384 = vmatpush.bf16.msra.mxu1 %v3756_v36  ;;  %v34_v36 = vld [vmem:[%s3978_s0 + $0x18] sm:$0xff]  ;;  %s3933_s0 = smov [#allocation5]  }
  0x99   :  { %2397 = vmatpush.bf16.msra.mxu2 %v3764_v37  ;;  %582 = vst [vmem:[#allocation1] ss:$9 sm:$0xff] %v34_v36  ;;  %v3777_v37 = vld [vmem:[#allocation2 + $0x500] sm:$0xff]  ;;  %v3870_v36 = vld [vmem:[#allocation2 + $0x7e8] sm:$0xff]  ;;  %s2581_s27 = sshll.u32 %s3933_s0, 4  ;;  %s2582_s27 = int_to_ptr.vmem [resolvable:$true] %s2581_s27 }
  0x9a   :  { %2410 = vmatpush.bf16.msra.mxu3 %v3772_v38  ;;  %v3785_v38 = vld [vmem:[#allocation2 + $0x540] sm:$0xff] }
  0x9b   :  { %2372 = vmatpush.bf16.msra.mxu0 %v3747_v39  ;;  %v3793_v39 = vld [vmem:[#allocation2 + $0x580] sm:$0xff] }
  0x9c   :  { %2385 = vmatpush.bf16.msra.mxu1 %v3755_v40  ;;  %v3801_v40 = vld [vmem:[#allocation2 + $0x5c0] sm:$0xff] }
  0x9d   :  { %2398 = vmatpush.bf16.msra.mxu2 %v3763_v41  ;;  %v3816_v41 = vld [vmem:[#allocation2 + $0x638] sm:$0xff] }
  0x9e   :  { %2411 = vmatpush.bf16.msra.mxu3 %v3771_v42  ;;  %v3824_v42 = vld [vmem:[#allocation2 + $0x678] sm:$0xff] }
  0x9f   :  { %2373 = vmatpush.bf16.msra.mxu0 %v3746_v43  ;;  %v3832_v43 = vld [vmem:[#allocation2 + $0x6b8] sm:$0xff] }
  0xa0   :  { %2386 = vmatpush.bf16.msra.mxu1 %v3754_v44  ;;  %v3840_v44 = vld [vmem:[#allocation2 + $0x6f8] sm:$0xff] }
  0xa1   :  { %2399 = vmatpush.bf16.msra.mxu2 %v3762_v45  ;;  %v3815_v45 = vld [vmem:[#allocation2 + $0x630] sm:$0xff] }
  0xa2   :  { %2412 = vmatpush.bf16.msra.mxu3 %v3770_v46  ;;  %v3823_v46 = vld [vmem:[#allocation2 + $0x670] sm:$0xff] }
  0xa3   :  { %2374 = vmatpush.bf16.msra.mxu0 %v3745_v47  ;;  %v2168_v4 = vpop.f32.mrf.mxu0  ;;  %v3831_v47 = vld [vmem:[#allocation2 + $0x6b0] sm:$0xff] }
  0xa4   :  { %2387 = vmatpush.bf16.msra.mxu1 %v3753_v48  ;;  %v2169_v7 = vadd.f32 %v3877_v1, %v2168_v4  ;;  %v2181_v8 = vpop.f32.mrf.mxu1  ;;  %v3839_v48 = vld [vmem:[#allocation2 + $0x6f0] sm:$0xff] }
  0xa5   :  { %2400 = vmatpush.bf16.msra.mxu2 %v3761_v49  ;;  %v3814_v49 = vld [vmem:[#allocation2 + $0x628] sm:$0xff] }
  0xa6   :  { %2413 = vmatpush.bf16.msra.mxu3 %v3769_v50  ;;  %2375 = vmatmul.bf16.vlgmr.msra.gmra.mxu0 %v573_v55  ;;  %v2182_v11 = vadd.f32 %v2181_v8, %v2169_v7  ;;  %v3822_v50 = vld [vmem:[#allocation2 + $0x668] sm:$0xff]  ;;  %v3821_v55 = vld [vmem:[#allocation2 + $0x660] sm:$0xff] }
  0xa7   :  { %2419 = vmatpush.bf16.msrb.mxu0 %v3784_v51  ;;  %2388 = vmatmul.bf16.vlgmr.msra.gmra.mxu1 %v574_v57  ;;  %v3830_v51 = vld [vmem:[#allocation2 + $0x6a8] sm:$0xff] }
  0xa8   :  { %2432 = vmatpush.bf16.msrb.mxu1 %v3792_v52  ;;  %2401 = vmatmul.bf16.vlgmr.msra.gmra.mxu2 %v575_v56  ;;  %v3838_v52 = vld [vmem:[#allocation2 + $0x6e8] sm:$0xff] }
  0xa9   :  { %2445 = vmatpush.bf16.msrb.mxu2 %v3800_v53  ;;  %2414 = vmatmul.bf16.vlgmr.msra.gmra.mxu3 %v576_v58  ;;  %v3829_v58 = vld [vmem:[#allocation2 + $0x6a0] sm:$0xff] }
  0xaa   :  { %2458 = vmatpush.bf16.msrb.mxu3 %v3808_v54  ;;  %v3813_v54 = vld [vmem:[#allocation2 + $0x620] sm:$0xff] }
  0xab   :  { %2420 = vmatpush.bf16.msrb.mxu0 %v3783_v59  ;;  %v2194_v16 = vpop.f32.mrf.mxu2  ;;  %v2170_v19 = vpop.f32.mrf.mxu0  ;;  %v3837_v59 = vld [vmem:[#allocation2 + $0x6e0] sm:$0xff] }
  0xac   :  { %2433 = vmatpush.bf16.msrb.mxu1 %v3791_v60  ;;  %v2195_v17 = vadd.f32 %v2194_v16, %v2182_v11  ;;  %v2207_v18 = vpop.f32.mrf.mxu3  ;;  %v2183_v23 = vpop.f32.mrf.mxu1  ;;  %v3810_v11 = vld [vmem:[#allocation2 + $0x608] sm:$0xff]  ;;  %v3825_v19 = vld [vmem:[#allocation2 + $0x680] sm:$0xff] }
  0xad   :  { %2446 = vmatpush.bf16.msrb.mxu2 %v3799_v61  ;;  %v3812_v61 = vld [vmem:[#allocation2 + $0x618] sm:$0xff] }
  0xae   :  { %2459 = vmatpush.bf16.msrb.mxu3 %v3807_v62  ;;  %v3969_v22 = vadd.f32 %v2207_v18, %v2195_v17  ;;  %v3820_v62 = vld [vmem:[#allocation2 + $0x658] sm:$0xff]  ;;  %v3809_v17 = vld [vmem:[#allocation2 + $0x600] sm:$0xff] }
  0xaf   :  { %2421 = vmatpush.bf16.msrb.mxu0 %v3782_v63  ;;  %v3828_v63 = vld [vmem:[#allocation2 + $0x698] sm:$0xff]  ;;  %v3817_v18 = vld [vmem:[#allocation2 + $0x640] sm:$0xff] }
  0xb0   :  { %2434 = vmatpush.bf16.msrb.mxu1 %v3790_v0  ;;  %v3836_v0 = vld [vmem:[#allocation2 + $0x6d8] sm:$0xff] }
  0xb1   :  { %2447 = vmatpush.bf16.msrb.mxu2 %v3798_v2  ;;  %v3864_v23 = vld [vmem:[#allocation2 + $0x7b8] sm:$0xff] }
  0xb2   :  { %2460 = vmatpush.bf16.msrb.mxu3 %v3806_v3 }
  0xb3   :  { %2422 = vmatpush.bf16.msrb.mxu0 %v3781_v5  ;;  %v2196_v32 = vpop.f32.mrf.mxu2  ;;  %v3811_v5 = vld [vmem:[#allocation2 + $0x610] sm:$0xff] }
  0xb4   :  { %2435 = vmatpush.bf16.msrb.mxu1 %v3789_v6  ;;  %v2209_v35 = vpop.f32.mrf.mxu3  ;;  %v3819_v6 = vld [vmem:[#allocation2 + $0x650] sm:$0xff] }
  0xb5   :  { %2448 = vmatpush.bf16.msrb.mxu2 %v3797_v9  ;;  %v3827_v9 = vld [vmem:[#allocation2 + $0x690] sm:$0xff]  ;;  %v3862_v35 = vld [vmem:[#allocation2 + $0x7a8] sm:$0xff] }
  0xb6   :  { %2461 = vmatpush.bf16.msrb.mxu3 %v3805_v10  ;;  %v3835_v10 = vld [vmem:[#allocation2 + $0x6d0] sm:$0xff] }
  0xb7   :  { %2423 = vmatpush.bf16.msrb.mxu0 %v3780_v12  ;;  %v3818_v12 = vld [vmem:[#allocation2 + $0x648] sm:$0xff]  ;;  %v3871_v32 = vld [vmem:[#allocation2 + $0x7f0] sm:$0xff] }
  0xb8   :  { %2436 = vmatpush.bf16.msrb.mxu1 %v3788_v13  ;;  %v3826_v13 = vld [vmem:[#allocation2 + $0x688] sm:$0xff] }
  0xb9   :  { %2449 = vmatpush.bf16.msrb.mxu2 %v3796_v14  ;;  %v3834_v14 = vld [vmem:[#allocation2 + $0x6c8] sm:$0xff] }
  0xba   :  { %2462 = vmatpush.bf16.msrb.mxu3 %v3804_v15 }
  0xbb   :  { %2424 = vmatpush.bf16.msrb.mxu0 %v3779_v20  ;;  %v3833_v20 = vld [vmem:[#allocation2 + $0x6c0] sm:$0xff] }
  0xbc   :  { %2437 = vmatpush.bf16.msrb.mxu1 %v3787_v21  ;;  %v3848_v21 = vld [vmem:[#allocation2 + $0x738] sm:$0xff] }
  0xbd   :  { %2450 = vmatpush.bf16.msrb.mxu2 %v3795_v24  ;;  %v3872_v24 = vld [vmem:[#allocation2 + $0x7f8] sm:$0xff] }
  0xbe   :  { %2463 = vmatpush.bf16.msrb.mxu3 %v3803_v25  ;;  %v583_v25 = vld [vmem:[#allocation1] sm:$0xff] }
  0xbf   :  { %2425 = vmatpush.bf16.msrb.mxu0 %v3778_v26  ;;  %v585_v26 = vld [vmem:[#allocation1 + $0x12] sm:$0xff] }
  0xc0   :  { %2438 = vmatpush.bf16.msrb.mxu1 %v3786_v27  ;;  %v584_v27 = vld [vmem:[#allocation1 + $0x9] sm:$0xff] }
  0xc1   :  { %2451 = vmatpush.bf16.msrb.mxu2 %v3794_v28  ;;  %v586_v28 = vld [vmem:[#allocation1 + $0x1b] sm:$0xff] }
  0xc2   :  { %2464 = vmatpush.bf16.msrb.mxu3 %v3802_v29  ;;  %v3847_v29 = vld [vmem:[#allocation2 + $0x730] sm:$0xff] }
  0xc3   :  { %2426 = vmatpush.bf16.msrb.mxu0 %v3777_v37  ;;  %v2220_v53 = vpop.f32.mrf.mxu0 }
  0xc4   :  { %2439 = vmatpush.bf16.msrb.mxu1 %v3785_v38  ;;  %v2221_v56 = vadd.f32 %v2220_v53, %v3969_v22  ;;  %v2233_v57 = vpop.f32.mrf.mxu1  ;;  %v3856_v22 = vld [vmem:[#allocation2 + $0x778] sm:$0xff] }
  0xc5   :  { %2452 = vmatpush.bf16.msrb.mxu2 %v3793_v39  ;;  %v3845_v39 = vld [vmem:[#allocation2 + $0x720] sm:$0xff] }
  0xc6   :  { %2465 = vmatpush.bf16.msrb.mxu3 %v3801_v40  ;;  %2427 = vmatmul.bf16.vlgmr.msrb.gmra.mxu0 %v577_v30  ;;  %v2234_v60 = vadd.f32 %v2233_v57, %v2221_v56  ;;  %v3855_v30 = vld [vmem:[#allocation2 + $0x770] sm:$0xff]  ;;  %v3853_v40 = vld [vmem:[#allocation2 + $0x760] sm:$0xff] }
  0xc7   :  { %2471 = vmatpush.bf16.msra.mxu0 %v3816_v41  ;;  %2440 = vmatmul.bf16.vlgmr.msrb.gmra.mxu1 %v578_v33  ;;  %v3846_v33 = vld [vmem:[#allocation2 + $0x728] sm:$0xff]  ;;  %v3859_v57 = vld [vmem:[#allocation2 + $0x790] sm:$0xff] }
  0xc8   :  { %2484 = vmatpush.bf16.msra.mxu1 %v3824_v42  ;;  %2453 = vmatmul.bf16.vlgmr.msrb.gmra.mxu2 %v579_v31  ;;  %v3863_v31 = vld [vmem:[#allocation2 + $0x7b0] sm:$0xff]  ;;  %v3861_v42 = vld [vmem:[#allocation2 + $0x7a0] sm:$0xff] }
  0xc9   :  { %2497 = vmatpush.bf16.msra.mxu2 %v3832_v43  ;;  %2466 = vmatmul.bf16.vlgmr.msrb.gmra.mxu3 %v580_v34  ;;  %v3854_v34 = vld [vmem:[#allocation2 + $0x768] sm:$0xff]  ;;  %v3869_v43 = vld [vmem:[#allocation2 + $0x7e0] sm:$0xff] }
  0xca   :  { %2510 = vmatpush.bf16.msra.mxu3 %v3840_v44 }
  0xcb   :  { %2472 = vmatpush.bf16.msra.mxu0 %v3815_v45  ;;  %v2246_v1 = vpop.f32.mrf.mxu2  ;;  %v2222_v4 = vpop.f32.mrf.mxu0  ;;  %v3844_v45 = vld [vmem:[#allocation2 + $0x718] sm:$0xff] }
  0xcc   :  { %2485 = vmatpush.bf16.msra.mxu1 %v3823_v46  ;;  %v2247_v2 = vadd.f32 %v2246_v1, %v2234_v60  ;;  %v2259_v3 = vpop.f32.mrf.mxu3  ;;  %v2235_v8 = vpop.f32.mrf.mxu1  ;;  %v3852_v46 = vld [vmem:[#allocation2 + $0x758] sm:$0xff]  ;;  %v3850_v60 = vld [vmem:[#allocation2 + $0x748] sm:$0xff]  ;;  %v3841_v1 = vld [vmem:[#allocation2 + $0x700] sm:$0xff] }
  0xcd   :  { %2498 = vmatpush.bf16.msra.mxu2 %v3831_v47  ;;  %v3860_v47 = vld [vmem:[#allocation2 + $0x798] sm:$0xff]  ;;  %v3865_v4 = vld [vmem:[#allocation2 + $0x7c0] sm:$0xff] }
  0xce   :  { %2511 = vmatpush.bf16.msra.mxu3 %v3839_v48  ;;  %v2260_v7 = vadd.f32 %v2259_v3, %v2247_v2  ;;  %v3868_v48 = vld [vmem:[#allocation2 + $0x7d8] sm:$0xff]  ;;  %v3849_v2 = vld [vmem:[#allocation2 + $0x740] sm:$0xff] }
  0xcf   :  { %2473 = vmatpush.bf16.msra.mxu0 %v3814_v49  ;;  %v3857_v3 = vld [vmem:[#allocation2 + $0x780] sm:$0xff]  ;;  %v590_v8 = vld [vmem:[#allocation1 + $0x3f] sm:$0xff] }
  0xd0   :  { %2486 = vmatpush.bf16.msra.mxu1 %v3822_v50 }
  0xd1   :  { %2499 = vmatpush.bf16.msra.mxu2 %v3830_v51 }
  0xd2   :  { %2512 = vmatpush.bf16.msra.mxu3 %v3838_v52 }
  0xd3   :  { %2474 = vmatpush.bf16.msra.mxu0 %v3813_v54  ;;  %v2248_v15 = vpop.f32.mrf.mxu2  ;;  %v3843_v54 = vld [vmem:[#allocation2 + $0x710] sm:$0xff] }
  0xd4   :  { %2487 = vmatpush.bf16.msra.mxu1 %v3821_v55  ;;  %v2261_v16 = vpop.f32.mrf.mxu3  ;;  %v3851_v55 = vld [vmem:[#allocation2 + $0x750] sm:$0xff] }
  0xd5   :  { %2500 = vmatpush.bf16.msra.mxu2 %v3829_v58  ;;  %v3867_v58 = vld [vmem:[#allocation2 + $0x7d0] sm:$0xff] }
  0xd6   :  { %2513 = vmatpush.bf16.msra.mxu3 %v3837_v59  ;;  %v3842_v59 = vld [vmem:[#allocation2 + $0x708] sm:$0xff] }
  0xd7   :  { %2475 = vmatpush.bf16.msra.mxu0 %v3812_v61  ;;  %v3858_v61 = vld [vmem:[#allocation2 + $0x788] sm:$0xff] }
  0xd8   :  { %2488 = vmatpush.bf16.msra.mxu1 %v3820_v62  ;;  %v3866_v62 = vld [vmem:[#allocation2 + $0x7c8] sm:$0xff] }
  0xd9   :  { %2501 = vmatpush.bf16.msra.mxu2 %v3828_v63 }
  0xda   :  { %2514 = vmatpush.bf16.msra.mxu3 %v3836_v0 }
  0xdb   :  { %2476 = vmatpush.bf16.msra.mxu0 %v3811_v5  ;;  %v587_v5 = vld [vmem:[#allocation1 + $0x24] sm:$0xff] }
  0xdc   :  { %2489 = vmatpush.bf16.msra.mxu1 %v3819_v6  ;;  %v588_v6 = vld [vmem:[#allocation1 + $0x2d] sm:$0xff] }
  0xdd   :  { %2502 = vmatpush.bf16.msra.mxu2 %v3827_v9 }
  0xde   :  { %2515 = vmatpush.bf16.msra.mxu3 %v3835_v10 }
  0xdf   :  { %2477 = vmatpush.bf16.msra.mxu0 %v3810_v11 }
  0xe0   :  { %2490 = vmatpush.bf16.msra.mxu1 %v3818_v12 }
  0xe1   :  { %2503 = vmatpush.bf16.msra.mxu2 %v3826_v13 }
  0xe2   :  { %2516 = vmatpush.bf16.msra.mxu3 %v3834_v14 }
  0xe3   :  { %2478 = vmatpush.bf16.msra.mxu0 %v3809_v17  ;;  %v2272_v37 = vpop.f32.mrf.mxu0 }
  0xe4   :  { %2491 = vmatpush.bf16.msra.mxu1 %v3817_v18  ;;  %v2273_v38 = vadd.f32 %v2272_v37, %v2260_v7  ;;  %v2285_v41 = vpop.f32.mrf.mxu1  ;;  %v589_v7 = vld [vmem:[#allocation1 + $0x36] sm:$0xff] }
  0xe5   :  { %2504 = vmatpush.bf16.msra.mxu2 %v3825_v19 }
  0xe6   :  { %2517 = vmatpush.bf16.msra.mxu3 %v3833_v20  ;;  %2479 = vmatmul.bf16.vlgmr.msra.gmra.mxu0 %v583_v25  ;;  %v2286_v44 = vadd.f32 %v2285_v41, %v2273_v38 }
  0xe7   :  { %2523 = vmatpush.bf16.msrb.mxu0 %v3848_v21  ;;  %2492 = vmatmul.bf16.vlgmr.msra.gmra.mxu1 %v584_v27 }
  0xe8   :  { %2536 = vmatpush.bf16.msrb.mxu1 %v3856_v22  ;;  %2505 = vmatmul.bf16.vlgmr.msra.gmra.mxu2 %v585_v26 }
  0xe9   :  { %2549 = vmatpush.bf16.msrb.mxu2 %v3864_v23  ;;  %2518 = vmatmul.bf16.vlgmr.msra.gmra.mxu3 %v586_v28 }
  0xea   :  { %2562 = vmatpush.bf16.msrb.mxu3 %v3872_v24 }
  0xeb   :  { %2524 = vmatpush.bf16.msrb.mxu0 %v3847_v29  ;;  %v2298_v49 = vpop.f32.mrf.mxu2  ;;  %v2274_v52 = vpop.f32.mrf.mxu0 }
  0xec   :  { %2537 = vmatpush.bf16.msrb.mxu1 %v3855_v30  ;;  %v2299_v50 = vadd.f32 %v2298_v49, %v2286_v44  ;;  %v2311_v51 = vpop.f32.mrf.mxu3  ;;  %v2287_v56 = vpop.f32.mrf.mxu1 }
  0xed   :  { %2550 = vmatpush.bf16.msrb.mxu2 %v3863_v31 }
  0xee   :  { %2563 = vmatpush.bf16.msrb.mxu3 %v3871_v32  ;;  %v2312_v53 = vadd.f32 %v2311_v51, %v2299_v50 }
  0xef   :  { %2525 = vmatpush.bf16.msrb.mxu0 %v3846_v33 }
  0xf0   :  { %2538 = vmatpush.bf16.msrb.mxu1 %v3854_v34 }
  0xf1   :  { %2551 = vmatpush.bf16.msrb.mxu2 %v3862_v35 }
  0xf2   :  { %2564 = vmatpush.bf16.msrb.mxu3 %v3870_v36 }
  0xf3   :  { %2526 = vmatpush.bf16.msrb.mxu0 %v3845_v39  ;;  %v2300_v63 = vpop.f32.mrf.mxu2 }
  0xf4   :  { %2539 = vmatpush.bf16.msrb.mxu1 %v3853_v40  ;;  %v2313_v0 = vpop.f32.mrf.mxu3 }
  0xf5   :  { %2552 = vmatpush.bf16.msrb.mxu2 %v3861_v42 }
  0xf6   :  { %2565 = vmatpush.bf16.msrb.mxu3 %v3869_v43 }
  0xf7   :  { %2527 = vmatpush.bf16.msrb.mxu0 %v3844_v45 }
  0xf8   :  { %2540 = vmatpush.bf16.msrb.mxu1 %v3852_v46 }
  0xf9   :  { %2553 = vmatpush.bf16.msrb.mxu2 %v3860_v47 }
  0xfa   :  { %2566 = vmatpush.bf16.msrb.mxu3 %v3868_v48 }
  0xfb   :  { %2528 = vmatpush.bf16.msrb.mxu0 %v3843_v54 }
  0xfc   :  { %2541 = vmatpush.bf16.msrb.mxu1 %v3851_v55 }
  0xfd   :  { %2554 = vmatpush.bf16.msrb.mxu2 %v3859_v57 }
  0xfe   :  { %2567 = vmatpush.bf16.msrb.mxu3 %v3867_v58 }
  0xff   :  { %2529 = vmatpush.bf16.msrb.mxu0 %v3842_v59 }
 0x100   :  { %2542 = vmatpush.bf16.msrb.mxu1 %v3850_v60 }
 0x101   :  { %2555 = vmatpush.bf16.msrb.mxu2 %v3858_v61 }
 0x102   :  { %2568 = vmatpush.bf16.msrb.mxu3 %v3866_v62 }
 0x103   :  { %2530 = vmatpush.bf16.msrb.mxu0 %v3841_v1  ;;  %v2324_v9 = vpop.f32.mrf.mxu0 }
 0x104   :  { %2543 = vmatpush.bf16.msrb.mxu1 %v3849_v2  ;;  %v2325_v10 = vadd.f32 %v2324_v9, %v2312_v53  ;;  %v2337_v11 = vpop.f32.mrf.mxu1 }
 0x105   :  { %2556 = vmatpush.bf16.msrb.mxu2 %v3857_v3 }
 0x106   :  { %2569 = vmatpush.bf16.msrb.mxu3 %v3865_v4  ;;  %2531 = vmatmul.bf16.vlgmr.msrb.gmra.mxu0 %v587_v5  ;;  %v2338_v12 = vadd.f32 %v2337_v11, %v2325_v10 }
 0x107   :  { %2544 = vmatmul.bf16.vlgmr.msrb.gmra.mxu1 %v588_v6 }
 0x108   :  { %2557 = vmatmul.bf16.vlgmr.msrb.gmra.mxu2 %v589_v7 }
 0x109   :  { %2570 = vmatmul.bf16.vlgmr.msrb.gmra.mxu3 %v590_v8 }
 0x10b   :  { %v2350_v13 = vpop.f32.mrf.mxu2  ;;  %v2326_v16 = vpop.f32.mrf.mxu0 }
 0x10c   :  { %v2351_v14 = vadd.f32 %v2350_v13, %v2338_v12  ;;  %v2363_v15 = vpop.f32.mrf.mxu3  ;;  %v2339_v18 = vpop.f32.mrf.mxu1 }
 0x10e   :  { %v2364_v17 = vadd.f32 %v2363_v15, %v2351_v14 }
 0x113   :  { %v2352_v19 = vpop.f32.mrf.mxu2 }
 0x114   :  { %v2365_v20 = vpop.f32.mrf.mxu3 }
 0x123   :  { %v2376_v21 = vpop.f32.mrf.mxu0 }
 0x124   :  { %v2377_v22 = vadd.f32 %v2376_v21, %v2364_v17  ;;  %v2389_v23 = vpop.f32.mrf.mxu1 }
 0x126   :  { %v2390_v24 = vadd.f32 %v2389_v23, %v2377_v22 }
 0x12b   :  { %v2402_v25 = vpop.f32.mrf.mxu2  ;;  %v2378_v28 = vpop.f32.mrf.mxu0 }
 0x12c   :  { %v2403_v26 = vadd.f32 %v2402_v25, %v2390_v24  ;;  %v2415_v27 = vpop.f32.mrf.mxu3  ;;  %v2391_v30 = vpop.f32.mrf.mxu1 }
 0x12e   :  { %v2416_v29 = vadd.f32 %v2415_v27, %v2403_v26 }
 0x133   :  { %v2404_v31 = vpop.f32.mrf.mxu2 }
 0x134   :  { %v2417_v32 = vpop.f32.mrf.mxu3 }
 0x143   :  { %v2428_v33 = vpop.f32.mrf.mxu0 }
 0x144   :  { %v2441_v34 = vpop.f32.mrf.mxu1  ;;  %v2429_v44 = vadd.f32 %v2428_v33, %v2416_v29 }
 0x146   :  { %v2442_v48 = vadd.f32 %v2441_v34, %v2429_v44 }
 0x14b   :  { %v2454_v35 = vpop.f32.mrf.mxu2  ;;  %v2430_v37 = vpop.f32.mrf.mxu0 }
 0x14c   :  { %v2467_v36 = vpop.f32.mrf.mxu3  ;;  %v2443_v38 = vpop.f32.mrf.mxu1  ;;  %v2455_v49 = vadd.f32 %v2454_v35, %v2442_v48 }
 0x14e   :  { %v2468_v52 = vadd.f32 %v2467_v36, %v2455_v49 }
 0x153   :  { %v2456_v39 = vpop.f32.mrf.mxu2 }
 0x154   :  { %v2469_v40 = vpop.f32.mrf.mxu3 }
 0x163   :  { %v2480_v41 = vpop.f32.mrf.mxu0 }
 0x164   :  { %v2493_v42 = vpop.f32.mrf.mxu1  ;;  %v2481_v53 = vadd.f32 %v2480_v41, %v2468_v52 }
 0x166   :  { %v2494_v54 = vadd.f32 %v2493_v42, %v2481_v53 }
 0x16b   :  { %v2506_v43 = vpop.f32.mrf.mxu2  ;;  %v2482_v46 = vpop.f32.mrf.mxu0 }
 0x16c   :  { %v2519_v45 = vpop.f32.mrf.mxu3  ;;  %v2495_v47 = vpop.f32.mrf.mxu1  ;;  %v2507_v55 = vadd.f32 %v2506_v43, %v2494_v54 }
 0x16e   :  { %v2520_v56 = vadd.f32 %v2519_v45, %v2507_v55 }
 0x173   :  { %v2508_v50 = vpop.f32.mrf.mxu2 }
 0x174   :  { %v2521_v51 = vpop.f32.mrf.mxu3 }
 0x183   :  { %v2532_v57 = vpop.f32.mrf.mxu0 }
 0x184   :  { %v2545_v58 = vpop.f32.mrf.mxu1  ;;  %v2533_v59 = vadd.f32 %v2532_v57, %v2520_v56 }
 0x186   :  { %v2546_v60 = vadd.f32 %v2545_v58, %v2533_v59 }
 0x18b   :  { %v2558_v61 = vpop.f32.mrf.mxu2  ;;  %v2534_v0 = vpop.f32.mrf.mxu0 }
 0x18c   :  { %v2571_v62 = vpop.f32.mrf.mxu3  ;;  %v2559_v63 = vadd.f32 %v2558_v61, %v2546_v60  ;;  %v2547_v1 = vpop.f32.mrf.mxu1 }
 0x18e   :  { %v2572_v2 = vadd.f32 %v2571_v62, %v2559_v63 }
 0x190   :  { %2575 = vst [vmem:[#allocation5] sm:$0x3] %v2572_v2 }
 0x191   :  { %2586 = dma.vmem_to_hbm [thread:$0]  %s2582_s27, 32, %s2584_s30, [#allocation4]  }
 0x193   :  { %v2560_v3 = vpop.f32.mrf.mxu2 }
 0x194   :  { %v2573_v4 = vpop.f32.mrf.mxu3 }
 0x195   :  { %3928 = dma.done.wait [#allocation4], 32  }
 0x196   :  { %3929 = vsyncadd [#allocation4], 4294967264 }
 0x197   :  { %2591 = vsyncpa [#allocation3], 1 }
 0x198   :  { %2592 = vsyncpa [#allocation4], 1 }

// kernel: custom_cnn_forward.3
= control target key start
LH: loop header
LB: loop body
LE: loop exit
PB: predicated region body
PF: predicated region fallthrough
CT: control target
= control target key end

     0   :  { %s5699_s12 = smov 0   ;;  %s7371_s0 = inlined_call_operand.vmem [shape: bf16[2,18,18,3], index: 0, kind: input, shape index: {}]   ;;  %s7372_s1 = inlined_call_operand.vmem [shape: bf16[3,3,3,64], index: 1, kind: input, shape index: {}]   ;;  %s7373_s2 = inlined_call_operand.vmem [shape: f32[1,64], index: 2, kind: input, shape index: {}]   ;;  %s7374_s3 = inlined_call_operand.vmem [shape: f32[2,8,8,64], index: 3, kind: output, shape index: {}]  }
   0x1 LB: > { %s4962_s13 = sadd.s32 4294967295, %s5676_s12   ;;  %p4966_p0 = scmp.ge.s32.totalorder %s5676_s12, 1  ;;  %s5676_s12 = sphi %s5699_s12, %s13_s12  }
   0x2   : > { %p137_p1 = scmp.lt.s32.totalorder %s5676_s12, 3 }
   0x4   : > { %p138_p2 = pnand %p4966_p0, %p137_p1 }
   0x6   : > { %141 = sbr.rel (%p138_p2) target bundleno = 808 (0x328), region = 32 }
   0xb   : > { %v4970_v0 = vld [vmem:[%s7372_s1 + $0x2] sm:$0x3]  ;;  %vm707_vm0 = vcmask 1040384   ;;  %vm708_vm1 = vcmask 1041408   ;;  %p161_p3 = scmp.lt.s32.totalorder %s4962_s13, 1  ;;  %v5678_v1 = vmov 65535  }
   0xc   : > { %v709_v2 = vsel %vm707_vm0, 4294967295, %v5678_v1  ;;  %v5083_v4 = vld [vmem:[%s7372_s1 + $0x4] sm:$0x3]  ;;  %v5132_v7 = vld [vmem:[%s7372_s1 + $0x6] sm:$0x3]  ;;  %vm658_vm5 = vcmask 23552  }
   0xd   : > { %v5710_v3 = vsel %vm708_vm1, %v709_v2, 0  ;;  %s7400_s13 = smov (!%p161_p3, %s4962_s13), 1  ;;  %v204_v8 = vld [vmem:[%s7372_s1] sm:$0x3]  ;;  %v5261_v9 = vld [vmem:[%s7372_s1 + $0x8] sm:$0x3] }
   0xe   : > { %v712_v5 = vand.u32 %v4970_v0, %v5710_v3  ;;  %v1285_v6 = vand.u32 %v5083_v4, %v5710_v3  ;;  %s5608_s24 = smul.u32 216, %s7400_s13  ;;  %v1572_v10 = vand.u32 %v5132_v7, %v5710_v3  ;;  %v932_v11 = vand.u32 %v5710_v3, %v204_v8  ;;  %s5556_s11 = sshll.u32 %s7400_s13, 6 }
   0xf   : > { %v2226_v12 = vand.u32 %v5261_v9, %v5710_v3  ;;  %vm221_vm2 = vsmask.f32 3328  ;;  %vm222_vm3 = vsmask.f32 7440  ;;  %vm1071_vm6 = vcmask 1042432   ;;  %s6963_s15 = scalar_lea.vmem %s7374_s3, %s5556_s11 }
  0x10   : > { %5605 = vmatpush.bf16.msra.mxu1 %v712_v5  ;;  %5606 = vmatpush.bf16.msra.mxu2 %v712_v5  ;;  %s5735_s27 = scalar_lea.vmem %s7371_s0, %s5608_s24  ;;  %vm5747_vm4 = vmor %vm221_vm2, %vm222_vm3  ;;  %vm1072_vm7 = vcmask 1046532   ;;  %vm4154_vm9 = vcmask 523264   ;;  %vm4315_vm10 = vcmask 517120   ;;  %vm4828_vm11 = vcmask 1041409  }
  0x11   : > { %5607 = vmatpush.bf16.msra.mxu3 %v712_v5  ;;  %721 = vmatpush.bf16.msra.mxu0 %v712_v5  ;;  %v180_v13 = vld [vmem:[%s5735_s27 + $0x30] sm:$0xf]  ;;  %v181_v14 = vld [vmem:[%s5735_s27 + $0x34] sm:$0xf]  ;;  %v209_v15 = vld [vmem:[%s5735_s27 + $0x38] sm:$0x1] }
  0x12   : > { %v321_v16 = vshrl.u32 %v180_v13, 16  ;;  %v324_v17 = vshll.u32 %v180_v13, 16  ;;  %v330_v18 = vshll.u32 %v181_v14, 16  ;;  %v334_v19 = vshrl.u32 %v181_v14, 16  ;;  %v188_v20 = vld [vmem:[%s5735_s27 + $0x60] sm:$0xf]  ;;  %vm5921_vm8 = vmor %vm1071_vm6, %vm1072_vm7 }
  0x13   : > { %v340_v21 = vshll.u32 %v209_v15, 16  ;;  %v189_v22 = vld [vmem:[%s5735_s27 + $0x64] sm:$0xf]  ;;  %v213_v23 = vld [vmem:[%s5735_s27 + $0x68] sm:$0x1]  ;;  %v417_v24 = vshrl.u32 %v188_v20, 16 }
  0x14   : > { %1294 = vmatpush.bf16.msrb.mxu2 %v1285_v6  ;;  %941 = vmatpush.bf16.msrb.mxu1 %v932_v11  ;;  %v323_v25 = vrot.slane %v321_v16, 4  ;;  %v326_v26 = vrot.slane %v324_v17, 5  ;;  %v332_v27 = vrot.slane %v330_v18, 5  ;;  %v336_v28 = vrot.slane %v334_v19, 4  ;;  %v196_v29 = vld [vmem:[%s5735_s27 + $0x90] sm:$0xf] }
  0x15   : > { %1581 = vmatpush.bf16.msrb.mxu3 %v1572_v10  ;;  %2235 = vmatpush.bf16.msrb.mxu0 %v2226_v12  ;;  %v342_v30 = vrot.slane %v340_v21, 5  ;;  %v419_v31 = vrot.slane %v417_v24, 4  ;;  %v420_v32 = vshll.u32 %v188_v20, 16  ;;  %v426_v33 = vshll.u32 %v189_v22, 16  ;;  %v197_v38 = vld [vmem:[%s5735_s27 + $0x94] sm:$0xf] }
  0x16   : > { %v327_v34 = vor.u32 %v326_v26, %v323_v25  ;;  %v337_v35 = vor.u32 %v336_v28, %v332_v27  ;;  %v430_v36 = vshrl.u32 %v189_v22, 16  ;;  %v436_v37 = vshll.u32 %v213_v23, 16  ;;  %v217_v48 = vld [vmem:[%s5735_s27 + $0x98] sm:$0x1]  ;;  %v172_v0 = vld [vmem:[%s5735_s27] sm:$0xf] }
  0x17   : > { %v422_v40 = vrot.slane %v420_v32, 5  ;;  %v428_v41 = vrot.slane %v426_v33, 5  ;;  %v513_v42 = vshrl.u32 %v196_v29, 16  ;;  %v516_v50 = vshll.u32 %v196_v29, 16  ;;  %v5760_v5 = vld [vmem:[%s5735_s27 + $0x4] sm:$0xf] }
  0x18   : > { %v328_v43 = vrot.slane %v327_v34, 4  ;;  %v338_v44 = vrot.slane %v337_v35, 4  ;;  %v432_v45 = vrot.slane %v430_v36, 4  ;;  %v438_v46 = vrot.slane %v436_v37, 5  ;;  %v5763_v6 = vld [vmem:[%s5735_s27 + $0x8] sm:$0x1] }
  0x19   : > { %v423_v47 = vor.u32 %v422_v40, %v419_v31  ;;  %v515_v49 = vrot.slane %v513_v42, 4  ;;  %v522_v51 = vshll.u32 %v197_v38, 16  ;;  %v526_v55 = vshrl.u32 %v197_v38, 16  ;;  %v182_v23 = vld [vmem:[%s5735_s27 + $0x3c] sm:$0xf] }
  0x1a   : > { %v333_v52 = vsel %vm5747_vm4, %v328_v43, %v332_v27  ;;  %v343_v53 = vsel %vm5747_vm4, %v338_v44, %v342_v30  ;;  %v433_v54 = vor.u32 %v432_v45, %v428_v41  ;;  %v518_v59 = vrot.slane %v516_v50, 5  ;;  %v5775_v24 = vld [vmem:[%s5735_s27 + $0x40] sm:$0xf]  ;;  %v5780_v29 = vld [vmem:[%s5735_s27 + $0x44] sm:$0x1] }
  0x1b   : > { %v618_v56 = vunpack.c.l.b16 %v333_v52  ;;  %v619_v57 = vunpack.c.l.b16 %v343_v53  ;;  %v424_v58 = vrot.slane %v423_v47, 4  ;;  %v524_v61 = vrot.slane %v522_v51, 5  ;;  %v190_v37 = vld [vmem:[%s5735_s27 + $0x6c] sm:$0xf]  ;;  %v191_v47 = vld [vmem:[%s5735_s27 + $0x70] sm:$0xf] }
  0x1c   : > { %v434_v60 = vrot.slane %v433_v54, 4  ;;  %v528_v62 = vrot.slane %v526_v55, 4  ;;  %v532_v63 = vshll.u32 %v217_v48, 16  ;;  %v519_v4 = vor.u32 %v518_v59, %v515_v49  ;;  %v214_v51 = vld [vmem:[%s5735_s27 + $0x74] sm:$0x1] }
  0x1d   : > { %v646_v1 = vpack.c.b16 %v619_v57, %v618_v56  ;;  %v429_v2 = vsel %vm5747_vm4, %v424_v58, %v428_v41  ;;  %v225_v13 = vshrl.u32 %v172_v0, 16  ;;  %v228_v14 = vshll.u32 %v172_v0, 16 }
  0x1e   : > { %v439_v7 = vsel %vm5747_vm4, %v434_v60, %v438_v46  ;;  %v626_v8 = vunpack.c.l.b16 %v429_v2  ;;  %v529_v9 = vor.u32 %v528_v62, %v524_v61  ;;  %v534_v10 = vrot.slane %v532_v63, 5 }
  0x1f   : > { %4975 = vmatmul.msk.bf16.vlgmr.msra.gmra.mxu1 %vm658_vm5, %v646_v1  ;;  %v627_v11 = vunpack.c.l.b16 %v439_v7  ;;  %v520_v12 = vrot.slane %v519_v4, 4  ;;  %v234_v16 = vshll.u32 %v5760_v5, 16  ;;  %v238_v17 = vshrl.u32 %v5760_v5, 16  ;;  %v198_v1 = vld [vmem:[%s5735_s27 + $0x9c] sm:$0xf] }
  0x20   : > { %v530_v15 = vrot.slane %v529_v9, 4  ;;  %v244_v18 = vshll.u32 %v5763_v6, 16  ;;  %v227_v21 = vrot.slane %v225_v13, 4  ;;  %v230_v22 = vrot.slane %v228_v14, 5  ;;  %v218_v13 = vld [vmem:[%s5735_s27 + $0xa4] sm:$0x1] }
  0x21   : > { %v650_v19 = vpack.c.b16 %v627_v11, %v626_v8  ;;  %v525_v20 = vsel %vm5747_vm4, %v520_v12, %v524_v61  ;;  %v236_v27 = vrot.slane %v234_v16, 5  ;;  %v240_v28 = vrot.slane %v238_v17, 4  ;;  %v199_v8 = vld [vmem:[%s5735_s27 + $0xa0] sm:$0xf] }
  0x22   : > { %v535_v25 = vsel %vm5747_vm4, %v530_v15, %v534_v10  ;;  %v634_v26 = vunpack.c.l.b16 %v525_v20  ;;  %v231_v31 = vor.u32 %v230_v22, %v227_v21  ;;  %v246_v32 = vrot.slane %v244_v18, 5 }
  0x23   : > { %4979 = vmatmul.msk.bf16.vlgmr.msra.gmra.mxu2 %vm658_vm5, %v650_v19  ;;  %v635_v30 = vunpack.c.l.b16 %v535_v25  ;;  %v241_v33 = vor.u32 %v240_v28, %v236_v27  ;;  %v345_v34 = vshrl.u32 %v182_v23, 16  ;;  %v348_v35 = vshll.u32 %v182_v23, 16 }
  0x24   : > { %v354_v36 = vshll.u32 %v5775_v24, 16  ;;  %v232_v40 = vrot.slane %v231_v31, 4  ;;  %v358_v41 = vshrl.u32 %v5775_v24, 16  ;;  %v364_v42 = vshll.u32 %v5780_v29, 16 }
  0x25   : > { %v654_v38 = vpack.c.b16 %v635_v30, %v634_v26  ;;  %v242_v43 = vrot.slane %v241_v33, 4  ;;  %v347_v44 = vrot.slane %v345_v34, 4  ;;  %v350_v45 = vrot.slane %v348_v35, 5  ;;  %v5806_v33 = vld [vmem:[%s5735_s27 + $0x10] sm:$0xf] }
  0x26   : > { %v356_v46 = vrot.slane %v354_v36, 5  ;;  %v237_v48 = vsel %vm5747_vm4, %v232_v40, %v236_v27  ;;  %v360_v49 = vrot.slane %v358_v41, 4  ;;  %v366_v50 = vrot.slane %v364_v42, 5  ;;  %v174_v27 = vld [vmem:[%s5735_s27 + $0xc] sm:$0xf] }
  0x27   : > { %4983 = vmatmul.msk.bf16.vlgmr.msra.gmra.mxu3 %vm658_vm5, %v654_v38  ;;  %v441_v52 = vshrl.u32 %v190_v37, 16  ;;  %v247_v53 = vsel %vm5747_vm4, %v242_v43, %v246_v32  ;;  %v610_v54 = vunpack.c.l.b16 %v237_v48  ;;  %v351_v55 = vor.u32 %v350_v45, %v347_v44 }
  0x28   : > { %v444_v56 = vshll.u32 %v190_v37, 16  ;;  %v611_v57 = vunpack.c.l.b16 %v247_v53  ;;  %v361_v58 = vor.u32 %v360_v49, %v356_v46  ;;  %v450_v60 = vshll.u32 %v191_v47, 16  ;;  %v5809_v37 = vld [vmem:[%s5735_s27 + $0x14] sm:$0x1] }
  0x29   : > { %v443_v59 = vrot.slane %v441_v52, 4  ;;  %v352_v61 = vrot.slane %v351_v55, 4  ;;  %v454_v63 = vshrl.u32 %v191_v47, 16  ;;  %v460_v0 = vshll.u32 %v214_v51, 16  ;;  %v184_v47 = vld [vmem:[%s5735_s27 + $0x48] sm:$0xf] }
  0x2a   : > { %v446_v62 = vrot.slane %v444_v56, 5  ;;  %v642_v2 = vpack.c.b16 %v611_v57, %v610_v54  ;;  %v362_v4 = vrot.slane %v361_v58, 4  ;;  %v452_v7 = vrot.slane %v450_v60, 5  ;;  %v5819_v52 = vld [vmem:[%s5735_s27 + $0x4c] sm:$0xf] }
  0x2b   : > { %v357_v9 = vsel %vm5747_vm4, %v352_v61, %v356_v46  ;;  %v456_v11 = vrot.slane %v454_v63, 4  ;;  %v462_v12 = vrot.slane %v460_v0, 5  ;;  %v537_v16 = vshrl.u32 %v198_v1, 16  ;;  %v5824_v61 = vld [vmem:[%s5735_s27 + $0x50] sm:$0x1] }
  0x2c   : > { %v447_v10 = vor.u32 %v446_v62, %v443_v59  ;;  %4971 = vmatmul.msk.bf16.vlgmr.msra.gmra.mxu0 %vm658_vm5, %v642_v2  ;;  %v367_v14 = vsel %vm5747_vm4, %v362_v4, %v366_v50  ;;  %v620_v15 = vunpack.c.l.b16 %v357_v9  ;;  %v540_v17 = vshll.u32 %v198_v1, 16  ;;  %v192_v9 = vld [vmem:[%s5735_s27 + $0x78] sm:$0xf] }
  0x2d   : > { %v621_v18 = vunpack.c.l.b16 %v367_v14  ;;  %v457_v20 = vor.u32 %v456_v11, %v452_v7  ;;  %v546_v21 = vshll.u32 %v199_v8, 16  ;;  %v539_v22 = vrot.slane %v537_v16, 4  ;;  %v193_v14 = vld [vmem:[%s5735_s27 + $0x7c] sm:$0xf] }
  0x2e   : > { %v448_v19 = vrot.slane %v447_v10, 4  ;;  %v542_v23 = vrot.slane %v540_v17, 5  ;;  %v550_v25 = vshrl.u32 %v199_v8, 16  ;;  %v556_v26 = vshll.u32 %v218_v13, 16 }
  0x2f   : > { %v647_v28 = vpack.c.b16 %v621_v18, %v620_v15  ;;  %v458_v31 = vrot.slane %v457_v20, 4  ;;  %v548_v32 = vrot.slane %v546_v21, 5  ;;  %v249_v41 = vshrl.u32 %v174_v27, 16 }
  0x30   : > { %v453_v30 = vsel %vm5747_vm4, %v448_v19, %v452_v7  ;;  %v543_v35 = vor.u32 %v542_v23, %v539_v22  ;;  %v552_v36 = vrot.slane %v550_v25, 4  ;;  %v558_v40 = vrot.slane %v556_v26, 5  ;;  %v215_v22 = vld [vmem:[%s5735_s27 + $0x80] sm:$0x1] }
  0x31   : > { %v628_v34 = vunpack.c.l.b16 %v453_v30  ;;  %4976 = vmatmul.msk.bf16.gmra.mxu1 %vm658_vm5, %v647_v28  ;;  %v463_v38 = vsel %vm5747_vm4, %v458_v31, %v462_v12  ;;  %v252_v42 = vshll.u32 %v174_v27, 16  ;;  %v258_v46 = vshll.u32 %v5806_v33, 16 }
  0x32   : > { %v629_v43 = vunpack.c.l.b16 %v463_v38  ;;  %v544_v44 = vrot.slane %v543_v35, 4  ;;  %v553_v45 = vor.u32 %v552_v36, %v548_v32  ;;  %v251_v48 = vrot.slane %v249_v41, 4  ;;  %v200_v41 = vld [vmem:[%s5735_s27 + $0xa8] sm:$0xf] }
  0x33   : > { %v254_v49 = vrot.slane %v252_v42, 5  ;;  %v262_v50 = vshrl.u32 %v5806_v33, 16  ;;  %v268_v51 = vshll.u32 %v5809_v37, 16  ;;  %v260_v56 = vrot.slane %v258_v46, 5  ;;  %v219_v46 = vld [vmem:[%s5735_s27 + $0xb0] sm:$0x1] }
  0x34   : > { %v651_v53 = vpack.c.b16 %v629_v43, %v628_v34  ;;  %v549_v54 = vsel %vm5747_vm4, %v544_v44, %v548_v32  ;;  %v554_v55 = vrot.slane %v553_v45, 4  ;;  %v369_v63 = vshrl.u32 %v184_v47, 16  ;;  %v201_v45 = vld [vmem:[%s5735_s27 + $0xac] sm:$0xf] }
  0x35   : > { %v636_v57 = vunpack.c.l.b16 %v549_v54  ;;  %v255_v58 = vor.u32 %v254_v49, %v251_v48  ;;  %v264_v59 = vrot.slane %v262_v50, 4  ;;  %v270_v60 = vrot.slane %v268_v51, 5 }
  0x36   : > { %4980 = vmatmul.msk.bf16.gmra.mxu2 %vm658_vm5, %v651_v53  ;;  %v559_v62 = vsel %vm5747_vm4, %v554_v55, %v558_v40  ;;  %v372_v0 = vshll.u32 %v184_v47, 16  ;;  %v378_v1 = vshll.u32 %v5819_v52, 16  ;;  %v382_v8 = vshrl.u32 %v5819_v52, 16 }
  0x37   : > { %v637_v2 = vunpack.c.l.b16 %v559_v62  ;;  %v256_v4 = vrot.slane %v255_v58, 4  ;;  %v265_v7 = vor.u32 %v264_v59, %v260_v56  ;;  %v371_v10 = vrot.slane %v369_v63, 4 }
  0x38   : > { %v374_v11 = vrot.slane %v372_v0, 5  ;;  %v380_v12 = vrot.slane %v378_v1, 5  ;;  %v388_v13 = vshll.u32 %v5824_v61, 16  ;;  %v384_v18 = vrot.slane %v382_v8, 4  ;;  %v176_v1 = vld [vmem:[%s5735_s27 + $0x18] sm:$0xf] }
  0x39   : > { %v655_v15 = vpack.c.b16 %v637_v2, %v636_v57  ;;  %v261_v16 = vsel %vm5747_vm4, %v256_v4, %v260_v56  ;;  %v266_v17 = vrot.slane %v265_v7, 4  ;;  %v465_v23 = vshrl.u32 %v192_v9, 16  ;;  %v5852_v8 = vld [vmem:[%s5735_s27 + $0x1c] sm:$0xf] }
  0x3a   : > { %v612_v19 = vunpack.c.l.b16 %v261_v16  ;;  %v375_v20 = vor.u32 %v374_v11, %v371_v10  ;;  %v390_v21 = vrot.slane %v388_v13, 5  ;;  %v385_v26 = vor.u32 %v384_v18, %v380_v12 }
  0x3b   : > { %4984 = vmatmul.msk.bf16.gmra.mxu3 %vm658_vm5, %v655_v15  ;;  %v271_v25 = vsel %vm5747_vm4, %v266_v17, %v270_v60  ;;  %v468_v27 = vshll.u32 %v192_v9, 16  ;;  %v474_v28 = vshll.u32 %v193_v14, 16  ;;  %v467_v32 = vrot.slane %v465_v23, 4  ;;  %v5855_v9 = vld [vmem:[%s5735_s27 + $0x20] sm:$0x1] }
  0x3c   : > { %v613_v30 = vunpack.c.l.b16 %v271_v25  ;;  %v376_v31 = vrot.slane %v375_v20, 4  ;;  %v478_v34 = vshrl.u32 %v193_v14, 16  ;;  %v386_v35 = vrot.slane %v385_v26, 4 }
  0x3d   : > { %v470_v36 = vrot.slane %v468_v27, 5  ;;  %v476_v38 = vrot.slane %v474_v28, 5  ;;  %v484_v40 = vshll.u32 %v215_v22, 16  ;;  %v561_v54 = vshrl.u32 %v200_v41, 16  ;;  %v186_v22 = vld [vmem:[%s5735_s27 + $0x54] sm:$0xf] }
  0x3e   : > { %v643_v42 = vpack.c.b16 %v613_v30, %v612_v19  ;;  %v381_v43 = vsel %vm5747_vm4, %v376_v31, %v380_v12  ;;  %v480_v44 = vrot.slane %v478_v34, 4  ;;  %v391_v47 = vsel %vm5747_vm4, %v386_v35, %v390_v21  ;;  %v5865_v28 = vld [vmem:[%s5735_s27 + $0x58] sm:$0xf]  ;;  %v5870_v35 = vld [vmem:[%s5735_s27 + $0x5c] sm:$0x1] }
  0x3f   : > { %v622_v48 = vunpack.c.l.b16 %v381_v43  ;;  %v471_v49 = vor.u32 %v470_v36, %v467_v32  ;;  %v486_v50 = vrot.slane %v484_v40, 5  ;;  %v623_v51 = vunpack.c.l.b16 %v391_v47 }
  0x40   : > { %4972 = vmatmul.msk.bf16.gmra.mxu0 %vm658_vm5, %v643_v42  ;;  %v481_v53 = vor.u32 %v480_v44, %v476_v38  ;;  %v564_v55 = vshll.u32 %v200_v41, 16  ;;  %v570_v57 = vshll.u32 %v201_v45, 16  ;;  %v574_v58 = vshrl.u32 %v201_v45, 16 }
  0x41   : > { %v472_v56 = vrot.slane %v471_v49, 4  ;;  %v580_v59 = vshll.u32 %v219_v46, 16  ;;  %v648_v60 = vpack.c.b16 %v623_v51, %v622_v48  ;;  %v563_v63 = vrot.slane %v561_v54, 4  ;;  %v194_v46 = vld [vmem:[%s5735_s27 + $0x84] sm:$0xf] }
  0x42   : > { %v482_v62 = vrot.slane %v481_v53, 4  ;;  %v566_v0 = vrot.slane %v564_v55, 5  ;;  %v572_v4 = vrot.slane %v570_v57, 5  ;;  %v576_v7 = vrot.slane %v574_v58, 4 }
  0x43   : > { %v477_v2 = vsel %vm5747_vm4, %v472_v56, %v476_v38  ;;  %4977 = vmatmul.msk.bf16.gmra.mxu1 %vm658_vm5, %v648_v60  ;;  %v582_v13 = vrot.slane %v580_v59, 5  ;;  %v273_v16 = vshrl.u32 %v176_v1, 16  ;;  %v276_v17 = vshll.u32 %v176_v1, 16  ;;  %v195_v56 = vld [vmem:[%s5735_s27 + $0x88] sm:$0xf] }
  0x44   : > { %v487_v10 = vsel %vm5747_vm4, %v482_v62, %v486_v50  ;;  %v630_v11 = vunpack.c.l.b16 %v477_v2  ;;  %v567_v12 = vor.u32 %v566_v0, %v563_v63  ;;  %v577_v15 = vor.u32 %v576_v7, %v572_v4  ;;  %v216_v60 = vld [vmem:[%s5735_s27 + $0x8c] sm:$0x1] }
  0x45   : > { %v631_v14 = vunpack.c.l.b16 %v487_v10  ;;  %v282_v19 = vshll.u32 %v5852_v8, 16  ;;  %v286_v20 = vshrl.u32 %v5852_v8, 16  ;;  %v292_v21 = vshll.u32 %v5855_v9, 16 }
  0x46   : > { %v568_v18 = vrot.slane %v567_v12, 4  ;;  %v578_v25 = vrot.slane %v577_v15, 4  ;;  %v275_v26 = vrot.slane %v273_v16, 4  ;;  %v278_v27 = vrot.slane %v276_v17, 5  ;;  %v202_v16 = vld [vmem:[%s5735_s27 + $0xb4] sm:$0xf] }
  0x47   : > { %v652_v23 = vpack.c.b16 %v631_v14, %v630_v11  ;;  %v284_v31 = vrot.slane %v282_v19, 5  ;;  %v288_v32 = vrot.slane %v286_v20, 4  ;;  %v294_v34 = vrot.slane %v292_v21, 5  ;;  %v203_v20 = vld [vmem:[%s5735_s27 + $0xb8] sm:$0xf] }
  0x48   : > { %v573_v30 = vsel %vm5747_vm4, %v568_v18, %v572_v4  ;;  %v583_v36 = vsel %vm5747_vm4, %v578_v25, %v582_v13  ;;  %v279_v40 = vor.u32 %v278_v27, %v275_v26  ;;  %v393_v41 = vshrl.u32 %v186_v22, 16  ;;  %v220_v26 = vld [vmem:[%s5735_s27 + $0xbc] sm:$0x1] }
  0x49   : > { %4981 = vmatmul.msk.bf16.gmra.mxu2 %vm658_vm5, %v652_v23  ;;  %v638_v38 = vunpack.c.l.b16 %v573_v30  ;;  %v639_v42 = vunpack.c.l.b16 %v583_v36  ;;  %v289_v43 = vor.u32 %v288_v32, %v284_v31  ;;  %v396_v44 = vshll.u32 %v186_v22, 16 }
  0x4a   : > { %v402_v45 = vshll.u32 %v5865_v28, 16  ;;  %v280_v47 = vrot.slane %v279_v40, 4  ;;  %v395_v48 = vrot.slane %v393_v41, 4  ;;  %v406_v49 = vshrl.u32 %v5865_v28, 16 }
  0x4b   : > { %v412_v50 = vshll.u32 %v5870_v35, 16  ;;  %v656_v51 = vpack.c.b16 %v639_v42, %v638_v38  ;;  %v290_v53 = vrot.slane %v289_v43, 4  ;;  %v398_v54 = vrot.slane %v396_v44, 5 }
  0x4c   : > { %v404_v55 = vrot.slane %v402_v45, 5  ;;  %v285_v57 = vsel %vm5747_vm4, %v280_v47, %v284_v31  ;;  %v408_v58 = vrot.slane %v406_v49, 4  ;;  %v489_v62 = vshrl.u32 %v194_v46, 16  ;;  %v178_v45 = vld [vmem:[%s5735_s27 + $0x24] sm:$0xf] }
  0x4d   : > { %v414_v59 = vrot.slane %v412_v50, 5  ;;  %4985 = vmatmul.msk.bf16.gmra.mxu3 %vm658_vm5, %v656_v51  ;;  %v295_v63 = vsel %vm5747_vm4, %v290_v53, %v294_v34  ;;  %v614_v0 = vunpack.c.l.b16 %v285_v57  ;;  %v399_v1 = vor.u32 %v398_v54, %v395_v48  ;;  %v5898_v50 = vld [vmem:[%s5735_s27 + $0x28] sm:$0xf] }
  0x4e   : > { %v492_v2 = vshll.u32 %v194_v46, 16  ;;  %v615_v4 = vunpack.c.l.b16 %v295_v63  ;;  %v409_v7 = vor.u32 %v408_v58, %v404_v55  ;;  %v491_v10 = vrot.slane %v489_v62, 4 }
  0x4f   : > { %v498_v11 = vshll.u32 %v195_v56, 16  ;;  %v400_v12 = vrot.slane %v399_v1, 4  ;;  %v502_v14 = vshrl.u32 %v195_v56, 16  ;;  %v508_v15 = vshll.u32 %v216_v60, 16  ;;  %v5902_v56 = vld [vmem:[%s5735_s27 + $0x2c] sm:$0x1] }
  0x50   : > { %v494_v13 = vrot.slane %v492_v2, 5  ;;  %v644_v17 = vpack.c.b16 %v615_v4, %v614_v0  ;;  %v410_v18 = vrot.slane %v409_v7, 4  ;;  %v585_v31 = vshrl.u32 %v202_v16, 16 }
  0x51   : > { %v500_v19 = vrot.slane %v498_v11, 5  ;;  %v405_v21 = vsel %vm5747_vm4, %v400_v12, %v404_v55  ;;  %v504_v23 = vrot.slane %v502_v14, 4  ;;  %v510_v25 = vrot.slane %v508_v15, 5  ;;  %v5213_v15 = vld [vmem:[%s5735_s27 + $0xc] sm:$0xf] }
  0x52   : > { %v495_v22 = vor.u32 %v494_v13, %v491_v10  ;;  %4973 = vmatmul.msk.bf16.gmra.mxu0 %vm658_vm5, %v644_v17  ;;  %v415_v27 = vsel %vm5747_vm4, %v410_v18, %v414_v59  ;;  %v624_v30 = vunpack.c.l.b16 %v405_v21  ;;  %v588_v32 = vshll.u32 %v202_v16, 16  ;;  %v1023_v10 = vld [vmem:[%s5735_s27] sm:$0xe]  ;;  %v5214_v21 = vld [vmem:[%s5735_s27 + $0x10] sm:$0xf] }
  0x53   : > { %v625_v34 = vunpack.c.l.b16 %v415_v27  ;;  %v505_v38 = vor.u32 %v504_v23, %v500_v19  ;;  %v594_v40 = vshll.u32 %v203_v20, 16  ;;  %v587_v41 = vrot.slane %v585_v31, 4 }
  0x54   : > { %v496_v36 = vrot.slane %v495_v22, 4  ;;  %v590_v42 = vrot.slane %v588_v32, 5  ;;  %v598_v43 = vshrl.u32 %v203_v20, 16  ;;  %v604_v44 = vshll.u32 %v220_v26, 16  ;;  %v5359_v20 = vld [vmem:[%s7372_s1 + $0xc] sm:$0x3] }
  0x55   : > { %v649_v46 = vpack.c.b16 %v625_v34, %v624_v30  ;;  %v506_v48 = vrot.slane %v505_v38, 4  ;;  %v596_v49 = vrot.slane %v594_v40, 5  ;;  %v1079_v51 = vrot.slane %v5763_v6, 5 }
  0x56   : > { %v501_v47 = vsel %vm5747_vm4, %v496_v36, %v500_v19  ;;  %v591_v54 = vor.u32 %v590_v42, %v587_v41  ;;  %v600_v55 = vrot.slane %v598_v43, 4  ;;  %v606_v58 = vrot.slane %v604_v44, 5 }
  0x57   : > { %v632_v53 = vunpack.c.l.b16 %v501_v47  ;;  %4978 = vmatmul.msk.bf16.gmra.mxu1 %vm658_vm5, %v649_v46  ;;  %v511_v57 = vsel %vm5747_vm4, %v506_v48, %v510_v25  ;;  %v297_v59 = vshrl.u32 %v178_v45, 16  ;;  %v300_v60 = vshll.u32 %v178_v45, 16  ;;  %v5215_v47 = vld [vmem:[%s5735_s27 + $0x14] sm:$0x1] }
  0x58   : > { %v633_v62 = vunpack.c.l.b16 %v511_v57  ;;  %v592_v63 = vrot.slane %v591_v54, 4  ;;  %v601_v0 = vor.u32 %v600_v55, %v596_v49  ;;  %v306_v6 = vshll.u32 %v5898_v50, 16  ;;  %v5488_v55 = vld [vmem:[%s7372_s1 + $0xe] sm:$0x3] }
  0x59   : > { %v299_v1 = vrot.slane %v297_v59, 4  ;;  %v302_v2 = vrot.slane %v300_v60, 5  ;;  %v310_v4 = vshrl.u32 %v5898_v50, 16  ;;  %v316_v7 = vshll.u32 %v5902_v56, 16  ;;  %v5310_v59 = vld [vmem:[%s7372_s1 + $0xa] sm:$0x3] }
  0x5a   : > { %v653_v11 = vpack.c.b16 %v633_v62, %v632_v53  ;;  %v597_v12 = vsel %vm5747_vm4, %v592_v63, %v596_v49  ;;  %v602_v13 = vrot.slane %v601_v0, 4  ;;  %v308_v14 = vrot.slane %v306_v6, 5  ;;  %v5557_v60 = vld [vmem:[%s5735_s27] sm:$0xff] }
  0x5b   : > { %v640_v16 = vunpack.c.l.b16 %v597_v12  ;;  %v303_v17 = vor.u32 %v302_v2, %v299_v1  ;;  %v312_v18 = vrot.slane %v310_v4, 4  ;;  %v318_v19 = vrot.slane %v316_v7, 5  ;;  %v5537_v1 = vld [vmem:[%s7372_s1 + $0x10] sm:$0x3] }
  0x5c   : > { %4982 = vmatmul.msk.bf16.gmra.mxu2 %vm658_vm5, %v653_v11  ;;  %v607_v22 = vsel %vm5747_vm4, %v602_v13, %v606_v58  ;;  %v5067_v23 = vrot.slane %v1023_v10, 9  ;;  %v1076_v31 = vrot.slane %v5760_v5, 5  ;;  %v2911_v32 = vand.u32 %v5359_v20, %v5710_v3 }
  0x5d   : > { %v641_v25 = vunpack.c.l.b16 %v607_v22  ;;  %v304_v26 = vrot.slane %v303_v17, 4  ;;  %v313_v27 = vor.u32 %v312_v18, %v308_v14  ;;  %v1744_v34 = vshrl.u32 %v5213_v15, 16  ;;  %v1024_v18 = vld [vmem:[%s5735_s27 + $0xc] sm:$0xe] }
  0x5e   : > { %v1747_v36 = vshll.u32 %v5213_v15, 16  ;;  %v1753_v38 = vshll.u32 %v5214_v21, 16  ;;  %v1077_v43 = vsel %vm5921_vm8, %v5067_v23, %v1076_v31  ;;  %v1078_v45 = vrot.slane %v1076_v31, 4  ;;  %2920 = vmatpush.bf16.msra.mxu2 %v2911_v32  ;;  %v5216_v15 = vld [vmem:[%s5735_s27 + $0x18] sm:$0xf] }
  0x5f   : > { %v657_v40 = vpack.c.b16 %v641_v25, %v640_v16  ;;  %v309_v41 = vsel %vm5747_vm4, %v304_v26, %v308_v14  ;;  %v314_v42 = vrot.slane %v313_v27, 4  ;;  %v1188_v46 = vunpack.c.l.b16 %v1077_v43  ;;  %v5217_v16 = vld [vmem:[%s5735_s27 + $0x1c] sm:$0xf]  ;;  %v5573_v25 = vld [vmem:[%s5735_s27 + $0xc] sm:$0xff] }
  0x60   : > { %v616_v44 = vunpack.c.l.b16 %v309_v41  ;;  %v1746_v5 = vrot.slane %v1744_v34, 4  ;;  %v1749_v49 = vrot.slane %v1747_v36, 5  ;;  %v1755_v53 = vrot.slane %v1753_v38, 5  ;;  %v5218_v41 = vld [vmem:[%s5735_s27 + $0x20] sm:$0x1] }
  0x61   : > { %4986 = vmatmul.msk.bf16.gmra.mxu3 %vm658_vm5, %v657_v40  ;;  %v319_v48 = vsel %vm5747_vm4, %v314_v42, %v318_v19  ;;  %v1757_v54 = vshrl.u32 %v5214_v21, 16  ;;  %v1080_v58 = vsel %vm5921_vm8, %v1078_v45, %v1079_v51  ;;  %v1763_v6 = vshll.u32 %v5215_v47, 16 }
  0x62   : > { %v617_v57 = vunpack.c.l.b16 %v319_v48  ;;  %v1189_v62 = vunpack.c.l.b16 %v1080_v58  ;;  %v1750_v63 = vor.u32 %v1749_v49, %v1746_v5  ;;  %v3565_v4 = vand.u32 %v5488_v55, %v5710_v3  ;;  %v5219_v55 = vld [vmem:[%s5735_s27 + $0x24] sm:$0xf]  ;;  %v5220_v58 = vld [vmem:[%s5735_s27 + $0x28] sm:$0xf] }
  0x63   : > { %v1759_v0 = vrot.slane %v1757_v54, 4  ;;  %v2624_v10 = vand.u32 %v5310_v59, %v5710_v3  ;;  %v3963_v11 = vand.u32 %v5537_v1, %v5710_v3  ;;  %v1765_v14 = vrot.slane %v1763_v6, 5 }
  0x64   : > { %v645_v2 = vpack.c.b16 %v617_v57, %v616_v44  ;;  %v1220_v51 = vpack.c.b16 %v1189_v62, %v1188_v46  ;;  %3574 = vmatpush.bf16.msra.mxu3 %v3565_v4  ;;  %v1751_v12 = vrot.slane %v1750_v63, 4  ;;  %v1083_v17 = vrot.slane %v5806_v33, 5  ;;  %v1025_v62 = vld [vmem:[%s5735_s27 + $0x18] sm:$0xe] }
  0x65   : > { %v1760_v7 = vor.u32 %v1759_v0, %v1755_v53  ;;  %2633 = vmatpush.bf16.msra.mxu1 %v2624_v10  ;;  %3972 = vmatpush.bf16.msra.mxu0 %v3963_v11  ;;  %v1768_v19 = vshrl.u32 %v5216_v15, 16  ;;  %v1771_v20 = vshll.u32 %v5216_v15, 16  ;;  %v1777_v22 = vshll.u32 %v5217_v16, 16  ;;  %v5574_v4 = vld [vmem:[%s5735_s27 + $0x18] sm:$0xff] }
  0x66   : > { %4974 = vmatmul.msk.bf16.gmra.mxu0 %vm658_vm5, %v645_v2  ;;  %v1756_v21 = vsel %vm5747_vm4, %v1751_v12, %v1755_v53  ;;  %v1781_v23 = vshrl.u32 %v5217_v16, 16  ;;  %v5068_v26 = vrot.slane %v1024_v18, 9  ;;  %v1085_v27 = vrot.slane %v1083_v17, 4  ;;  %v5221_v16 = vld [vmem:[%s5735_s27 + $0x2c] sm:$0x1] }
  0x67   : > { %5051 = vmatmul.msk.bf16.vlgmr.msrb.gmra.mxu1 %vm658_vm5, %v5557_v60  ;;  %v1761_v13 = vrot.slane %v1760_v7, 4  ;;  %v1086_v33 = vrot.slane %v5809_v37, 5  ;;  %v2129_v31 = vunpack.c.l.b16 %v1756_v21  ;;  %v1770_v34 = vrot.slane %v1768_v19, 4  ;;  %v5558_v37 = vld [vmem:[%s5735_s27 + $0xc] sm:$0xff] }
  0x68   : > { %v1773_v36 = vrot.slane %v1771_v20, 5  ;;  %v1779_v38 = vrot.slane %v1777_v22, 5  ;;  %v1783_v40 = vrot.slane %v1781_v23, 4  ;;  %v1084_v42 = vsel %vm5921_vm8, %v5068_v26, %v1083_v17  ;;  %v5223_v26 = vld [vmem:[%s5735_s27 + $0x34] sm:$0xf] }
  0x69   : > { %v1766_v3 = vsel %vm5747_vm4, %v1761_v13, %v1765_v14  ;;  %v1087_v43 = vsel %vm5921_vm8, %v1085_v27, %v1086_v33  ;;  %v1787_v47 = vshll.u32 %v5218_v41, 16  ;;  %v1190_v5 = vunpack.c.l.b16 %v1084_v42 }
  0x6a   : > { %v2130_v32 = vunpack.c.l.b16 %v1766_v3  ;;  %v1774_v45 = vor.u32 %v1773_v36, %v1770_v34  ;;  %v1784_v46 = vor.u32 %v1783_v40, %v1779_v38  ;;  %v1191_v48 = vunpack.c.l.b16 %v1087_v43  ;;  %v1026_v36 = vld [vmem:[%s5735_s27 + $0x24] sm:$0xe] }
  0x6b   : > { %v1789_v54 = vrot.slane %v1787_v47, 5  ;;  %v1090_v59 = vrot.slane %v5852_v8, 5  ;;  %v1792_v63 = vshrl.u32 %v5219_v55, 16  ;;  %v1795_v6 = vshll.u32 %v5219_v55, 16  ;;  %v5224_v55 = vld [vmem:[%s5735_s27 + $0x38] sm:$0x1] }
  0x6c   : > { %5084 = vmatmul.msk.bf16.vlgmr.msrb.gmra.mxu2 %vm658_vm5, %v1220_v51  ;;  %v2161_v44 = vpack.c.b16 %v2130_v32, %v2129_v31  ;;  %v1775_v49 = vrot.slane %v1774_v45, 4  ;;  %v1785_v53 = vrot.slane %v1784_v46, 4  ;;  %v1221_v57 = vpack.c.b16 %v1191_v48, %v1190_v5 }
  0x6d   : > { %v1801_v1 = vshll.u32 %v5220_v58, 16  ;;  %v1805_v2 = vshrl.u32 %v5220_v58, 16  ;;  %v5069_v51 = vrot.slane %v1025_v62, 9  ;;  %v1092_v7 = vrot.slane %v1090_v59, 4 }
  0x6e   : > { %v1780_v60 = vsel %vm5747_vm4, %v1775_v49, %v1779_v38  ;;  %v1790_v0 = vsel %vm5747_vm4, %v1785_v53, %v1789_v54  ;;  %v1093_v8 = vrot.slane %v5855_v9, 5  ;;  %v1794_v12 = vrot.slane %v1792_v63, 4  ;;  %v5559_v9 = vld [vmem:[%s5735_s27 + $0x18] sm:$0xff]  ;;  %v5560_v63 = vld [vmem:[%s5735_s27 + $0x24] sm:$0xff] }
  0x6f   : > { %v2131_v10 = vunpack.c.l.b16 %v1780_v60  ;;  %v2132_v11 = vunpack.c.l.b16 %v1790_v0  ;;  %v1797_v13 = vrot.slane %v1795_v6, 5  ;;  %v1803_v14 = vrot.slane %v1801_v1, 5 }
  0x70   : > { %v1807_v15 = vrot.slane %v1805_v2, 4  ;;  %v1091_v17 = vsel %vm5921_vm8, %v5069_v51, %v1090_v59  ;;  %v1094_v18 = vsel %vm5921_vm8, %v1092_v7, %v1093_v8  ;;  %v1811_v3 = vshll.u32 %v5221_v16, 16  ;;  %v5225_v51 = vld [vmem:[%s5735_s27 + $0x3c] sm:$0xf]  ;;  %v5226_v7 = vld [vmem:[%s5735_s27 + $0x40] sm:$0xf] }
  0x71   : > { %5197 = vmatmul.msk.bf16.vlgmr.msrb.gmra.mxu3 %vm658_vm5, %v5573_v25  ;;  %v2162_v19 = vpack.c.b16 %v2132_v11, %v2131_v10  ;;  %v1798_v20 = vor.u32 %v1797_v13, %v1794_v12  ;;  %v1192_v22 = vunpack.c.l.b16 %v1091_v17  ;;  %v1193_v23 = vunpack.c.l.b16 %v1094_v18  ;;  %v5222_v25 = vld [vmem:[%s5735_s27 + $0x30] sm:$0xf]  ;;  %v5619_v12 = vld [vmem:[%s5735_s27 + $0x34] sm:$0xf] }
  0x72   : > { %v1808_v21 = vor.u32 %v1807_v15, %v1803_v14  ;;  %v1813_v31 = vrot.slane %v1811_v3, 5  ;;  %v1097_v34 = vrot.slane %v5898_v50, 5  ;;  %v1816_v38 = vshrl.u32 %v5222_v25, 16  ;;  %v5575_v50 = vld [vmem:[%s5735_s27 + $0x24] sm:$0xff]  ;;  %v1027_v15 = vld [vmem:[%s5735_s27 + $0x30] sm:$0xe] }
  0x73   : > { %v1799_v27 = vrot.slane %v1798_v20, 4  ;;  %v1222_v32 = vpack.c.b16 %v1193_v23, %v1192_v22  ;;  %v1819_v40 = vshll.u32 %v5222_v25, 16  ;;  %v1825_v41 = vshll.u32 %v5223_v26, 16  ;;  %v5576_v20 = vld [vmem:[%s5735_s27 + $0x30] sm:$0xff]  ;;  %v5620_v23 = vld [vmem:[%s5735_s27 + $0x38] sm:$0x1] }
  0x74   : > { %v1809_v33 = vrot.slane %v1808_v21, 4  ;;  %v1829_v42 = vshrl.u32 %v5223_v26, 16  ;;  %v5070_v45 = vrot.slane %v1026_v36, 9  ;;  %v1100_v46 = vrot.slane %v5902_v56, 5 }
  0x75   : > { %v1804_v43 = vsel %vm5747_vm4, %v1799_v27, %v1803_v14  ;;  %v1818_v47 = vrot.slane %v1816_v38, 4  ;;  %v1821_v5 = vrot.slane %v1819_v40, 5  ;;  %v1827_v48 = vrot.slane %v1825_v41, 5 }
  0x76   : > { %5262 = vmatmul.msk.bf16.vlgmr.msrb.gmra.mxu0 %vm658_vm5, %v2161_v44  ;;  %v1814_v44 = vsel %vm5747_vm4, %v1809_v33, %v1813_v31  ;;  %v1831_v49 = vrot.slane %v1829_v42, 4  ;;  %v2133_v53 = vunpack.c.l.b16 %v1804_v43  ;;  %v1835_v60 = vshll.u32 %v5224_v55, 16  ;;  %v5561_v43 = vld [vmem:[%s5735_s27 + $0x30] sm:$0xff] }
  0x77   : > { %5052 = vmatmul.msk.bf16.gmra.mxu1 %vm658_vm5, %v5558_v37  ;;  %v1099_v37 = vrot.slane %v1097_v34, 4  ;;  %v2134_v54 = vunpack.c.l.b16 %v1814_v44  ;;  %v1822_v56 = vor.u32 %v1821_v5, %v1818_v47  ;;  %v1104_v13 = vrot.slane %v5619_v12, 5 }
  0x78   : > { %v1832_v59 = vor.u32 %v1831_v49, %v1827_v48  ;;  %v1840_v16 = vshrl.u32 %v5225_v51, 16  ;;  %v1843_v17 = vshll.u32 %v5225_v51, 16  ;;  %v1849_v18 = vshll.u32 %v5226_v7, 16 }
  0x79   : > { %v1101_v58 = vsel %vm5921_vm8, %v1099_v37, %v1100_v46  ;;  %v2163_v62 = vpack.c.b16 %v2134_v54, %v2133_v53  ;;  %v1823_v1 = vrot.slane %v1822_v56, 4  ;;  %v5071_v3 = vrot.slane %v1027_v15, 9  ;;  %v5228_v53 = vld [vmem:[%s5735_s27 + $0x48] sm:$0xf]  ;;  %v5229_v54 = vld [vmem:[%s5735_s27 + $0x4c] sm:$0xf] }
  0x7a   : > { %v1195_v6 = vunpack.c.l.b16 %v1101_v58  ;;  %v1833_v2 = vrot.slane %v1832_v59, 4  ;;  %v1106_v22 = vrot.slane %v1104_v13, 4  ;;  %v1107_v25 = vrot.slane %v5620_v23, 5  ;;  %v1028_v59 = vld [vmem:[%s5735_s27 + $0x3c] sm:$0xe] }
  0x7b   : > { %v1828_v10 = vsel %vm5747_vm4, %v1823_v1, %v1827_v48  ;;  %v1842_v26 = vrot.slane %v1840_v16, 4  ;;  %v1845_v27 = vrot.slane %v1843_v17, 5  ;;  %v1851_v33 = vrot.slane %v1849_v18, 5  ;;  %v5230_v15 = vld [vmem:[%s5735_s27 + $0x50] sm:$0x1] }
  0x7c   : > { %5085 = vmatmul.msk.bf16.gmra.mxu2 %vm658_vm5, %v1221_v57  ;;  %v1098_v57 = vsel %vm5921_vm8, %v5070_v45, %v1097_v34  ;;  %v1105_v34 = vsel %vm5921_vm8, %v5071_v3, %v1104_v13  ;;  %v1108_v36 = vsel %vm5921_vm8, %v1106_v22, %v1107_v25  ;;  %v1883_v3 = vshll.u32 %v5230_v15, 16  ;;  %v5231_v25 = vld [vmem:[%s5735_s27 + $0x54] sm:$0xf] }
  0x7d   : > { %v1194_v0 = vunpack.c.l.b16 %v1098_v57  ;;  %v1846_v40 = vor.u32 %v1845_v27, %v1842_v26  ;;  %v1196_v45 = vunpack.c.l.b16 %v1105_v34  ;;  %v1197_v37 = vunpack.c.l.b16 %v1108_v36  ;;  %v5232_v26 = vld [vmem:[%s5735_s27 + $0x58] sm:$0xf] }
  0x7e   : > { %v1111_v57 = vrot.slane %v5775_v24, 5  ;;  %v1114_v24 = vrot.slane %v5780_v29, 5  ;;  %vm4830_vm12 = vcmask 1042434   ;;  %vm4832_vm13 = vcmask 1043459  }
  0x7f   : > { %v1223_v8 = vpack.c.b16 %v1195_v6, %v1194_v0  ;;  %v1224_v49 = vpack.c.b16 %v1197_v37, %v1196_v45  ;;  %v1877_v0 = vshrl.u32 %v5229_v54, 16  ;;  %v5577_v6 = vld [vmem:[%s5735_s27 + $0x3c] sm:$0xff]  ;;  %v1029_v45 = vld [vmem:[%s5735_s27 + $0x48] sm:$0xe]  ;;  %vm4834_vm14 = vcmask 1044484  }
  0x80   : > { %vm4836_vm15 = vcmask 1045509   ;;  %vm4838_vm0 = vcmask 1046534   ;;  %vm4840_vm1 = vcmask 1047559  }
  0x81   : > { %5198 = vmatmul.msk.bf16.gmra.mxu3 %vm658_vm5, %v5574_v4  ;;  %v1837_v4 = vrot.slane %v1835_v60, 5  ;;  %v1864_v60 = vshrl.u32 %v5228_v53, 16  ;;  %v1879_v13 = vrot.slane %v1877_v0, 4 }
  0x83   : > { %v1838_v11 = vsel %vm5747_vm4, %v1833_v2, %v1837_v4  ;;  %v5072_v2 = vrot.slane %v1028_v59, 9  ;;  %v1113_v4 = vrot.slane %v1111_v57, 4 }
  0x84   : > { %v2136_v21 = vunpack.c.l.b16 %v1838_v11 }
  0x85   : > { %v1112_v16 = vsel %vm5921_vm8, %v5072_v2, %v1111_v57  ;;  %v1115_v17 = vsel %vm5921_vm8, %v1113_v4, %v1114_v24 }
  0x86   : > { %5263 = vmatmul.msk.bf16.gmra.mxu0 %vm658_vm5, %v2162_v19  ;;  %v1853_v19 = vshrl.u32 %v5226_v7, 16  ;;  %v1198_v22 = vunpack.c.l.b16 %v1112_v16  ;;  %v1199_v23 = vunpack.c.l.b16 %v1115_v17 }
  0x87   : > { %5053 = vmatmul.msk.bf16.gmra.mxu1 %vm658_vm5, %v5559_v9  ;;  %v2135_v9 = vunpack.c.l.b16 %v1828_v10  ;;  %v1866_v10 = vrot.slane %v1864_v60, 4 }
  0x88   : > { %v1855_v31 = vrot.slane %v1853_v19, 4  ;;  %v1225_v34 = vpack.c.b16 %v1199_v23, %v1198_v22  ;;  %v1125_v23 = vrot.slane %v5865_v28, 5  ;;  %v1128_v28 = vrot.slane %v5870_v35, 5 }
  0x89   : > { %v2164_v38 = vpack.c.b16 %v2136_v21, %v2135_v9  ;;  %v5562_v9 = vld [vmem:[%s5735_s27 + $0x3c] sm:$0xff] }
  0x8a   : > { %v1856_v41 = vor.u32 %v1855_v31, %v1851_v33 }
  0x8c   : > { %5086 = vmatmul.msk.bf16.gmra.mxu2 %vm658_vm5, %v1222_v32  ;;  %v5227_v32 = vld [vmem:[%s5735_s27 + $0x44] sm:$0x1]  ;;  %v1857_v47 = vrot.slane %v1856_v41, 4  ;;  %v1897_v41 = vshll.u32 %v5232_v26, 16 }
  0x8d   : > { %v1859_v42 = vshll.u32 %v5227_v32, 16  ;;  %v1885_v32 = vrot.slane %v1883_v3, 5 }
  0x8f   : > { %v1861_v5 = vrot.slane %v1859_v42, 5  ;;  %v1118_v42 = vrot.slane %v5819_v52, 5  ;;  %v5073_v52 = vrot.slane %v1029_v45, 9  ;;  %v1127_v45 = vrot.slane %v1125_v23, 4 }
  0x91   : > { %5199 = vmatmul.msk.bf16.gmra.mxu3 %vm658_vm5, %v5575_v50  ;;  %v1847_v50 = vrot.slane %v1846_v40, 4  ;;  %v1862_v56 = vsel %vm5747_vm4, %v1857_v47, %v1861_v5  ;;  %v1891_v40 = vshll.u32 %v5231_v25, 16  ;;  %v1119_v4 = vsel %vm5921_vm8, %v5073_v52, %v1118_v42 }
  0x92   : > { %v2138_v7 = vunpack.c.l.b16 %v1862_v56  ;;  %v1121_v56 = vrot.slane %v5824_v61, 5 }
  0x93   : > { %v1852_v58 = vsel %vm5747_vm4, %v1847_v50, %v1851_v33 }
  0x94   : > { %v2137_v51 = vunpack.c.l.b16 %v1852_v58  ;;  %v1120_v58 = vrot.slane %v1118_v42, 4 }
  0x96   : > { %5264 = vmatmul.msk.bf16.gmra.mxu0 %vm658_vm5, %v2163_v62  ;;  %v1867_v62 = vshll.u32 %v5228_v53, 16  ;;  %v2165_v29 = vpack.c.b16 %v2138_v7, %v2137_v51  ;;  %v1899_v53 = vrot.slane %v1897_v41, 5  ;;  %v1122_v24 = vsel %vm5921_vm8, %v1120_v58, %v1121_v56  ;;  %v5579_v41 = vld [vmem:[%s5735_s27 + $0x54] sm:$0xff] }
  0x97   : > { %5054 = vmatmul.msk.bf16.gmra.mxu1 %vm658_vm5, %v5560_v63  ;;  %v1873_v63 = vshll.u32 %v5229_v54, 16  ;;  %v5578_v54 = vld [vmem:[%s5735_s27 + $0x48] sm:$0xff]  ;;  %v1129_v56 = vsel %vm5921_vm8, %v1127_v45, %v1128_v28 }
  0x98   : > { %v1869_v11 = vrot.slane %v1867_v62, 5 }
  0x99   : > { %v1875_v12 = vrot.slane %v1873_v63, 5  ;;  %v5233_v63 = vld [vmem:[%s5735_s27 + $0x5c] sm:$0x1] }
  0x9a   : > { %v1907_v51 = vshll.u32 %v5233_v63, 16  ;;  %v5564_v63 = vld [vmem:[%s5735_s27 + $0x54] sm:$0xff] }
  0x9b   : > { %v1880_v21 = vor.u32 %v1879_v13, %v1875_v12 }
  0x9c   : > { %v6019_v14 = vpop.f32.mrf.mxu1  ;;  %5087 = vmatmul.msk.bf16.gmra.mxu2 %vm658_vm5, %v1223_v8  ;;  %v1909_v17 = vrot.slane %v1907_v51, 5 }
  0x9d   : > { %v1881_v31 = vrot.slane %v1880_v21, 4 }
  0x9f   : > { %v1886_v50 = vsel %vm5747_vm4, %v1881_v31, %v1885_v32 }
  0xa0   : > { %v2140_v62 = vunpack.c.l.b16 %v1886_v50 }
  0xa1   : > { %5200 = vmatmul.msk.bf16.gmra.mxu3 %vm658_vm5, %v5576_v20  ;;  %v1870_v20 = vor.u32 %v1869_v11, %v1866_v10  ;;  %v5563_v10 = vld [vmem:[%s5735_s27 + $0x48] sm:$0xff]  ;;  %v1200_v11 = vunpack.c.l.b16 %v1119_v4 }
  0xa3   : > { %v1871_v33 = vrot.slane %v1870_v20, 4  ;;  %v5235_v20 = vld [vmem:[%s5735_s27 + $0x64] sm:$0xf] }
  0xa4   : > { %v6032_v44 = vpop.f32.mrf.mxu1  ;;  %v1921_v32 = vshll.u32 %v5235_v20, 16 }
  0xa5   : > { %v1876_v37 = vsel %vm5747_vm4, %v1871_v33, %v1875_v12  ;;  %v1201_v12 = vunpack.c.l.b16 %v1122_v24  ;;  %v1203_v24 = vunpack.c.l.b16 %v1129_v56 }
  0xa6   : > { %v6034_v46 = vpop.f32.mrf.mxu2  ;;  %5265 = vmatmul.msk.bf16.gmra.mxu0 %vm658_vm5, %v2164_v38  ;;  %v1888_v38 = vshrl.u32 %v5231_v25, 16  ;;  %v2139_v60 = vunpack.c.l.b16 %v1876_v37 }
  0xa7   : > { %5055 = vmatmul.msk.bf16.gmra.mxu1 %vm658_vm5, %v5561_v43  ;;  %v1901_v43 = vshrl.u32 %v5232_v26, 16  ;;  %v1226_v21 = vpack.c.b16 %v1201_v12, %v1200_v11  ;;  %v1030_v26 = vld [vmem:[%s5735_s27 + $0x54] sm:$0xe]  ;;  %v5237_v12 = vld [vmem:[%s5735_s27 + $0x6c] sm:$0xf] }
  0xa8   : > { %v1890_v5 = vrot.slane %v1888_v38, 4  ;;  %v2166_v7 = vpack.c.b16 %v2140_v62, %v2139_v60 }
  0xa9   : > { %v6038_v48 = vpop.f32.mrf.mxu0  ;;  %v1903_v59 = vrot.slane %v1901_v43, 4  ;;  %v5074_v43 = vrot.slane %v1030_v26, 9  ;;  %v1939_v26 = vshll.u32 %v5237_v12, 16 }
  0xaa   : > { %v6042_v55 = vpop.f32.mrf.mxu3 }
  0xab   : > { %v1904_v61 = vor.u32 %v1903_v59, %v1899_v53  ;;  %v1126_v58 = vsel %vm5921_vm8, %v5074_v43, %v1125_v23  ;;  %v1936_v23 = vshrl.u32 %v5237_v12, 16 }
  0xac   : > { %5088 = vmatmul.msk.bf16.gmra.mxu2 %vm658_vm5, %v1224_v49  ;;  %v1893_v49 = vrot.slane %v1891_v40, 5  ;;  %v1202_v4 = vunpack.c.l.b16 %v1126_v58  ;;  %v5239_v58 = vld [vmem:[%s5735_s27 + $0x74] sm:$0x1] }
  0xad   : > { %v1905_v16 = vrot.slane %v1904_v61, 4 }
  0xae   : > { %v6052_v1 = vpop.f32.mrf.mxu1  ;;  %v6055_v8 = vpop.f32.mrf.mxu2  ;;  %v1227_v11 = vpack.c.b16 %v1203_v24, %v1202_v4  ;;  %v1955_v24 = vshll.u32 %v5239_v58, 16  ;;  %v5581_v58 = vld [vmem:[%s5735_s27 + $0x6c] sm:$0xff] }
  0xaf   : > { %v1910_v22 = vsel %vm5747_vm4, %v1905_v16, %v1909_v17  ;;  %v5621_v17 = vld [vmem:[%s5735_s27 + $0x64] sm:$0xf] }
  0xb0   : > { %v2142_v42 = vunpack.c.l.b16 %v1910_v22  ;;  %v1031_v22 = vld [vmem:[%s5735_s27 + $0x60] sm:$0xe] }
  0xb1   : > { %5201 = vmatmul.msk.bf16.gmra.mxu3 %vm658_vm5, %v5577_v6  ;;  %v6063_v18 = vpop.f32.mrf.mxu0  ;;  %v1894_v6 = vor.u32 %v1893_v49, %v1890_v5  ;;  %v1923_v5 = vrot.slane %v1921_v32, 5 }
  0xb2   : > { %v6065_v19 = vpop.f32.mrf.mxu3 }
  0xb3   : > { %v1895_v15 = vrot.slane %v1894_v6, 4 }
  0xb5   : > { %v1900_v3 = vsel %vm5747_vm4, %v1895_v15, %v1899_v53  ;;  %v5238_v15 = vld [vmem:[%s5735_s27 + $0x70] sm:$0xf] }
  0xb6   : > { %5266 = vmatmul.msk.bf16.gmra.mxu0 %vm658_vm5, %v2165_v29  ;;  %v6071_v27 = vpop.f32.mrf.mxu1  ;;  %v2141_v40 = vunpack.c.l.b16 %v1900_v3 }
  0xb7   : > { %5056 = vmatmul.msk.bf16.gmra.mxu1 %vm658_vm5, %v5562_v9  ;;  %v5234_v9 = vld [vmem:[%s5735_s27 + $0x60] sm:$0xf] }
  0xb8   : > { %v1912_v33 = vshrl.u32 %v5234_v9, 16  ;;  %v1915_v31 = vshll.u32 %v5234_v9, 16  ;;  %v2167_v59 = vpack.c.b16 %v2142_v42, %v2141_v40  ;;  %v1132_v9 = vrot.slane %v5621_v17, 5 }
  0xb9   : > { %v6074_v36 = vpop.f32.mrf.mxu2  ;;  %v5075_v42 = vrot.slane %v1031_v22, 9 }
  0xba   : > { %v1914_v37 = vrot.slane %v1912_v33, 4  ;;  %v1917_v50 = vrot.slane %v1915_v31, 5  ;;  %v1945_v33 = vshll.u32 %v5238_v15, 16  ;;  %v1949_v31 = vshrl.u32 %v5238_v15, 16 }
  0xbb   : > { %v1134_v43 = vrot.slane %v1132_v9, 4  ;;  %v1133_v56 = vsel %vm5921_vm8, %v5075_v42, %v1132_v9 }
  0xbc   : > { %5089 = vmatmul.msk.bf16.gmra.mxu2 %vm658_vm5, %v1225_v34  ;;  %v1925_v34 = vshrl.u32 %v5235_v20, 16  ;;  %v1918_v35 = vor.u32 %v1917_v50, %v1914_v37  ;;  %v1938_v50 = vrot.slane %v1936_v23, 4  ;;  %v5241_v23 = vld [vmem:[%s5735_s27 + $0x7c] sm:$0xf] }
  0xbd   : > { %v6082_v47 = vpop.f32.mrf.mxu0 }
  0xbe   : > { %v6086_v57 = vpop.f32.mrf.mxu3  ;;  %v1927_v49 = vrot.slane %v1925_v34, 4  ;;  %v1919_v51 = vrot.slane %v1918_v35, 4  ;;  %v5622_v34 = vld [vmem:[%s5735_s27 + $0x68] sm:$0x1] }
  0xbf   : > { %v1135_v40 = vrot.slane %v5622_v34, 5 }
  0xc0   : > { %v6090_v0 = vpop.f32.mrf.mxu1  ;;  %v1928_v60 = vor.u32 %v1927_v49, %v1923_v5  ;;  %v1947_v49 = vrot.slane %v1945_v33, 5 }
  0xc1   : > { %5202 = vmatmul.msk.bf16.gmra.mxu3 %vm658_vm5, %v5578_v54  ;;  %v6093_v2 = vpop.f32.mrf.mxu2  ;;  %v5236_v54 = vld [vmem:[%s5735_s27 + $0x68] sm:$0x1] }
  0xc2   : > { %v1931_v62 = vshll.u32 %v5236_v54, 16  ;;  %v1951_v54 = vrot.slane %v1949_v31, 4  ;;  %v1032_v31 = vld [vmem:[%s5735_s27 + $0x6c] sm:$0xe] }
  0xc4   : > { %v1952_v4 = vor.u32 %v1951_v54, %v1947_v49 }
  0xc5   : > { %v6100_v13 = vpop.f32.mrf.mxu0 }
  0xc6   : > { %5267 = vmatmul.msk.bf16.gmra.mxu0 %vm658_vm5, %v2166_v7  ;;  %v6103_v29 = vpop.f32.mrf.mxu3  ;;  %v1929_v7 = vrot.slane %v1928_v60, 4  ;;  %v1953_v9 = vrot.slane %v1952_v4, 4 }
  0xc7   : > { %5057 = vmatmul.msk.bf16.gmra.mxu1 %vm658_vm5, %v5563_v10  ;;  %v1933_v10 = vrot.slane %v1931_v62, 5  ;;  %v5565_v62 = vld [vmem:[%s5735_s27 + $0x60] sm:$0xff] }
  0xc8   : > { %v6113_v25 = vpop.f32.mrf.mxu1 }
  0xc9   : > { %v1934_v3 = vsel %vm5747_vm4, %v1929_v7, %v1933_v10  ;;  %v1204_v10 = vunpack.c.l.b16 %v1133_v56 }
  0xca   : > { %v2144_v28 = vunpack.c.l.b16 %v1934_v3  ;;  %v5240_v3 = vld [vmem:[%s5735_s27 + $0x78] sm:$0xf] }
  0xcb   : > { %v1960_v34 = vshrl.u32 %v5240_v3, 16 }
  0xcc   : > { %v6116_v38 = vpop.f32.mrf.mxu2  ;;  %5090 = vmatmul.msk.bf16.gmra.mxu2 %vm658_vm5, %v1226_v21  ;;  %v1924_v21 = vsel %vm5747_vm4, %v1919_v51, %v1923_v5  ;;  %v1941_v5 = vrot.slane %v1939_v26, 5  ;;  %v5623_v26 = vld [vmem:[%s5735_s27 + $0x70] sm:$0xf] }
  0xcd   : > { %v2143_v45 = vunpack.c.l.b16 %v1924_v21  ;;  %v1957_v21 = vrot.slane %v1955_v24, 5  ;;  %v1139_v33 = vrot.slane %v5623_v26, 5 }
  0xcf   : > { %v6121_v53 = vpop.f32.mrf.mxu0  ;;  %v2168_v35 = vpack.c.b16 %v2144_v28, %v2143_v45  ;;  %v1958_v42 = vsel %vm5747_vm4, %v1953_v9, %v1957_v21  ;;  %v1973_v45 = vshrl.u32 %v5241_v23, 16 }
  0xd0   : > { %v6124_v52 = vpop.f32.mrf.mxu3 }
  0xd1   : > { %5203 = vmatmul.msk.bf16.gmra.mxu3 %vm658_vm5, %v5579_v41  ;;  %v5580_v41 = vld [vmem:[%s5735_s27 + $0x60] sm:$0xff] }
  0xd4   : > { %v6132_v6 = vpop.f32.mrf.mxu1  ;;  %v6134_v61 = vpop.f32.mrf.mxu2 }
  0xd6   : > { %5268 = vmatmul.msk.bf16.gmra.mxu0 %vm658_vm5, %v2167_v59  ;;  %v1136_v59 = vsel %vm5921_vm8, %v1134_v43, %v1135_v40  ;;  %v1963_v40 = vshll.u32 %v5240_v3, 16  ;;  %v1969_v43 = vshll.u32 %v5241_v23, 16  ;;  %v5566_v23 = vld [vmem:[%s5735_s27 + $0x6c] sm:$0xff] }
  0xd7   : > { %5058 = vmatmul.msk.bf16.gmra.mxu1 %vm658_vm5, %v5564_v63  ;;  %v6140_v16 = vpop.f32.mrf.mxu0  ;;  %v1942_v63 = vor.u32 %v1941_v5, %v1938_v50  ;;  %v5624_v5 = vld [vmem:[%s5735_s27 + $0x74] sm:$0x1] }
  0xd8   : > { %v6143_v20 = vpop.f32.mrf.mxu3  ;;  %v1142_v54 = vrot.slane %v5624_v5, 5  ;;  %v1965_v4 = vrot.slane %v1963_v40, 5 }
  0xd9   : > { %v1943_v17 = vrot.slane %v1942_v63, 4  ;;  %v1962_v63 = vrot.slane %v1960_v34, 4 }
  0xdb   : > { %v1966_v3 = vor.u32 %v1965_v4, %v1962_v63  ;;  %v1033_v4 = vld [vmem:[%s5735_s27 + $0x78] sm:$0xe] }
  0xdc   : > { %5091 = vmatmul.msk.bf16.gmra.mxu2 %vm658_vm5, %v1227_v11  ;;  %v6151_v32 = vpop.f32.mrf.mxu1  ;;  %v1205_v11 = vunpack.c.l.b16 %v1136_v59  ;;  %v5076_v59 = vrot.slane %v1032_v31, 9 }
  0xde   : > { %v1228_v22 = vpack.c.b16 %v1205_v11, %v1204_v10  ;;  %v1975_v10 = vrot.slane %v1973_v45, 4  ;;  %v1140_v9 = vsel %vm5921_vm8, %v5076_v59, %v1139_v33 }
  0xdf   : > { %v6155_v37 = vpop.f32.mrf.mxu2 }
  0xe1   : > { %5204 = vmatmul.msk.bf16.gmra.mxu3 %vm658_vm5, %v5580_v41  ;;  %v1948_v41 = vsel %vm5747_vm4, %v1943_v17, %v1947_v49  ;;  %v5242_v17 = vld [vmem:[%s5735_s27 + $0x80] sm:$0x1] }
  0xe2   : > { %v2145_v49 = vunpack.c.l.b16 %v1948_v41  ;;  %v1979_v31 = vshll.u32 %v5242_v17, 16 }
  0xe3   : > { %v6163_v60 = vpop.f32.mrf.mxu0 }
  0xe4   : > { %v6166_v51 = vpop.f32.mrf.mxu3  ;;  %v943_v7 = vpop.f32.mrf.mxu1  ;;  %v1981_v5 = vrot.slane %v1979_v31, 5  ;;  %v5077_v31 = vrot.slane %v1033_v4, 9 }
  0xe5   : > { %v944_v12 = vadd.f32 %v943_v7, %v6038_v48  ;;  %v1971_v7 = vrot.slane %v1969_v43, 5  ;;  %v1967_v43 = vrot.slane %v1966_v3, 4 }
  0xe6   : > { %5269 = vmatmul.msk.bf16.gmra.mxu0 %vm658_vm5, %v2168_v35  ;;  %v1141_v35 = vrot.slane %v1139_v33, 4 }
  0xe7   : > { %v6170_v15 = vpop.f32.mrf.mxu2  ;;  %5059 = vmatmul.msk.bf16.gmra.mxu1 %vm658_vm5, %v5565_v62  ;;  %v2146_v62 = vunpack.c.l.b16 %v1958_v42  ;;  %v1976_v26 = vor.u32 %v1975_v10, %v1971_v7 }
  0xe9   : > { %v2169_v21 = vpack.c.b16 %v2146_v62, %v2145_v49  ;;  %v5244_v49 = vld [vmem:[%s5735_s27 + $0x88] sm:$0xf]  ;;  %v5625_v62 = vld [vmem:[%s5735_s27 + $0x7c] sm:$0xf] }
  0xea   : > { %v1146_v63 = vrot.slane %v5625_v62, 5 }
  0xeb   : > { %v6177_v48 = vpop.f32.mrf.mxu0 }
  0xec   : > { %v6183_v28 = vpop.f32.mrf.mxu3  ;;  %5092 = vmatmul.msk.bf16.gmra.mxu2 %vm658_vm5, %v1228_v22  ;;  %v945_v50 = vpop.f32.mrf.mxu1 }
  0xed   : > { %v946_v56 = vadd.f32 %v945_v50, %v6063_v18  ;;  %v1143_v18 = vsel %vm5921_vm8, %v1141_v35, %v1142_v54  ;;  %v1977_v50 = vrot.slane %v1976_v26, 4  ;;  %v5243_v54 = vld [vmem:[%s5735_s27 + $0x84] sm:$0xf]  ;;  %v5582_v26 = vld [vmem:[%s5735_s27 + $0x78] sm:$0xff] }
  0xee   : > { %v1207_v41 = vunpack.c.l.b16 %v1143_v18  ;;  %v1987_v17 = vshll.u32 %v5243_v54, 16  ;;  %v1997_v18 = vshrl.u32 %v5244_v49, 16 }
  0xef   : > { %v1296_v24 = vpop.f32.mrf.mxu2 }
  0xf0   : > { %v1376_v11 = vadd.f32 %v1296_v24, %v944_v12  ;;  %v1206_v12 = vunpack.c.l.b16 %v1140_v9  ;;  %v1984_v24 = vshrl.u32 %v5243_v54, 16  ;;  %v1993_v9 = vshll.u32 %v5244_v49, 16 }
  0xf1   : > { %5205 = vmatmul.msk.bf16.gmra.mxu3 %vm658_vm5, %v5581_v58 }
  0xf2   : > { %v1229_v35 = vpack.c.b16 %v1207_v41, %v1206_v12  ;;  %v1986_v41 = vrot.slane %v1984_v24, 4 }
  0xf3   : > { %v2237_v22 = vpop.f32.mrf.mxu0 }
  0xf4   : > { %v1583_v34 = vpop.f32.mrf.mxu3  ;;  %v948_v40 = vpop.f32.mrf.mxu1 }
  0xf5   : > { %v1663_v42 = vadd.f32 %v1583_v34, %v1376_v11  ;;  %v949_v33 = vadd.f32 %v948_v40, %v6082_v47  ;;  %v1972_v47 = vsel %vm5747_vm4, %v1967_v43, %v1971_v7  ;;  %v1982_v11 = vsel %vm5747_vm4, %v1977_v50, %v1981_v5 }
  0xf6   : > { %5270 = vmatmul.msk.bf16.gmra.mxu0 %vm658_vm5, %v2169_v21  ;;  %v5626_v21 = vld [vmem:[%s5735_s27 + $0x80] sm:$0x1]  ;;  %v1148_v34 = vrot.slane %v1146_v63, 4  ;;  %v2147_v40 = vunpack.c.l.b16 %v1972_v47  ;;  %v2148_v12 = vunpack.c.l.b16 %v1982_v11  ;;  %v1989_v43 = vrot.slane %v1987_v17, 5  ;;  %v5567_v47 = vld [vmem:[%s5735_s27 + $0x78] sm:$0xff] }
  0xf7   : > { %v1298_v45 = vpop.f32.mrf.mxu2  ;;  %5060 = vmatmul.msk.bf16.gmra.mxu1 %vm658_vm5, %v5566_v23  ;;  %v6200_v58 = vadd.f32 %v2237_v22, %v1663_v42  ;;  %v1149_v3 = vrot.slane %v5626_v21, 5  ;;  %v1999_v50 = vrot.slane %v1997_v18, 4 }
  0xf8   : > { %v1377_v59 = vadd.f32 %v1298_v45, %v946_v56  ;;  %v1995_v45 = vrot.slane %v1993_v9, 5  ;;  %v2170_v49 = vpack.c.b16 %v2148_v12, %v2147_v40  ;;  %v1990_v4 = vor.u32 %v1989_v43, %v1986_v41  ;;  %v5247_v40 = vld [vmem:[%s5735_s27 + $0x94] sm:$0xf]  ;;  %v5627_v12 = vld [vmem:[%s5735_s27 + $0x88] sm:$0xf] }
  0xf9   : > { %v1153_v41 = vrot.slane %v5627_v12, 5 }
  0xfa   : > { %v2000_v24 = vor.u32 %v1999_v50, %v1995_v45 }
  0xfb   : > { %v2239_v10 = vpop.f32.mrf.mxu0 }
  0xfc   : > { %v1585_v56 = vpop.f32.mrf.mxu3  ;;  %5093 = vmatmul.msk.bf16.gmra.mxu2 %vm658_vm5, %v1229_v35  ;;  %v950_v22 = vpop.f32.mrf.mxu1  ;;  %v5245_v35 = vld [vmem:[%s5735_s27 + $0x8c] sm:$0x1] }
  0xfd   : > { %v1664_v23 = vadd.f32 %v1585_v56, %v1377_v59  ;;  %v951_v7 = vadd.f32 %v950_v22, %v6100_v13  ;;  %v1147_v59 = vsel %vm5921_vm8, %v5077_v31, %v1146_v63  ;;  %v1150_v13 = vsel %vm5921_vm8, %v1148_v34, %v1149_v3 }
  0xfe   : > { %v2003_v11 = vshll.u32 %v5245_v35, 16  ;;  %v1209_v9 = vunpack.c.l.b16 %v1150_v13  ;;  %v1991_v3 = vrot.slane %v1990_v4, 4  ;;  %v2001_v56 = vrot.slane %v2000_v24, 4  ;;  %v5583_v24 = vld [vmem:[%s5735_s27 + $0x84] sm:$0xff] }
  0xff   : > { %v1301_v42 = vpop.f32.mrf.mxu2  ;;  %v6213_v5 = vadd.f32 %v2239_v10, %v1664_v23  ;;  %v5246_v23 = vld [vmem:[%s5735_s27 + $0x90] sm:$0xf]  ;;  %v2021_v13 = vshrl.u32 %v5247_v40, 16 }
 0x100   : > { %v1378_v54 = vadd.f32 %v1301_v42, %v949_v33  ;;  %v1208_v33 = vunpack.c.l.b16 %v1147_v59  ;;  %v2005_v22 = vrot.slane %v2003_v11, 5  ;;  %v1034_v42 = vld [vmem:[%s5735_s27 + $0x84] sm:$0xe]  ;;  %v2011_v43 = vshll.u32 %v5246_v23, 16 }
 0x101   : > { %5206 = vmatmul.msk.bf16.gmra.mxu3 %vm658_vm5, %v5582_v26  ;;  %v2017_v59 = vshll.u32 %v5247_v40, 16 }
 0x102   : > { %v1230_v34 = vpack.c.b16 %v1209_v9, %v1208_v33  ;;  %v2006_v35 = vsel %vm5747_vm4, %v2001_v56, %v2005_v22  ;;  %v2023_v56 = vrot.slane %v2021_v13, 4 }
 0x103   : > { %v2242_v62 = vpop.f32.mrf.mxu0 }
 0x104   : > { %v1588_v17 = vpop.f32.mrf.mxu3  ;;  %v953_v10 = vpop.f32.mrf.mxu1 }
 0x105   : > { %v1665_v18 = vadd.f32 %v1588_v17, %v1378_v54  ;;  %v954_v63 = vadd.f32 %v953_v10, %v6121_v53  ;;  %v2008_v53 = vshrl.u32 %v5246_v23, 16  ;;  %v1996_v54 = vsel %vm5747_vm4, %v1991_v3, %v1995_v45 }
 0x106   : > { %5271 = vmatmul.msk.bf16.gmra.mxu0 %vm658_vm5, %v2170_v49  ;;  %v5628_v49 = vld [vmem:[%s5735_s27 + $0x8c] sm:$0x1]  ;;  %v5078_v17 = vrot.slane %v1034_v42, 9  ;;  %v1155_v10 = vrot.slane %v1153_v41, 4  ;;  %v2149_v33 = vunpack.c.l.b16 %v1996_v54  ;;  %v2150_v45 = vunpack.c.l.b16 %v2006_v35 }
 0x107   : > { %v1303_v21 = vpop.f32.mrf.mxu2  ;;  %5061 = vmatmul.msk.bf16.gmra.mxu1 %vm658_vm5, %v5567_v47  ;;  %v6226_v26 = vadd.f32 %v2242_v62, %v1665_v18  ;;  %v1156_v62 = vrot.slane %v5628_v49, 5  ;;  %v2010_v9 = vrot.slane %v2008_v53, 4  ;;  %v2013_v18 = vrot.slane %v2011_v43, 5  ;;  %v5568_v53 = vld [vmem:[%s5735_s27 + $0x84] sm:$0xff] }
 0x108   : > { %v1379_v31 = vadd.f32 %v1303_v21, %v951_v7  ;;  %v2019_v3 = vrot.slane %v2017_v59, 5  ;;  %v2171_v40 = vpack.c.b16 %v2150_v45, %v2149_v33  ;;  %v5250_v33 = vld [vmem:[%s5735_s27 + $0xa0] sm:$0xf]  ;;  %v5629_v45 = vld [vmem:[%s5735_s27 + $0x94] sm:$0xf] }
 0x109   : > { %v2014_v12 = vor.u32 %v2013_v18, %v2010_v9  ;;  %v1160_v9 = vrot.slane %v5629_v45, 5  ;;  %v1035_v18 = vld [vmem:[%s5735_s27 + $0x90] sm:$0xe] }
 0x10a   : > { %v2024_v43 = vor.u32 %v2023_v56, %v2019_v3 }
 0x10b   : > { %v2244_v50 = vpop.f32.mrf.mxu0  ;;  %v2015_v49 = vrot.slane %v2014_v12, 4 }
 0x10c   : > { %v1590_v7 = vpop.f32.mrf.mxu3  ;;  %5094 = vmatmul.msk.bf16.gmra.mxu2 %vm658_vm5, %v1230_v34  ;;  %v955_v47 = vpop.f32.mrf.mxu1  ;;  %v5248_v34 = vld [vmem:[%s5735_s27 + $0x98] sm:$0x1] }
 0x10d   : > { %v1666_v4 = vadd.f32 %v1590_v7, %v1379_v31  ;;  %v956_v11 = vadd.f32 %v955_v47, %v6140_v16  ;;  %v1154_v31 = vsel %vm5921_vm8, %v5078_v17, %v1153_v41  ;;  %v1157_v16 = vsel %vm5921_vm8, %v1155_v10, %v1156_v62 }
 0x10e   : > { %v2027_v54 = vshll.u32 %v5248_v34, 16  ;;  %v1211_v59 = vunpack.c.l.b16 %v1157_v16  ;;  %v2025_v7 = vrot.slane %v2024_v43, 4  ;;  %v2045_v16 = vshrl.u32 %v5250_v33, 16  ;;  %v5584_v43 = vld [vmem:[%s5735_s27 + $0x90] sm:$0xff] }
 0x10f   : > { %v1306_v21 = vpop.f32.mrf.mxu2  ;;  %v6239_v22 = vadd.f32 %v2244_v50, %v1666_v4  ;;  %v5249_v4 = vld [vmem:[%s5735_s27 + $0x9c] sm:$0xf] }
 0x110   : > { %v1380_v23 = vadd.f32 %v1306_v21, %v954_v63  ;;  %v1210_v63 = vunpack.c.l.b16 %v1154_v31  ;;  %v2029_v47 = vrot.slane %v2027_v54, 5  ;;  %v2032_v21 = vshrl.u32 %v5249_v4, 16 }
 0x111   : > { %5207 = vmatmul.msk.bf16.gmra.mxu3 %vm658_vm5, %v5583_v24  ;;  %v2035_v34 = vshll.u32 %v5249_v4, 16  ;;  %v2041_v31 = vshll.u32 %v5250_v33, 16  ;;  %v5079_v54 = vrot.slane %v1035_v18, 9 }
 0x112   : > { %v1231_v10 = vpack.c.b16 %v1211_v59, %v1210_v63  ;;  %v2034_v59 = vrot.slane %v2032_v21, 4 }
 0x113   : > { %v2247_v42 = vpop.f32.mrf.mxu0 }
 0x114   : > { %v1593_v35 = vpop.f32.mrf.mxu3  ;;  %v958_v50 = vpop.f32.mrf.mxu1 }
 0x115   : > { %v1667_v13 = vadd.f32 %v1593_v35, %v1380_v23  ;;  %v959_v41 = vadd.f32 %v958_v50, %v6163_v60  ;;  %v2020_v60 = vsel %vm5747_vm4, %v2015_v49, %v2019_v3  ;;  %v2030_v23 = vsel %vm5747_vm4, %v2025_v7, %v2029_v47 }
 0x116   : > { %5272 = vmatmul.msk.bf16.gmra.mxu0 %vm658_vm5, %v2171_v40  ;;  %v5630_v40 = vld [vmem:[%s5735_s27 + $0x98] sm:$0x1]  ;;  %v1162_v35 = vrot.slane %v1160_v9, 4  ;;  %v2151_v50 = vunpack.c.l.b16 %v2020_v60  ;;  %v2152_v63 = vunpack.c.l.b16 %v2030_v23  ;;  %v2037_v49 = vrot.slane %v2035_v34, 5  ;;  %v5569_v60 = vld [vmem:[%s5735_s27 + $0x90] sm:$0xff] }
 0x117   : > { %v1308_v62 = vpop.f32.mrf.mxu2  ;;  %5062 = vmatmul.msk.bf16.gmra.mxu1 %vm658_vm5, %v5568_v53  ;;  %v6252_v24 = vadd.f32 %v2247_v42, %v1667_v13  ;;  %v1163_v12 = vrot.slane %v5630_v40, 5  ;;  %v2047_v7 = vrot.slane %v2045_v16, 4  ;;  %v5252_v40 = vld [vmem:[%s5735_s27 + $0xa8] sm:$0xf] }
 0x118   : > { %v1381_v17 = vadd.f32 %v1308_v62, %v956_v11  ;;  %v2043_v62 = vrot.slane %v2041_v31, 5  ;;  %v2172_v33 = vpack.c.b16 %v2152_v63, %v2151_v50  ;;  %v2038_v18 = vor.u32 %v2037_v49, %v2034_v59  ;;  %v5631_v63 = vld [vmem:[%s5735_s27 + $0xa0] sm:$0xf]  ;;  %v1036_v49 = vld [vmem:[%s5735_s27 + $0x9c] sm:$0xe] }
 0x119   : > { %v2056_v50 = vshrl.u32 %v5252_v40, 16  ;;  %v1167_v59 = vrot.slane %v5631_v63, 5 }
 0x11a   : > { %v2048_v21 = vor.u32 %v2047_v7, %v2043_v62 }
 0x11b   : > { %v2249_v56 = vpop.f32.mrf.mxu0 }
 0x11c   : > { %v1595_v11 = vpop.f32.mrf.mxu3  ;;  %5095 = vmatmul.msk.bf16.gmra.mxu2 %vm658_vm5, %v1231_v10  ;;  %v960_v42 = vpop.f32.mrf.mxu1  ;;  %v5251_v10 = vld [vmem:[%s5735_s27 + $0xa4] sm:$0x1] }
 0x11d   : > { %v1668_v53 = vadd.f32 %v1595_v11, %v1381_v17  ;;  %v961_v3 = vadd.f32 %v960_v42, %v6177_v48  ;;  %v1161_v48 = vsel %vm5921_vm8, %v5079_v54, %v1160_v9  ;;  %v1164_v17 = vsel %vm5921_vm8, %v1162_v35, %v1163_v12  ;;  %v5253_v35 = vld [vmem:[%s5735_s27 + $0xac] sm:$0xf] }
 0x11e   : > { %v2051_v23 = vshll.u32 %v5251_v10, 16  ;;  %v1213_v31 = vunpack.c.l.b16 %v1164_v17  ;;  %v2039_v12 = vrot.slane %v2038_v18, 4  ;;  %v2049_v11 = vrot.slane %v2048_v21, 4 }
 0x11f   : > { %v1311_v13 = vpop.f32.mrf.mxu2  ;;  %v6265_v47 = vadd.f32 %v2249_v56, %v1668_v53  ;;  %v2069_v17 = vshrl.u32 %v5253_v35, 16  ;;  %v2058_v18 = vrot.slane %v2056_v50, 4 }
 0x120   : > { %v1382_v4 = vadd.f32 %v1311_v13, %v959_v41  ;;  %v1212_v41 = vunpack.c.l.b16 %v1161_v48  ;;  %v2053_v42 = vrot.slane %v2051_v23, 5  ;;  %v2059_v13 = vshll.u32 %v5252_v40, 16  ;;  %v5585_v23 = vld [vmem:[%s5735_s27 + $0x9c] sm:$0xff] }
 0x121   : > { %5208 = vmatmul.msk.bf16.gmra.mxu3 %vm658_vm5, %v5584_v43  ;;  %v2065_v48 = vshll.u32 %v5253_v35, 16 }
 0x122   : > { %v1232_v54 = vpack.c.b16 %v1213_v31, %v1212_v41  ;;  %v2054_v10 = vsel %vm5747_vm4, %v2049_v11, %v2053_v42  ;;  %v1169_v41 = vrot.slane %v1167_v59, 4  ;;  %v2061_v31 = vrot.slane %v2059_v13, 5  ;;  %v5570_v13 = vld [vmem:[%s5735_s27 + $0x9c] sm:$0xff] }
 0x123   : > { %v2252_v45 = vpop.f32.mrf.mxu0  ;;  %v2154_v40 = vunpack.c.l.b16 %v2054_v10  ;;  %v2071_v11 = vrot.slane %v2069_v17, 4 }
 0x124   : > { %v1598_v56 = vpop.f32.mrf.mxu3  ;;  %v963_v34 = vpop.f32.mrf.mxu1  ;;  %v2062_v63 = vor.u32 %v2061_v31, %v2058_v18 }
 0x125   : > { %v1669_v16 = vadd.f32 %v1598_v56, %v1382_v4  ;;  %v2044_v4 = vsel %vm5747_vm4, %v2039_v12, %v2043_v62  ;;  %v5080_v56 = vrot.slane %v1036_v49, 9  ;;  %v964_v62 = vadd.f32 %v963_v34, %v6019_v14 }
 0x126   : > { %5273 = vmatmul.msk.bf16.gmra.mxu0 %vm658_vm5, %v2172_v33  ;;  %v5632_v33 = vld [vmem:[%s5735_s27 + $0xa4] sm:$0x1]  ;;  %v2067_v12 = vrot.slane %v2065_v48, 5 }
 0x127   : > { %v1313_v9 = vpop.f32.mrf.mxu2  ;;  %5063 = vmatmul.msk.bf16.gmra.mxu1 %vm658_vm5, %v5569_v60  ;;  %v6277_v53 = vadd.f32 %v2252_v45, %v1669_v16  ;;  %v1170_v45 = vrot.slane %v5632_v33, 5  ;;  %v2153_v16 = vunpack.c.l.b16 %v2044_v4 }
 0x128   : > { %v1383_v43 = vadd.f32 %v1313_v9, %v961_v3  ;;  %v2072_v49 = vor.u32 %v2071_v11, %v2067_v12 }
 0x129   : > { %v1171_v50 = vsel %vm5921_vm8, %v1169_v41, %v1170_v45  ;;  %v2173_v14 = vpack.c.b16 %v2154_v40, %v2153_v16 }
 0x12a   : > { %v1215_v17 = vunpack.c.l.b16 %v1171_v50  ;;  %v2073_v18 = vrot.slane %v2072_v49, 4 }
 0x12b   : > { %v2254_v7 = vpop.f32.mrf.mxu0 }
 0x12c   : > { %v1600_v3 = vpop.f32.mrf.mxu3  ;;  %5096 = vmatmul.msk.bf16.gmra.mxu2 %vm658_vm5, %v1232_v54  ;;  %v965_v60 = vpop.f32.mrf.mxu1  ;;  %v5254_v54 = vld [vmem:[%s5735_s27 + $0xb0] sm:$0x1] }
 0x12d   : > { %v1670_v21 = vadd.f32 %v1600_v3, %v1383_v43  ;;  %v1168_v43 = vsel %vm5921_vm8, %v5080_v56, %v1167_v59  ;;  %v2075_v4 = vshll.u32 %v5254_v54, 16  ;;  %v2063_v3 = vrot.slane %v2062_v63, 4  ;;  %v5256_v56 = vld [vmem:[%s5735_s27 + $0xb8] sm:$0xf]  ;;  %v5634_v63 = vld [vmem:[%s5735_s27 + $0xb0] sm:$0x1] }
 0x12e   : > { %v1214_v48 = vunpack.c.l.b16 %v1168_v43  ;;  %v966_v59 = vadd.f32 %v965_v60, %v6032_v44  ;;  %v1037_v44 = vld [vmem:[%s5735_s27 + $0xa8] sm:$0xe]  ;;  %v2089_v60 = vshll.u32 %v5256_v56, 16  ;;  %v2093_v54 = vshrl.u32 %v5256_v56, 16 }
 0x12f   : > { %v1316_v9 = vpop.f32.mrf.mxu2  ;;  %v6290_v42 = vadd.f32 %v2254_v7, %v1670_v21  ;;  %v5255_v21 = vld [vmem:[%s5735_s27 + $0xb4] sm:$0xf]  ;;  %v2068_v40 = vsel %vm5747_vm4, %v2063_v3, %v2067_v12 }
 0x130   : > { %v1384_v35 = vadd.f32 %v1316_v9, %v964_v62  ;;  %v1233_v62 = vpack.c.b16 %v1215_v17, %v1214_v48  ;;  %v2080_v16 = vshrl.u32 %v5255_v21, 16  ;;  %v5633_v9 = vld [vmem:[%s5735_s27 + $0xac] sm:$0xf]  ;;  %v5081_v48 = vrot.slane %v1037_v44, 9 }
 0x131   : > { %5209 = vmatmul.msk.bf16.gmra.mxu3 %vm658_vm5, %v5585_v23  ;;  %v2077_v23 = vrot.slane %v2075_v4, 5  ;;  %v1174_v11 = vrot.slane %v5633_v9, 5  ;;  %v5571_v44 = vld [vmem:[%s5735_s27 + $0xa8] sm:$0xff] }
 0x132   : > { %v2082_v12 = vrot.slane %v2080_v16, 4 }
 0x133   : > { %v2257_v34 = vpop.f32.mrf.mxu0  ;;  %v2078_v50 = vsel %vm5747_vm4, %v2073_v18, %v2077_v23  ;;  %v1176_v17 = vrot.slane %v1174_v11, 4  ;;  %v5257_v23 = vld [vmem:[%s5735_s27 + $0xbc] sm:$0x1] }
 0x134   : > { %v1603_v7 = vpop.f32.mrf.mxu3  ;;  %v968_v10 = vpop.f32.mrf.mxu1 }
 0x135   : > { %v1671_v33 = vadd.f32 %v1603_v7, %v1384_v35  ;;  %v2083_v35 = vshll.u32 %v5255_v21, 16  ;;  %v5586_v7 = vld [vmem:[%s5735_s27 + $0xa8] sm:$0xff]  ;;  %v969_v3 = vadd.f32 %v968_v10, %v6052_v1  ;;  %v2156_v21 = vunpack.c.l.b16 %v2078_v50 }
 0x136   : > { %5274 = vmatmul.msk.bf16.gmra.mxu0 %vm658_vm5, %v2173_v14  ;;  %v1177_v14 = vrot.slane %v5634_v63, 5 }
 0x137   : > { %v1318_v45 = vpop.f32.mrf.mxu2  ;;  %5064 = vmatmul.msk.bf16.gmra.mxu1 %vm658_vm5, %v5570_v13  ;;  %v6304_v41 = vadd.f32 %v2257_v34, %v1671_v33  ;;  %v2155_v13 = vunpack.c.l.b16 %v2068_v40  ;;  %v2085_v33 = vrot.slane %v2083_v35, 5  ;;  %v2099_v40 = vshll.u32 %v5257_v23, 16 }
 0x138   : > { %v1385_v31 = vadd.f32 %v1318_v45, %v966_v59  ;;  %v2091_v59 = vrot.slane %v2089_v60, 5  ;;  %v2095_v45 = vrot.slane %v2093_v54, 4 }
 0x139   : > { %v2086_v16 = vor.u32 %v2085_v33, %v2082_v12  ;;  %v2174_v1 = vpack.c.b16 %v2156_v21, %v2155_v13  ;;  %v2101_v13 = vrot.slane %v2099_v40, 5  ;;  %v5635_v12 = vld [vmem:[%s5735_s27 + $0x10] sm:$0xf]  ;;  %v1038_v21 = vld [vmem:[%s5735_s27 + $0xb4] sm:$0xe] }
 0x13a   : > { %v2096_v10 = vor.u32 %v2095_v45, %v2091_v59  ;;  %v5636_v45 = vld [vmem:[%s5735_s27 + $0xb8] sm:$0xf] }
 0x13b   : > { %v2259_v43 = vpop.f32.mrf.mxu0 }
 0x13c   : > { %v1605_v34 = vpop.f32.mrf.mxu3  ;;  %5097 = vmatmul.msk.bf16.gmra.mxu2 %vm658_vm5, %v1233_v62  ;;  %v970_v49 = vpop.f32.mrf.mxu1  ;;  %v1178_v62 = vsel %vm5921_vm8, %v1176_v17, %v1177_v14  ;;  %v5259_v17 = vld [vmem:[%s5735_s27 + $0xc4] sm:$0xf] }
 0x13d   : > { %v1672_v4 = vadd.f32 %v1605_v34, %v1385_v31  ;;  %v1175_v31 = vsel %vm5921_vm8, %v5081_v48, %v1174_v11  ;;  %v1217_v50 = vunpack.c.l.b16 %v1178_v62  ;;  %v2087_v11 = vrot.slane %v2086_v16, 4  ;;  %v5258_v48 = vld [vmem:[%s5735_s27 + $0xc0] sm:$0xf] }
 0x13e   : > { %v971_v14 = vadd.f32 %v970_v49, %v6071_v27  ;;  %v2097_v34 = vrot.slane %v2096_v10, 4  ;;  %v2113_v62 = vshll.u32 %v5259_v17, 16 }
 0x13f   : > { %v1321_v18 = vpop.f32.mrf.mxu2  ;;  %v6317_v56 = vadd.f32 %v2259_v43, %v1672_v4  ;;  %v1216_v43 = vunpack.c.l.b16 %v1175_v31  ;;  %v2415_v4 = vrot.slane %v5635_v12, 5  ;;  %v2092_v27 = vsel %vm5747_vm4, %v2087_v11, %v2091_v59  ;;  %v5278_v11 = vld [vmem:[%s5735_s27 + $0xc] sm:$0xe] }
 0x140   : > { %v1386_v9 = vadd.f32 %v1321_v18, %v969_v3  ;;  %v1181_v18 = vrot.slane %v5636_v45, 5  ;;  %v2102_v49 = vsel %vm5747_vm4, %v2097_v34, %v2101_v13  ;;  %v2107_v31 = vshll.u32 %v5258_v48, 16  ;;  %v5587_v34 = vld [vmem:[%s5735_s27 + $0xb4] sm:$0xff] }
 0x141   : > { %5210 = vmatmul.msk.bf16.gmra.mxu3 %vm658_vm5, %v5586_v7  ;;  %v1234_v3 = vpack.c.b16 %v1217_v50, %v1216_v43  ;;  %v2417_v16 = vrot.slane %v2415_v4, 4  ;;  %v5638_v43 = vld [vmem:[%s5735_s27 + $0xbc] sm:$0x1]  ;;  %v2157_v13 = vunpack.c.l.b16 %v2092_v27  ;;  %v2158_v12 = vunpack.c.l.b16 %v2102_v49 }
 0x143   : > { %v2262_v35 = vpop.f32.mrf.mxu0 }
 0x144   : > { %v1608_v60 = vpop.f32.mrf.mxu3  ;;  %v973_v54 = vpop.f32.mrf.mxu1 }
 0x145   : > { %v1673_v63 = vadd.f32 %v1608_v60, %v1386_v9  ;;  %v2104_v9 = vshrl.u32 %v5258_v48, 16  ;;  %v2117_v60 = vshrl.u32 %v5259_v17, 16  ;;  %v974_v48 = vadd.f32 %v973_v54, %v6090_v0  ;;  %v5260_v0 = vld [vmem:[%s5735_s27 + $0xc8] sm:$0x1] }
 0x146   : > { %5275 = vmatmul.msk.bf16.gmra.mxu0 %vm658_vm5, %v2174_v1  ;;  %v5637_v1 = vld [vmem:[%s5735_s27 + $0x14] sm:$0x1]  ;;  %v2115_v17 = vrot.slane %v2113_v62, 5 }
 0x147   : > { %v1323_v7 = vpop.f32.mrf.mxu2  ;;  %5065 = vmatmul.msk.bf16.gmra.mxu1 %vm658_vm5, %v5571_v44  ;;  %v6333_v23 = vadd.f32 %v2262_v35, %v1673_v63  ;;  %v2418_v10 = vrot.slane %v5637_v1, 5  ;;  %v5082_v44 = vrot.slane %v1038_v21, 9  ;;  %v1184_v35 = vrot.slane %v5638_v43, 5 }
 0x148   : > { %v1387_v33 = vadd.f32 %v1323_v7, %v971_v14  ;;  %v1183_v63 = vrot.slane %v1181_v18, 4  ;;  %v5294_v7 = vrot.slane %v5278_v11, 9  ;;  %v2106_v45 = vrot.slane %v2104_v9, 4  ;;  %v5572_v11 = vld [vmem:[%s5735_s27 + $0xb4] sm:$0xff] }
 0x149   : > { %v2109_v21 = vrot.slane %v2107_v31, 5  ;;  %v1182_v43 = vsel %vm5921_vm8, %v5082_v44, %v1181_v18  ;;  %v2419_v27 = vsel %vm5921_vm8, %v2417_v16, %v2418_v10  ;;  %v5440_v31 = vld [vmem:[%s5735_s27 + $0x18] sm:$0xf]  ;;  %v2175_v18 = vpack.c.b16 %v2158_v12, %v2157_v13 }
 0x14a   : > { %v2528_v9 = vunpack.c.l.b16 %v2419_v27  ;;  %v1218_v16 = vunpack.c.l.b16 %v1182_v43  ;;  %v3086_v27 = vshll.u32 %v5440_v31, 16 }
 0x14b   : > { %v2264_v40 = vpop.f32.mrf.mxu0  ;;  %v2110_v62 = vor.u32 %v2109_v21, %v2106_v45 }
 0x14c   : > { %v1610_v50 = vpop.f32.mrf.mxu3  ;;  %5098 = vmatmul.msk.bf16.gmra.mxu2 %vm658_vm5, %v1234_v3  ;;  %v975_v59 = vpop.f32.mrf.mxu1  ;;  %v2119_v3 = vrot.slane %v2117_v60, 4 }
 0x14d   : > { %v1674_v14 = vadd.f32 %v1610_v50, %v1387_v33  ;;  %v2416_v33 = vsel %vm5921_vm8, %v5294_v7, %v2415_v4  ;;  %v1185_v50 = vsel %vm5921_vm8, %v1183_v63, %v1184_v35  ;;  %v6362_v35 = vld [vmem:[%s5735_s27 + $0x1c] sm:$0xf]  ;;  %v976_v13 = vadd.f32 %v975_v59, %v6113_v25 }
 0x14e   : > { %v2527_v54 = vunpack.c.l.b16 %v2416_v33  ;;  %v1219_v10 = vunpack.c.l.b16 %v1185_v50  ;;  %v2120_v7 = vor.u32 %v2119_v3, %v2115_v17  ;;  %v3083_v33 = vshrl.u32 %v5440_v31, 16 }
 0x14f   : > { %v1326_v1 = vpop.f32.mrf.mxu2  ;;  %v6358_v60 = vadd.f32 %v2264_v40, %v1674_v14  ;;  %v2111_v12 = vrot.slane %v2110_v62, 4  ;;  %v3092_v40 = vshll.u32 %v6362_v35, 16  ;;  %v3096_v14 = vshrl.u32 %v6362_v35, 16  ;;  %v5442_v62 = vld [vmem:[%s5735_s27 + $0x20] sm:$0x1] }
 0x150   : > { %v1388_v49 = vadd.f32 %v1326_v1, %v974_v48  ;;  %v6356_v44 = vpack.c.b16 %v2528_v9, %v2527_v54  ;;  %v2123_v48 = vshll.u32 %v5260_v0, 16  ;;  %v1235_v21 = vpack.c.b16 %v1219_v10, %v1218_v16 }
 0x151   : > { %5211 = vmatmul.msk.bf16.gmra.mxu3 %vm658_vm5, %v5587_v34  ;;  %v2121_v43 = vrot.slane %v2120_v7, 4  ;;  %v3085_v0 = vrot.slane %v3083_v33, 4  ;;  %v2116_v25 = vsel %vm5747_vm4, %v2111_v12, %v2115_v17  ;;  %v3094_v59 = vrot.slane %v3092_v40, 5 }
 0x152   : > { %v2125_v3 = vrot.slane %v2123_v48, 5  ;;  %v3098_v9 = vrot.slane %v3096_v14, 4  ;;  %v2159_v48 = vunpack.c.l.b16 %v2116_v25 }
 0x153   : > { %v2267_v4 = vpop.f32.mrf.mxu0 }
 0x154   : > { %v1613_v63 = vpop.f32.mrf.mxu3  ;;  %v978_v1 = vpop.f32.mrf.mxu1  ;;  %v3099_v33 = vor.u32 %v3098_v9, %v3094_v59  ;;  %v5639_v9 = vld [vmem:[%s5735_s27 + $0x1c] sm:$0xf] }
 0x155   : > { %v1675_v34 = vadd.f32 %v1613_v63, %v1388_v49  ;;  %v3088_v49 = vrot.slane %v3086_v27, 5  ;;  %v979_v63 = vadd.f32 %v978_v1, %v6132_v6  ;;  %v3102_v27 = vshll.u32 %v5442_v62, 16  ;;  %v6386_v1 = vld [vmem:[%s5735_s27 + $0x28] sm:$0xf] }
 0x156   : > { %5276 = vmatmul.msk.bf16.gmra.mxu0 %vm658_vm5, %v2175_v18  ;;  %v2126_v18 = vsel %vm5747_vm4, %v2121_v43, %v2125_v3  ;;  %v3100_v14 = vrot.slane %v3099_v33, 4  ;;  %v5443_v43 = vld [vmem:[%s5735_s27 + $0x24] sm:$0xf]  ;;  %v3754_v6 = vrot.slane %v6362_v35, 5 }
 0x157   : > { %v1328_v45 = vpop.f32.mrf.mxu2  ;;  %5066 = vmatmul.msk.bf16.gmra.mxu1 %vm658_vm5, %v5572_v11  ;;  %v6369_v54 = vadd.f32 %v2267_v4, %v1675_v34  ;;  %v3089_v10 = vor.u32 %v3088_v49, %v3085_v0  ;;  %v5588_v4 = vld [vmem:[%s5735_s27 + $0xc0] sm:$0xff]  ;;  %v2160_v17 = vunpack.c.l.b16 %v2126_v18  ;;  %v2422_v18 = vrot.slane %v5639_v9, 5 }
 0x158   : > { %v1389_v50 = vadd.f32 %v1328_v45, %v976_v13  ;;  %v3104_v45 = vrot.slane %v3102_v27, 5 }
 0x159   : > { %7379 = vst [vmem:[#allocation2_spill] sm:$0xff] %v6369_v54  ;;  %v3090_v12 = vrot.slane %v3089_v10, 4  ;;  %v2176_v40 = vpack.c.b16 %v2160_v17, %v2159_v48  ;;  %v3107_v48 = vshrl.u32 %v5443_v43, 16  ;;  %v3120_v17 = vshrl.u32 %v6386_v1, 16 }
 0x15b   : > { %v2269_v31 = vpop.f32.mrf.mxu0  ;;  %v3095_v25 = vsel %vm5747_vm4, %v3090_v12, %v3094_v59  ;;  %v5640_v59 = vld [vmem:[%s5735_s27 + $0x20] sm:$0x1] }
 0x15c   : > { %v1615_v11 = vpop.f32.mrf.mxu3  ;;  %5099 = vmatmul.msk.bf16.gmra.mxu2 %vm658_vm5, %v1235_v21  ;;  %v980_v16 = vpop.f32.mrf.mxu1  ;;  %v5505_v21 = vld [vmem:[%s5735_s27 + $0x18] sm:$0xe]  ;;  %v2425_v33 = vrot.slane %v5640_v59, 5 }
 0x15d   : > { %v1676_v7 = vadd.f32 %v1615_v11, %v1389_v50  ;;  %v5521_v10 = vrot.slane %v5505_v21, 9  ;;  %v981_v35 = vadd.f32 %v980_v16, %v6151_v32  ;;  %v2424_v32 = vrot.slane %v2422_v18, 4 }
 0x15f   : > { %v1331_v34 = vpop.f32.mrf.mxu2  ;;  %v6382_v3 = vadd.f32 %v2269_v31, %v1676_v7  ;;  %v3110_v31 = vshll.u32 %v5443_v43, 16  ;;  %v3105_v7 = vsel %vm5747_vm4, %v3100_v14, %v3104_v45  ;;  %v3468_v14 = vunpack.c.l.b16 %v3095_v25 }
 0x160   : > { %v1390_v13 = vadd.f32 %v1331_v34, %v979_v63  ;;  %v3116_v63 = vshll.u32 %v6386_v1, 16  ;;  %v3756_v34 = vrot.slane %v3754_v6, 4  ;;  %v3469_v45 = vunpack.c.l.b16 %v3105_v7 }
 0x161   : > { %5212 = vmatmul.msk.bf16.gmra.mxu3 %vm658_vm5, %v5588_v4  ;;  %7380 = vst [vmem:[#allocation3_spill] sm:$0xff] %v6382_v3  ;;  %v5279_v4 = vld [vmem:[%s5735_s27 + $0x18] sm:$0xe]  ;;  %v3109_v43 = vrot.slane %v3107_v48, 4  ;;  %v3755_v9 = vsel %vm5921_vm8, %v5521_v10, %v3754_v6  ;;  %v3122_v3 = vrot.slane %v3120_v17, 4 }
 0x162   : > { %v5295_v21 = vrot.slane %v5279_v4, 9  ;;  %v3118_v59 = vrot.slane %v3116_v63, 5  ;;  %v3500_v10 = vpack.c.b16 %v3469_v45, %v3468_v14  ;;  %v3866_v4 = vunpack.c.l.b16 %v3755_v9  ;;  %v5446_v14 = vld [vmem:[%s5735_s27 + $0x30] sm:$0xf] }
 0x163   : > { %v2272_v50 = vpop.f32.mrf.mxu0  ;;  %v3761_v45 = vrot.slane %v6386_v1, 5 }
 0x164   : > { %v1618_v0 = vpop.f32.mrf.mxu3  ;;  %v983_v49 = vpop.f32.mrf.mxu1  ;;  %v2423_v25 = vsel %vm5921_vm8, %v5295_v21, %v2422_v18  ;;  %v3123_v63 = vor.u32 %v3122_v3, %v3118_v59 }
 0x165   : > { %v1677_v11 = vadd.f32 %v1618_v0, %v1390_v13  ;;  %v3757_v13 = vrot.slane %v5442_v62, 5  ;;  %v3112_v0 = vrot.slane %v3110_v31, 5  ;;  %v6409_v62 = vld [vmem:[%s5735_s27 + $0x2c] sm:$0x1]  ;;  %v984_v31 = vadd.f32 %v983_v49, %v6034_v46 }
 0x166   : > { %5277 = vmatmul.msk.bf16.gmra.mxu0 %vm658_vm5, %v2176_v40  ;;  %v5589_v40 = vld [vmem:[%s5735_s27 + $0x18] sm:$0xff]  ;;  %v3126_v17 = vshll.u32 %v6409_v62, 16  ;;  %v3124_v21 = vrot.slane %v3123_v63, 4  ;;  %v5642_v63 = vld [vmem:[%s5735_s27 + $0x2c] sm:$0x1] }
 0x167   : > { %v1333_v27 = vpop.f32.mrf.mxu2  ;;  %5311 = vmatmul.msk.bf16.vlgmr.msra.gmra.mxu1 %vm658_vm5, %v6356_v44  ;;  %v6402_v16 = vadd.f32 %v2272_v50, %v1677_v11  ;;  %v3758_v44 = vsel %vm5921_vm8, %v3756_v34, %v3757_v13  ;;  %v2426_v11 = vsel %vm5921_vm8, %v2424_v32, %v2425_v33  ;;  %v3113_v48 = vor.u32 %v3112_v0, %v3109_v43  ;;  %v6425_v43 = vld [vmem:[%s5735_s27 + $0x34] sm:$0xf] }
 0x168   : > { %v1391_v12 = vadd.f32 %v1333_v27, %v981_v35  ;;  %v3867_v7 = vunpack.c.l.b16 %v3758_v44  ;;  %v2529_v34 = vunpack.c.l.b16 %v2423_v25  ;;  %v2530_v13 = vunpack.c.l.b16 %v2426_v11 }
 0x169   : > { %v3114_v33 = vrot.slane %v3113_v48, 4  ;;  %v3128_v32 = vrot.slane %v3126_v17, 5  ;;  %v2432_v17 = vrot.slane %v5642_v63, 5 }
 0x16a   : > { %v2560_v49 = vpack.c.b16 %v2530_v13, %v2529_v34  ;;  %v3764_v34 = vrot.slane %v6409_v62, 5  ;;  %v6448_v62 = vld [vmem:[%s5735_s27 + $0x38] sm:$0x1] }
 0x16b   : > { %v2274_v54 = vpop.f32.mrf.mxu0  ;;  %v3129_v48 = vsel %vm5747_vm4, %v3124_v21, %v3128_v32 }
 0x16c   : > { %v1620_v35 = vpop.f32.mrf.mxu3  ;;  %5424 = vmatmul.msk.bf16.vlgmr.msra.gmra.mxu2 %vm658_vm5, %v5589_v40  ;;  %v985_v50 = vpop.f32.mrf.mxu1  ;;  %v3898_v40 = vpack.c.b16 %v3867_v7, %v3866_v4  ;;  %v5280_v4 = vld [vmem:[%s5735_s27 + $0x24] sm:$0xe]  ;;  %v3144_v7 = vshrl.u32 %v6425_v43, 16 }
 0x16d   : > { %v1678_v6 = vadd.f32 %v1620_v35, %v1391_v12  ;;  %v5506_v12 = vld [vmem:[%s5735_s27 + $0x24] sm:$0xe]  ;;  %v5641_v35 = vld [vmem:[%s5735_s27 + $0x28] sm:$0xf]  ;;  %v986_v1 = vadd.f32 %v985_v50, %v6055_v8 }
 0x16e   : > { %v5522_v44 = vrot.slane %v5506_v12, 9  ;;  %v2429_v25 = vrot.slane %v5641_v35, 5  ;;  %v3146_v35 = vrot.slane %v3144_v7, 4  ;;  %v3150_v7 = vshll.u32 %v6448_v62, 16 }
 0x16f   : > { %v1336_v27 = vpop.f32.mrf.mxu2  ;;  %v6421_v46 = vadd.f32 %v2274_v54, %v1678_v6  ;;  %v3131_v54 = vshrl.u32 %v5446_v14, 16  ;;  %v3134_v6 = vshll.u32 %v5446_v14, 16 }
 0x170   : > { %v1392_v18 = vadd.f32 %v1336_v27, %v984_v31  ;;  %v3140_v31 = vshll.u32 %v6425_v43, 16  ;;  %v2431_v8 = vrot.slane %v2429_v25, 4  ;;  %v3762_v14 = vsel %vm5921_vm8, %v5522_v44, %v3761_v45 }
 0x171   : > { %5489 = vmatmul.msk.bf16.vlgmr.msra.gmra.mxu3 %vm658_vm5, %v3500_v10  ;;  %v3119_v10 = vsel %vm5747_vm4, %v3114_v33, %v3118_v59  ;;  %v3763_v59 = vrot.slane %v3761_v45, 4  ;;  %v5296_v33 = vrot.slane %v5280_v4, 9  ;;  %v3133_v21 = vrot.slane %v3131_v54, 4 }
 0x172   : > { %v3470_v12 = vunpack.c.l.b16 %v3119_v10  ;;  %v3136_v32 = vrot.slane %v3134_v6, 5  ;;  %v2433_v10 = vsel %vm5921_vm8, %v2431_v8, %v2432_v17  ;;  %v3868_v4 = vunpack.c.l.b16 %v3762_v14 }
 0x173   : > { %v2277_v3 = vpop.f32.mrf.mxu0  ;;  %v3765_v63 = vsel %vm5921_vm8, %v3763_v59, %v3764_v34  ;;  %v2532_v34 = vunpack.c.l.b16 %v2433_v10  ;;  %v3152_v8 = vrot.slane %v3150_v7, 5 }
 0x174   : > { %v1623_v0 = vpop.f32.mrf.mxu3  ;;  %v988_v9 = vpop.f32.mrf.mxu1  ;;  %v3137_v54 = vor.u32 %v3136_v32, %v3133_v21  ;;  %v3768_v21 = vrot.slane %v6425_v43, 5  ;;  %v6464_v32 = vld [vmem:[%s5735_s27 + $0x40] sm:$0xf] }
 0x175   : > { %v1679_v11 = vadd.f32 %v1623_v0, %v1392_v18  ;;  %v5590_v18 = vld [vmem:[%s5735_s27 + $0x24] sm:$0xff]  ;;  %v3142_v0 = vrot.slane %v3140_v31, 5  ;;  %v989_v6 = vadd.f32 %v988_v9, %v6074_v36 }
 0x176   : > { %5538 = vmatmul.msk.bf16.vlgmr.msra.gmra.mxu0 %vm658_vm5, %v3898_v40  ;;  %v3471_v40 = vunpack.c.l.b16 %v3129_v48  ;;  %v3869_v48 = vunpack.c.l.b16 %v3765_v63  ;;  %v3138_v17 = vrot.slane %v3137_v54, 4 }
 0x177   : > { %v1338_v27 = vpop.f32.mrf.mxu2  ;;  %5312 = vmatmul.msk.bf16.gmra.mxu1 %vm658_vm5, %v2560_v49  ;;  %v6441_v50 = vadd.f32 %v2277_v3, %v1679_v11  ;;  %v2430_v11 = vsel %vm5921_vm8, %v5296_v33, %v2429_v25  ;;  %v3147_v31 = vor.u32 %v3146_v35, %v3142_v0 }
 0x178   : > { %v1393_v13 = vadd.f32 %v1338_v27, %v986_v1  ;;  %v3501_v44 = vpack.c.b16 %v3471_v40, %v3470_v12  ;;  %v2531_v59 = vunpack.c.l.b16 %v2430_v11  ;;  %v5449_v12 = vld [vmem:[%s5735_s27 + $0x3c] sm:$0xf] }
 0x179   : > { %v3148_v33 = vrot.slane %v3147_v31, 4  ;;  %v5644_v31 = vld [vmem:[%s5735_s27 + $0x38] sm:$0x1] }
 0x17a   : > { %v2561_v40 = vpack.c.b16 %v2532_v34, %v2531_v59  ;;  %v2439_v7 = vrot.slane %v5644_v31, 5  ;;  %v3771_v59 = vrot.slane %v6448_v62, 5  ;;  %v6487_v62 = vld [vmem:[%s5735_s27 + $0x44] sm:$0x1] }
 0x17b   : > { %v2279_v49 = vpop.f32.mrf.mxu0  ;;  %v3153_v54 = vsel %vm5747_vm4, %v3148_v33, %v3152_v8 }
 0x17c   : > { %v1625_v1 = vpop.f32.mrf.mxu3  ;;  %5425 = vmatmul.msk.bf16.gmra.mxu2 %vm658_vm5, %v5590_v18  ;;  %v990_v3 = vpop.f32.mrf.mxu1  ;;  %v3899_v18 = vpack.c.b16 %v3869_v48, %v3868_v4  ;;  %v5281_v4 = vld [vmem:[%s5735_s27 + $0x30] sm:$0xe]  ;;  %v3168_v48 = vshrl.u32 %v6464_v32, 16 }
 0x17d   : > { %v1680_v45 = vadd.f32 %v1625_v1, %v1393_v13  ;;  %v5507_v13 = vld [vmem:[%s5735_s27 + $0x30] sm:$0xe]  ;;  %v5643_v1 = vld [vmem:[%s5735_s27 + $0x34] sm:$0xf]  ;;  %v991_v43 = vadd.f32 %v990_v3, %v6093_v2 }
 0x17e   : > { %v5523_v63 = vrot.slane %v5507_v13, 9  ;;  %v2436_v11 = vrot.slane %v5643_v1, 5  ;;  %v3170_v1 = vrot.slane %v3168_v48, 4  ;;  %v3174_v48 = vshll.u32 %v6487_v62, 16 }
 0x17f   : > { %v1341_v27 = vpop.f32.mrf.mxu2  ;;  %v6460_v36 = vadd.f32 %v2279_v49, %v1680_v45  ;;  %v3155_v49 = vshrl.u32 %v5449_v12, 16  ;;  %v3158_v45 = vshll.u32 %v5449_v12, 16 }
 0x180   : > { %v1394_v25 = vadd.f32 %v1341_v27, %v989_v6  ;;  %v3164_v6 = vshll.u32 %v6464_v32, 16  ;;  %v2438_v2 = vrot.slane %v2436_v11, 4  ;;  %v3769_v12 = vsel %vm5921_vm8, %v5523_v63, %v3768_v21 }
 0x181   : > { %5490 = vmatmul.msk.bf16.gmra.mxu3 %vm658_vm5, %v3501_v44  ;;  %v3143_v44 = vsel %vm5747_vm4, %v3138_v17, %v3142_v0  ;;  %v3770_v0 = vrot.slane %v3768_v21, 4  ;;  %v5297_v17 = vrot.slane %v5281_v4, 9  ;;  %v3157_v33 = vrot.slane %v3155_v49, 4 }
 0x182   : > { %v3472_v13 = vunpack.c.l.b16 %v3143_v44  ;;  %v3160_v8 = vrot.slane %v3158_v45, 5  ;;  %v2440_v44 = vsel %vm5921_vm8, %v2438_v2, %v2439_v7  ;;  %v3870_v4 = vunpack.c.l.b16 %v3769_v12 }
 0x183   : > { %v2282_v9 = vpop.f32.mrf.mxu0  ;;  %v3772_v31 = vsel %vm5921_vm8, %v3770_v0, %v3771_v59  ;;  %v2534_v59 = vunpack.c.l.b16 %v2440_v44  ;;  %v3176_v2 = vrot.slane %v3174_v48, 5 }
 0x184   : > { %v1628_v14 = vpop.f32.mrf.mxu3  ;;  %v993_v35 = vpop.f32.mrf.mxu1  ;;  %v3161_v49 = vor.u32 %v3160_v8, %v3157_v33  ;;  %v3775_v33 = vrot.slane %v6464_v32, 5  ;;  %v6503_v8 = vld [vmem:[%s5735_s27 + $0x4c] sm:$0xf] }
 0x185   : > { %v1681_v10 = vadd.f32 %v1628_v14, %v1394_v25  ;;  %v5591_v25 = vld [vmem:[%s5735_s27 + $0x30] sm:$0xff]  ;;  %v3166_v14 = vrot.slane %v3164_v6, 5  ;;  %v994_v45 = vadd.f32 %v993_v35, %v6116_v38 }
 0x186   : > { %5539 = vmatmul.msk.bf16.gmra.mxu0 %vm658_vm5, %v3899_v18  ;;  %v3473_v18 = vunpack.c.l.b16 %v3153_v54  ;;  %v3871_v54 = vunpack.c.l.b16 %v3772_v31  ;;  %v3162_v7 = vrot.slane %v3161_v49, 4 }
 0x187   : > { %v1343_v27 = vpop.f32.mrf.mxu2  ;;  %5313 = vmatmul.msk.bf16.gmra.mxu1 %vm658_vm5, %v2561_v40  ;;  %v6480_v3 = vadd.f32 %v2282_v9, %v1681_v10  ;;  %v2437_v10 = vsel %vm5921_vm8, %v5297_v17, %v2436_v11  ;;  %v3171_v6 = vor.u32 %v3170_v1, %v3166_v14 }
 0x188   : > { %v1395_v34 = vadd.f32 %v1343_v27, %v991_v43  ;;  %v3502_v63 = vpack.c.b16 %v3473_v18, %v3472_v13  ;;  %v2533_v0 = vunpack.c.l.b16 %v2437_v10  ;;  %v5452_v13 = vld [vmem:[%s5735_s27 + $0x48] sm:$0xf] }
 0x189   : > { %v3172_v17 = vrot.slane %v3171_v6, 4  ;;  %v5646_v6 = vld [vmem:[%s5735_s27 + $0x44] sm:$0x1] }
 0x18a   : > { %v2562_v18 = vpack.c.b16 %v2534_v59, %v2533_v0  ;;  %v2446_v48 = vrot.slane %v5646_v6, 5  ;;  %v3778_v0 = vrot.slane %v6487_v62, 5  ;;  %v6526_v62 = vld [vmem:[%s5735_s27 + $0x50] sm:$0x1] }
 0x18b   : > { %v2284_v40 = vpop.f32.mrf.mxu0  ;;  %v3177_v49 = vsel %vm5747_vm4, %v3172_v17, %v3176_v2 }
 0x18c   : > { %v1630_v43 = vpop.f32.mrf.mxu3  ;;  %5426 = vmatmul.msk.bf16.gmra.mxu2 %vm658_vm5, %v5591_v25  ;;  %v995_v9 = vpop.f32.mrf.mxu1  ;;  %v3900_v25 = vpack.c.b16 %v3871_v54, %v3870_v4  ;;  %v5282_v4 = vld [vmem:[%s5735_s27 + $0x3c] sm:$0xe]  ;;  %v3192_v54 = vshrl.u32 %v6503_v8, 16 }
 0x18d   : > { %v1682_v21 = vadd.f32 %v1630_v43, %v1395_v34  ;;  %v5508_v34 = vld [vmem:[%s5735_s27 + $0x3c] sm:$0xe]  ;;  %v5645_v43 = vld [vmem:[%s5735_s27 + $0x40] sm:$0xf]  ;;  %v996_v32 = vadd.f32 %v995_v9, %v6134_v61 }
 0x18e   : > { %v5524_v31 = vrot.slane %v5508_v34, 9  ;;  %v2443_v10 = vrot.slane %v5645_v43, 5  ;;  %v3194_v43 = vrot.slane %v3192_v54, 4  ;;  %v3198_v54 = vshll.u32 %v6526_v62, 16 }
 0x18f   : > { %v1346_v27 = vpop.f32.mrf.mxu2  ;;  %v6499_v38 = vadd.f32 %v2284_v40, %v1682_v21  ;;  %v3179_v40 = vshrl.u32 %v5452_v13, 16  ;;  %v3182_v21 = vshll.u32 %v5452_v13, 16 }
 0x190   : > { %v1396_v11 = vadd.f32 %v1346_v27, %v994_v45  ;;  %v3188_v45 = vshll.u32 %v6503_v8, 16  ;;  %v2445_v61 = vrot.slane %v2443_v10, 4  ;;  %v3776_v13 = vsel %vm5921_vm8, %v5524_v31, %v3775_v33 }
 0x191   : > { %5491 = vmatmul.msk.bf16.gmra.mxu3 %vm658_vm5, %v3502_v63  ;;  %v3167_v63 = vsel %vm5747_vm4, %v3162_v7, %v3166_v14  ;;  %v3777_v14 = vrot.slane %v3775_v33, 4  ;;  %v5298_v7 = vrot.slane %v5282_v4, 9  ;;  %v3181_v17 = vrot.slane %v3179_v40, 4 }
 0x192   : > { %v3474_v34 = vunpack.c.l.b16 %v3167_v63  ;;  %v3184_v2 = vrot.slane %v3182_v21, 5  ;;  %v2447_v63 = vsel %vm5921_vm8, %v2445_v61, %v2446_v48  ;;  %v3872_v4 = vunpack.c.l.b16 %v3776_v13 }
 0x193   : > { %v2287_v35 = vpop.f32.mrf.mxu0  ;;  %v3779_v6 = vsel %vm5921_vm8, %v3777_v14, %v3778_v0  ;;  %v2536_v0 = vunpack.c.l.b16 %v2447_v63  ;;  %v3200_v61 = vrot.slane %v3198_v54, 5 }
 0x194   : > { %v1633_v12 = vpop.f32.mrf.mxu3  ;;  %v998_v1 = vpop.f32.mrf.mxu1  ;;  %v3185_v40 = vor.u32 %v3184_v2, %v3181_v17  ;;  %v3782_v17 = vrot.slane %v6503_v8, 5  ;;  %v6542_v2 = vld [vmem:[%s5735_s27 + $0x58] sm:$0xf] }
 0x195   : > { %v1683_v44 = vadd.f32 %v1633_v12, %v1396_v11  ;;  %v5592_v11 = vld [vmem:[%s5735_s27 + $0x3c] sm:$0xff]  ;;  %v3190_v12 = vrot.slane %v3188_v45, 5  ;;  %v999_v21 = vadd.f32 %v998_v1, %v6155_v37 }
 0x196   : > { %5540 = vmatmul.msk.bf16.gmra.mxu0 %vm658_vm5, %v3900_v25  ;;  %v3475_v25 = vunpack.c.l.b16 %v3177_v49  ;;  %v3873_v49 = vunpack.c.l.b16 %v3779_v6  ;;  %v3186_v48 = vrot.slane %v3185_v40, 4 }
 0x197   : > { %v1348_v27 = vpop.f32.mrf.mxu2  ;;  %5314 = vmatmul.msk.bf16.gmra.mxu1 %vm658_vm5, %v2562_v18  ;;  %v6519_v9 = vadd.f32 %v2287_v35, %v1683_v44  ;;  %v2444_v44 = vsel %vm5921_vm8, %v5298_v7, %v2443_v10  ;;  %v3195_v45 = vor.u32 %v3194_v43, %v3190_v12 }
 0x198   : > { %v1397_v59 = vadd.f32 %v1348_v27, %v996_v32  ;;  %v3503_v31 = vpack.c.b16 %v3475_v25, %v3474_v34  ;;  %v2535_v14 = vunpack.c.l.b16 %v2444_v44  ;;  %v5455_v34 = vld [vmem:[%s5735_s27 + $0x54] sm:$0xf] }
 0x199   : > { %v3196_v7 = vrot.slane %v3195_v45, 4  ;;  %v5648_v45 = vld [vmem:[%s5735_s27 + $0x50] sm:$0x1] }
 0x19a   : > { %v2563_v25 = vpack.c.b16 %v2536_v0, %v2535_v14  ;;  %v2453_v54 = vrot.slane %v5648_v45, 5  ;;  %v3785_v14 = vrot.slane %v6526_v62, 5  ;;  %v6565_v62 = vld [vmem:[%s5735_s27 + $0x5c] sm:$0x1] }
 0x19b   : > { %v2289_v18 = vpop.f32.mrf.mxu0  ;;  %v3201_v40 = vsel %vm5747_vm4, %v3196_v7, %v3200_v61 }
 0x19c   : > { %v1635_v32 = vpop.f32.mrf.mxu3  ;;  %5427 = vmatmul.msk.bf16.gmra.mxu2 %vm658_vm5, %v5592_v11  ;;  %v1000_v35 = vpop.f32.mrf.mxu1  ;;  %v3901_v11 = vpack.c.b16 %v3873_v49, %v3872_v4  ;;  %v5283_v4 = vld [vmem:[%s5735_s27 + $0x48] sm:$0xe]  ;;  %v3216_v49 = vshrl.u32 %v6542_v2, 16 }
 0x19d   : > { %v1684_v33 = vadd.f32 %v1635_v32, %v1397_v59  ;;  %v5509_v59 = vld [vmem:[%s5735_s27 + $0x48] sm:$0xe]  ;;  %v5647_v32 = vld [vmem:[%s5735_s27 + $0x4c] sm:$0xf]  ;;  %v1001_v8 = vadd.f32 %v1000_v35, %v6170_v15 }
 0x19e   : > { %v5525_v6 = vrot.slane %v5509_v59, 9  ;;  %v2450_v44 = vrot.slane %v5647_v32, 5  ;;  %v3218_v32 = vrot.slane %v3216_v49, 4  ;;  %v3222_v49 = vshll.u32 %v6565_v62, 16 }
 0x19f   : > { %v1351_v27 = vpop.f32.mrf.mxu2  ;;  %v6538_v37 = vadd.f32 %v2289_v18, %v1684_v33  ;;  %v3203_v18 = vshrl.u32 %v5455_v34, 16  ;;  %v3206_v33 = vshll.u32 %v5455_v34, 16 }
 0x1a0   : > { %v1398_v10 = vadd.f32 %v1351_v27, %v999_v21  ;;  %v3212_v21 = vshll.u32 %v6542_v2, 16  ;;  %v2452_v15 = vrot.slane %v2450_v44, 4  ;;  %v3783_v34 = vsel %vm5921_vm8, %v5525_v6, %v3782_v17 }
 0x1a1   : > { %5492 = vmatmul.msk.bf16.gmra.mxu3 %vm658_vm5, %v3503_v31  ;;  %v3191_v31 = vsel %vm5747_vm4, %v3186_v48, %v3190_v12  ;;  %v3784_v12 = vrot.slane %v3782_v17, 4  ;;  %v5299_v48 = vrot.slane %v5283_v4, 9  ;;  %v3205_v7 = vrot.slane %v3203_v18, 4 }
 0x1a2   : > { %v3476_v59 = vunpack.c.l.b16 %v3191_v31  ;;  %v3208_v61 = vrot.slane %v3206_v33, 5  ;;  %v2454_v31 = vsel %vm5921_vm8, %v2452_v15, %v2453_v54  ;;  %v3874_v4 = vunpack.c.l.b16 %v3783_v34 }
 0x1a3   : > { %v2292_v1 = vpop.f32.mrf.mxu0  ;;  %v3786_v45 = vsel %vm5921_vm8, %v3784_v12, %v3785_v14  ;;  %v2538_v14 = vunpack.c.l.b16 %v2454_v31  ;;  %v3224_v15 = vrot.slane %v3222_v49, 5 }
 0x1a4   : > { %v1638_v13 = vpop.f32.mrf.mxu3  ;;  %v1003_v43 = vpop.f32.mrf.mxu1  ;;  %v3209_v18 = vor.u32 %v3208_v61, %v3205_v7  ;;  %v3789_v7 = vrot.slane %v6542_v2, 5  ;;  %v6581_v61 = vld [vmem:[%s5735_s27 + $0x64] sm:$0xf] }
 0x1a5   : > { %v1685_v63 = vadd.f32 %v1638_v13, %v1398_v10  ;;  %v5593_v10 = vld [vmem:[%s5735_s27 + $0x48] sm:$0xff]  ;;  %v3214_v13 = vrot.slane %v3212_v21, 5  ;;  %v1004_v33 = vadd.f32 %v1003_v43, %v6042_v55  ;;  %v3240_v49 = vshrl.u32 %v6581_v61, 16 }
 0x1a6   : > { %5541 = vmatmul.msk.bf16.gmra.mxu0 %vm658_vm5, %v3901_v11  ;;  %v3477_v11 = vunpack.c.l.b16 %v3201_v40  ;;  %v3875_v40 = vunpack.c.l.b16 %v3786_v45  ;;  %v3210_v54 = vrot.slane %v3209_v18, 4 }
 0x1a7   : > { %v1353_v27 = vpop.f32.mrf.mxu2  ;;  %5315 = vmatmul.msk.bf16.gmra.mxu1 %vm658_vm5, %v2563_v25  ;;  %v6558_v35 = vadd.f32 %v2292_v1, %v1685_v63  ;;  %v2451_v63 = vsel %vm5921_vm8, %v5299_v48, %v2450_v44  ;;  %v3219_v21 = vor.u32 %v3218_v32, %v3214_v13  ;;  %v5458_v44 = vld [vmem:[%s5735_s27 + $0x60] sm:$0xf] }
 0x1a8   : > { %v1399_v0 = vadd.f32 %v1353_v27, %v1001_v8  ;;  %v3504_v6 = vpack.c.b16 %v3477_v11, %v3476_v59  ;;  %v2537_v12 = vunpack.c.l.b16 %v2451_v63  ;;  %v5510_v59 = vld [vmem:[%s5735_s27 + $0x54] sm:$0xe]  ;;  %v3227_v34 = vshrl.u32 %v5458_v44, 16  ;;  %v5649_v63 = vld [vmem:[%s5735_s27 + $0x58] sm:$0xf] }
 0x1a9   : > { %v3220_v48 = vrot.slane %v3219_v21, 4  ;;  %v3230_v32 = vshll.u32 %v5458_v44, 16  ;;  %v2457_v31 = vrot.slane %v5649_v63, 5  ;;  %v3236_v21 = vshll.u32 %v6581_v61, 16 }
 0x1aa   : > { %v2564_v11 = vpack.c.b16 %v2538_v14, %v2537_v12  ;;  %v3791_v12 = vrot.slane %v3789_v7, 4  ;;  %v3229_v14 = vrot.slane %v3227_v34, 4  ;;  %v3242_v63 = vrot.slane %v3240_v49, 4 }
 0x1ab   : > { %v2294_v25 = vpop.f32.mrf.mxu0 }
 0x1ac   : > { %v1640_v8 = vpop.f32.mrf.mxu3  ;;  %5428 = vmatmul.msk.bf16.gmra.mxu2 %vm658_vm5, %v5593_v10  ;;  %v1005_v1 = vpop.f32.mrf.mxu1 }
 0x1ad   : > { %v1686_v17 = vadd.f32 %v1640_v8, %v1399_v0  ;;  %v3902_v0 = vpack.c.b16 %v3875_v40, %v3874_v4  ;;  %v1006_v2 = vadd.f32 %v1005_v1, %v6065_v19  ;;  %v3225_v40 = vsel %vm5747_vm4, %v3220_v48, %v3224_v15 }
 0x1ae   : > { %v2459_v19 = vrot.slane %v2457_v31, 4  ;;  %v3479_v15 = vunpack.c.l.b16 %v3225_v40 }
 0x1af   : > { %v1356_v27 = vpop.f32.mrf.mxu2  ;;  %v6577_v55 = vadd.f32 %v2294_v25, %v1686_v17  ;;  %v3215_v25 = vsel %vm5747_vm4, %v3210_v54, %v3214_v13  ;;  %v5526_v17 = vrot.slane %v5510_v59, 9  ;;  %v3792_v13 = vrot.slane %v6565_v62, 5  ;;  %v5594_v54 = vld [vmem:[%s5735_s27 + $0x54] sm:$0xff]  ;;  %v6604_v62 = vld [vmem:[%s5735_s27 + $0x68] sm:$0x1] }
 0x1b0   : > { %v1400_v10 = vadd.f32 %v1356_v27, %v1004_v33  ;;  %v5284_v33 = vld [vmem:[%s5735_s27 + $0x54] sm:$0xe]  ;;  %v3478_v48 = vunpack.c.l.b16 %v3215_v25  ;;  %v3246_v49 = vshll.u32 %v6604_v62, 16 }
 0x1b1   : > { %5493 = vmatmul.msk.bf16.gmra.mxu3 %vm658_vm5, %v3504_v6  ;;  %v5650_v6 = vld [vmem:[%s5735_s27 + $0x5c] sm:$0x1]  ;;  %v3790_v59 = vsel %vm5921_vm8, %v5526_v17, %v3789_v7 }
 0x1b2   : > { %v2460_v4 = vrot.slane %v5650_v6, 5  ;;  %v3793_v6 = vsel %vm5921_vm8, %v3791_v12, %v3792_v13  ;;  %v3505_v17 = vpack.c.b16 %v3479_v15, %v3478_v48 }
 0x1b3   : > { %v2297_v43 = vpop.f32.mrf.mxu0  ;;  %v3877_v40 = vunpack.c.l.b16 %v3793_v6 }
 0x1b4   : > { %v1643_v45 = vpop.f32.mrf.mxu3  ;;  %v1008_v8 = vpop.f32.mrf.mxu1  ;;  %v2461_v7 = vsel %vm5921_vm8, %v2459_v19, %v2460_v4  ;;  %v3796_v4 = vrot.slane %v6581_v61, 5  ;;  %v3799_v61 = vrot.slane %v6604_v62, 5 }
 0x1b5   : > { %v1687_v18 = vadd.f32 %v1643_v45, %v1400_v10  ;;  %v3232_v10 = vrot.slane %v3230_v32, 5  ;;  %v3238_v45 = vrot.slane %v3236_v21, 5  ;;  %v2540_v13 = vunpack.c.l.b16 %v2461_v7  ;;  %v5651_v7 = vld [vmem:[%s5735_s27 + $0x64] sm:$0xf] }
 0x1b6   : > { %5542 = vmatmul.msk.bf16.gmra.mxu0 %vm658_vm5, %v3902_v0  ;;  %v5300_v0 = vrot.slane %v5284_v33, 9  ;;  %v3876_v33 = vunpack.c.l.b16 %v3790_v59 }
 0x1b7   : > { %v1358_v27 = vpop.f32.mrf.mxu2  ;;  %5316 = vmatmul.msk.bf16.gmra.mxu1 %vm658_vm5, %v2564_v11  ;;  %v6597_v1 = vadd.f32 %v2297_v43, %v1687_v18  ;;  %v3233_v18 = vor.u32 %v3232_v10, %v3229_v14  ;;  %v3243_v21 = vor.u32 %v3242_v63, %v3238_v45 }
 0x1b8   : > { %v1401_v44 = vadd.f32 %v1358_v27, %v1006_v2  ;;  %v2458_v43 = vsel %vm5921_vm8, %v5300_v0, %v2457_v31  ;;  %v1009_v2 = vadd.f32 %v1008_v8, %v6086_v57  ;;  %v5511_v0 = vld [vmem:[%s5735_s27 + $0x60] sm:$0xe]  ;;  %v3903_v14 = vpack.c.b16 %v3877_v40, %v3876_v33  ;;  %v6618_v8 = vld [vmem:[%s5735_s27 + $0x70] sm:$0xf]  ;;  %v5652_v40 = vld [vmem:[%s5735_s27 + $0x68] sm:$0x1] }
 0x1b9   : > { %7381 = vst [vmem:[#allocation4_spill] sm:$0xff] %v6597_v1  ;;  %v2539_v12 = vunpack.c.l.b16 %v2458_v43  ;;  %v3234_v31 = vrot.slane %v3233_v18, 4  ;;  %v5461_v1 = vld [vmem:[%s5735_s27 + $0x6c] sm:$0xf]  ;;  %v3244_v10 = vrot.slane %v3243_v21, 4  ;;  %v3248_v57 = vrot.slane %v3246_v49, 5 }
 0x1ba   : > { %v5527_v15 = vrot.slane %v5511_v0, 9  ;;  %v3251_v59 = vshrl.u32 %v5461_v1, 16  ;;  %v3254_v63 = vshll.u32 %v5461_v1, 16  ;;  %v2464_v18 = vrot.slane %v5651_v7, 5 }
 0x1bb   : > { %v2299_v11 = vpop.f32.mrf.mxu0  ;;  %v2565_v48 = vpack.c.b16 %v2540_v13, %v2539_v12  ;;  %v3239_v43 = vsel %vm5747_vm4, %v3234_v31, %v3238_v45  ;;  %v3798_v33 = vrot.slane %v3796_v4, 4  ;;  %v2467_v21 = vrot.slane %v5652_v40, 5  ;;  %v5595_v31 = vld [vmem:[%s5735_s27 + $0x60] sm:$0xff]  ;;  %v5464_v40 = vld [vmem:[%s5735_s27 + $0x78] sm:$0xf] }
 0x1bc   : > { %v1645_v34 = vpop.f32.mrf.mxu3  ;;  %5429 = vmatmul.msk.bf16.gmra.mxu2 %vm658_vm5, %v5594_v54  ;;  %v1010_v32 = vpop.f32.mrf.mxu1  ;;  %v3249_v45 = vsel %vm5747_vm4, %v3244_v10, %v3248_v57  ;;  %v3480_v49 = vunpack.c.l.b16 %v3239_v43  ;;  %v3253_v12 = vrot.slane %v3251_v59, 4  ;;  %v3256_v13 = vrot.slane %v3254_v63, 5 }
 0x1bd   : > { %v1688_v25 = vadd.f32 %v1645_v34, %v1401_v44  ;;  %v1011_v1 = vadd.f32 %v1010_v32, %v6103_v29  ;;  %v3481_v29 = vunpack.c.l.b16 %v3249_v45  ;;  %v3800_v32 = vsel %vm5921_vm8, %v3798_v33, %v3799_v61 }
 0x1be   : > { %v3879_v59 = vunpack.c.l.b16 %v3800_v32  ;;  %v3257_v7 = vor.u32 %v3256_v13, %v3253_v12  ;;  %v5512_v12 = vld [vmem:[%s5735_s27 + $0x6c] sm:$0xe]  ;;  %v3803_v13 = vrot.slane %v6618_v8, 5 }
 0x1bf   : > { %v1361_v27 = vpop.f32.mrf.mxu2  ;;  %v6620_v44 = vadd.f32 %v2299_v11, %v1688_v25  ;;  %v5285_v11 = vld [vmem:[%s5735_s27 + $0x60] sm:$0xe]  ;;  %v3260_v25 = vshll.u32 %v6618_v8, 16  ;;  %v3506_v33 = vpack.c.b16 %v3481_v29, %v3480_v49 }
 0x1c0   : > { %v1402_v54 = vadd.f32 %v1361_v27, %v1009_v2  ;;  %v3264_v2 = vshrl.u32 %v6618_v8, 16  ;;  %v3797_v27 = vsel %vm5921_vm8, %v5527_v15, %v3796_v4  ;;  %v5301_v0 = vrot.slane %v5285_v11, 9  ;;  %v5286_v8 = vld [vmem:[%s5735_s27 + $0x6c] sm:$0xe] }
 0x1c1   : > { %5494 = vmatmul.msk.bf16.gmra.mxu3 %vm658_vm5, %v3505_v17  ;;  %7382 = vst [vmem:[#allocation5_spill] sm:$0xff] %v6620_v44  ;;  %v6642_v10 = vrot.slane %v3260_v25, 5  ;;  %v3878_v4 = vunpack.c.l.b16 %v3797_v27  ;;  %v6657_v27 = vld [vmem:[%s5735_s27 + $0x7c] sm:$0xf] }
 0x1c2   : > { %v3266_v57 = vrot.slane %v3264_v2, 4 }
 0x1c3   : > { %v2302_v19 = vpop.f32.mrf.mxu0 }
 0x1c4   : > { %v1648_v6 = vpop.f32.mrf.mxu3  ;;  %v1013_v34 = vpop.f32.mrf.mxu1  ;;  %v3267_v11 = vor.u32 %v3266_v57, %v6642_v10 }
 0x1c5   : > { %v1689_v17 = vadd.f32 %v1648_v6, %v1402_v54  ;;  %v2466_v6 = vrot.slane %v2464_v18, 4  ;;  %v1014_v2 = vadd.f32 %v1013_v34, %v6124_v52  ;;  %v3278_v52 = vshll.u32 %v5464_v40, 16 }
 0x1c6   : > { %5543 = vmatmul.msk.bf16.gmra.mxu0 %vm658_vm5, %v3903_v14  ;;  %v3284_v34 = vshll.u32 %v6657_v27, 16 }
 0x1c7   : > { %v1363_v62 = vpop.f32.mrf.mxu2  ;;  %5317 = vmatmul.msk.bf16.gmra.mxu1 %vm658_vm5, %v2565_v48  ;;  %v6638_v14 = vadd.f32 %v2302_v19, %v1689_v17  ;;  %v6645_v48 = vld [vmem:[%s5735_s27 + $0x74] sm:$0x1]  ;;  %v2465_v19 = vsel %vm5921_vm8, %v5301_v0, %v2464_v18  ;;  %v2468_v61 = vsel %vm5921_vm8, %v2466_v6, %v2467_v21  ;;  %v3904_v18 = vpack.c.b16 %v3879_v59, %v3878_v4 }
 0x1c8   : > { %v1403_v54 = vadd.f32 %v1363_v62, %v1011_v1  ;;  %v3270_v25 = vshll.u32 %v6645_v48, 16  ;;  %v2541_v45 = vunpack.c.l.b16 %v2465_v19  ;;  %v2542_v62 = vunpack.c.l.b16 %v2468_v61 }
 0x1c9   : > { %v3258_v0 = vrot.slane %v3257_v7, 4  ;;  %v3268_v21 = vrot.slane %v3267_v11, 4  ;;  %v3288_v6 = vshrl.u32 %v6657_v27, 16  ;;  %v5528_v19 = vrot.slane %v5512_v12, 9  ;;  %v5653_v7 = vld [vmem:[%s5735_s27 + $0x70] sm:$0xf] }
 0x1ca   : > { %v3272_v49 = vrot.slane %v3270_v25, 5  ;;  %v2566_v57 = vpack.c.b16 %v2542_v62, %v2541_v45  ;;  %v3806_v61 = vrot.slane %v6645_v48, 5  ;;  %v5302_v45 = vrot.slane %v5286_v8, 9  ;;  %v6680_v62 = vld [vmem:[%s5735_s27 + $0x80] sm:$0x1] }
 0x1cb   : > { %v2304_v43 = vpop.f32.mrf.mxu0  ;;  %v3263_v59 = vsel %vm5747_vm4, %v3258_v0, %v6642_v10  ;;  %v3290_v48 = vrot.slane %v3288_v6, 4  ;;  %v5596_v0 = vld [vmem:[%s5735_s27 + $0x6c] sm:$0xff]  ;;  %v3294_v8 = vshll.u32 %v6680_v62, 16 }
 0x1cc   : > { %v1650_v15 = vpop.f32.mrf.mxu3  ;;  %5430 = vmatmul.msk.bf16.gmra.mxu2 %vm658_vm5, %v5595_v31  ;;  %v1015_v63 = vpop.f32.mrf.mxu1 }
 0x1cd   : > { %v1690_v17 = vadd.f32 %v1650_v15, %v1403_v54  ;;  %v3275_v54 = vshrl.u32 %v5464_v40, 16  ;;  %v1016_v10 = vadd.f32 %v1015_v63, %v6143_v20  ;;  %v6676_v40 = vrot.slane %v3284_v34, 5  ;;  %v6690_v34 = vld [vmem:[%s5735_s27 + $0x88] sm:$0xf] }
 0x1ce   : > { %v3482_v20 = vunpack.c.l.b16 %v3263_v59 }
 0x1cf   : > { %v1366_v1 = vpop.f32.mrf.mxu2  ;;  %v6664_v29 = vadd.f32 %v2304_v43, %v1690_v17  ;;  %v3273_v43 = vsel %vm5747_vm4, %v3268_v21, %v3272_v49  ;;  %v3805_v17 = vrot.slane %v3803_v13, 4  ;;  %v3277_v25 = vrot.slane %v3275_v54, 4  ;;  %v5654_v49 = vld [vmem:[%s5735_s27 + $0x74] sm:$0x1]  ;;  %v5467_v54 = vld [vmem:[%s5735_s27 + $0x84] sm:$0xf] }
 0x1d0   : > { %v1404_v31 = vadd.f32 %v1366_v1, %v1014_v2  ;;  %v3280_v2 = vrot.slane %v3278_v52, 5  ;;  %v2474_v12 = vrot.slane %v5654_v49, 5  ;;  %v3483_v63 = vunpack.c.l.b16 %v3273_v43 }
 0x1d1   : > { %5495 = vmatmul.msk.bf16.gmra.mxu3 %vm658_vm5, %v3506_v33  ;;  %7383 = vst [vmem:[#allocation6_spill] sm:$0xff] %v6664_v29  ;;  %v2471_v33 = vrot.slane %v5653_v7, 5  ;;  %v3804_v52 = vsel %vm5921_vm8, %v5528_v19, %v3803_v13  ;;  %v3807_v6 = vsel %vm5921_vm8, %v3805_v17, %v3806_v61  ;;  %v3302_v19 = vshll.u32 %v5467_v54, 16 }
 0x1d2   : > { %v3308_v61 = vshll.u32 %v6690_v34, 16  ;;  %v3312_v17 = vshrl.u32 %v6690_v34, 16 }
 0x1d3   : > { %v2307_v32 = vpop.f32.mrf.mxu0  ;;  %v2473_v21 = vrot.slane %v2471_v33, 4 }
 0x1d4   : > { %v1653_v4 = vpop.f32.mrf.mxu3  ;;  %v1018_v15 = vpop.f32.mrf.mxu1 }
 0x1d5   : > { %v1691_v11 = vadd.f32 %v1653_v4, %v1404_v31  ;;  %v3291_v4 = vor.u32 %v3290_v48, %v6676_v40  ;;  %v2475_v13 = vsel %vm5921_vm8, %v2473_v21, %v2474_v12  ;;  %v3881_v48 = vunpack.c.l.b16 %v3807_v6  ;;  %v5513_v12 = vld [vmem:[%s5735_s27 + $0x78] sm:$0xe] }
 0x1d6   : > { %5544 = vmatmul.msk.bf16.gmra.mxu0 %vm658_vm5, %v3904_v18  ;;  %v2544_v21 = vunpack.c.l.b16 %v2475_v13  ;;  %v3813_v13 = vrot.slane %v6680_v62, 5 }
 0x1d7   : > { %v1368_v1 = vpop.f32.mrf.mxu2  ;;  %5318 = vmatmul.msk.bf16.gmra.mxu1 %vm658_vm5, %v2566_v57  ;;  %v6685_v18 = vadd.f32 %v2307_v32, %v1691_v11  ;;  %v3281_v57 = vor.u32 %v3280_v2, %v3277_v25  ;;  %v2472_v32 = vsel %vm5921_vm8, %v5302_v45, %v2471_v33  ;;  %v3299_v11 = vshrl.u32 %v5467_v54, 16 }
 0x1d8   : > { %v1405_v31 = vadd.f32 %v1368_v1, %v1016_v10  ;;  %v3507_v10 = vpack.c.b16 %v3483_v63, %v3482_v20  ;;  %v3880_v2 = vunpack.c.l.b16 %v3804_v52  ;;  %v1019_v33 = vadd.f32 %v1018_v15, %v6166_v51  ;;  %v5655_v51 = vld [vmem:[%s5735_s27 + $0x7c] sm:$0xf]  ;;  %v6711_v52 = vld [vmem:[%s5735_s27 + $0x8c] sm:$0x1] }
 0x1d9   : > { %7384 = vst [vmem:[#allocation7_spill] sm:$0xff] %v6685_v18  ;;  %v3282_v1 = vrot.slane %v3281_v57, 4  ;;  %v3292_v45 = vrot.slane %v3291_v4, 4  ;;  %v2543_v18 = vunpack.c.l.b16 %v2472_v32  ;;  %v3810_v54 = vrot.slane %v6657_v27, 5  ;;  %v5287_v4 = vld [vmem:[%s5735_s27 + $0x78] sm:$0xe] }
 0x1da   : > { %v3301_v29 = vrot.slane %v3299_v11, 4  ;;  %v6706_v20 = vrot.slane %v3308_v61, 5  ;;  %v3314_v63 = vrot.slane %v3312_v17, 4  ;;  %v2478_v15 = vrot.slane %v5655_v51, 5  ;;  %v5597_v51 = vld [vmem:[%s5735_s27 + $0x78] sm:$0xff] }
 0x1db   : > { %v2309_v7 = vpop.f32.mrf.mxu0  ;;  %v3905_v6 = vpack.c.b16 %v3881_v48, %v3880_v2  ;;  %v5529_v57 = vrot.slane %v5513_v12, 9  ;;  %v2567_v27 = vpack.c.b16 %v2544_v21, %v2543_v18  ;;  %v3287_v11 = vsel %vm5747_vm4, %v3282_v1, %v6676_v40  ;;  %v5656_v40 = vld [vmem:[%s5735_s27 + $0x80] sm:$0x1]  ;;  %v5470_v12 = vld [vmem:[%s5735_s27 + $0x90] sm:$0xf] }
 0x1dc   : > { %v1655_v59 = vpop.f32.mrf.mxu3  ;;  %5431 = vmatmul.msk.bf16.gmra.mxu2 %vm658_vm5, %v5596_v0  ;;  %v1020_v43 = vpop.f32.mrf.mxu1  ;;  %v3296_v0 = vrot.slane %v3294_v8, 5  ;;  %v3315_v2 = vor.u32 %v3314_v63, %v6706_v20  ;;  %v2480_v48 = vrot.slane %v2478_v15, 4  ;;  %v3484_v1 = vunpack.c.l.b16 %v3287_v11 }
 0x1dd   : > { %v1692_v25 = vadd.f32 %v1655_v59, %v1405_v31  ;;  %v3304_v31 = vrot.slane %v3302_v19, 5  ;;  %v3812_v59 = vrot.slane %v3810_v54, 4  ;;  %v1021_v62 = vadd.f32 %v1020_v43, %v6183_v28 }
 0x1de   : > { %v3297_v17 = vsel %vm5747_vm4, %v3292_v45, %v3296_v0  ;;  %v3811_v0 = vsel %vm5921_vm8, %v5529_v57, %v3810_v54  ;;  %v3817_v21 = vrot.slane %v6690_v34, 5  ;;  %v3316_v43 = vrot.slane %v3315_v2, 4 }
 0x1df   : > { %v1371_v49 = vpop.f32.mrf.mxu2  ;;  %v6714_v8 = vadd.f32 %v2309_v7, %v1692_v25  ;;  %v3318_v7 = vshll.u32 %v6711_v52, 16  ;;  %v5303_v25 = vrot.slane %v5287_v4, 9  ;;  %v3323_v11 = vshrl.u32 %v5470_v12, 16 }
 0x1e0   : > { %v1406_v44 = vadd.f32 %v1371_v49, %v1019_v33  ;;  %v2481_v33 = vrot.slane %v5656_v40, 5  ;;  %v5514_v49 = vld [vmem:[%s5735_s27 + $0x84] sm:$0xe] }
 0x1e1   : > { %5496 = vmatmul.msk.bf16.gmra.mxu3 %vm658_vm5, %v3507_v10  ;;  %v3305_v10 = vor.u32 %v3304_v31, %v3301_v29  ;;  %v3485_v29 = vunpack.c.l.b16 %v3297_v17  ;;  %v6736_v31 = vld [vmem:[%s5735_s27 + $0x94] sm:$0xf]  ;;  %v2479_v4 = vsel %vm5921_vm8, %v5303_v25, %v2478_v15  ;;  %v3320_v57 = vrot.slane %v3318_v7, 5 }
 0x1e2   : > { %v2482_v54 = vsel %vm5921_vm8, %v2480_v48, %v2481_v33  ;;  %v3332_v34 = vshll.u32 %v6736_v31, 16  ;;  %v3882_v17 = vunpack.c.l.b16 %v3811_v0  ;;  %v2545_v25 = vunpack.c.l.b16 %v2479_v4 }
 0x1e3   : > { %v2312_v32 = vpop.f32.mrf.mxu0  ;;  %v3306_v28 = vrot.slane %v3305_v10, 4  ;;  %v3819_v10 = vrot.slane %v3817_v21, 4  ;;  %v3508_v15 = vpack.c.b16 %v3485_v29, %v3484_v1  ;;  %v2546_v33 = vunpack.c.l.b16 %v2482_v54 }
 0x1e4   : > { %v1658_v19 = vpop.f32.mrf.mxu3  ;;  %v2635_v61 = vpop.f32.mrf.mxu1 }
 0x1e5   : > { %v1693_v18 = vadd.f32 %v1658_v19, %v1406_v44  ;;  %v3814_v44 = vsel %vm5921_vm8, %v3812_v59, %v3813_v13  ;;  %v3326_v59 = vshll.u32 %v5470_v12, 16  ;;  %v3336_v13 = vshrl.u32 %v6736_v31, 16 }
 0x1e6   : > { %5545 = vmatmul.msk.bf16.gmra.mxu0 %vm658_vm5, %v3905_v6  ;;  %v3311_v48 = vsel %vm5747_vm4, %v3306_v28, %v6706_v20  ;;  %v5657_v20 = vld [vmem:[%s5735_s27 + $0x88] sm:$0xf]  ;;  %v6763_v28 = vld [vmem:[%s5735_s27 + $0x98] sm:$0x1] }
 0x1e7   : > { %v1373_v45 = vpop.f32.mrf.mxu2  ;;  %5319 = vmatmul.msk.bf16.gmra.mxu1 %vm658_vm5, %v2567_v27  ;;  %v6739_v6 = vadd.f32 %v2312_v32, %v1693_v18  ;;  %v5530_v27 = vrot.slane %v5514_v49, 9  ;;  %v3820_v32 = vrot.slane %v6711_v52, 5  ;;  %v3883_v18 = vunpack.c.l.b16 %v3814_v44 }
 0x1e8   : > { %v1407_v63 = vadd.f32 %v1373_v45, %v1021_v62  ;;  %v3321_v62 = vsel %vm5747_vm4, %v3316_v43, %v3320_v57  ;;  %v3325_v49 = vrot.slane %v3323_v11, 4  ;;  %v3328_v1 = vrot.slane %v3326_v59, 5 }
 0x1e9   : > { %v3818_v52 = vsel %vm5921_vm8, %v5530_v27, %v3817_v21  ;;  %v6756_v45 = vrot.slane %v3332_v34, 5  ;;  %v3338_v29 = vrot.slane %v3336_v13, 4  ;;  %v3821_v44 = vsel %vm5921_vm8, %v3819_v10, %v3820_v32 }
 0x1ea   : > { %v3906_v12 = vpack.c.b16 %v3883_v18, %v3882_v17  ;;  %v2715_v43 = vadd.f32 %v2635_v61, %v6200_v58  ;;  %v6767_v21 = vunpack.c.l.b16 %v3311_v48  ;;  %v6769_v4 = vunpack.c.l.b16 %v3321_v62  ;;  %v5515_v48 = vld [vmem:[%s5735_s27 + $0x90] sm:$0xe] }
 0x1eb   : > { %v2314_v19 = vpop.f32.mrf.mxu0  ;;  %v3884_v54 = vunpack.c.l.b16 %v3818_v52  ;;  %v2568_v57 = vpack.c.b16 %v2546_v33, %v2545_v25  ;;  %v3885_v27 = vunpack.c.l.b16 %v3821_v44  ;;  %v3329_v11 = vor.u32 %v3328_v1, %v3325_v49 }
 0x1ec   : > { %v1660_v2 = vpop.f32.mrf.mxu3  ;;  %5432 = vmatmul.msk.bf16.gmra.mxu2 %vm658_vm5, %v5597_v51  ;;  %v2637_v7 = vpop.f32.mrf.mxu1  ;;  %v5288_v51 = vld [vmem:[%s5735_s27 + $0x84] sm:$0xe]  ;;  %v3339_v59 = vor.u32 %v3338_v29, %v6756_v45  ;;  %v3342_v10 = vshll.u32 %v6763_v28, 16  ;;  %v3824_v33 = vrot.slane %v6736_v31, 5  ;;  %v5531_v44 = vrot.slane %v5515_v48, 9 }
 0x1ed   : > { %v1694_v40 = vadd.f32 %v1660_v2, %v1407_v63  ;;  %v2485_v63 = vrot.slane %v5657_v20, 5  ;;  %v5304_v17 = vrot.slane %v5288_v51, 9  ;;  %v2716_v62 = vadd.f32 %v2637_v7, %v6213_v5  ;;  %v5473_v51 = vld [vmem:[%s5735_s27 + $0x9c] sm:$0xf]  ;;  %v6789_v20 = vld [vmem:[%s5735_s27 + $0xa0] sm:$0xf] }
 0x1ee   : > { %v3340_v52 = vrot.slane %v3339_v59, 4  ;;  %v5598_v31 = vld [vmem:[%s5735_s27 + $0x84] sm:$0xff]  ;;  %v3347_v7 = vshrl.u32 %v5473_v51, 16 }
 0x1ef   : > { %v2922_v0 = vpop.f32.mrf.mxu2  ;;  %v6773_v58 = vadd.f32 %v2314_v19, %v1694_v40  ;;  %v2487_v2 = vrot.slane %v2485_v63, 4  ;;  %v6782_v19 = vpack.c.b16 %v3885_v27, %v3884_v54  ;;  %v3330_v40 = vrot.slane %v3329_v11, 4 }
 0x1f0   : > { %v3002_v13 = vadd.f32 %v2922_v0, %v2715_v43  ;;  %v2486_v29 = vsel %vm5921_vm8, %v5304_v17, %v2485_v63  ;;  %v3344_v0 = vrot.slane %v3342_v10, 5  ;;  %v3356_v43 = vshll.u32 %v6789_v20, 16 }
 0x1f1   : > { %5497 = vmatmul.msk.bf16.gmra.mxu3 %vm658_vm5, %v3508_v15  ;;  %7385 = vst [vmem:[#allocation8_spill] sm:$0xff] %v6773_v58  ;;  %v5658_v15 = vld [vmem:[%s5735_s27 + $0x8c] sm:$0x1]  ;;  %v3826_v27 = vrot.slane %v3824_v33, 4  ;;  %v3360_v63 = vshrl.u32 %v6789_v20, 16  ;;  %v2547_v11 = vunpack.c.l.b16 %v2486_v29  ;;  %v3335_v59 = vsel %vm5747_vm4, %v3330_v40, %v6756_v45 }
 0x1f2   : > { %v2488_v18 = vrot.slane %v5658_v15, 5  ;;  %v3345_v45 = vsel %vm5747_vm4, %v3340_v52, %v3344_v0  ;;  %v5660_v52 = vld [vmem:[%s5735_s27 + $0x98] sm:$0x1] }
 0x1f3   : > { %v3974_v34 = vpop.f32.mrf.mxu0  ;;  %v3362_v48 = vrot.slane %v3360_v63, 4  ;;  %v2495_v0 = vrot.slane %v5660_v52, 5  ;;  %v6821_v58 = vunpack.c.l.b16 %v3345_v45 }
 0x1f4   : > { %v3576_v61 = vpop.f32.mrf.mxu3  ;;  %v2640_v32 = vpop.f32.mrf.mxu1  ;;  %v2489_v5 = vsel %vm5921_vm8, %v2487_v2, %v2488_v18  ;;  %v3358_v18 = vrot.slane %v3356_v43, 5  ;;  %v5289_v43 = vld [vmem:[%s5735_s27 + $0x90] sm:$0xe] }
 0x1f5   : > { %v3656_v49 = vadd.f32 %v3576_v61, %v3002_v13  ;;  %v3349_v13 = vrot.slane %v3347_v7, 4  ;;  %v6803_v61 = vld [vmem:[%s7373_s2] ss:$0 sm:$0xff]  ;;  %v2548_v15 = vunpack.c.l.b16 %v2489_v5  ;;  %v6810_v7 = vunpack.c.l.b16 %v3335_v59 }
 0x1f6   : > { %5546 = vmatmul.msk.bf16.gmra.mxu0 %vm658_vm5, %v3906_v12  ;;  %v3350_v12 = vshll.u32 %v5473_v51, 16  ;;  %v3825_v5 = vsel %vm5921_vm8, %v5531_v44, %v3824_v33  ;;  %v5305_v63 = vrot.slane %v5289_v43, 9  ;;  %v3363_v59 = vor.u32 %v3362_v48, %v3358_v18 }
 0x1f7   : > { %v2924_v1 = vpop.f32.mrf.mxu2  ;;  %5320 = vmatmul.msk.bf16.gmra.mxu1 %vm658_vm5, %v2568_v57  ;;  %v3827_v57 = vrot.slane %v6763_v28, 5  ;;  %v4054_v10 = vadd.f32 %v3974_v34, %v3656_v49  ;;  %v5475_v28 = vld [vmem:[%s5735_s27 + $0xa4] sm:$0x1]  ;;  %v5659_v34 = vld [vmem:[%s5735_s27 + $0x94] sm:$0xf]  ;;  %v3886_v33 = vunpack.c.l.b16 %v3825_v5 }
 0x1f8   : > { %v3003_v54 = vadd.f32 %v2924_v1, %v2716_v62  ;;  %v3352_v17 = vrot.slane %v3350_v12, 5  ;;  %v2492_v40 = vrot.slane %v5659_v34, 5  ;;  %v3366_v29 = vshll.u32 %v5475_v28, 16 }
 0x1f9   : > { %v3828_v12 = vsel %vm5921_vm8, %v3826_v27, %v3827_v57  ;;  %v3364_v45 = vrot.slane %v3363_v59, 4 }
 0x1fa   : > { %v3353_v49 = vor.u32 %v3352_v17, %v3349_v13  ;;  %v2494_v25 = vrot.slane %v2492_v40, 4  ;;  %v4090_v13 = vadd.f32 %v6803_v61, %v4054_v10  ;;  %v2493_v44 = vsel %vm5921_vm8, %v5305_v63, %v2492_v40 }
 0x1fb   : > { %v3976_v2 = vpop.f32.mrf.mxu0  ;;  %v3368_v27 = vrot.slane %v3366_v29, 5  ;;  %v2569_v10 = vpack.c.b16 %v2548_v15, %v2547_v11  ;;  %v3887_v48 = vunpack.c.l.b16 %v3828_v12  ;;  %v2549_v29 = vunpack.c.l.b16 %v2493_v44 }
 0x1fc   : > { %v3578_v62 = vpop.f32.mrf.mxu3  ;;  %5433 = vmatmul.msk.bf16.gmra.mxu2 %vm658_vm5, %v5598_v31  ;;  %v2642_v1 = vpop.f32.mrf.mxu1  ;;  %v2717_v31 = vadd.f32 %v2640_v32, %v6226_v26  ;;  %v7386_v32 = vpack.c.b16 %v6769_v4, %v6767_v21  ;;  %v4122_v5 = vmax.f32 %v4090_v13, 0.0  ;;  %v3834_v63 = vrot.slane %v5475_v28, 5 }
 0x1fd   : > { %v3657_v51 = vadd.f32 %v3578_v62, %v3003_v54  ;;  %v3354_v54 = vrot.slane %v3353_v49, 4  ;;  %v5516_v62 = vld [vmem:[%s5735_s27 + $0x9c] sm:$0xe]  ;;  %v3369_v11 = vsel %vm5747_vm4, %v3364_v45, %v3368_v27  ;;  %v2718_v28 = vadd.f32 %v2642_v1, %v6239_v22  ;;  %v5599_v1 = vld [vmem:[%s5735_s27 + $0x90] sm:$0xff] }
 0x1fe   : > { %v5532_v49 = vrot.slane %v5516_v62, 9  ;;  %v5476_v62 = vld [vmem:[%s5735_s27 + $0xa8] sm:$0xf]  ;;  %v4155_v22 = vsel %vm4154_vm9, %v4122_v5, -inf }
 0x1ff   : > { %v4055_v17 = vadd.f32 %v3976_v2, %v3657_v51  ;;  %v2927_v34 = vpop.f32.mrf.mxu2  ;;  %v2496_v2 = vsel %vm5921_vm8, %v2494_v25, %v2495_v0  ;;  %v3831_v51 = vrot.slane %v6789_v20, 5  ;;  %v3359_v43 = vsel %vm5747_vm4, %v3354_v54, %v3358_v18 }
 0x200   : > { %v3004_v57 = vadd.f32 %v2927_v34, %v2717_v31  ;;  %v2550_v52 = vunpack.c.l.b16 %v2496_v2  ;;  %v3510_v18 = vpack.c.b16 %v6821_v58, %v6810_v7  ;;  %v6844_v31 = vunpack.c.l.b16 %v3359_v43 }
 0x201   : > { %v4091_v26 = vadd.f32 %v6803_v61, %v4055_v17  ;;  %5498 = vmatmul.msk.bf16.gmra.mxu3 %vm658_vm5, %v7386_v32  ;;  %v3832_v25 = vsel %vm5921_vm8, %v5532_v49, %v3831_v51  ;;  %v3833_v15 = vrot.slane %v3831_v51, 4  ;;  %v6849_v34 = vunpack.c.l.b16 %v3369_v11 }
 0x202   : > { %v3888_v54 = vunpack.c.l.b16 %v3832_v25  ;;  %v6857_v58 = vpack.c.b16 %v3887_v48, %v3886_v33  ;;  %v6859_v7 = vpack.c.b16 %v2550_v52, %v2549_v29  ;;  %v3371_v44 = vshrl.u32 %v5476_v62, 16 }
 0x203   : > { %v3979_v40 = vpop.f32.mrf.mxu0  ;;  %v4123_v20 = vmax.f32 %v4091_v26, 0.0  ;;  %v3835_v0 = vsel %vm5921_vm8, %v3833_v15, %v3834_v63  ;;  %v3511_v51 = vpack.c.b16 %v6849_v34, %v6844_v31  ;;  %v5661_v63 = vld [vmem:[%s5735_s27 + $0xa0] sm:$0xf] }
 0x204   : > { %v3581_v21 = vpop.f32.mrf.mxu3  ;;  %v2645_v4 = vpop.f32.mrf.mxu1  ;;  %v3889_v59 = vunpack.c.l.b16 %v3835_v0  ;;  %v3373_v2 = vrot.slane %v3371_v44, 4 }
 0x205   : > { %v3658_v12 = vadd.f32 %v3581_v21, %v3004_v57  ;;  %v6862_v27 = vsel %vm4154_vm9, %v4123_v20, -inf  ;;  %v3374_v57 = vshll.u32 %v5476_v62, 16  ;;  %v2499_v21 = vrot.slane %v5661_v63, 5 }
 0x206   : > { %5547 = vmatmul.msk.bf16.gmra.mxu0 %vm658_vm5, %v6782_v19  ;;  %v6853_v19 = vld [vmem:[%s5735_s27 + $0xac] sm:$0xf]  ;;  %v6870_v5 = vpack.c.b16 %v3889_v59, %v3888_v54  ;;  %v5662_v54 = vld [vmem:[%s5735_s27 + $0xa4] sm:$0x1] }
 0x207   : > { %v4056_v13 = vadd.f32 %v3979_v40, %v3658_v12  ;;  %v2929_v17 = vpop.f32.mrf.mxu2  ;;  %5321 = vmatmul.msk.bf16.gmra.mxu1 %vm658_vm5, %v2569_v10  ;;  %v2719_v10 = vadd.f32 %v2645_v4, %v6252_v24  ;;  %v3380_v45 = vshll.u32 %v6853_v19, 16  ;;  %v3384_v49 = vshrl.u32 %v6853_v19, 16  ;;  %v6873_v40 = vld [vmem:[%s5735_s27 + $0xb0] sm:$0x1]  ;;  %v5290_v12 = vld [vmem:[%s5735_s27 + $0x9c] sm:$0xe] }
 0x208   : > { %v3005_v32 = vadd.f32 %v2929_v17, %v2718_v28  ;;  %v3376_v29 = vrot.slane %v3374_v57, 5  ;;  %v3390_v11 = vshll.u32 %v6873_v40, 16  ;;  %v2501_v17 = vrot.slane %v2499_v21, 4 }
 0x209   : > { %v4092_v26 = vadd.f32 %v6803_v61, %v4056_v13  ;;  %v6877_v4 = vrot.slane %v3380_v45, 5  ;;  %v6879_v52 = vrot.slane %v3384_v49, 4  ;;  %v5306_v13 = vrot.slane %v5290_v12, 9 }
 0x20a   : > { %v3377_v28 = vor.u32 %v3376_v29, %v3373_v2  ;;  %v2502_v59 = vrot.slane %v5662_v54, 5  ;;  %v6890_v57 = vrot.slane %v3390_v11, 5 }
 0x20b   : > { %v4124_v33 = vmax.f32 %v4092_v26, 0.0  ;;  %v3981_v48 = vpop.f32.mrf.mxu0  ;;  %v3387_v26 = vor.u32 %v6879_v52, %v6877_v4 }
 0x20c   : > { %v3583_v43 = vpop.f32.mrf.mxu3  ;;  %5434 = vmatmul.msk.bf16.gmra.mxu2 %vm658_vm5, %v5599_v1  ;;  %v2647_v24 = vpop.f32.mrf.mxu1  ;;  %v6886_v44 = vrot.slane %v3377_v28, 4  ;;  %v2503_v63 = vsel %vm5921_vm8, %v2501_v17, %v2502_v59 }
 0x20d   : > { %v4156_v25 = vsel %vm4154_vm9, %v4124_v33, -inf  ;;  %v3659_v15 = vadd.f32 %v3583_v43, %v3005_v32  ;;  %v2720_v20 = vadd.f32 %v2647_v24, %v6265_v47 }
 0x20e   : > { %v4157_v0 = vmax.f32 %v4155_v22, %v4156_v25 }
 0x20f   : > { %v4057_v62 = vadd.f32 %v3981_v48, %v3659_v15  ;;  %v2932_v1 = vpop.f32.mrf.mxu2  ;;  %v2500_v48 = vsel %vm5921_vm8, %v5306_v13, %v2499_v21  ;;  %v2552_v21 = vunpack.c.l.b16 %v2503_v63 }
 0x210   : > { %v4219_v45 = vrot.slane %v4157_v0, 2  ;;  %v4220_v32 = vrot.slane %v4157_v0, 4  ;;  %v4221_v49 = vrot.slane %v4157_v0, 6  ;;  %v4316_v47 = vsel %vm4315_vm10, %v4157_v0, -inf }
 0x211   : > { %v4317_v2 = vrot.slane %v4316_v47, 4  ;;  %v4093_v22 = vadd.f32 %v6803_v61, %v4057_v62  ;;  %5499 = vmatmul.msk.bf16.gmra.mxu3 %vm658_vm5, %v3510_v18  ;;  %v3006_v33 = vadd.f32 %v2932_v1, %v2719_v10  ;;  %v2551_v0 = vunpack.c.l.b16 %v2500_v48 }
 0x212   : > { %v4323_v29 = vsel %vm4315_vm10, %v4219_v45, -inf  ;;  %v4330_v43 = vsel %vm4315_vm10, %v4220_v32, -inf  ;;  %v4337_v24 = vsel %vm4315_vm10, %v4221_v49, -inf }
 0x213   : > { %v4318_v52 = vmax.f32 %v4316_v47, %v4317_v2  ;;  %v4324_v11 = vrot.slane %v4323_v29, 4  ;;  %v4331_v25 = vrot.slane %v4330_v43, 4  ;;  %v4338_v15 = vrot.slane %v4337_v24, 4  ;;  %v3984_v12 = vpop.f32.mrf.mxu0 }
 0x214   : > { %v4125_v18 = vmax.f32 %v4093_v22, 0.0  ;;  %v3586_v10 = vpop.f32.mrf.mxu3  ;;  %v2650_v28 = vpop.f32.mrf.mxu1  ;;  %v6910_v49 = vpack.c.b16 %v2552_v21, %v2551_v0 }
 0x215   : > { %v4319_v54 = vrot.slane %v4318_v52, 2  ;;  %v4325_v62 = vmax.f32 %v4323_v29, %v4324_v11  ;;  %v4332_v1 = vmax.f32 %v4330_v43, %v4331_v25  ;;  %v4339_v17 = vmax.f32 %v4337_v24, %v4338_v15  ;;  %v5600_v11 = vld [vmem:[%s5735_s27 + $0x9c] sm:$0xff] }
 0x216   : > { %v4159_v59 = vsel %vm4154_vm9, %v4125_v18, -inf  ;;  %5548 = vmatmul.msk.bf16.gmra.mxu0 %vm658_vm5, %v6857_v58  ;;  %v3660_v45 = vadd.f32 %v3586_v10, %v3006_v33  ;;  %v2721_v32 = vadd.f32 %v2650_v28, %v6277_v53  ;;  %v6916_v25 = vrot.slane %v3387_v26, 4 }
 0x217   : > { %v4320_v47 = vmax.f32 %v4318_v52, %v4319_v54  ;;  %v4326_v2 = vrot.slane %v4325_v62, 2  ;;  %v4333_v22 = vrot.slane %v4332_v1, 2  ;;  %v4340_v48 = vrot.slane %v4339_v17, 2  ;;  %v2934_v29 = vpop.f32.mrf.mxu2  ;;  %5322 = vmatmul.msk.bf16.gmra.mxu1 %vm658_vm5, %v6859_v7 }
 0x218   : > { %v4160_v43 = vmax.f32 %v6862_v27, %v4159_v59  ;;  %v4058_v24 = vadd.f32 %v3984_v12, %v3660_v45  ;;  %v3007_v63 = vadd.f32 %v2934_v29, %v2720_v20 }
 0x219   : > { %v4321_v58 = vrot.slane %v4320_v47, 1  ;;  %v4327_v33 = vmax.f32 %v4325_v62, %v4326_v2  ;;  %v4334_v53 = vmax.f32 %v4332_v1, %v4333_v22  ;;  %v4341_v15 = vmax.f32 %v4339_v17, %v4340_v48 }
 0x21a   : > { %v4222_v18 = vrot.slane %v4160_v43, 2  ;;  %v4223_v52 = vrot.slane %v4160_v43, 4  ;;  %v4224_v10 = vrot.slane %v4160_v43, 6  ;;  %v4344_v28 = vsel %vm4315_vm10, %v4160_v43, -inf }
 0x21b   : > { %v4322_v0 = vmax.f32 %v4320_v47, %v4321_v58  ;;  %v4328_v21 = vrot.slane %v4327_v33, 1  ;;  %v4335_v54 = vrot.slane %v4334_v53, 1  ;;  %v4342_v7 = vrot.slane %v4341_v15, 1  ;;  %v3986_v13 = vpop.f32.mrf.mxu0 }
 0x21c   : > { %v4345_v27 = vrot.slane %v4344_v28, 4  ;;  %v4351_v20 = vsel %vm4315_vm10, %v4222_v18, -inf  ;;  %v4358_v26 = vsel %vm4315_vm10, %v4223_v52, -inf  ;;  %v4365_v12 = vsel %vm4315_vm10, %v4224_v10, -inf  ;;  %v3588_v62 = vpop.f32.mrf.mxu3  ;;  %5435 = vmatmul.msk.bf16.gmra.mxu2 %vm658_vm5, %v5600_v11  ;;  %v2652_v1 = vpop.f32.mrf.mxu1 }
 0x21d   : > { %v4329_v17 = vmax.f32 %v4327_v33, %v4328_v21  ;;  %v4336_v59 = vmax.f32 %v4334_v53, %v4335_v54  ;;  %v4343_v45 = vmax.f32 %v4341_v15, %v4342_v7  ;;  %v4352_v2 = vrot.slane %v4351_v20, 4 }
 0x21e   : > { %v4346_v47 = vmax.f32 %v4344_v28, %v4345_v27  ;;  %v4359_v22 = vrot.slane %v4358_v26, 4  ;;  %v4366_v48 = vrot.slane %v4365_v12, 4  ;;  %v4094_v29 = vadd.f32 %v6803_v61, %v4058_v24 }
 0x21f   : > { %v4829_v43 = vsel %vm4828_vm11, %v4329_v17, %v4322_v0  ;;  %v4353_v58 = vmax.f32 %v4351_v20, %v4352_v2  ;;  %v3661_v18 = vadd.f32 %v3588_v62, %v3007_v63  ;;  %v2937_v52 = vpop.f32.mrf.mxu2  ;;  %v2722_v11 = vadd.f32 %v2652_v1, %v6290_v42 }
 0x220   : > { %v4831_v33 = vsel %vm4830_vm12, %v4336_v59, %v4829_v43  ;;  %v4347_v53 = vrot.slane %v4346_v47, 2  ;;  %v4360_v15 = vmax.f32 %v4358_v26, %v4359_v22  ;;  %v4367_v10 = vmax.f32 %v4365_v12, %v4366_v48  ;;  %v5517_v59 = vld [vmem:[%s5735_s27 + $0xa8] sm:$0xe] }
 0x221   : > { %v4833_v28 = vsel %vm4832_vm13, %v4343_v45, %v4831_v33  ;;  %v4354_v21 = vrot.slane %v4353_v58, 2  ;;  %v4126_v54 = vmax.f32 %v4094_v29, 0.0  ;;  %v4059_v7 = vadd.f32 %v3986_v13, %v3661_v18  ;;  %5500 = vmatmul.msk.bf16.gmra.mxu3 %vm658_vm5, %v3511_v51  ;;  %v5291_v18 = vld [vmem:[%s5735_s27 + $0xa8] sm:$0xe] }
 0x222   : > { %v4348_v24 = vmax.f32 %v4346_v47, %v4347_v53  ;;  %v4361_v63 = vrot.slane %v4360_v15, 2  ;;  %v4368_v42 = vrot.slane %v4367_v10, 2  ;;  %v3008_v0 = vadd.f32 %v2937_v52, %v2721_v32 }
 0x223   : > { %v4355_v27 = vmax.f32 %v4353_v58, %v4354_v21  ;;  %v4161_v20 = vsel %vm4154_vm9, %v4126_v54, -inf  ;;  %v4095_v26 = vadd.f32 %v6803_v61, %v4059_v7  ;;  %v3989_v12 = vpop.f32.mrf.mxu0  ;;  %v3393_v13 = vsel %vm5747_vm4, %v6916_v25, %v6890_v57 }
 0x224   : > { %v4349_v31 = vrot.slane %v4348_v24, 1  ;;  %v4362_v34 = vmax.f32 %v4360_v15, %v4361_v63  ;;  %v4369_v51 = vmax.f32 %v4367_v10, %v4368_v42  ;;  %v3591_v62 = vpop.f32.mrf.mxu3  ;;  %v2655_v1 = vpop.f32.mrf.mxu1  ;;  %v7387_v32 = vsel %vm5747_vm4, %v6886_v44, %v6877_v4  ;;  %v5601_v10 = vld [vmem:[%s5735_s27 + $0xa8] sm:$0xff] }
 0x225   : > { %v6943_v17 = vunpack.c.l.b16 %v7387_v32  ;;  %v4356_v45 = vrot.slane %v4355_v27, 1  ;;  %v4127_v2 = vmax.f32 %v4095_v26, 0.0  ;;  %v3662_v47 = vadd.f32 %v3591_v62, %v3008_v0 }
 0x226   : > { %v6947_v22 = vadd.f32 %v2655_v1, %v6304_v41  ;;  %v4350_v57 = vmax.f32 %v4348_v24, %v4349_v31  ;;  %v4363_v25 = vrot.slane %v4362_v34, 1  ;;  %v4370_v48 = vrot.slane %v4369_v51, 1  ;;  %5549 = vmatmul.msk.bf16.gmra.mxu0 %vm658_vm5, %v6870_v5  ;;  %v5663_v24 = vld [vmem:[%s5735_s27 + $0xac] sm:$0xf]  ;;  %v5479_v1 = vld [vmem:[%s5735_s27 + $0xb4] sm:$0xf] }
 0x227   : > { %v3493_v29 = vunpack.c.l.b16 %v3393_v13  ;;  %v4357_v4 = vmax.f32 %v4355_v27, %v4356_v45  ;;  %v6953_v44 = vsel %vm4154_vm9, %v4127_v2, -inf  ;;  %v4060_v43 = vadd.f32 %v3989_v12, %v3662_v47  ;;  %v2939_v58 = vpop.f32.mrf.mxu2  ;;  %5323 = vmatmul.msk.bf16.gmra.mxu1 %vm658_vm5, %v6910_v49 }
 0x228   : > { %v5533_v41 = vrot.slane %v5517_v59, 9  ;;  %v4364_v52 = vmax.f32 %v4362_v34, %v4363_v25  ;;  %v4371_v33 = vmax.f32 %v4369_v51, %v4370_v48  ;;  %v4835_v53 = vsel %vm4834_vm14, %v4350_v57, %v4833_v28  ;;  %v5664_v51 = vld [vmem:[%s5735_s27 + $0xb0] sm:$0x1] }
 0x229   : > { %v3009_v15 = vadd.f32 %v2939_v58, %v2722_v11  ;;  %v4837_v5 = vsel %vm4836_vm15, %v4357_v4, %v4835_v53  ;;  %v4096_v21 = vadd.f32 %v6803_v61, %v4060_v43  ;;  %v3512_v49 = vpack.c.b16 %v3493_v29, %v6943_v17 }
 0x22a   : > { %v3838_v54 = vrot.slane %v6853_v19, 5  ;;  %v4839_v7 = vsel %vm4838_vm0, %v4364_v52, %v4837_v5  ;;  %v3841_v28 = vrot.slane %v6873_v40, 5  ;;  %v5307_v11 = vrot.slane %v5291_v18, 9 }
 0x22b   : > { %v2506_v63 = vrot.slane %v5663_v24, 5  ;;  %v4841_v42 = vsel %vm4840_vm1, %v4371_v33, %v4839_v7  ;;  %v4128_v0 = vmax.f32 %v4096_v21, 0.0  ;;  %v3991_v27 = vpop.f32.mrf.mxu0  ;;  %v2509_v62 = vrot.slane %v5664_v51, 5 }
 0x22c   : > { %v3839_v26 = vsel %vm5921_vm8, %v5533_v41, %v3838_v54  ;;  %v3840_v12 = vrot.slane %v3838_v54, 4  ;;  %4899 = vst.msk [vmem:[%s6963_s15] sm:$0xff] %vm4154_vm9, %v4841_v42  ;;  %v3593_v19 = vpop.f32.mrf.mxu3  ;;  %5436 = vmatmul.msk.bf16.gmra.mxu2 %vm658_vm5, %v5601_v10  ;;  %v2657_v40 = vpop.f32.mrf.mxu1  ;;  %v3395_v43 = vshrl.u32 %v5479_v1, 16  ;;  %v3398_v58 = vshll.u32 %v5479_v1, 16  ;;  %v6993_v10 = vld [vmem:[%s5735_s27 + $0xb8] sm:$0xf] }
 0x22d   : > { %v3890_v13 = vunpack.c.l.b16 %v3839_v26  ;;  %v2507_v31 = vsel %vm5921_vm8, %v5307_v11, %v2506_v63  ;;  %v2508_v34 = vrot.slane %v2506_v63, 4  ;;  %v4162_v32 = vsel %vm4154_vm9, %v4128_v0, -inf }
 0x22e   : > { %v3663_v17 = vadd.f32 %v3593_v19, %v3009_v15  ;;  %v3842_v59 = vsel %vm5921_vm8, %v3840_v12, %v3841_v28  ;;  %v2724_v45 = vadd.f32 %v2657_v40, %v6317_v56  ;;  %v4163_v2 = vmax.f32 %v4161_v20, %v4162_v32 }
 0x22f   : > { %v3891_v47 = vunpack.c.l.b16 %v3842_v59  ;;  %v2510_v57 = vsel %vm5921_vm8, %v2508_v34, %v2509_v62  ;;  %v2553_v25 = vunpack.c.l.b16 %v2507_v31  ;;  %v2942_v29 = vpop.f32.mrf.mxu2  ;;  %v3397_v26 = vrot.slane %v3395_v43, 4 }
 0x230   : > { %v4061_v48 = vadd.f32 %v3991_v27, %v3663_v17  ;;  %v2554_v4 = vunpack.c.l.b16 %v2510_v57  ;;  %v4225_v41 = vrot.slane %v4163_v2, 2  ;;  %v4226_v18 = vrot.slane %v4163_v2, 4 }
 0x231   : > { %v4227_v52 = vrot.slane %v4163_v2, 6  ;;  %v4372_v33 = vsel %vm4315_vm10, %v4163_v2, -inf  ;;  %5501 = vmatmul.msk.bf16.gmra.mxu3 %vm658_vm5, %v3512_v49  ;;  %v3910_v20 = vpack.c.b16 %v3891_v47, %v3890_v13  ;;  %v3010_v15 = vadd.f32 %v2942_v29, %v6947_v22  ;;  %v5602_v29 = vld [vmem:[%s5735_s27 + $0xb4] sm:$0xff] }
 0x232   : > { %v4373_v53 = vrot.slane %v4372_v33, 4  ;;  %v4097_v56 = vadd.f32 %v6803_v61, %v4061_v48  ;;  %v4379_v5 = vsel %vm4315_vm10, %v4225_v41, -inf  ;;  %v4386_v21 = vsel %vm4315_vm10, %v4226_v18, -inf }
 0x233   : > { %v4393_v54 = vsel %vm4315_vm10, %v4227_v52, -inf  ;;  %v2572_v7 = vpack.c.b16 %v2554_v4, %v2553_v25  ;;  %v4380_v11 = vrot.slane %v4379_v5, 4  ;;  %v4387_v24 = vrot.slane %v4386_v21, 4  ;;  %v3994_v42 = vpop.f32.mrf.mxu0 }
 0x234   : > { %v4374_v28 = vmax.f32 %v4372_v33, %v4373_v53  ;;  %v4394_v63 = vrot.slane %v4393_v54, 4  ;;  %v4129_v0 = vmax.f32 %v4097_v56, 0.0  ;;  %v3596_v27 = vpop.f32.mrf.mxu3  ;;  %v2660_v49 = vpop.f32.mrf.mxu1  ;;  %v3400_v12 = vrot.slane %v3398_v58, 5 }
 0x235   : > { %v3404_v22 = vshll.u32 %v6993_v10, 16  ;;  %v4381_v13 = vmax.f32 %v4379_v5, %v4380_v11  ;;  %v4388_v40 = vmax.f32 %v4386_v21, %v4387_v24  ;;  %v3664_v51 = vadd.f32 %v3596_v27, %v3010_v15 }
 0x236   : > { %v4375_v19 = vrot.slane %v4374_v28, 2  ;;  %v4395_v31 = vmax.f32 %v4393_v54, %v4394_v63  ;;  %v4165_v34 = vsel %vm4154_vm9, %v4129_v0, -inf  ;;  %5550 = vmatmul.msk.bf16.gmra.mxu0 %vm658_vm5, %v3910_v20  ;;  %v7002_v62 = vadd.f32 %v2660_v49, %v6333_v23 }
 0x237   : > { %v3401_v1 = vor.u32 %v3400_v12, %v3397_v26  ;;  %v4382_v17 = vrot.slane %v4381_v13, 2  ;;  %v4389_v59 = vrot.slane %v4388_v40, 2  ;;  %v2944_v47 = vpop.f32.mrf.mxu2  ;;  %5324 = vmatmul.msk.bf16.gmra.mxu1 %vm658_vm5, %v2572_v7  ;;  %v4166_v57 = vmax.f32 %v6953_v44, %v4165_v34 }
 0x238   : > { %v4376_v32 = vmax.f32 %v4374_v28, %v4375_v19  ;;  %v4396_v2 = vrot.slane %v4395_v31, 2  ;;  %v4062_v25 = vadd.f32 %v3994_v42, %v3664_v51  ;;  %v3011_v48 = vadd.f32 %v2944_v47, %v2724_v45 }
 0x239   : > { %v3402_v4 = vrot.slane %v3401_v1, 4  ;;  %v4383_v58 = vmax.f32 %v4381_v13, %v4382_v17  ;;  %v4390_v41 = vmax.f32 %v4388_v40, %v4389_v59  ;;  %v4228_v23 = vrot.slane %v4166_v57, 2 }
 0x23a   : > { %v4377_v43 = vrot.slane %v4376_v32, 1  ;;  %v4397_v18 = vmax.f32 %v4395_v31, %v4396_v2  ;;  %v4229_v52 = vrot.slane %v4166_v57, 4  ;;  %v4230_v33 = vrot.slane %v4166_v57, 6 }
 0x23b   : > { %v4400_v53 = vsel %vm4315_vm10, %v4166_v57, -inf  ;;  %v4384_v20 = vrot.slane %v4383_v58, 1  ;;  %v4391_v15 = vrot.slane %v4390_v41, 1  ;;  %v3996_v21 = vpop.f32.mrf.mxu0  ;;  %v4407_v44 = vsel %vm4315_vm10, %v4228_v23, -inf }
 0x23c   : > { %v4378_v56 = vmax.f32 %v4376_v32, %v4377_v43  ;;  %v4398_v5 = vrot.slane %v4397_v18, 1  ;;  %v4401_v54 = vrot.slane %v4400_v53, 4  ;;  %v4414_v45 = vsel %vm4315_vm10, %v4229_v52, -inf  ;;  %v3598_v28 = vpop.f32.mrf.mxu3  ;;  %5437 = vmatmul.msk.bf16.gmra.mxu2 %vm658_vm5, %v5602_v29  ;;  %v2662_v0 = vpop.f32.mrf.mxu1  ;;  %v5481_v29 = vld [vmem:[%s5735_s27 + $0xbc] sm:$0x1] }
 0x23d   : > { %v4421_v7 = vsel %vm4315_vm10, %v4230_v33, -inf  ;;  %v4385_v11 = vmax.f32 %v4383_v58, %v4384_v20  ;;  %v4392_v24 = vmax.f32 %v4390_v41, %v4391_v15  ;;  %v4408_v42 = vrot.slane %v4407_v44, 4  ;;  %v5518_v15 = vld [vmem:[%s5735_s27 + $0xb4] sm:$0xe] }
 0x23e   : > { %v4399_v63 = vmax.f32 %v4397_v18, %v4398_v5  ;;  %v4402_v27 = vmax.f32 %v4400_v53, %v4401_v54  ;;  %v4415_v49 = vrot.slane %v4414_v45, 4  ;;  %v4422_v26 = vrot.slane %v4421_v7, 4 }
 0x23f   : > { %v4098_v12 = vadd.f32 %v6803_v61, %v4062_v25  ;;  %v4842_v19 = vsel %vm4828_vm11, %v4385_v11, %v4378_v56  ;;  %v4409_v13 = vmax.f32 %v4407_v44, %v4408_v42  ;;  %v3665_v40 = vadd.f32 %v3598_v28, %v3011_v48  ;;  %v2947_v34 = vpop.f32.mrf.mxu2 }
 0x240   : > { %v3406_v31 = vrot.slane %v3404_v22, 5  ;;  %v4843_v51 = vsel %vm4830_vm12, %v4392_v24, %v4842_v19  ;;  %v4403_v1 = vrot.slane %v4402_v27, 2  ;;  %v4416_v32 = vmax.f32 %v4414_v45, %v4415_v49 }
 0x241   : > { %v4423_v17 = vmax.f32 %v4421_v7, %v4422_v26  ;;  %v4844_v59 = vsel %vm4832_vm13, %v4399_v63, %v4843_v51  ;;  %v4410_v2 = vrot.slane %v4409_v13, 2  ;;  %v4130_v47 = vmax.f32 %v4098_v12, 0.0  ;;  %v5603_v51 = vld [vmem:[%s5735_s27 + $0xc0] sm:$0xff] }
 0x242   : > { %v4063_v57 = vadd.f32 %v3996_v21, %v3665_v40  ;;  %v4404_v43 = vmax.f32 %v4402_v27, %v4403_v1  ;;  %v4417_v25 = vrot.slane %v4416_v32, 2  ;;  %v3407_v48 = vsel %vm5747_vm4, %v3402_v4, %v3406_v31 }
 0x243   : > { %v4424_v58 = vrot.slane %v4423_v17, 2  ;;  %v4411_v22 = vmax.f32 %v4409_v13, %v4410_v2  ;;  %v7020_v41 = vsel %vm4154_vm9, %v4130_v47, -inf  ;;  %v3999_v23 = vpop.f32.mrf.mxu0  ;;  %v3408_v52 = vshrl.u32 %v6993_v10, 16 }
 0x244   : > { %v4099_v18 = vadd.f32 %v6803_v61, %v4063_v57  ;;  %v4405_v33 = vrot.slane %v4404_v43, 1  ;;  %v4418_v53 = vmax.f32 %v4416_v32, %v4417_v25  ;;  %v3414_v20 = vshll.u32 %v5481_v29, 16  ;;  %v3601_v5 = vpop.f32.mrf.mxu3  ;;  %v2665_v26 = vpop.f32.mrf.mxu1 }
 0x245   : > { %v4425_v56 = vmax.f32 %v4423_v17, %v4424_v58  ;;  %v4412_v21 = vrot.slane %v4411_v22, 1  ;;  %v3410_v44 = vrot.slane %v3408_v52, 4  ;;  %v3494_v4 = vunpack.c.l.b16 %v3407_v48 }
 0x246   : > { %v4131_v54 = vmax.f32 %v4099_v18, 0.0  ;;  %v4406_v45 = vmax.f32 %v4404_v43, %v4405_v33  ;;  %v4419_v7 = vrot.slane %v4418_v53, 1  ;;  %v3416_v11 = vrot.slane %v3414_v20, 5  ;;  %v7388_v18 = vld [vmem:[#allocation2_spill] sm:$0xff]  ;;  %v5665_v20 = vld [vmem:[%s5735_s27 + $0xb8] sm:$0xf] }
 0x247   : > { %v4426_v28 = vrot.slane %v4425_v56, 1  ;;  %v4413_v24 = vmax.f32 %v4411_v22, %v4412_v21  ;;  %v3411_v42 = vor.u32 %v3410_v44, %v3406_v31  ;;  %v5534_v27 = vrot.slane %v5518_v15, 9  ;;  %v2949_v49 = vpop.f32.mrf.mxu2 }
 0x248   : > { %v7026_v63 = vsel %vm4154_vm9, %v4131_v54, -inf  ;;  %v4420_v12 = vmax.f32 %v4418_v53, %v4419_v7  ;;  %v4845_v13 = vsel %vm4834_vm14, %v4406_v45, %v4844_v59  ;;  %v3845_v40 = vrot.slane %v6993_v10, 5  ;;  %v5292_v59 = vld [vmem:[%s5735_s27 + $0xb4] sm:$0xe]  ;;  %v5666_v54 = vld [vmem:[%s5735_s27 + $0xbc] sm:$0x1] }
 0x249   : > { %v4427_v19 = vmax.f32 %v4425_v56, %v4426_v28  ;;  %v4846_v1 = vsel %vm4836_vm15, %v4413_v24, %v4845_v13  ;;  %v3412_v32 = vrot.slane %v3411_v42, 4  ;;  %v3848_v17 = vrot.slane %v5481_v29, 5  ;;  %v7053_v45 = vld [vmem:[%s5735_s27 + $0xc4] sm:$0xf] }
 0x24a   : > { %v3012_v2 = vadd.f32 %v2947_v34, %v7002_v62  ;;  %v4847_v31 = vsel %vm4838_vm0, %v4420_v12, %v4846_v1  ;;  %v3846_v47 = vsel %vm5921_vm8, %v5534_v27, %v3845_v40  ;;  %v3847_v57 = vrot.slane %v3845_v40, 4  ;;  %v5482_v62 = vld [vmem:[%s5735_s27 + $0xc0] sm:$0xf]  ;;  %v7059_v27 = vld [vmem:[%s5735_s27 + $0xc8] sm:$0x1] }
 0x24b   : > { %v2726_v43 = vadd.f32 %v2662_v0, %v6358_v60  ;;  %v4848_v10 = vsel %vm4840_vm1, %v4427_v19, %v4847_v31  ;;  %v3417_v25 = vsel %vm5747_vm4, %v3412_v32, %v3416_v11  ;;  %v3892_v58 = vunpack.c.l.b16 %v3846_v47  ;;  %v4001_v29 = vpop.f32.mrf.mxu0  ;;  %v7065_v19 = vld [vmem:[%s5735_s27 + $0xc0] sm:$0xe] }
 0x24c   : > { %v3666_v48 = vadd.f32 %v3601_v5, %v3012_v2  ;;  %4900 = vst.msk [vmem:[%s6963_s15 + $0x8] sm:$0xff] %vm4154_vm9, %v4848_v10  ;;  %v3495_v34 = vunpack.c.l.b16 %v3417_v25  ;;  %v3849_v22 = vsel %vm5921_vm8, %v3847_v57, %v3848_v17  ;;  %v3603_v0 = vpop.f32.mrf.mxu3  ;;  %v7047_v52 = vadd.f32 %v2665_v26, %v7388_v18  ;;  %5438 = vmatmul.msk.bf16.gmra.mxu2 %vm658_vm5, %v5603_v51  ;;  %v7072_v32 = vpop.f32.mrf.mxu1 }
 0x24d   : > { %v3013_v60 = vadd.f32 %v2949_v49, %v2726_v43  ;;  %v3893_v33 = vunpack.c.l.b16 %v3849_v22  ;;  %v5308_v56 = vrot.slane %v5292_v59, 9  ;;  %v2513_v15 = vrot.slane %v5665_v20, 5 }
 0x24e   : > { %v4064_v53 = vadd.f32 %v3999_v23, %v3666_v48  ;;  %v3513_v5 = vpack.c.b16 %v3495_v34, %v3494_v4  ;;  %v2516_v44 = vrot.slane %v5666_v54, 5  ;;  %v3419_v7 = vshrl.u32 %v5482_v62, 16 }
 0x24f   : > { %v3667_v21 = vadd.f32 %v3603_v0, %v3013_v60  ;;  %v3911_v28 = vpack.c.b16 %v3893_v33, %v3892_v58  ;;  %v2514_v24 = vsel %vm5921_vm8, %v5308_v56, %v2513_v15  ;;  %v2515_v42 = vrot.slane %v2513_v15, 4  ;;  %v7061_v23 = vpop.f32.mrf.mxu2 }
 0x250   : > { %v4100_v11 = vadd.f32 %v6803_v61, %v4064_v53  ;;  %5502 = vmatmul.msk.bf16.gmra.mxu3 %vm658_vm5, %v3513_v5  ;;  %v2555_v49 = vunpack.c.l.b16 %v2514_v24  ;;  %v3421_v26 = vrot.slane %v3419_v7, 4  ;;  %v3422_v12 = vshll.u32 %v5482_v62, 16 }
 0x251   : > { %v4065_v4 = vadd.f32 %v4001_v29, %v3667_v21  ;;  %5551 = vmatmul.msk.bf16.gmra.mxu0 %vm658_vm5, %v3911_v28  ;;  %v2517_v40 = vsel %vm5921_vm8, %v2515_v42, %v2516_v44  ;;  %v3428_v51 = vshll.u32 %v7053_v45, 16  ;;  %v3432_v1 = vshrl.u32 %v7053_v45, 16 }
 0x252   : > { %v4132_v13 = vmax.f32 %v4100_v11, 0.0  ;;  %v2556_v2 = vunpack.c.l.b16 %v2517_v40  ;;  %v3424_v31 = vrot.slane %v3422_v12, 5  ;;  %v3438_v47 = vshll.u32 %v7059_v27, 16  ;;  %v5604_v11 = vld [vmem:[%s5735_s27 + $0xcc] sm:$0xff] }
 0x253   : > { %v4101_v17 = vadd.f32 %v6803_v61, %v4065_v4  ;;  %v7077_v43 = vpop.f32.mrf.mxu0  ;;  %v7079_v59 = vrot.slane %v3428_v51, 5  ;;  %v3434_v10 = vrot.slane %v3432_v1, 4 }
 0x254   : > { %v4168_v57 = vsel %vm4154_vm9, %v4132_v13, -inf  ;;  %v2573_v29 = vpack.c.b16 %v2556_v2, %v2555_v49  ;;  %v3425_v62 = vor.u32 %v3424_v31, %v3421_v26  ;;  %v7083_v34 = vpop.f32.mrf.mxu3  ;;  %v7086_v22 = vrot.slane %v3438_v47, 5  ;;  %v7104_v26 = vpop.f32.mrf.mxu1 }
 0x255   : > { %v4169_v58 = vmax.f32 %v7020_v41, %v4168_v57  ;;  %v4133_v48 = vmax.f32 %v4101_v17, 0.0  ;;  %v3435_v61 = vor.u32 %v3434_v10, %v7079_v59 }
 0x256   : > { %5325 = vmatmul.msk.bf16.gmra.mxu1 %vm658_vm5, %v2573_v29  ;;  %v7093_v15 = vrot.slane %v3425_v62, 4 }
 0x257   : > { %v4231_v18 = vrot.slane %v4169_v58, 2  ;;  %v4232_v33 = vrot.slane %v4169_v58, 4  ;;  %v4233_v53 = vrot.slane %v4169_v58, 6  ;;  %v4428_v56 = vsel %vm4315_vm10, %v4169_v58, -inf  ;;  %v7097_v21 = vpop.f32.mrf.mxu2 }
 0x258   : > { %v4429_v41 = vrot.slane %v4428_v56, 4  ;;  %v4171_v20 = vsel %vm4154_vm9, %v4133_v48, -inf  ;;  %v7095_v5 = vrot.slane %v3435_v61, 4 }
 0x259   : > { %v4435_v54 = vsel %vm4315_vm10, %v4231_v18, -inf  ;;  %v4442_v44 = vsel %vm4315_vm10, %v4232_v33, -inf  ;;  %v4449_v7 = vsel %vm4315_vm10, %v4233_v53, -inf  ;;  %v4172_v28 = vmax.f32 %v7026_v63, %v4171_v20 }
 0x25a   : > { %v4430_v24 = vmax.f32 %v4428_v56, %v4429_v41  ;;  %v4436_v42 = vrot.slane %v4435_v54, 4  ;;  %v4443_v4 = vrot.slane %v4442_v44, 4  ;;  %v4450_v49 = vrot.slane %v4449_v7, 4 }
 0x25b   : > { %v4234_v12 = vrot.slane %v4172_v28, 2  ;;  %v4235_v13 = vrot.slane %v4172_v28, 4  ;;  %v4236_v40 = vrot.slane %v4172_v28, 6  ;;  %v4456_v51 = vsel %vm4315_vm10, %v4172_v28, -inf  ;;  %v7107_v47 = vpop.f32.mrf.mxu0 }
 0x25c   : > { %v4431_v1 = vrot.slane %v4430_v24, 2  ;;  %v4437_v17 = vmax.f32 %v4435_v54, %v4436_v42  ;;  %v4444_v2 = vmax.f32 %v4442_v44, %v4443_v4  ;;  %v4451_v31 = vmax.f32 %v4449_v7, %v4450_v49  ;;  %v7112_v48 = vpop.f32.mrf.mxu3  ;;  %5439 = vmatmul.msk.bf16.gmra.mxu2 %vm658_vm5, %v5604_v11 }
 0x25d   : > { %v4457_v57 = vrot.slane %v4456_v51, 4  ;;  %v4463_v63 = vsel %vm4315_vm10, %v4234_v12, -inf  ;;  %v4470_v10 = vsel %vm4315_vm10, %v4235_v13, -inf  ;;  %v4477_v58 = vsel %vm4315_vm10, %v4236_v40, -inf }
 0x25e   : > { %v4432_v29 = vmax.f32 %v4430_v24, %v4431_v1  ;;  %v4438_v62 = vrot.slane %v4437_v17, 2  ;;  %v4445_v61 = vrot.slane %v4444_v2, 2  ;;  %v4452_v18 = vrot.slane %v4451_v31, 2  ;;  %v7117_v1 = vpop.f32.mrf.mxu1 }
 0x25f   : > { %v4458_v33 = vmax.f32 %v4456_v51, %v4457_v57  ;;  %v4464_v53 = vrot.slane %v4463_v63, 4  ;;  %v4471_v56 = vrot.slane %v4470_v10, 4  ;;  %v4478_v41 = vrot.slane %v4477_v58, 4  ;;  %v7115_v28 = vpop.f32.mrf.mxu2 }
 0x260   : > { %v4433_v20 = vrot.slane %v4432_v29, 1  ;;  %v4439_v54 = vmax.f32 %v4437_v17, %v4438_v62  ;;  %v4446_v44 = vmax.f32 %v4444_v2, %v4445_v61  ;;  %v4453_v7 = vmax.f32 %v4451_v31, %v4452_v18 }
 0x261   : > { %v4459_v42 = vrot.slane %v4458_v33, 2  ;;  %v4465_v4 = vmax.f32 %v4463_v63, %v4464_v53  ;;  %v4472_v49 = vmax.f32 %v4470_v10, %v4471_v56  ;;  %v4479_v12 = vmax.f32 %v4477_v58, %v4478_v41 }
 0x262   : > { %v4434_v13 = vmax.f32 %v4432_v29, %v4433_v20  ;;  %v4440_v11 = vrot.slane %v4439_v54, 1  ;;  %v4447_v24 = vrot.slane %v4446_v44, 1  ;;  %v4454_v40 = vrot.slane %v4453_v7, 1 }
 0x263   : > { %v4460_v51 = vmax.f32 %v4458_v33, %v4459_v42  ;;  %v4466_v57 = vrot.slane %v4465_v4, 2  ;;  %v4473_v0 = vrot.slane %v4472_v49, 2  ;;  %v4480_v25 = vrot.slane %v4479_v12, 2  ;;  %v7123_v63 = vpop.f32.mrf.mxu0 }
 0x264   : > { %v4441_v60 = vmax.f32 %v4439_v54, %v4440_v11  ;;  %v4448_v17 = vmax.f32 %v4446_v44, %v4447_v24  ;;  %v4455_v2 = vmax.f32 %v4453_v7, %v4454_v40  ;;  %v3431_v31 = vsel %vm5747_vm4, %v7093_v15, %v7079_v59  ;;  %v7125_v61 = vpop.f32.mrf.mxu3 }
 0x265   : > { %v4461_v10 = vrot.slane %v4460_v51, 1  ;;  %v4467_v58 = vmax.f32 %v4465_v4, %v4466_v57  ;;  %v4474_v29 = vmax.f32 %v4472_v49, %v4473_v0  ;;  %v4481_v62 = vmax.f32 %v4479_v12, %v4480_v25  ;;  %v5293_v12 = vld [vmem:[%s5735_s27 + $0xc0] sm:$0xe] }
 0x266   : > { %v4849_v18 = vsel %vm4828_vm11, %v4441_v60, %v4434_v13  ;;  %v3441_v33 = vsel %vm5747_vm4, %v7095_v5, %v7086_v22  ;;  %v3496_v53 = vunpack.c.l.b16 %v3431_v31  ;;  %v7389_v56 = vrot.slane %v7053_v45, 5  ;;  %v7152_v40 = vpop.f32.mrf.mxu1 }
 0x267   : > { %v7390_v59 = vrot.slane %v7065_v19, 9  ;;  %v4850_v25 = vsel %vm4830_vm12, %v4448_v17, %v4849_v18  ;;  %v4462_v0 = vmax.f32 %v4460_v51, %v4461_v10  ;;  %v4468_v41 = vrot.slane %v4467_v58, 1  ;;  %v7142_v7 = vpop.f32.mrf.mxu2 }
 0x268   : > { %v4475_v20 = vrot.slane %v4474_v29, 1  ;;  %v4851_v60 = vsel %vm4832_vm13, %v4455_v2, %v4850_v25  ;;  %v4482_v54 = vrot.slane %v4481_v62, 1  ;;  %v3497_v44 = vunpack.c.l.b16 %v3441_v33  ;;  %v5485_v2 = vld [vmem:[%s5735_s27 + $0xcc] sm:$0xf] }
 0x269   : > { %v3853_v15 = vsel %vm5921_vm8, %v7390_v59, %v7389_v56  ;;  %v7391_v22 = vmov %v7389_v56  ;;  %v4469_v42 = vmax.f32 %v4467_v58, %v4468_v41  ;;  %v4852_v4 = vsel %vm4834_vm14, %v4462_v0, %v4851_v60  ;;  %v5668_v56 = vld [vmem:[%s5735_s27 + $0xc8] sm:$0x1]  ;;  %v5487_v60 = vld [vmem:[%s5735_s27 + $0xd4] sm:$0x1] }
 0x26a   : > { %v3854_v5 = vrot.slane %v7391_v22, 4  ;;  %v4476_v19 = vmax.f32 %v4474_v29, %v4475_v20  ;;  %v3894_v49 = vunpack.c.l.b16 %v3853_v15  ;;  %v3514_v13 = vpack.c.b16 %v3497_v44, %v3496_v53  ;;  %v5667_v29 = vld [vmem:[%s5735_s27 + $0xc4] sm:$0xf]  ;;  %v5520_v22 = vld [vmem:[%s5735_s27 + $0xcc] sm:$0xe] }
 0x26b   : > { %v7392_v11 = vrot.slane %v7059_v27, 5  ;;  %v3014_v45 = vadd.f32 %v7061_v23, %v7047_v52  ;;  %v4483_v51 = vmax.f32 %v4481_v62, %v4482_v54  ;;  %v4853_v57 = vsel %vm4836_vm15, %v4469_v42, %v4852_v4  ;;  %v7393_v27 = vld [vmem:[#allocation3_spill] sm:$0xff]  ;;  %v5486_v52 = vld [vmem:[%s5735_s27 + $0xd0] sm:$0xf]  ;;  %v7162_v23 = vpop.f32.mrf.mxu0 }
 0x26c   : > { %v4854_v31 = vsel %vm4838_vm0, %v4476_v19, %v4853_v57  ;;  %5503 = vmatmul.msk.bf16.gmra.mxu3 %vm658_vm5, %v3514_v13  ;;  %v2728_v10 = vadd.f32 %v7072_v32, %v7393_v27  ;;  %v5309_v58 = vrot.slane %v5293_v12, 9  ;;  %v2520_v18 = vrot.slane %v5667_v29, 5  ;;  %v3613_v15 = vpop.f32.mrf.mxu3 }
 0x26d   : > { %v3856_v24 = vsel %vm5921_vm8, %v3854_v5, %v7392_v11  ;;  %v4855_v62 = vsel %vm4840_vm1, %v4483_v51, %v4854_v31  ;;  %v3668_v53 = vadd.f32 %v7083_v34, %v3014_v45  ;;  %v2523_v59 = vrot.slane %v5668_v56, 5 }
 0x26e   : > { %v3895_v17 = vunpack.c.l.b16 %v3856_v24  ;;  %4901 = vst.msk [vmem:[%s6963_s15 + $0x10] sm:$0xff] %vm4154_vm9, %v4855_v62  ;;  %v3015_v32 = vadd.f32 %v7097_v21, %v2728_v10  ;;  %v2521_v25 = vsel %vm5921_vm8, %v5309_v58, %v2520_v18  ;;  %v2522_v0 = vrot.slane %v2520_v18, 4  ;;  %v2677_v51 = vpop.f32.mrf.mxu1 }
 0x26f   : > { %v3443_v41 = vshrl.u32 %v5485_v2, 16  ;;  %v2557_v20 = vunpack.c.l.b16 %v2521_v25  ;;  %v3446_v54 = vshll.u32 %v5485_v2, 16  ;;  %v3452_v44 = vshll.u32 %v5486_v52, 16  ;;  %v2962_v19 = vpop.f32.mrf.mxu2 }
 0x270   : > { %v3912_v33 = vpack.c.b16 %v3895_v17, %v3894_v49  ;;  %v2524_v34 = vsel %vm5921_vm8, %v2522_v0, %v2523_v59  ;;  %v3456_v42 = vshrl.u32 %v5486_v52, 16  ;;  %v4066_v21 = vadd.f32 %v7077_v43, %v3668_v53  ;;  %v7184_v43 = vld [vmem:[%s7373_s2] ss:$0 sm:$0xff] }
 0x271   : > { %v3445_v5 = vrot.slane %v3443_v41, 4  ;;  %v2558_v4 = vunpack.c.l.b16 %v2524_v34  ;;  %v3448_v49 = vrot.slane %v3446_v54, 5  ;;  %v3454_v12 = vrot.slane %v3452_v44, 5 }
 0x272   : > { %5552 = vmatmul.msk.bf16.gmra.mxu0 %vm658_vm5, %v3912_v33  ;;  %v3669_v13 = vadd.f32 %v7112_v48, %v3015_v32  ;;  %v3458_v11 = vrot.slane %v3456_v42, 4  ;;  %v3462_v24 = vshll.u32 %v5487_v60, 16  ;;  %v5536_v45 = vrot.slane %v5520_v22, 9 }
 0x273   : > { %v2574_v57 = vpack.c.b16 %v2558_v4, %v2557_v20  ;;  %v3449_v17 = vor.u32 %v3448_v49, %v3445_v5  ;;  %v3859_v2 = vrot.slane %v5486_v52, 5  ;;  %v2729_v31 = vadd.f32 %v7104_v26, %v6402_v16  ;;  %v4014_v29 = vpop.f32.mrf.mxu0 }
 0x274   : > { %v3459_v27 = vor.u32 %v3458_v11, %v3454_v12  ;;  %v3464_v10 = vrot.slane %v3462_v24, 5  ;;  %v3862_v58 = vrot.slane %v5487_v60, 5  ;;  %v4102_v48 = vadd.f32 %v7184_v43, %v4066_v21  ;;  %v3616_v33 = vpop.f32.mrf.mxu3 }
 0x275   : > { %5326 = vmatmul.msk.bf16.gmra.mxu1 %vm658_vm5, %v2574_v57  ;;  %v3450_v18 = vrot.slane %v3449_v17, 4  ;;  %v3860_v52 = vsel %vm5921_vm8, %v5536_v45, %v3859_v2  ;;  %v3861_v62 = vrot.slane %v3859_v2, 4  ;;  %v4067_v16 = vadd.f32 %v7107_v47, %v3669_v13 }
 0x276   : > { %v3460_v26 = vrot.slane %v3459_v27, 4  ;;  %v3896_v53 = vunpack.c.l.b16 %v3860_v52  ;;  %v3016_v56 = vadd.f32 %v7115_v28, %v2729_v31  ;;  %v2730_v25 = vadd.f32 %v7117_v1, %v6421_v46  ;;  %v2680_v1 = vpop.f32.mrf.mxu1 }
 0x277   : > { %v3455_v59 = vsel %vm5747_vm4, %v3450_v18, %v3454_v12  ;;  %v3863_v32 = vsel %vm5921_vm8, %v3861_v62, %v3862_v58  ;;  %v2731_v0 = vadd.f32 %v7152_v40, %v6441_v50  ;;  %v2964_v28 = vpop.f32.mrf.mxu2  ;;  %v4103_v30 = vadd.f32 %v7184_v43, %v4067_v16 }
 0x278   : > { %v3465_v41 = vsel %vm5747_vm4, %v3460_v26, %v3464_v10  ;;  %v3498_v47 = vunpack.c.l.b16 %v3455_v59  ;;  %v3897_v20 = vunpack.c.l.b16 %v3863_v32  ;;  %v3670_v60 = vadd.f32 %v7125_v61, %v3016_v56 }
 0x279   : > { %v3499_v54 = vunpack.c.l.b16 %v3465_v41  ;;  %v3017_v44 = vadd.f32 %v7142_v7, %v2730_v25  ;;  %v3018_v22 = vadd.f32 %v2962_v19, %v2731_v0  ;;  %v2732_v46 = vadd.f32 %v2677_v51, %v6460_v36 }
 0x27a   : > { %v4068_v34 = vadd.f32 %v7123_v63, %v3670_v60  ;;  %v3913_v40 = vpack.c.b16 %v3897_v20, %v3896_v53  ;;  %v4134_v42 = vmax.f32 %v4102_v48, 0.0  ;;  %v4135_v49 = vmax.f32 %v4103_v30, 0.0 }
 0x27b   : > { %v3515_v50 = vpack.c.b16 %v3499_v54, %v3498_v47  ;;  %v3671_v39 = vadd.f32 %v3613_v15, %v3017_v44  ;;  %v3672_v5 = vadd.f32 %v3616_v33, %v3018_v22  ;;  %v4016_v61 = vpop.f32.mrf.mxu0  ;;  %v3019_v4 = vadd.f32 %v2964_v28, %v2732_v46 }
 0x27c   : > { %v4104_v21 = vadd.f32 %v7184_v43, %v4068_v34  ;;  %v3618_v19 = vpop.f32.mrf.mxu3  ;;  %v4173_v15 = vsel %vm4154_vm9, %v4134_v42, -inf  ;;  %v4176_v57 = vsel %vm4154_vm9, %v4135_v49, -inf  ;;  %v2733_v17 = vadd.f32 %v2680_v1, %v6480_v3 }
 0x27d   : > { %5504 = vmatmul.msk.bf16.gmra.mxu3 %vm658_vm5, %v3515_v50  ;;  %v4069_v7 = vadd.f32 %v7162_v23, %v3671_v39  ;;  %v4070_v63 = vadd.f32 %v4014_v29, %v3672_v5  ;;  %v3673_v11 = vadd.f32 %v3618_v19, %v3019_v4 }
 0x27e   : > { %v4136_v12 = vmax.f32 %v4104_v21, 0.0  ;;  %v7219_v2 = vpop.f32.mrf.mxu1 }
 0x27f   : > { %v4105_v36 = vadd.f32 %v7184_v43, %v4069_v7  ;;  %v2967_v24 = vpop.f32.mrf.mxu2  ;;  %v7216_v23 = vadd.f32 %v7184_v43, %v4070_v63  ;;  %v4071_v18 = vadd.f32 %v4016_v61, %v3673_v11 }
 0x280   : > { %v4174_v13 = vsel %vm4154_vm9, %v4136_v12, -inf  ;;  %v3020_v62 = vadd.f32 %v2967_v24, %v2733_v17 }
 0x281   : > { %v4175_v45 = vmax.f32 %v4173_v15, %v4174_v13  ;;  %v4137_v51 = vmax.f32 %v4105_v36, 0.0 }
 0x282   : > { %5553 = vmatmul.msk.bf16.gmra.mxu0 %vm658_vm5, %v3913_v40 }
 0x283   : > { %v4237_v31 = vrot.slane %v4175_v45, 2  ;;  %v4238_v27 = vrot.slane %v4175_v45, 4  ;;  %v4239_v10 = vrot.slane %v4175_v45, 6  ;;  %v4484_v58 = vsel %vm4315_vm10, %v4175_v45, -inf  ;;  %v7223_v52 = vpop.f32.mrf.mxu0 }
 0x284   : > { %v4485_v29 = vrot.slane %v4484_v58, 4  ;;  %v4177_v48 = vsel %vm4154_vm9, %v4137_v51, -inf  ;;  %v3621_v53 = vpop.f32.mrf.mxu3 }
 0x285   : > { %v4491_v33 = vsel %vm4315_vm10, %v4237_v31, -inf  ;;  %v4498_v16 = vsel %vm4315_vm10, %v4238_v27, -inf  ;;  %v4505_v3 = vsel %vm4315_vm10, %v4239_v10, -inf  ;;  %v4178_v26 = vmax.f32 %v4176_v57, %v4177_v48 }
 0x286   : > { %v4486_v56 = vmax.f32 %v4484_v58, %v4485_v29  ;;  %v4492_v59 = vrot.slane %v4491_v33, 4  ;;  %v4499_v32 = vrot.slane %v4498_v16, 4  ;;  %v4506_v25 = vrot.slane %v4505_v3, 4  ;;  %v2685_v7 = vpop.f32.mrf.mxu1 }
 0x287   : > { %v4240_v0 = vrot.slane %v4178_v26, 2  ;;  %v4241_v41 = vrot.slane %v4178_v26, 4  ;;  %v4242_v47 = vrot.slane %v4178_v26, 6  ;;  %v4512_v20 = vsel %vm4315_vm10, %v4178_v26, -inf  ;;  %v2969_v22 = vpop.f32.mrf.mxu2 }
 0x288   : > { %v4487_v60 = vrot.slane %v4486_v56, 2  ;;  %v4493_v28 = vmax.f32 %v4491_v33, %v4492_v59  ;;  %v4500_v54 = vmax.f32 %v4498_v16, %v4499_v32  ;;  %v4507_v44 = vmax.f32 %v4505_v3, %v4506_v25 }
 0x289   : > { %v4513_v30 = vrot.slane %v4512_v20, 4  ;;  %v4519_v34 = vsel %vm4315_vm10, %v4240_v0, -inf  ;;  %v4526_v46 = vsel %vm4315_vm10, %v4241_v41, -inf  ;;  %v4533_v1 = vsel %vm4315_vm10, %v4242_v47, -inf }
 0x28a   : > { %v4488_v50 = vmax.f32 %v4486_v56, %v4487_v60  ;;  %v4494_v40 = vrot.slane %v4493_v28, 2  ;;  %v4501_v39 = vrot.slane %v4500_v54, 2  ;;  %v4508_v5 = vrot.slane %v4507_v44, 2 }
 0x28b   : > { %v4514_v42 = vmax.f32 %v4512_v20, %v4513_v30  ;;  %v4520_v21 = vrot.slane %v4519_v34, 4  ;;  %v4527_v61 = vrot.slane %v4526_v46, 4  ;;  %v4534_v4 = vrot.slane %v4533_v1, 4  ;;  %v4021_v36 = vpop.f32.mrf.mxu0 }
 0x28c   : > { %v4489_v19 = vrot.slane %v4488_v50, 1  ;;  %v4495_v49 = vmax.f32 %v4493_v28, %v4494_v40  ;;  %v4502_v12 = vmax.f32 %v4500_v54, %v4501_v39  ;;  %v4509_v63 = vmax.f32 %v4507_v44, %v4508_v5  ;;  %v3623_v45 = vpop.f32.mrf.mxu3 }
 0x28d   : > { %v4515_v15 = vrot.slane %v4514_v42, 2  ;;  %v4521_v13 = vmax.f32 %v4519_v34, %v4520_v21  ;;  %v4528_v11 = vmax.f32 %v4526_v46, %v4527_v61  ;;  %v4535_v24 = vmax.f32 %v4533_v1, %v4534_v4 }
 0x28e   : > { %v4496_v51 = vrot.slane %v4495_v49, 1  ;;  %v4503_v57 = vrot.slane %v4502_v12, 1  ;;  %v4510_v17 = vrot.slane %v4509_v63, 1  ;;  %v4107_v31 = vadd.f32 %v7184_v43, %v4071_v18 }
 0x28f   : > { %v4516_v27 = vmax.f32 %v4514_v42, %v4515_v15  ;;  %v4522_v10 = vrot.slane %v4521_v13, 2  ;;  %v4529_v58 = vrot.slane %v4528_v11, 2  ;;  %v4536_v29 = vrot.slane %v4535_v24, 2  ;;  %v2972_v26 = vpop.f32.mrf.mxu2 }
 0x290   : > { %v4490_v48 = vmax.f32 %v4488_v50, %v4489_v19  ;;  %v4497_v33 = vmax.f32 %v4495_v49, %v4496_v51  ;;  %v4504_v16 = vmax.f32 %v4502_v12, %v4503_v57  ;;  %v4511_v3 = vmax.f32 %v4509_v63, %v4510_v17 }
 0x291   : > { %v4517_v56 = vrot.slane %v4516_v27, 1  ;;  %v4523_v59 = vmax.f32 %v4521_v13, %v4522_v10  ;;  %v4530_v32 = vmax.f32 %v4528_v11, %v4529_v58  ;;  %v4537_v25 = vmax.f32 %v4535_v24, %v4536_v29 }
 0x292   : > { %v4856_v0 = vsel %vm4828_vm11, %v4497_v33, %v4490_v48  ;;  %v3674_v41 = vadd.f32 %v3621_v53, %v3020_v62  ;;  %v2734_v47 = vadd.f32 %v7219_v2, %v6499_v38  ;;  %v2735_v18 = vadd.f32 %v2685_v7, %v6519_v9  ;;  %v2687_v9 = vpop.f32.mrf.mxu1 }
 0x293   : > { %v4857_v20 = vsel %vm4830_vm12, %v4504_v16, %v4856_v0  ;;  %v4518_v60 = vmax.f32 %v4516_v27, %v4517_v56  ;;  %v4524_v28 = vrot.slane %v4523_v59, 1  ;;  %v4531_v54 = vrot.slane %v4530_v32, 1  ;;  %v4024_v1 = vpop.f32.mrf.mxu0 }
 0x294   : > { %v4858_v44 = vsel %vm4832_vm13, %v4511_v3, %v4857_v20  ;;  %v4538_v30 = vrot.slane %v4537_v25, 1  ;;  %v4072_v34 = vadd.f32 %v7223_v52, %v3674_v41  ;;  %v3021_v46 = vadd.f32 %v2969_v22, %v2734_v47  ;;  %v3626_v2 = vpop.f32.mrf.mxu3 }
 0x295   : > { %v4525_v50 = vmax.f32 %v4523_v59, %v4524_v28  ;;  %v4532_v40 = vmax.f32 %v4530_v32, %v4531_v54  ;;  %v4859_v62 = vsel %vm4834_vm14, %v4518_v60, %v4858_v44  ;;  %v3022_v38 = vadd.f32 %v2972_v26, %v2735_v18 }
 0x296   : > { %v4138_v53 = vmax.f32 %v7216_v23, 0.0  ;;  %v4108_v39 = vadd.f32 %v7184_v43, %v4072_v34  ;;  %v3675_v5 = vadd.f32 %v3623_v45, %v3021_v46  ;;  %v4539_v42 = vmax.f32 %v4537_v25, %v4538_v30 }
 0x297   : > { %v4860_v21 = vsel %vm4836_vm15, %v4525_v50, %v4859_v62  ;;  %v3676_v61 = vadd.f32 %v3626_v2, %v3022_v38  ;;  %v4139_v22 = vmax.f32 %v4107_v31, 0.0  ;;  %v2974_v19 = vpop.f32.mrf.mxu2  ;;  %v2736_v45 = vadd.f32 %v2687_v9, %v6538_v37 }
 0x298   : > { %v4861_v52 = vsel %vm4838_vm0, %v4532_v40, %v4860_v21  ;;  %v4140_v4 = vmax.f32 %v4108_v39, 0.0  ;;  %v4073_v7 = vadd.f32 %v4021_v36, %v3675_v5  ;;  %v4179_v12 = vsel %vm4154_vm9, %v4138_v53, -inf }
 0x299   : > { %v4862_v49 = vsel %vm4840_vm1, %v4539_v42, %v4861_v52  ;;  %v4074_v15 = vadd.f32 %v4024_v1, %v3676_v61  ;;  %v4182_v11 = vsel %vm4154_vm9, %v4139_v22, -inf  ;;  %v3023_v48 = vadd.f32 %v2974_v19, %v2736_v45 }
 0x29a   : > { %4902 = vst.msk [vmem:[%s6963_s15 + $0x18] sm:$0xff] %vm4154_vm9, %v4862_v49  ;;  %v4180_v23 = vsel %vm4154_vm9, %v4140_v4, -inf  ;;  %v4109_v63 = vadd.f32 %v7184_v43, %v4073_v7  ;;  %v2690_v26 = vpop.f32.mrf.mxu1 }
 0x29b   : > { %v4181_v13 = vmax.f32 %v4179_v12, %v4180_v23  ;;  %v7256_v58 = vadd.f32 %v7184_v43, %v4074_v15  ;;  %v7258_v29 = vpop.f32.mrf.mxu0 }
 0x29c   : > { %v4141_v24 = vmax.f32 %v4109_v63, 0.0  ;;  %v3628_v31 = vpop.f32.mrf.mxu3  ;;  %v2737_v63 = vadd.f32 %v2690_v26, %v6558_v35 }
 0x29d   : > { %v4243_v51 = vrot.slane %v4181_v13, 2  ;;  %v4244_v36 = vrot.slane %v4181_v13, 4  ;;  %v4245_v57 = vrot.slane %v4181_v13, 6  ;;  %v4540_v17 = vsel %vm4315_vm10, %v4181_v13, -inf }
 0x29e   : > { %v4541_v27 = vrot.slane %v4540_v17, 4  ;;  %v4183_v10 = vsel %vm4154_vm9, %v4141_v24, -inf }
 0x29f   : > { %v4547_v33 = vsel %vm4315_vm10, %v4243_v51, -inf  ;;  %v4554_v16 = vsel %vm4315_vm10, %v4244_v36, -inf  ;;  %v4561_v37 = vsel %vm4315_vm10, %v4245_v57, -inf  ;;  %v4184_v3 = vmax.f32 %v4182_v11, %v4183_v10  ;;  %v2977_v44 = vpop.f32.mrf.mxu2 }
 0x2a0   : > { %v4542_v56 = vmax.f32 %v4540_v17, %v4541_v27  ;;  %v4548_v59 = vrot.slane %v4547_v33, 4  ;;  %v4555_v32 = vrot.slane %v4554_v16, 4  ;;  %v4562_v25 = vrot.slane %v4561_v37, 4 }
 0x2a1   : > { %v4246_v0 = vrot.slane %v4184_v3, 2  ;;  %v4247_v41 = vrot.slane %v4184_v3, 4  ;;  %v4248_v47 = vrot.slane %v4184_v3, 6  ;;  %v4568_v18 = vsel %vm4315_vm10, %v4184_v3, -inf }
 0x2a2   : > { %v4543_v20 = vrot.slane %v4542_v56, 2  ;;  %v4549_v60 = vmax.f32 %v4547_v33, %v4548_v59  ;;  %v4556_v28 = vmax.f32 %v4554_v16, %v4555_v32  ;;  %v4563_v54 = vmax.f32 %v4561_v37, %v4562_v25  ;;  %v2692_v51 = vpop.f32.mrf.mxu1 }
 0x2a3   : > { %v4569_v30 = vrot.slane %v4568_v18, 4  ;;  %v4575_v34 = vsel %vm4315_vm10, %v4246_v0, -inf  ;;  %v4582_v46 = vsel %vm4315_vm10, %v4247_v41, -inf  ;;  %v4589_v1 = vsel %vm4315_vm10, %v4248_v47, -inf  ;;  %v4029_v15 = vpop.f32.mrf.mxu0 }
 0x2a4   : > { %v4544_v50 = vmax.f32 %v4542_v56, %v4543_v20  ;;  %v4550_v40 = vrot.slane %v4549_v60, 2  ;;  %v4557_v62 = vrot.slane %v4556_v28, 2  ;;  %v4564_v38 = vrot.slane %v4563_v54, 2  ;;  %v3631_v52 = vpop.f32.mrf.mxu3 }
 0x2a5   : > { %v4570_v2 = vmax.f32 %v4568_v18, %v4569_v30  ;;  %v4576_v9 = vrot.slane %v4575_v34, 4  ;;  %v4583_v53 = vrot.slane %v4582_v46, 4  ;;  %v4590_v39 = vrot.slane %v4589_v1, 4 }
 0x2a6   : > { %v4545_v5 = vrot.slane %v4544_v50, 1  ;;  %v4551_v42 = vmax.f32 %v4549_v60, %v4550_v40  ;;  %v4558_v21 = vmax.f32 %v4556_v28, %v4557_v62  ;;  %v4565_v61 = vmax.f32 %v4563_v54, %v4564_v38 }
 0x2a7   : > { %v4571_v22 = vrot.slane %v4570_v2, 2  ;;  %v4577_v4 = vmax.f32 %v4575_v34, %v4576_v9  ;;  %v4584_v7 = vmax.f32 %v4582_v46, %v4583_v53  ;;  %v4591_v19 = vmax.f32 %v4589_v1, %v4590_v39  ;;  %v2979_v26 = vpop.f32.mrf.mxu2 }
 0x2a8   : > { %v4552_v49 = vrot.slane %v4551_v42, 1  ;;  %v4559_v12 = vrot.slane %v4558_v21, 1  ;;  %v4566_v23 = vrot.slane %v4565_v61, 1  ;;  %v4546_v36 = vmax.f32 %v4544_v50, %v4545_v5 }
 0x2a9   : > { %v4572_v13 = vmax.f32 %v4570_v2, %v4571_v22  ;;  %v4578_v11 = vrot.slane %v4577_v4, 2  ;;  %v4585_v24 = vrot.slane %v4584_v7, 2  ;;  %v4592_v45 = vrot.slane %v4591_v19, 2 }
 0x2aa   : > { %v4553_v57 = vmax.f32 %v4551_v42, %v4552_v49  ;;  %v4560_v17 = vmax.f32 %v4558_v21, %v4559_v12  ;;  %v3677_v27 = vadd.f32 %v3628_v31, %v3023_v48  ;;  %v4567_v3 = vmax.f32 %v4565_v61, %v4566_v23  ;;  %v7283_v39 = vpop.f32.mrf.mxu1 }
 0x2ab   : > { %v4573_v10 = vrot.slane %v4572_v13, 1  ;;  %v4579_v33 = vmax.f32 %v4577_v4, %v4578_v11  ;;  %v4586_v16 = vmax.f32 %v4584_v7, %v4585_v24  ;;  %v4593_v37 = vmax.f32 %v4591_v19, %v4592_v45  ;;  %v4031_v62 = vpop.f32.mrf.mxu0 }
 0x2ac   : > { %v4863_v56 = vsel %vm4828_vm11, %v4553_v57, %v4546_v36  ;;  %v3024_v59 = vadd.f32 %v2977_v44, %v2737_v63  ;;  %v2738_v35 = vadd.f32 %v2692_v51, %v6577_v55  ;;  %v4075_v31 = vadd.f32 %v7258_v29, %v3677_v27  ;;  %v3633_v55 = vpop.f32.mrf.mxu3 }
 0x2ad   : > { %v4864_v32 = vsel %vm4830_vm12, %v4560_v17, %v4863_v56  ;;  %v4574_v25 = vmax.f32 %v4572_v13, %v4573_v10  ;;  %v4580_v0 = vrot.slane %v4579_v33, 1  ;;  %v4587_v41 = vrot.slane %v4586_v16, 1 }
 0x2ae   : > { %v4865_v47 = vsel %vm4832_vm13, %v4567_v3, %v4864_v32  ;;  %v4594_v18 = vrot.slane %v4593_v37, 1  ;;  %v3678_v48 = vadd.f32 %v3631_v52, %v3024_v59  ;;  %v3025_v54 = vadd.f32 %v2979_v26, %v2738_v35 }
 0x2af   : > { %v4581_v20 = vmax.f32 %v4579_v33, %v4580_v0  ;;  %v4588_v60 = vmax.f32 %v4586_v16, %v4587_v41  ;;  %v4866_v28 = vsel %vm4834_vm14, %v4574_v25, %v4865_v47  ;;  %v4142_v50 = vmax.f32 %v7256_v58, 0.0  ;;  %v7287_v52 = vpop.f32.mrf.mxu2 }
 0x2b0   : > { %v4076_v44 = vadd.f32 %v4029_v15, %v3678_v48  ;;  %v4595_v30 = vmax.f32 %v4593_v37, %v4594_v18  ;;  %v3679_v46 = vadd.f32 %v3633_v55, %v3025_v54  ;;  %v4111_v40 = vadd.f32 %v7184_v43, %v4075_v31 }
 0x2b1   : > { %v4867_v34 = vsel %vm4836_vm15, %v4581_v20, %v4866_v28  ;;  %v4185_v5 = vsel %vm4154_vm9, %v4142_v50, -inf }
 0x2b2   : > { %v4868_v1 = vsel %vm4838_vm0, %v4588_v60, %v4867_v34  ;;  %v4112_v29 = vadd.f32 %v7184_v43, %v4076_v44  ;;  %v4077_v2 = vadd.f32 %v4031_v62, %v3679_v46  ;;  %v4143_v42 = vmax.f32 %v4111_v40, 0.0  ;;  %v2697_v32 = vpop.f32.mrf.mxu1 }
 0x2b3   : > { %v4869_v38 = vsel %vm4840_vm1, %v4595_v30, %v4868_v1  ;;  %v4034_v18 = vpop.f32.mrf.mxu0 }
 0x2b4   : > { %4903 = vst.msk [vmem:[%s6963_s15 + $0x20] sm:$0xff] %vm4154_vm9, %v4869_v38  ;;  %v4144_v9 = vmax.f32 %v4112_v29, 0.0  ;;  %v4113_v53 = vadd.f32 %v7184_v43, %v4077_v2  ;;  %v4188_v49 = vsel %vm4154_vm9, %v4143_v42, -inf  ;;  %v3636_v31 = vpop.f32.mrf.mxu3 }
 0x2b6   : > { %v4186_v58 = vsel %vm4154_vm9, %v4144_v9, -inf  ;;  %v4145_v61 = vmax.f32 %v4113_v53, 0.0 }
 0x2b7   : > { %v4187_v21 = vmax.f32 %v4185_v5, %v4186_v58  ;;  %v2984_v34 = vpop.f32.mrf.mxu2 }
 0x2b8   : > { %v4189_v23 = vsel %vm4154_vm9, %v4145_v61, -inf  ;;  %v7394_v61 = vld [vmem:[#allocation4_spill] sm:$0xff] }
 0x2b9   : > { %v4249_v22 = vrot.slane %v4187_v21, 2  ;;  %v4250_v4 = vrot.slane %v4187_v21, 4  ;;  %v4251_v7 = vrot.slane %v4187_v21, 6  ;;  %v4596_v19 = vsel %vm4315_vm10, %v4187_v21, -inf }
 0x2ba   : > { %v4597_v12 = vrot.slane %v4596_v19, 4  ;;  %v4190_v11 = vmax.f32 %v4188_v49, %v4189_v23 }
 0x2bb   : > { %v4603_v63 = vsel %vm4315_vm10, %v4249_v22, -inf  ;;  %v4610_v15 = vsel %vm4315_vm10, %v4250_v4, -inf  ;;  %v4617_v13 = vsel %vm4315_vm10, %v4251_v7, -inf  ;;  %v2739_v22 = vadd.f32 %v7283_v39, %v7394_v61  ;;  %v4036_v39 = vpop.f32.mrf.mxu0 }
 0x2bc   : > { %v4598_v24 = vmax.f32 %v4596_v19, %v4597_v12  ;;  %v4604_v45 = vrot.slane %v4603_v63, 4  ;;  %v4611_v51 = vrot.slane %v4610_v15, 4  ;;  %v4618_v36 = vrot.slane %v4617_v13, 4 }
 0x2bd   : > { %v4252_v57 = vrot.slane %v4190_v11, 2  ;;  %v4253_v17 = vrot.slane %v4190_v11, 4  ;;  %v4254_v27 = vrot.slane %v4190_v11, 6  ;;  %v4624_v10 = vsel %vm4315_vm10, %v4190_v11, -inf }
 0x2be   : > { %v4599_v33 = vrot.slane %v4598_v24, 2  ;;  %v4605_v16 = vmax.f32 %v4603_v63, %v4604_v45  ;;  %v4612_v37 = vmax.f32 %v4610_v15, %v4611_v51  ;;  %v4619_v3 = vmax.f32 %v4617_v13, %v4618_v36  ;;  %v2700_v45 = vpop.f32.mrf.mxu1 }
 0x2bf   : > { %v4625_v56 = vrot.slane %v4624_v10, 4  ;;  %v4631_v59 = vsel %vm4315_vm10, %v4252_v57, -inf  ;;  %v4638_v35 = vsel %vm4315_vm10, %v4253_v17, -inf  ;;  %v4645_v26 = vsel %vm4315_vm10, %v4254_v27, -inf  ;;  %v3638_v57 = vpop.f32.mrf.mxu3 }
 0x2c0   : > { %v4600_v25 = vmax.f32 %v4598_v24, %v4599_v33  ;;  %v4606_v0 = vrot.slane %v4605_v16, 2  ;;  %v4613_v41 = vrot.slane %v4612_v37, 2  ;;  %v4620_v47 = vrot.slane %v4619_v3, 2  ;;  %v2987_v33 = vpop.f32.mrf.mxu2 }
 0x2c1   : > { %v4626_v48 = vmax.f32 %v4624_v10, %v4625_v56  ;;  %v4632_v20 = vrot.slane %v4631_v59, 4  ;;  %v4639_v60 = vrot.slane %v4638_v35, 4  ;;  %v4646_v28 = vrot.slane %v4645_v26, 4 }
 0x2c2   : > { %v4601_v54 = vrot.slane %v4600_v25, 1  ;;  %v4607_v44 = vmax.f32 %v4605_v16, %v4606_v0  ;;  %v4614_v55 = vmax.f32 %v4612_v37, %v4613_v41  ;;  %v4621_v30 = vmax.f32 %v4619_v3, %v4620_v47 }
 0x2c3   : > { %v4627_v46 = vrot.slane %v4626_v48, 2  ;;  %v4633_v1 = vmax.f32 %v4631_v59, %v4632_v20  ;;  %v4640_v50 = vmax.f32 %v4638_v35, %v4639_v60  ;;  %v4647_v40 = vmax.f32 %v4645_v26, %v4646_v28  ;;  %v7395_v35 = vld [vmem:[#allocation5_spill] sm:$0xff] }
 0x2c4   : > { %v4608_v29 = vrot.slane %v4607_v44, 1  ;;  %v4615_v62 = vrot.slane %v4614_v55, 1  ;;  %v4622_v38 = vrot.slane %v4621_v30, 1  ;;  %v4602_v42 = vmax.f32 %v4600_v25, %v4601_v54 }
 0x2c5   : > { %v4628_v2 = vmax.f32 %v4626_v48, %v4627_v46  ;;  %v4634_v9 = vrot.slane %v4633_v1, 2  ;;  %v4641_v53 = vrot.slane %v4640_v50, 2  ;;  %v4648_v5 = vrot.slane %v4647_v40, 2 }
 0x2c6   : > { %v4609_v58 = vmax.f32 %v4607_v44, %v4608_v29  ;;  %v4616_v21 = vmax.f32 %v4614_v55, %v4615_v62  ;;  %v4623_v12 = vmax.f32 %v4621_v30, %v4622_v38  ;;  %v3026_v63 = vadd.f32 %v7287_v52, %v2739_v22  ;;  %v2702_v47 = vpop.f32.mrf.mxu1  ;;  %v7396_v55 = vld [vmem:[#allocation6_spill] sm:$0xff] }
 0x2c7   : > { %v4629_v4 = vrot.slane %v4628_v2, 1  ;;  %v4635_v7 = vmax.f32 %v4633_v1, %v4634_v9  ;;  %v4642_v19 = vmax.f32 %v4640_v50, %v4641_v53  ;;  %v4649_v49 = vmax.f32 %v4647_v40, %v4648_v5 }
 0x2c8   : > { %v4870_v23 = vsel %vm4828_vm11, %v4609_v58, %v4602_v42  ;;  %v3680_v37 = vadd.f32 %v3636_v31, %v3026_v63  ;;  %v2741_v59 = vadd.f32 %v2700_v45, %v6638_v14  ;;  %v2740_v26 = vadd.f32 %v2697_v32, %v7395_v35  ;;  %v2989_v54 = vpop.f32.mrf.mxu2 }
 0x2c9   : > { %v4871_v15 = vsel %vm4830_vm12, %v4616_v21, %v4870_v23  ;;  %v4630_v13 = vmax.f32 %v4628_v2, %v4629_v4  ;;  %v4636_v11 = vrot.slane %v4635_v7, 1  ;;  %v4643_v24 = vrot.slane %v4642_v19, 1 }
 0x2ca   : > { %v4872_v51 = vsel %vm4832_vm13, %v4623_v12, %v4871_v15  ;;  %v4650_v36 = vrot.slane %v4649_v49, 1  ;;  %v4078_v25 = vadd.f32 %v4034_v18, %v3680_v37  ;;  %v3028_v0 = vadd.f32 %v2987_v33, %v2741_v59 }
 0x2cb   : > { %v4637_v17 = vmax.f32 %v4635_v7, %v4636_v11  ;;  %v4644_v27 = vmax.f32 %v4642_v19, %v4643_v24  ;;  %v4873_v10 = vsel %vm4834_vm14, %v4630_v13, %v4872_v51  ;;  %v3027_v41 = vadd.f32 %v2984_v34, %v2740_v26 }
 0x2cc   : > { %v4651_v16 = vmax.f32 %v4649_v49, %v4650_v36  ;;  %v4114_v60 = vadd.f32 %v7184_v43, %v4078_v25  ;;  %v2742_v30 = vadd.f32 %v2702_v47, %v7396_v55 }
 0x2cd   : > { %v4874_v52 = vsel %vm4836_vm15, %v4637_v17, %v4873_v10  ;;  %v3681_v31 = vadd.f32 %v3638_v57, %v3027_v41 }
 0x2ce   : > { %v4875_v3 = vsel %vm4838_vm0, %v4644_v27, %v4874_v52  ;;  %v4039_v48 = vpop.f32.mrf.mxu0  ;;  %v4146_v46 = vmax.f32 %v4114_v60, 0.0  ;;  %v3029_v1 = vadd.f32 %v2989_v54, %v2742_v30 }
 0x2cf   : > { %v4876_v56 = vsel %vm4840_vm1, %v4651_v16, %v4875_v3  ;;  %v4079_v50 = vadd.f32 %v4036_v39, %v3681_v31 }
 0x2d0   : > { %4904 = vst.msk [vmem:[%s6963_s15 + $0x28] sm:$0xff] %vm4154_vm9, %v4876_v56  ;;  %v4191_v34 = vsel %vm4154_vm9, %v4146_v46, -inf  ;;  %v2992_v11 = vpop.f32.mrf.mxu2 }
 0x2d1   : > { %v4115_v62 = vadd.f32 %v7184_v43, %v4079_v50 }
 0x2d3   : > { %v3641_v20 = vpop.f32.mrf.mxu3  ;;  %v2705_v22 = vpop.f32.mrf.mxu1  ;;  %v4147_v4 = vmax.f32 %v4115_v62, 0.0 }
 0x2d4   : > { %v3682_v28 = vadd.f32 %v3641_v20, %v3028_v0 }
 0x2d5   : > { %v4194_v57 = vsel %vm4154_vm9, %v4147_v4, -inf }
 0x2d6   : > { %v4080_v44 = vadd.f32 %v4039_v48, %v3682_v28  ;;  %v4041_v2 = vpop.f32.mrf.mxu0 }
 0x2d8   : > { %v4116_v14 = vadd.f32 %v7184_v43, %v4080_v44 }
 0x2da   : > { %v4148_v32 = vmax.f32 %v4116_v14, 0.0  ;;  %v2994_v14 = vpop.f32.mrf.mxu2 }
 0x2db   : > { %v3643_v18 = vpop.f32.mrf.mxu3  ;;  %v2707_v41 = vpop.f32.mrf.mxu1 }
 0x2dc   : > { %v4192_v40 = vsel %vm4154_vm9, %v4148_v32, -inf  ;;  %v3683_v29 = vadd.f32 %v3643_v18, %v3029_v1 }
 0x2dd   : > { %v4193_v38 = vmax.f32 %v4191_v34, %v4192_v40 }
 0x2de   : > { %v4081_v9 = vadd.f32 %v4041_v2, %v3683_v29 }
 0x2df   : > { %v4255_v53 = vrot.slane %v4193_v38, 2  ;;  %v4256_v5 = vrot.slane %v4193_v38, 4  ;;  %v4257_v42 = vrot.slane %v4193_v38, 6  ;;  %v4652_v58 = vsel %vm4315_vm10, %v4193_v38, -inf }
 0x2e0   : > { %v4653_v21 = vrot.slane %v4652_v58, 4  ;;  %v4117_v61 = vadd.f32 %v7184_v43, %v4081_v9 }
 0x2e1   : > { %v4659_v7 = vsel %vm4315_vm10, %v4255_v53, -inf  ;;  %v4666_v19 = vsel %vm4315_vm10, %v4256_v5, -inf  ;;  %v4673_v49 = vsel %vm4315_vm10, %v4257_v42, -inf }
 0x2e2   : > { %v4654_v12 = vmax.f32 %v4652_v58, %v4653_v21  ;;  %v4660_v23 = vrot.slane %v4659_v7, 4  ;;  %v4667_v63 = vrot.slane %v4666_v19, 4  ;;  %v4674_v15 = vrot.slane %v4673_v49, 4  ;;  %v7397_v58 = vld [vmem:[#allocation7_spill] sm:$0xff] }
 0x2e3   : > { %v4149_v13 = vmax.f32 %v4117_v61, 0.0  ;;  %v2743_v21 = vadd.f32 %v2705_v22, %v7397_v58 }
 0x2e4   : > { %v4655_v24 = vrot.slane %v4654_v12, 2  ;;  %v4661_v45 = vmax.f32 %v4659_v7, %v4660_v23  ;;  %v4668_v51 = vmax.f32 %v4666_v19, %v4667_v63  ;;  %v4675_v36 = vmax.f32 %v4673_v49, %v4674_v15 }
 0x2e5   : > { %v4195_v39 = vsel %vm4154_vm9, %v4149_v13, -inf  ;;  %v3030_v23 = vadd.f32 %v2992_v11, %v2743_v21 }
 0x2e6   : > { %v4656_v17 = vmax.f32 %v4654_v12, %v4655_v24  ;;  %v4662_v27 = vrot.slane %v4661_v45, 2  ;;  %v4669_v10 = vrot.slane %v4668_v51, 2  ;;  %v4196_v33 = vmax.f32 %v4194_v57, %v4195_v39 }
 0x2e7   : > { %v4676_v37 = vrot.slane %v4675_v36, 2 }
 0x2e8   : > { %v4663_v16 = vmax.f32 %v4661_v45, %v4662_v27  ;;  %v4670_v52 = vmax.f32 %v4668_v51, %v4669_v10  ;;  %v4258_v3 = vrot.slane %v4196_v33, 2  ;;  %v4259_v56 = vrot.slane %v4196_v33, 4 }
 0x2e9   : > { %v4260_v59 = vrot.slane %v4196_v33, 6  ;;  %v4680_v35 = vsel %vm4315_vm10, %v4196_v33, -inf  ;;  %v4657_v26 = vrot.slane %v4656_v17, 1  ;;  %v4677_v54 = vmax.f32 %v4675_v36, %v4676_v37 }
 0x2ea   : > { %v4664_v25 = vrot.slane %v4663_v16, 1  ;;  %v4671_v0 = vrot.slane %v4670_v52, 1  ;;  %v4681_v47 = vrot.slane %v4680_v35, 4  ;;  %v4687_v48 = vsel %vm4315_vm10, %v4258_v3, -inf }
 0x2eb   : > { %v4694_v20 = vsel %vm4315_vm10, %v4259_v56, -inf  ;;  %v4701_v60 = vsel %vm4315_vm10, %v4260_v59, -inf  ;;  %v4688_v44 = vrot.slane %v4687_v48, 4  ;;  %v4658_v1 = vmax.f32 %v4656_v17, %v4657_v26  ;;  %v2997_v17 = vpop.f32.mrf.mxu2 }
 0x2ec   : > { %v4665_v31 = vmax.f32 %v4663_v16, %v4664_v25  ;;  %v4682_v55 = vmax.f32 %v4680_v35, %v4681_v47  ;;  %v4695_v30 = vrot.slane %v4694_v20, 4  ;;  %v4702_v46 = vrot.slane %v4701_v60, 4 }
 0x2ed   : > { %v4689_v50 = vmax.f32 %v4687_v48, %v4688_v44  ;;  %v4672_v18 = vmax.f32 %v4670_v52, %v4671_v0  ;;  %v4678_v62 = vrot.slane %v4677_v54, 1  ;;  %v2744_v37 = vadd.f32 %v2707_v41, %v6714_v8 }
 0x2ee   : > { %v4683_v34 = vrot.slane %v4682_v55, 2  ;;  %v4696_v40 = vmax.f32 %v4694_v20, %v4695_v30  ;;  %v4703_v29 = vmax.f32 %v4701_v60, %v4702_v46  ;;  %v4877_v38 = vsel %vm4828_vm11, %v4665_v31, %v4658_v1  ;;  %v7398_v31 = vld [vmem:[#allocation8_spill] sm:$0xff] }
 0x2ef   : > { %v4044_v28 = vpop.f32.mrf.mxu0  ;;  %v3646_v32 = vpop.f32.mrf.mxu3  ;;  %v4690_v2 = vrot.slane %v4689_v50, 2  ;;  %v4878_v61 = vsel %vm4830_vm12, %v4672_v18, %v4877_v38  ;;  %v4679_v49 = vmax.f32 %v4677_v54, %v4678_v62  ;;  %v3031_v59 = vadd.f32 %v2994_v14, %v2744_v37 }
 0x2f0   : > { %v4684_v9 = vmax.f32 %v4682_v55, %v4683_v34  ;;  %v4697_v53 = vrot.slane %v4696_v40, 2  ;;  %v4704_v5 = vrot.slane %v4703_v29, 2  ;;  %v3684_v33 = vadd.f32 %v3646_v32, %v3030_v23 }
 0x2f1   : > { %v4691_v42 = vmax.f32 %v4689_v50, %v4690_v2  ;;  %v4879_v51 = vsel %vm4832_vm13, %v4679_v49, %v4878_v61 }
 0x2f2   : > { %v4685_v4 = vrot.slane %v4684_v9, 1  ;;  %v4698_v7 = vmax.f32 %v4696_v40, %v4697_v53  ;;  %v4705_v19 = vmax.f32 %v4703_v29, %v4704_v5  ;;  %v2710_v63 = vpop.f32.mrf.mxu1  ;;  %v4082_v3 = vadd.f32 %v4044_v28, %v3684_v33 }
 0x2f3   : > { %v4692_v12 = vrot.slane %v4691_v42, 1  ;;  %v2745_v52 = vadd.f32 %v2710_v63, %v6739_v6  ;;  %v2999_v20 = vpop.f32.mrf.mxu2 }
 0x2f4   : > { %v4686_v15 = vmax.f32 %v4684_v9, %v4685_v4  ;;  %v4699_v13 = vrot.slane %v4698_v7, 1  ;;  %v4706_v24 = vrot.slane %v4705_v19, 1  ;;  %v4118_v0 = vadd.f32 %v7184_v43, %v4082_v3 }
 0x2f5   : > { %v4693_v36 = vmax.f32 %v4691_v42, %v4692_v12  ;;  %v3032_v56 = vadd.f32 %v2997_v17, %v2745_v52 }
 0x2f6   : > { %v4700_v57 = vmax.f32 %v4698_v7, %v4699_v13  ;;  %v4880_v22 = vsel %vm4834_vm14, %v4686_v15, %v4879_v51  ;;  %v4707_v27 = vmax.f32 %v4705_v19, %v4706_v24  ;;  %v4150_v44 = vmax.f32 %v4118_v0, 0.0 }
 0x2f7   : > { %v4046_v45 = vpop.f32.mrf.mxu0  ;;  %v3648_v39 = vpop.f32.mrf.mxu3  ;;  %v4881_v10 = vsel %vm4836_vm15, %v4693_v36, %v4880_v22 }
 0x2f8   : > { %v4882_v11 = vsel %vm4838_vm0, %v4700_v57, %v4881_v10  ;;  %v3685_v48 = vadd.f32 %v3648_v39, %v3031_v59  ;;  %v4197_v28 = vsel %vm4154_vm9, %v4150_v44, -inf }
 0x2f9   : > { %v4883_v16 = vsel %vm4840_vm1, %v4707_v27, %v4882_v11 }
 0x2fa   : > { %4905 = vst.msk [vmem:[%s6963_s15 + $0x30] sm:$0xff] %vm4154_vm9, %v4883_v16  ;;  %v2712_v35 = vpop.f32.mrf.mxu1  ;;  %v4083_v30 = vadd.f32 %v4046_v45, %v3685_v48 }
 0x2fb   : > { %v2746_v54 = vadd.f32 %v2712_v35, %v7398_v31 }
 0x2fc   : > { %v4119_v1 = vadd.f32 %v7184_v43, %v4083_v30 }
 0x2fd   : > { %v3033_v55 = vadd.f32 %v2999_v20, %v2746_v54 }
 0x2fe   : > { %v4151_v9 = vmax.f32 %v4119_v1, 0.0 }
 0x2ff   : > { %v4049_v26 = vpop.f32.mrf.mxu0 }
 0x300   : > { %v3651_v25 = vpop.f32.mrf.mxu3 }
 0x301   : > { %v3686_v47 = vadd.f32 %v3651_v25, %v3032_v56 }
 0x303   : > { %v4084_v60 = vadd.f32 %v4049_v26, %v3686_v47 }
 0x305   : > { %v4120_v6 = vadd.f32 %v7184_v43, %v4084_v60 }
 0x307   : > { %v4152_v8 = vmax.f32 %v4120_v6, 0.0  ;;  %v4051_v32 = vpop.f32.mrf.mxu0 }
 0x308   : > { %v3653_v41 = vpop.f32.mrf.mxu3 }
 0x309   : > { %v4198_v46 = vsel %vm4154_vm9, %v4152_v8, -inf  ;;  %v3687_v14 = vadd.f32 %v3653_v41, %v3033_v55 }
 0x30a   : > { %v4199_v50 = vmax.f32 %v4197_v28, %v4198_v46 }
 0x30b   : > { %v4085_v18 = vadd.f32 %v4051_v32, %v3687_v14 }
 0x30c   : > { %v4261_v34 = vrot.slane %v4199_v50, 2  ;;  %v4262_v40 = vrot.slane %v4199_v50, 4  ;;  %v4263_v29 = vrot.slane %v4199_v50, 6  ;;  %v4708_v62 = vsel %vm4315_vm10, %v4199_v50, -inf }
 0x30d   : > { %v4709_v38 = vrot.slane %v4708_v62, 4  ;;  %v4121_v2 = vadd.f32 %v7184_v43, %v4085_v18  ;;  %v4200_v43 = vsel %vm4154_vm9, %v4151_v9, -inf }
 0x30e   : > { %v4715_v53 = vsel %vm4315_vm10, %v4261_v34, -inf  ;;  %v4722_v5 = vsel %vm4315_vm10, %v4262_v40, -inf  ;;  %v4729_v42 = vsel %vm4315_vm10, %v4263_v29, -inf }
 0x30f   : > { %v4710_v58 = vmax.f32 %v4708_v62, %v4709_v38  ;;  %v4716_v21 = vrot.slane %v4715_v53, 4  ;;  %v4723_v61 = vrot.slane %v4722_v5, 4  ;;  %v4730_v4 = vrot.slane %v4729_v42, 4 }
 0x310   : > { %v4153_v7 = vmax.f32 %v4121_v2, 0.0 }
 0x311   : > { %v4711_v19 = vrot.slane %v4710_v58, 2  ;;  %v4717_v49 = vmax.f32 %v4715_v53, %v4716_v21  ;;  %v4724_v12 = vmax.f32 %v4722_v5, %v4723_v61  ;;  %v4731_v23 = vmax.f32 %v4729_v42, %v4730_v4 }
 0x312   : > { %v4201_v63 = vsel %vm4154_vm9, %v4153_v7, -inf }
 0x313   : > { %v4712_v15 = vmax.f32 %v4710_v58, %v4711_v19  ;;  %v4718_v13 = vrot.slane %v4717_v49, 2  ;;  %v4725_v24 = vrot.slane %v4724_v12, 2  ;;  %v4202_v45 = vmax.f32 %v4200_v43, %v4201_v63 }
 0x314   : > { %v4732_v39 = vrot.slane %v4731_v23, 2 }
 0x315   : > { %v4719_v51 = vmax.f32 %v4717_v49, %v4718_v13  ;;  %v4726_v36 = vmax.f32 %v4724_v12, %v4725_v24  ;;  %v4264_v57 = vrot.slane %v4202_v45, 2  ;;  %v4265_v22 = vrot.slane %v4202_v45, 4 }
 0x316   : > { %v4266_v17 = vrot.slane %v4202_v45, 6  ;;  %v4736_v27 = vsel %vm4315_vm10, %v4202_v45, -inf  ;;  %v4713_v10 = vrot.slane %v4712_v15, 1  ;;  %v4733_v59 = vmax.f32 %v4731_v23, %v4732_v39 }
 0x317   : > { %v4720_v33 = vrot.slane %v4719_v51, 1  ;;  %v4727_v11 = vrot.slane %v4726_v36, 1  ;;  %v4737_v16 = vrot.slane %v4736_v27, 4  ;;  %v4743_v52 = vsel %vm4315_vm10, %v4264_v57, -inf }
 0x318   : > { %v4750_v37 = vsel %vm4315_vm10, %v4265_v22, -inf  ;;  %v4757_v3 = vsel %vm4315_vm10, %v4266_v17, -inf  ;;  %v4744_v35 = vrot.slane %v4743_v52, 4  ;;  %v4714_v47 = vmax.f32 %v4712_v15, %v4713_v10 }
 0x319   : > { %v4721_v56 = vmax.f32 %v4719_v51, %v4720_v33  ;;  %v4738_v26 = vmax.f32 %v4736_v27, %v4737_v16  ;;  %v4751_v25 = vrot.slane %v4750_v37, 4  ;;  %v4758_v0 = vrot.slane %v4757_v3, 4 }
 0x31a   : > { %v4745_v48 = vmax.f32 %v4743_v52, %v4744_v35  ;;  %v4728_v20 = vmax.f32 %v4726_v36, %v4727_v11  ;;  %v4734_v44 = vrot.slane %v4733_v59, 1 }
 0x31b   : > { %v4739_v60 = vrot.slane %v4738_v26, 2  ;;  %v4752_v31 = vmax.f32 %v4750_v37, %v4751_v25  ;;  %v4759_v54 = vmax.f32 %v4757_v3, %v4758_v0  ;;  %v4884_v6 = vsel %vm4828_vm11, %v4721_v56, %v4714_v47 }
 0x31c   : > { %v4746_v55 = vrot.slane %v4745_v48, 2  ;;  %v4885_v46 = vsel %vm4830_vm12, %v4728_v20, %v4884_v6  ;;  %v4735_v32 = vmax.f32 %v4733_v59, %v4734_v44 }
 0x31d   : > { %v4740_v30 = vmax.f32 %v4738_v26, %v4739_v60  ;;  %v4753_v8 = vrot.slane %v4752_v31, 2  ;;  %v4760_v41 = vrot.slane %v4759_v54, 2 }
 0x31e   : > { %v4747_v28 = vmax.f32 %v4745_v48, %v4746_v55  ;;  %v4886_v62 = vsel %vm4832_vm13, %v4735_v32, %v4885_v46 }
 0x31f   : > { %v4741_v14 = vrot.slane %v4740_v30, 1  ;;  %v4754_v1 = vmax.f32 %v4752_v31, %v4753_v8  ;;  %v4761_v50 = vmax.f32 %v4759_v54, %v4760_v41 }
 0x320   : > { %v4748_v18 = vrot.slane %v4747_v28, 1 }
 0x321   : > { %v4742_v34 = vmax.f32 %v4740_v30, %v4741_v14  ;;  %v4755_v40 = vrot.slane %v4754_v1, 1  ;;  %v4762_v29 = vrot.slane %v4761_v50, 1 }
 0x322   : > { %v4749_v38 = vmax.f32 %v4747_v28, %v4748_v18 }
 0x323   : > { %v4756_v2 = vmax.f32 %v4754_v1, %v4755_v40  ;;  %v4887_v9 = vsel %vm4834_vm14, %v4742_v34, %v4886_v62  ;;  %v4763_v53 = vmax.f32 %v4761_v50, %v4762_v29 }
 0x324   : > { %v4888_v5 = vsel %vm4836_vm15, %v4749_v38, %v4887_v9 }
 0x325   : > { %v4889_v42 = vsel %vm4838_vm0, %v4756_v2, %v4888_v5 }
 0x326   : > { %v4890_v58 = vsel %vm4840_vm1, %v4763_v53, %v4889_v42 }
 0x327   : > { %4906 = vst.msk [vmem:[%s6963_s15 + $0x38] sm:$0xff] %vm4154_vm9, %v4890_v58 }
 0x328 PF: > { %s13_s12 = sadd.s32 1, %s5676_s12  }
 0x329   : > { %p10_p4 = scmp.ge.s32.totalorder %s13_s12, 4  }
 0x32b   :  { %12 = sbr.rel (!%p10_p4) target bundleno = 1 (0x1), region = 72 }

</bundles_post_ra>
